<compile_context>
chip_gen: v5e
topology: v5e:2x2
jax: 0.10.0
libtpu: 0.0.40
codegen_flags: <defaults>
</compile_context>

<pallas_src>
import functools

import jax
import jax.numpy as jnp
from jax import lax
from jax.experimental import pallas as pl
from jax.experimental.pallas import tpu as pltpu

THRESHOLD = 1.25
CURRENT_DECAY = 0.25
VOLTAGE_DECAY = 0.03

IN_FEATURES = 34 * 34 * 2      # 2312
IN_PAD = 2432                  # 19 * 128 : lane/K aligned
HID = 512
OUT_FEATURES = 10
OUT_PAD = 128                  # lane-dense output tile
MAX_SHIFT = 3                  # 1-step delay_shift + learnable delay in {0,1,2}


def _fused_snn_kernel(x_ref, w1_ref, w2_ref, w3_ref, sh1_ref, sh2_ref,    # inputs
                      o_ref,                                               # output
                      z12_ref, z3_ref, x2_ref, x3_ref,                     # slabs
                      buf1, buf2, buf3,                                    # spike rings
                      cur1, vol1, cur2, vol2, cur3, vol3,                  # neuron state
                      *, batch, t_block, max_d,
                      threshold, current_decay, voltage_decay):
    rows = t_block * batch
    hd = max_d * batch
    alpha_c = jnp.float32(1.0 - current_decay)
    alpha_v = jnp.float32(1.0 - voltage_decay)
    thr = jnp.float32(threshold)

    @pl.when(pl.program_id(0) == 0)
    def _init():
        for ref in (cur1, vol1, cur2, vol2, cur3, vol3):
            ref[...] = jnp.zeros_like(ref)
        buf1[0:hd, :] = jnp.zeros((hd, buf1.shape[1]), jnp.float32)
        buf2[0:hd, :] = jnp.zeros((hd, buf2.shape[1]), jnp.float32)
        buf3[0:batch, :] = jnp.zeros((batch, buf3.shape[1]), jnp.float32)

    def cuba_scan(z_src, cur_ref, vol_ref, out_buf, hist_rows):
        """CUBA LIF recurrence over the t_block steps in z_src; spike rows (f32 0/1)
        land in out_buf after `hist_rows` history slots.  fori_loop(unroll=True) keeps
        live ranges bounded: only cur/vol stay in vregs across iterations."""
        def body(t, carry):
            cur, vol = carry
            r = pl.multiple_of(t * batch, batch)         # aligned per-step slices
            zt = z_src[pl.ds(r, batch), :]
            cur = alpha_c * cur + zt
            vol = alpha_v * vol + cur
            spk = vol >= thr
            out_buf[pl.ds(hist_rows + r, batch), :] = spk.astype(jnp.float32)
            vol = jnp.where(spk, jnp.float32(0.0), vol)  # hard reset on spike
            return cur, vol
        cur, vol = lax.fori_loop(0, t_block, body,
                                 (cur_ref[...], vol_ref[...]), unroll=True)
        cur_ref[...] = cur
        vol_ref[...] = vol

    def delayed(buf, sh_ref):
        """Per-neuron delayed spike slab for the next layer: lane-wise select over
        max_d statically shifted (rows, O) windows of the ring buffer."""
        sel = sh_ref[...]                                                    # (1, O)
        out = buf[(max_d - 1) * batch:(max_d - 1) * batch + rows, :]         # shift==1
        for s in range(2, max_d + 1):
            src = buf[(max_d - s) * batch:(max_d - s) * batch + rows, :]
            out = jnp.where(sel == s, src, out)
        return out.astype(jnp.bfloat16)

    # ---- block 0: 2312(pad 2432) -> 512, CUBA, delay_shift + learnable delay ----
    z12_ref[...] = jnp.dot(x_ref[...], w1_ref[...], preferred_element_type=jnp.float32)
    cuba_scan(z12_ref, cur1, vol1, buf1, hd)
    x2_ref[...] = delayed(buf1, sh1_ref)
    buf1[0:hd, :] = buf1[rows:rows + hd, :]        # carry last max_d steps forward

    # ---- block 1: 512 -> 512, CUBA, delay_shift + learnable delay ----
    z12_ref[...] = jnp.dot(x2_ref[...], w2_ref[...], preferred_element_type=jnp.float32)
    cuba_scan(z12_ref, cur2, vol2, buf2, hd)
    x3_ref[...] = delayed(buf2, sh2_ref)
    buf2[0:hd, :] = buf2[rows:rows + hd, :]

    # ---- block 2: 512 -> 10(pad 128), CUBA, fixed 1-step delay_shift ----
    z3_ref[...] = jnp.dot(x3_ref[...], w3_ref[...], preferred_element_type=jnp.float32)
    cuba_scan(z3_ref, cur3, vol3, buf3, batch)
    o_ref[...] = buf3[0:rows, :].astype(o_ref.dtype)   # one coalesced lane-dense store
    buf3[0:batch, :] = buf3[rows:rows + batch, :]


def _vmem_cap_bytes():
    try:
        return int(pltpu.get_tpu_info().vmem_capacity_bytes)
    except Exception:
        return 64 << 20                               # conservative (v7x physical VMEM)


def _choose_t_block(T, batch, vmem_cap):
    """Large, balanced time blocks: amortize grid-step cost, fill MXU M, tiny T padding."""
    max_rows = 1024 if vmem_cap >= (96 << 20) else 512
    tb_max = max(MAX_SHIFT, min(64, max(1, max_rows // batch)))
    n_blk = max(1, -(-T // tb_max))
    t_block = max(MAX_SHIFT, -(-T // n_blk))          # T is padded to n_blk * t_block
    n_blk = -(-T // t_block)
    return t_block, n_blk


def fused_snn_forward(x2d, w1, w2, w3, sh1, sh2, *, batch, t_block, n_tblk):
    rows = t_block * batch
    hd = MAX_SHIFT * batch

    kernel = functools.partial(
        _fused_snn_kernel, batch=batch, t_block=t_block, max_d=MAX_SHIFT,
        threshold=THRESHOLD, current_decay=CURRENT_DECAY, voltage_decay=VOLTAGE_DECAY)

    # VMEM budget: double-buffered pipeline blocks + persistent scratch, with headroom,
    # capped generation-aware (v5e/v6e 128 MiB physical, v7x 64 MiB).
    cap = _vmem_cap_bytes()
    need = (2 * rows * IN_PAD * 2                                   # x blocks (bf16)
            + 2 * 2 * (IN_PAD * HID + HID * HID + HID * OUT_PAD)    # weights (bf16)
            + 2 * 2 * HID * 4                                       # shift vectors
            + 2 * rows * OUT_PAD * 2                                # output blocks
            + rows * HID * 4 + rows * OUT_PAD * 4                   # z scratch (f32)
            + 2 * rows * HID * 2                                    # x2/x3 slabs (bf16)
            + 2 * (hd + rows) * HID * 4                             # buf1/buf2 (f32)
            + (batch + rows) * OUT_PAD * 4                          # buf3 (f32)
            + 4 * batch * HID * 4 + 2 * batch * OUT_PAD * 4)        # neuron state
    vmem_limit = int(min(max(2 * need, 32 << 20), int(cap * 0.75)))

    return pl.pallas_call(
        kernel,
        out_shape=jax.ShapeDtypeStruct((n_tblk * rows, OUT_PAD), jnp.bfloat16),
        grid_spec=pltpu.PrefetchScalarGridSpec(
            num_scalar_prefetch=0,
            grid=(n_tblk,),                            # sequential: carries SNN state
            in_specs=[
                pl.BlockSpec((rows, IN_PAD), lambda t: (t, 0)),
                pl.BlockSpec((IN_PAD, HID), lambda t: (0, 0)),   # weights stay resident
                pl.BlockSpec((HID, HID), lambda t: (0, 0)),
                pl.BlockSpec((HID, OUT_PAD), lambda t: (0, 0)),
                pl.BlockSpec((1, HID), lambda t: (0, 0)),
                pl.BlockSpec((1, HID), lambda t: (0, 0)),
            ],
            out_specs=pl.BlockSpec((rows, OUT_PAD), lambda t: (t, 0)),
            scratch_shapes=[
                pltpu.VMEM((rows, HID), jnp.float32),              # z12
                pltpu.VMEM((rows, OUT_PAD), jnp.float32),          # z3
                pltpu.VMEM((rows, HID), jnp.bfloat16),             # x2 slab
                pltpu.VMEM((rows, HID), jnp.bfloat16),             # x3 slab
                pltpu.VMEM((hd + rows, HID), jnp.float32),         # buf1 (ring + block)
                pltpu.VMEM((hd + rows, HID), jnp.float32),         # buf2
                pltpu.VMEM((batch + rows, OUT_PAD), jnp.float32),  # buf3
                pltpu.VMEM((batch, HID), jnp.float32),             # cur1
                pltpu.VMEM((batch, HID), jnp.float32),             # vol1
                pltpu.VMEM((batch, HID), jnp.float32),             # cur2
                pltpu.VMEM((batch, HID), jnp.float32),             # vol2
                pltpu.VMEM((batch, OUT_PAD), jnp.float32),         # cur3
                pltpu.VMEM((batch, OUT_PAD), jnp.float32),         # vol3
            ],
        ),
        compiler_params=pltpu.CompilerParams(
            dimension_semantics=("arbitrary",),
            vmem_limit_bytes=vmem_limit,
        ),
    )(x2d, w1, w2, w3, sh1, sh2)


# ---------------- parameter prep (host-side, one time) ----------------

def prepare_weight_io(v_oi, g_o, in_pad, out_pad):
    """PyTorch weight_norm (w = g * v / ||v||_row), emitted [I, O] bf16, zero-padded to
    MXU/lane friendly (in_pad, out_pad).  Padded rows meet only zero spikes."""
    norm = jnp.sqrt(jnp.sum(v_oi * v_oi, axis=1, keepdims=True)) + 1e-12
    w_io = (g_o[:, None] * v_oi / norm).T
    i, o = w_io.shape
    w_io = jnp.pad(w_io, ((0, in_pad - i), (0, out_pad - o)))
    return w_io.astype(jnp.bfloat16)


def init_params(key):
    """Deterministic synthetic parameters matching the module's shapes."""
    sizes = [(IN_FEATURES, HID), (HID, HID), (HID, OUT_FEATURES)]
    has_delay = [True, True, False]
    params = []
    for (fin, fout), learn_d in zip(sizes, has_delay):
        key, kw, kd = jax.random.split(key, 3)
        v = jax.random.normal(kw, (fout, fin), dtype=jnp.float32) / jnp.sqrt(fin)
        g = jnp.sqrt(jnp.sum(v * v, axis=1))            # weight_norm default: g = ||v||
        if learn_d:
            d = jnp.round(jax.random.uniform(kd, (fout,)) * 2.0).astype(jnp.int32)
        else:
            d = jnp.zeros((fout,), dtype=jnp.int32)
        params.append((v, g, d))
    return params


def prepare_params(params):
    (v1, g1, d1), (v2, g2, d2), (v3, g3, _) = params
    w1 = prepare_weight_io(v1, g1, IN_PAD, HID)
    w2 = prepare_weight_io(v2, g2, HID, HID)
    w3 = prepare_weight_io(v3, g3, HID, OUT_PAD)
    sh1 = (1 + d1).astype(jnp.int32).reshape(1, HID)    # delay_shift(1) + learnable d
    sh2 = (1 + d2).astype(jnp.int32).reshape(1, HID)
    assert int(jnp.max(sh1)) <= MAX_SHIFT and int(jnp.max(sh2)) <= MAX_SHIFT
    return w1, w2, w3, sh1, sh2


@jax.jit
def network_forward(spike_nct, w1, w2, w3, sh1, sh2):
    """spike_nct: [B, 2312, T] binary spikes (NCT, as in lava-dl) -> [B, 10, T]."""
    B, C, T = spike_nct.shape
    assert C <= IN_PAD
    x = jnp.transpose(spike_nct, (2, 0, 1)).astype(jnp.bfloat16)      # -> [T, B, C]
    b_pad = -(-B // 8) * 8                                            # sublane-align batch
    t_block, n_tblk = _choose_t_block(T, b_pad, _vmem_cap_bytes())
    t_pad = t_block * n_tblk
    # trailing zero-spike time steps / zero batch rows / zero feature columns are inert
    x = jnp.pad(x, ((0, t_pad - T), (0, b_pad - B), (0, IN_PAD - C)))
    x2d = x.reshape(t_pad * b_pad, IN_PAD)

    out2d = fused_snn_forward(x2d, w1, w2, w3, sh1, sh2,
                              batch=b_pad, t_block=t_block, n_tblk=n_tblk)
    out = out2d.reshape(t_pad, b_pad, OUT_PAD)[:T, :B, :OUT_FEATURES]
    return jnp.transpose(out.astype(jnp.float32), (1, 2, 0))          # -> [B, 10, T]


if __name__ == "__main__":
    key = jax.random.PRNGKey(0)
    k_in, k_par = jax.random.split(key)

    B, T = 2, 8
    spike_in = (jax.random.uniform(k_in, (B, IN_FEATURES, T)) < 0.1).astype(jnp.float32)

    w1, w2, w3, sh1, sh2 = prepare_params(init_params(k_par))

    out = network_forward(spike_in, w1, w2, w3, sh1, sh2)
    out = jax.block_until_ready(out)

    assert out.shape == (B, OUT_FEATURES, T), out.shape
    assert bool(jnp.all((out == 0.0) | (out == 1.0)))                 # outputs are spikes
    print("KERNEL_OK")
</pallas_src>

<mosaic_0001>
module attributes {stable_mosaic.version = 11 : i64} {
  func.func @_fused_snn_kernel(%arg0: i32, %arg1: memref<64x2432xbf16, #tpu.memory_space<vmem>>, %arg2: memref<2432x512xbf16, #tpu.memory_space<vmem>>, %arg3: memref<512x512xbf16, #tpu.memory_space<vmem>>, %arg4: memref<512x128xbf16, #tpu.memory_space<vmem>>, %arg5: memref<1x512xi32, #tpu.memory_space<vmem>>, %arg6: memref<1x512xi32, #tpu.memory_space<vmem>>, %arg7: memref<64x128xbf16, #tpu.memory_space<vmem>>, %arg8: memref<64x512xf32, #tpu.memory_space<vmem>>, %arg9: memref<64x128xf32, #tpu.memory_space<vmem>>, %arg10: memref<64x512xbf16, #tpu.memory_space<vmem>>, %arg11: memref<64x512xbf16, #tpu.memory_space<vmem>>, %arg12: memref<88x512xf32, #tpu.memory_space<vmem>>, %arg13: memref<88x512xf32, #tpu.memory_space<vmem>>, %arg14: memref<72x128xf32, #tpu.memory_space<vmem>>, %arg15: memref<8x512xf32, #tpu.memory_space<vmem>>, %arg16: memref<8x512xf32, #tpu.memory_space<vmem>>, %arg17: memref<8x512xf32, #tpu.memory_space<vmem>>, %arg18: memref<8x512xf32, #tpu.memory_space<vmem>>, %arg19: memref<8x128xf32, #tpu.memory_space<vmem>>, %arg20: memref<8x128xf32, #tpu.memory_space<vmem>>) attributes {dimension_semantics = [#tpu.dimension_semantics<arbitrary>], iteration_bounds = array<i64: 1>, scalar_prefetch = 0 : i64, scratch_operands = 13 : i64, tpu.core_type = #tpu.core_type<tc>, window_params = [{transform_indices = @transform_0, window_bounds = array<i64: 64, 2432>}, {pipeline_mode = #tpu.pipeline_mode<synchronous>, transform_indices = @transform_1, window_bounds = array<i64: 2432, 512>}, {pipeline_mode = #tpu.pipeline_mode<synchronous>, transform_indices = @transform_2, window_bounds = array<i64: 512, 512>}, {pipeline_mode = #tpu.pipeline_mode<synchronous>, transform_indices = @transform_3, window_bounds = array<i64: 512, 128>}, {pipeline_mode = #tpu.pipeline_mode<synchronous>, transform_indices = @transform_4, window_bounds = array<i64: 1, 512>}, {pipeline_mode = #tpu.pipeline_mode<synchronous>, transform_indices = @transform_5, window_bounds = array<i64: 1, 512>}, {transform_indices = @transform_6, window_bounds = array<i64: 64, 128>}]} {
    %c0_i32 = arith.constant 0 : i32
    %0 = arith.cmpi eq, %arg0, %c0_i32 : i32
    %1 = arith.extui %0 : i1 to i32
    %c0_i32_0 = arith.constant 0 : i32
    %2 = arith.cmpi ne, %1, %c0_i32_0 : i32
    scf.if %2 {
      %cst_228 = arith.constant 0.000000e+00 : f32
      %524 = vector.broadcast %cst_228 : f32 to vector<8x512xf32>
      %c0_229 = arith.constant 0 : index
      %c0_230 = arith.constant 0 : index
      %525 = vector.load %arg15[%c0_229, %c0_230] : memref<8x512xf32, #tpu.memory_space<vmem>>, vector<8x512xf32>
      tpu.vector_store %arg15[%c0_229, %c0_230], %524 {strides = array<i32>} : memref<8x512xf32, #tpu.memory_space<vmem>>, vector<8x512xf32>,
      %cst_231 = arith.constant 0.000000e+00 : f32
      %526 = vector.broadcast %cst_231 : f32 to vector<8x512xf32>
      %c0_232 = arith.constant 0 : index
      %c0_233 = arith.constant 0 : index
      %527 = vector.load %arg16[%c0_232, %c0_233] : memref<8x512xf32, #tpu.memory_space<vmem>>, vector<8x512xf32>
      tpu.vector_store %arg16[%c0_232, %c0_233], %526 {strides = array<i32>} : memref<8x512xf32, #tpu.memory_space<vmem>>, vector<8x512xf32>,
      %cst_234 = arith.constant 0.000000e+00 : f32
      %528 = vector.broadcast %cst_234 : f32 to vector<8x512xf32>
      %c0_235 = arith.constant 0 : index
      %c0_236 = arith.constant 0 : index
      %529 = vector.load %arg17[%c0_235, %c0_236] : memref<8x512xf32, #tpu.memory_space<vmem>>, vector<8x512xf32>
      tpu.vector_store %arg17[%c0_235, %c0_236], %528 {strides = array<i32>} : memref<8x512xf32, #tpu.memory_space<vmem>>, vector<8x512xf32>,
      %cst_237 = arith.constant 0.000000e+00 : f32
      %530 = vector.broadcast %cst_237 : f32 to vector<8x512xf32>
      %c0_238 = arith.constant 0 : index
      %c0_239 = arith.constant 0 : index
      %531 = vector.load %arg18[%c0_238, %c0_239] : memref<8x512xf32, #tpu.memory_space<vmem>>, vector<8x512xf32>
      tpu.vector_store %arg18[%c0_238, %c0_239], %530 {strides = array<i32>} : memref<8x512xf32, #tpu.memory_space<vmem>>, vector<8x512xf32>,
      %cst_240 = arith.constant 0.000000e+00 : f32
      %532 = vector.broadcast %cst_240 : f32 to vector<8x128xf32>
      %c0_241 = arith.constant 0 : index
      %c0_242 = arith.constant 0 : index
      %533 = vector.load %arg19[%c0_241, %c0_242] : memref<8x128xf32, #tpu.memory_space<vmem>>, vector<8x128xf32>
      tpu.vector_store %arg19[%c0_241, %c0_242], %532 {strides = array<i32>} : memref<8x128xf32, #tpu.memory_space<vmem>>, vector<8x128xf32>,
      %cst_243 = arith.constant 0.000000e+00 : f32
      %534 = vector.broadcast %cst_243 : f32 to vector<8x128xf32>
      %c0_244 = arith.constant 0 : index
      %c0_245 = arith.constant 0 : index
      %535 = vector.load %arg20[%c0_244, %c0_245] : memref<8x128xf32, #tpu.memory_space<vmem>>, vector<8x128xf32>
      tpu.vector_store %arg20[%c0_244, %c0_245], %534 {strides = array<i32>} : memref<8x128xf32, #tpu.memory_space<vmem>>, vector<8x128xf32>,
      %cst_246 = arith.constant 0.000000e+00 : f32
      %536 = vector.broadcast %cst_246 : f32 to vector<24x512xf32>
      %c0_247 = arith.constant 0 : index
      %c0_248 = arith.constant 0 : index
      %537 = vector.load %arg12[%c0_247, %c0_248] : memref<88x512xf32, #tpu.memory_space<vmem>>, vector<24x512xf32>
      tpu.vector_store %arg12[%c0_247, %c0_248], %536 {strides = array<i32>} : memref<88x512xf32, #tpu.memory_space<vmem>>, vector<24x512xf32>,
      %cst_249 = arith.constant 0.000000e+00 : f32
      %538 = vector.broadcast %cst_249 : f32 to vector<24x512xf32>
      %c0_250 = arith.constant 0 : index
      %c0_251 = arith.constant 0 : index
      %539 = vector.load %arg13[%c0_250, %c0_251] : memref<88x512xf32, #tpu.memory_space<vmem>>, vector<24x512xf32>
      tpu.vector_store %arg13[%c0_250, %c0_251], %538 {strides = array<i32>} : memref<88x512xf32, #tpu.memory_space<vmem>>, vector<24x512xf32>,
      %cst_252 = arith.constant 0.000000e+00 : f32
      %540 = vector.broadcast %cst_252 : f32 to vector<8x128xf32>
      %c0_253 = arith.constant 0 : index
      %c0_254 = arith.constant 0 : index
      %541 = vector.load %arg14[%c0_253, %c0_254] : memref<72x128xf32, #tpu.memory_space<vmem>>, vector<8x128xf32>
      tpu.vector_store %arg14[%c0_253, %c0_254], %540 {strides = array<i32>} : memref<72x128xf32, #tpu.memory_space<vmem>>, vector<8x128xf32>,
    } else {
    }
    %c0 = arith.constant 0 : index
    %c0_1 = arith.constant 0 : index
    %3 = vector.load %arg1[%c0, %c0_1] : memref<64x2432xbf16, #tpu.memory_space<vmem>>, vector<64x2432xbf16>
    %c0_2 = arith.constant 0 : index
    %c0_3 = arith.constant 0 : index
    %4 = vector.load %arg2[%c0_2, %c0_3] : memref<2432x512xbf16, #tpu.memory_space<vmem>>, vector<2432x512xbf16>
    %cst = arith.constant dense<0.000000e+00> : vector<64x512xf32>
    %5 = tpu.matmul %3, %4, %cst {dimension_numbers = #tpu.dot_dimension_numbers<[1], [0], [0], [1], [0, 0, 1, 1], [], []>} : vector<64x2432xbf16>, vector<2432x512xbf16>, vector<64x512xf32> -> vector<64x512xf32>
    %c0_4 = arith.constant 0 : index
    %c0_5 = arith.constant 0 : index
    %6 = vector.load %arg8[%c0_4, %c0_5] : memref<64x512xf32, #tpu.memory_space<vmem>>, vector<64x512xf32>
    tpu.vector_store %arg8[%c0_4, %c0_5], %5 {strides = array<i32>} : memref<64x512xf32, #tpu.memory_space<vmem>>, vector<64x512xf32>,
    %c0_6 = arith.constant 0 : index
    %c0_7 = arith.constant 0 : index
    %7 = vector.load %arg15[%c0_6, %c0_7] : memref<8x512xf32, #tpu.memory_space<vmem>>, vector<8x512xf32>
    %c0_8 = arith.constant 0 : index
    %c0_9 = arith.constant 0 : index
    %8 = vector.load %arg16[%c0_8, %c0_9] : memref<8x512xf32, #tpu.memory_space<vmem>>, vector<8x512xf32>
    %cst_10 = arith.constant 7.500000e-01 : f32
    %cst_11 = arith.constant 9.700000e-01 : f32
    %cst_12 = arith.constant 1.250000e+00 : f32
    %c0_i32_13 = arith.constant 0 : i32
    %c8_i32 = arith.constant 8 : i32
    %9 = arith.muli %c0_i32_13, %c8_i32 : i32
    %10 = tpu.assume_multiple %9, 8 : i32
    %11 = arith.index_cast %10 : i32 to index
    %c0_14 = arith.constant 0 : index
    %12 = vector.load %arg8[%11, %c0_14] : memref<64x512xf32, #tpu.memory_space<vmem>>, vector<8x512xf32>
    %13 = vector.broadcast %cst_10 : f32 to vector<8x512xf32>
    %14 = arith.mulf %13, %7 : vector<8x512xf32>
    %15 = arith.addf %14, %12 : vector<8x512xf32>
    %16 = vector.broadcast %cst_11 : f32 to vector<8x512xf32>
    %17 = arith.mulf %16, %8 : vector<8x512xf32>
    %18 = arith.addf %17, %15 : vector<8x512xf32>
    %19 = vector.broadcast %cst_12 : f32 to vector<8x512xf32>
    %20 = arith.cmpf oge, %18, %19 : vector<8x512xf32>
    %21 = arith.extui %20 : vector<8x512xi1> to vector<8x512xi32>
    %22 = arith.sitofp %21 : vector<8x512xi32> to vector<8x512xf32>
    %c24_i32 = arith.constant 24 : i32
    %23 = arith.addi %c24_i32, %10 : i32
    %24 = arith.index_cast %23 : i32 to index
    %c0_15 = arith.constant 0 : index
    %25 = vector.load %arg12[%24, %c0_15] : memref<88x512xf32, #tpu.memory_space<vmem>>, vector<8x512xf32>
    tpu.vector_store %arg12[%24, %c0_15], %22 {strides = array<i32>} : memref<88x512xf32, #tpu.memory_space<vmem>>, vector<8x512xf32>,
    %cst_16 = arith.constant 0.000000e+00 : f32
    %26 = vector.broadcast %cst_16 : f32 to vector<8x512xf32>
    %27 = arith.select %20, %26, %18 : vector<8x512xi1>, vector<8x512xf32>
    %c1_i32 = arith.constant 1 : i32
    %c8_i32_17 = arith.constant 8 : i32
    %28 = arith.muli %c1_i32, %c8_i32_17 : i32
    %29 = tpu.assume_multiple %28, 8 : i32
    %30 = arith.index_cast %29 : i32 to index
    %c0_18 = arith.constant 0 : index
    %31 = vector.load %arg8[%30, %c0_18] : memref<64x512xf32, #tpu.memory_space<vmem>>, vector<8x512xf32>
    %32 = vector.broadcast %cst_10 : f32 to vector<8x512xf32>
    %33 = arith.mulf %32, %15 : vector<8x512xf32>
    %34 = arith.addf %33, %31 : vector<8x512xf32>
    %35 = vector.broadcast %cst_11 : f32 to vector<8x512xf32>
    %36 = arith.mulf %35, %27 : vector<8x512xf32>
    %37 = arith.addf %36, %34 : vector<8x512xf32>
    %38 = vector.broadcast %cst_12 : f32 to vector<8x512xf32>
    %39 = arith.cmpf oge, %37, %38 : vector<8x512xf32>
    %40 = arith.extui %39 : vector<8x512xi1> to vector<8x512xi32>
    %41 = arith.sitofp %40 : vector<8x512xi32> to vector<8x512xf32>
    %c24_i32_19 = arith.constant 24 : i32
    %42 = arith.addi %c24_i32_19, %29 : i32
    %43 = arith.index_cast %42 : i32 to index
    %c0_20 = arith.constant 0 : index
    %44 = vector.load %arg12[%43, %c0_20] : memref<88x512xf32, #tpu.memory_space<vmem>>, vector<8x512xf32>
    tpu.vector_store %arg12[%43, %c0_20], %41 {strides = array<i32>} : memref<88x512xf32, #tpu.memory_space<vmem>>, vector<8x512xf32>,
    %cst_21 = arith.constant 0.000000e+00 : f32
    %45 = vector.broadcast %cst_21 : f32 to vector<8x512xf32>
    %46 = arith.select %39, %45, %37 : vector<8x512xi1>, vector<8x512xf32>
    %c2_i32 = arith.constant 2 : i32
    %c8_i32_22 = arith.constant 8 : i32
    %47 = arith.muli %c2_i32, %c8_i32_22 : i32
    %48 = tpu.assume_multiple %47, 8 : i32
    %49 = arith.index_cast %48 : i32 to index
    %c0_23 = arith.constant 0 : index
    %50 = vector.load %arg8[%49, %c0_23] : memref<64x512xf32, #tpu.memory_space<vmem>>, vector<8x512xf32>
    %51 = vector.broadcast %cst_10 : f32 to vector<8x512xf32>
    %52 = arith.mulf %51, %34 : vector<8x512xf32>
    %53 = arith.addf %52, %50 : vector<8x512xf32>
    %54 = vector.broadcast %cst_11 : f32 to vector<8x512xf32>
    %55 = arith.mulf %54, %46 : vector<8x512xf32>
    %56 = arith.addf %55, %53 : vector<8x512xf32>
    %57 = vector.broadcast %cst_12 : f32 to vector<8x512xf32>
    %58 = arith.cmpf oge, %56, %57 : vector<8x512xf32>
    %59 = arith.extui %58 : vector<8x512xi1> to vector<8x512xi32>
    %60 = arith.sitofp %59 : vector<8x512xi32> to vector<8x512xf32>
    %c24_i32_24 = arith.constant 24 : i32
    %61 = arith.addi %c24_i32_24, %48 : i32
    %62 = arith.index_cast %61 : i32 to index
    %c0_25 = arith.constant 0 : index
    %63 = vector.load %arg12[%62, %c0_25] : memref<88x512xf32, #tpu.memory_space<vmem>>, vector<8x512xf32>
    tpu.vector_store %arg12[%62, %c0_25], %60 {strides = array<i32>} : memref<88x512xf32, #tpu.memory_space<vmem>>, vector<8x512xf32>,
    %cst_26 = arith.constant 0.000000e+00 : f32
    %64 = vector.broadcast %cst_26 : f32 to vector<8x512xf32>
    %65 = arith.select %58, %64, %56 : vector<8x512xi1>, vector<8x512xf32>
    %c3_i32 = arith.constant 3 : i32
    %c8_i32_27 = arith.constant 8 : i32
    %66 = arith.muli %c3_i32, %c8_i32_27 : i32
    %67 = tpu.assume_multiple %66, 8 : i32
    %68 = arith.index_cast %67 : i32 to index
    %c0_28 = arith.constant 0 : index
    %69 = vector.load %arg8[%68, %c0_28] : memref<64x512xf32, #tpu.memory_space<vmem>>, vector<8x512xf32>
    %70 = vector.broadcast %cst_10 : f32 to vector<8x512xf32>
    %71 = arith.mulf %70, %53 : vector<8x512xf32>
    %72 = arith.addf %71, %69 : vector<8x512xf32>
    %73 = vector.broadcast %cst_11 : f32 to vector<8x512xf32>
    %74 = arith.mulf %73, %65 : vector<8x512xf32>
    %75 = arith.addf %74, %72 : vector<8x512xf32>
    %76 = vector.broadcast %cst_12 : f32 to vector<8x512xf32>
    %77 = arith.cmpf oge, %75, %76 : vector<8x512xf32>
    %78 = arith.extui %77 : vector<8x512xi1> to vector<8x512xi32>
    %79 = arith.sitofp %78 : vector<8x512xi32> to vector<8x512xf32>
    %c24_i32_29 = arith.constant 24 : i32
    %80 = arith.addi %c24_i32_29, %67 : i32
    %81 = arith.index_cast %80 : i32 to index
    %c0_30 = arith.constant 0 : index
    %82 = vector.load %arg12[%81, %c0_30] : memref<88x512xf32, #tpu.memory_space<vmem>>, vector<8x512xf32>
    tpu.vector_store %arg12[%81, %c0_30], %79 {strides = array<i32>} : memref<88x512xf32, #tpu.memory_space<vmem>>, vector<8x512xf32>,
    %cst_31 = arith.constant 0.000000e+00 : f32
    %83 = vector.broadcast %cst_31 : f32 to vector<8x512xf32>
    %84 = arith.select %77, %83, %75 : vector<8x512xi1>, vector<8x512xf32>
    %c4_i32 = arith.constant 4 : i32
    %c8_i32_32 = arith.constant 8 : i32
    %85 = arith.muli %c4_i32, %c8_i32_32 : i32
    %86 = tpu.assume_multiple %85, 8 : i32
    %87 = arith.index_cast %86 : i32 to index
    %c0_33 = arith.constant 0 : index
    %88 = vector.load %arg8[%87, %c0_33] : memref<64x512xf32, #tpu.memory_space<vmem>>, vector<8x512xf32>
    %89 = vector.broadcast %cst_10 : f32 to vector<8x512xf32>
    %90 = arith.mulf %89, %72 : vector<8x512xf32>
    %91 = arith.addf %90, %88 : vector<8x512xf32>
    %92 = vector.broadcast %cst_11 : f32 to vector<8x512xf32>
    %93 = arith.mulf %92, %84 : vector<8x512xf32>
    %94 = arith.addf %93, %91 : vector<8x512xf32>
    %95 = vector.broadcast %cst_12 : f32 to vector<8x512xf32>
    %96 = arith.cmpf oge, %94, %95 : vector<8x512xf32>
    %97 = arith.extui %96 : vector<8x512xi1> to vector<8x512xi32>
    %98 = arith.sitofp %97 : vector<8x512xi32> to vector<8x512xf32>
    %c24_i32_34 = arith.constant 24 : i32
    %99 = arith.addi %c24_i32_34, %86 : i32
    %100 = arith.index_cast %99 : i32 to index
    %c0_35 = arith.constant 0 : index
    %101 = vector.load %arg12[%100, %c0_35] : memref<88x512xf32, #tpu.memory_space<vmem>>, vector<8x512xf32>
    tpu.vector_store %arg12[%100, %c0_35], %98 {strides = array<i32>} : memref<88x512xf32, #tpu.memory_space<vmem>>, vector<8x512xf32>,
    %cst_36 = arith.constant 0.000000e+00 : f32
    %102 = vector.broadcast %cst_36 : f32 to vector<8x512xf32>
    %103 = arith.select %96, %102, %94 : vector<8x512xi1>, vector<8x512xf32>
    %c5_i32 = arith.constant 5 : i32
    %c8_i32_37 = arith.constant 8 : i32
    %104 = arith.muli %c5_i32, %c8_i32_37 : i32
    %105 = tpu.assume_multiple %104, 8 : i32
    %106 = arith.index_cast %105 : i32 to index
    %c0_38 = arith.constant 0 : index
    %107 = vector.load %arg8[%106, %c0_38] : memref<64x512xf32, #tpu.memory_space<vmem>>, vector<8x512xf32>
    %108 = vector.broadcast %cst_10 : f32 to vector<8x512xf32>
    %109 = arith.mulf %108, %91 : vector<8x512xf32>
    %110 = arith.addf %109, %107 : vector<8x512xf32>
    %111 = vector.broadcast %cst_11 : f32 to vector<8x512xf32>
    %112 = arith.mulf %111, %103 : vector<8x512xf32>
    %113 = arith.addf %112, %110 : vector<8x512xf32>
    %114 = vector.broadcast %cst_12 : f32 to vector<8x512xf32>
    %115 = arith.cmpf oge, %113, %114 : vector<8x512xf32>
    %116 = arith.extui %115 : vector<8x512xi1> to vector<8x512xi32>
    %117 = arith.sitofp %116 : vector<8x512xi32> to vector<8x512xf32>
    %c24_i32_39 = arith.constant 24 : i32
    %118 = arith.addi %c24_i32_39, %105 : i32
    %119 = arith.index_cast %118 : i32 to index
    %c0_40 = arith.constant 0 : index
    %120 = vector.load %arg12[%119, %c0_40] : memref<88x512xf32, #tpu.memory_space<vmem>>, vector<8x512xf32>
    tpu.vector_store %arg12[%119, %c0_40], %117 {strides = array<i32>} : memref<88x512xf32, #tpu.memory_space<vmem>>, vector<8x512xf32>,
    %cst_41 = arith.constant 0.000000e+00 : f32
    %121 = vector.broadcast %cst_41 : f32 to vector<8x512xf32>
    %122 = arith.select %115, %121, %113 : vector<8x512xi1>, vector<8x512xf32>
    %c6_i32 = arith.constant 6 : i32
    %c8_i32_42 = arith.constant 8 : i32
    %123 = arith.muli %c6_i32, %c8_i32_42 : i32
    %124 = tpu.assume_multiple %123, 8 : i32
    %125 = arith.index_cast %124 : i32 to index
    %c0_43 = arith.constant 0 : index
    %126 = vector.load %arg8[%125, %c0_43] : memref<64x512xf32, #tpu.memory_space<vmem>>, vector<8x512xf32>
    %127 = vector.broadcast %cst_10 : f32 to vector<8x512xf32>
    %128 = arith.mulf %127, %110 : vector<8x512xf32>
    %129 = arith.addf %128, %126 : vector<8x512xf32>
    %130 = vector.broadcast %cst_11 : f32 to vector<8x512xf32>
    %131 = arith.mulf %130, %122 : vector<8x512xf32>
    %132 = arith.addf %131, %129 : vector<8x512xf32>
    %133 = vector.broadcast %cst_12 : f32 to vector<8x512xf32>
    %134 = arith.cmpf oge, %132, %133 : vector<8x512xf32>
    %135 = arith.extui %134 : vector<8x512xi1> to vector<8x512xi32>
    %136 = arith.sitofp %135 : vector<8x512xi32> to vector<8x512xf32>
    %c24_i32_44 = arith.constant 24 : i32
    %137 = arith.addi %c24_i32_44, %124 : i32
    %138 = arith.index_cast %137 : i32 to index
    %c0_45 = arith.constant 0 : index
    %139 = vector.load %arg12[%138, %c0_45] : memref<88x512xf32, #tpu.memory_space<vmem>>, vector<8x512xf32>
    tpu.vector_store %arg12[%138, %c0_45], %136 {strides = array<i32>} : memref<88x512xf32, #tpu.memory_space<vmem>>, vector<8x512xf32>,
    %cst_46 = arith.constant 0.000000e+00 : f32
    %140 = vector.broadcast %cst_46 : f32 to vector<8x512xf32>
    %141 = arith.select %134, %140, %132 : vector<8x512xi1>, vector<8x512xf32>
    %c7_i32 = arith.constant 7 : i32
    %c8_i32_47 = arith.constant 8 : i32
    %142 = arith.muli %c7_i32, %c8_i32_47 : i32
    %143 = tpu.assume_multiple %142, 8 : i32
    %144 = arith.index_cast %143 : i32 to index
    %c0_48 = arith.constant 0 : index
    %145 = vector.load %arg8[%144, %c0_48] : memref<64x512xf32, #tpu.memory_space<vmem>>, vector<8x512xf32>
    %146 = vector.broadcast %cst_10 : f32 to vector<8x512xf32>
    %147 = arith.mulf %146, %129 : vector<8x512xf32>
    %148 = arith.addf %147, %145 : vector<8x512xf32>
    %149 = vector.broadcast %cst_11 : f32 to vector<8x512xf32>
    %150 = arith.mulf %149, %141 : vector<8x512xf32>
    %151 = arith.addf %150, %148 : vector<8x512xf32>
    %152 = vector.broadcast %cst_12 : f32 to vector<8x512xf32>
    %153 = arith.cmpf oge, %151, %152 : vector<8x512xf32>
    %154 = arith.extui %153 : vector<8x512xi1> to vector<8x512xi32>
    %155 = arith.sitofp %154 : vector<8x512xi32> to vector<8x512xf32>
    %c24_i32_49 = arith.constant 24 : i32
    %156 = arith.addi %c24_i32_49, %143 : i32
    %157 = arith.index_cast %156 : i32 to index
    %c0_50 = arith.constant 0 : index
    %158 = vector.load %arg12[%157, %c0_50] : memref<88x512xf32, #tpu.memory_space<vmem>>, vector<8x512xf32>
    tpu.vector_store %arg12[%157, %c0_50], %155 {strides = array<i32>} : memref<88x512xf32, #tpu.memory_space<vmem>>, vector<8x512xf32>,
    %cst_51 = arith.constant 0.000000e+00 : f32
    %159 = vector.broadcast %cst_51 : f32 to vector<8x512xf32>
    %160 = arith.select %153, %159, %151 : vector<8x512xi1>, vector<8x512xf32>
    %c8_i32_52 = arith.constant 8 : i32
    %c0_53 = arith.constant 0 : index
    %c0_54 = arith.constant 0 : index
    %161 = vector.load %arg15[%c0_53, %c0_54] : memref<8x512xf32, #tpu.memory_space<vmem>>, vector<8x512xf32>
    tpu.vector_store %arg15[%c0_53, %c0_54], %148 {strides = array<i32>} : memref<8x512xf32, #tpu.memory_space<vmem>>, vector<8x512xf32>,
    %c0_55 = arith.constant 0 : index
    %c0_56 = arith.constant 0 : index
    %162 = vector.load %arg16[%c0_55, %c0_56] : memref<8x512xf32, #tpu.memory_space<vmem>>, vector<8x512xf32>
    tpu.vector_store %arg16[%c0_55, %c0_56], %160 {strides = array<i32>} : memref<8x512xf32, #tpu.memory_space<vmem>>, vector<8x512xf32>,
    %c0_57 = arith.constant 0 : index
    %c0_58 = arith.constant 0 : index
    %163 = vector.load %arg5[%c0_57, %c0_58] : memref<1x512xi32, #tpu.memory_space<vmem>>, vector<1x512xi32>
    %c16 = arith.constant 16 : index
    %c0_59 = arith.constant 0 : index
    %164 = vector.load %arg12[%c16, %c0_59] : memref<88x512xf32, #tpu.memory_space<vmem>>, vector<64x512xf32>
    %c8 = arith.constant 8 : index
    %c0_60 = arith.constant 0 : index
    %165 = vector.load %arg12[%c8, %c0_60] : memref<88x512xf32, #tpu.memory_space<vmem>>, vector<64x512xf32>
    %c2_i32_61 = arith.constant 2 : i32
    %166 = vector.broadcast %c2_i32_61 : i32 to vector<1x512xi32>
    %167 = arith.cmpi eq, %163, %166 : vector<1x512xi32>
    %168 = vector.shape_cast %167 : vector<1x512xi1> to vector<1x512xi1>
    %169 = vector.broadcast %168 : vector<1x512xi1> to vector<64x512xi1>
    %170 = arith.select %169, %165, %164 : vector<64x512xi1>, vector<64x512xf32>
    %c0_62 = arith.constant 0 : index
    %c0_63 = arith.constant 0 : index
    %171 = vector.load %arg12[%c0_62, %c0_63] : memref<88x512xf32, #tpu.memory_space<vmem>>, vector<64x512xf32>
    %c3_i32_64 = arith.constant 3 : i32
    %172 = vector.broadcast %c3_i32_64 : i32 to vector<1x512xi32>
    %173 = arith.cmpi eq, %163, %172 : vector<1x512xi32>
    %174 = vector.shape_cast %173 : vector<1x512xi1> to vector<1x512xi1>
    %175 = vector.broadcast %174 : vector<1x512xi1> to vector<64x512xi1>
    %176 = arith.select %175, %171, %170 : vector<64x512xi1>, vector<64x512xf32>
    %177 = arith.truncf %176 : vector<64x512xf32> to vector<64x512xbf16>
    %c0_65 = arith.constant 0 : index
    %c0_66 = arith.constant 0 : index
    %178 = vector.load %arg10[%c0_65, %c0_66] : memref<64x512xbf16, #tpu.memory_space<vmem>>, vector<64x512xbf16>
    tpu.vector_store %arg10[%c0_65, %c0_66], %177 {strides = array<i32>} : memref<64x512xbf16, #tpu.memory_space<vmem>>, vector<64x512xbf16>,
    %c64 = arith.constant 64 : index
    %c0_67 = arith.constant 0 : index
    %179 = vector.load %arg12[%c64, %c0_67] : memref<88x512xf32, #tpu.memory_space<vmem>>, vector<24x512xf32>
    %c0_68 = arith.constant 0 : index
    %c0_69 = arith.constant 0 : index
    %180 = vector.load %arg12[%c0_68, %c0_69] : memref<88x512xf32, #tpu.memory_space<vmem>>, vector<24x512xf32>
    tpu.vector_store %arg12[%c0_68, %c0_69], %179 {strides = array<i32>} : memref<88x512xf32, #tpu.memory_space<vmem>>, vector<24x512xf32>,
    %c0_70 = arith.constant 0 : index
    %c0_71 = arith.constant 0 : index
    %181 = vector.load %arg10[%c0_70, %c0_71] : memref<64x512xbf16, #tpu.memory_space<vmem>>, vector<64x512xbf16>
    %c0_72 = arith.constant 0 : index
    %c0_73 = arith.constant 0 : index
    %182 = vector.load %arg3[%c0_72, %c0_73] : memref<512x512xbf16, #tpu.memory_space<vmem>>, vector<512x512xbf16>
    %cst_74 = arith.constant dense<0.000000e+00> : vector<64x512xf32>
    %183 = tpu.matmul %181, %182, %cst_74 {dimension_numbers = #tpu.dot_dimension_numbers<[1], [0], [0], [1], [0, 0, 1, 1], [], []>} : vector<64x512xbf16>, vector<512x512xbf16>, vector<64x512xf32> -> vector<64x512xf32>
    %c0_75 = arith.constant 0 : index
    %c0_76 = arith.constant 0 : index
    %184 = vector.load %arg8[%c0_75, %c0_76] : memref<64x512xf32, #tpu.memory_space<vmem>>, vector<64x512xf32>
    tpu.vector_store %arg8[%c0_75, %c0_76], %183 {strides = array<i32>} : memref<64x512xf32, #tpu.memory_space<vmem>>, vector<64x512xf32>,
    %c0_77 = arith.constant 0 : index
    %c0_78 = arith.constant 0 : index
    %185 = vector.load %arg17[%c0_77, %c0_78] : memref<8x512xf32, #tpu.memory_space<vmem>>, vector<8x512xf32>
    %c0_79 = arith.constant 0 : index
    %c0_80 = arith.constant 0 : index
    %186 = vector.load %arg18[%c0_79, %c0_80] : memref<8x512xf32, #tpu.memory_space<vmem>>, vector<8x512xf32>
    %cst_81 = arith.constant 7.500000e-01 : f32
    %cst_82 = arith.constant 9.700000e-01 : f32
    %cst_83 = arith.constant 1.250000e+00 : f32
    %c0_i32_84 = arith.constant 0 : i32
    %c8_i32_85 = arith.constant 8 : i32
    %187 = arith.muli %c0_i32_84, %c8_i32_85 : i32
    %188 = tpu.assume_multiple %187, 8 : i32
    %189 = arith.index_cast %188 : i32 to index
    %c0_86 = arith.constant 0 : index
    %190 = vector.load %arg8[%189, %c0_86] : memref<64x512xf32, #tpu.memory_space<vmem>>, vector<8x512xf32>
    %191 = vector.broadcast %cst_81 : f32 to vector<8x512xf32>
    %192 = arith.mulf %191, %185 : vector<8x512xf32>
    %193 = arith.addf %192, %190 : vector<8x512xf32>
    %194 = vector.broadcast %cst_82 : f32 to vector<8x512xf32>
    %195 = arith.mulf %194, %186 : vector<8x512xf32>
    %196 = arith.addf %195, %193 : vector<8x512xf32>
    %197 = vector.broadcast %cst_83 : f32 to vector<8x512xf32>
    %198 = arith.cmpf oge, %196, %197 : vector<8x512xf32>
    %199 = arith.extui %198 : vector<8x512xi1> to vector<8x512xi32>
    %200 = arith.sitofp %199 : vector<8x512xi32> to vector<8x512xf32>
    %c24_i32_87 = arith.constant 24 : i32
    %201 = arith.addi %c24_i32_87, %188 : i32
    %202 = arith.index_cast %201 : i32 to index
    %c0_88 = arith.constant 0 : index
    %203 = vector.load %arg13[%202, %c0_88] : memref<88x512xf32, #tpu.memory_space<vmem>>, vector<8x512xf32>
    tpu.vector_store %arg13[%202, %c0_88], %200 {strides = array<i32>} : memref<88x512xf32, #tpu.memory_space<vmem>>, vector<8x512xf32>,
    %cst_89 = arith.constant 0.000000e+00 : f32
    %204 = vector.broadcast %cst_89 : f32 to vector<8x512xf32>
    %205 = arith.select %198, %204, %196 : vector<8x512xi1>, vector<8x512xf32>
    %c1_i32_90 = arith.constant 1 : i32
    %c8_i32_91 = arith.constant 8 : i32
    %206 = arith.muli %c1_i32_90, %c8_i32_91 : i32
    %207 = tpu.assume_multiple %206, 8 : i32
    %208 = arith.index_cast %207 : i32 to index
    %c0_92 = arith.constant 0 : index
    %209 = vector.load %arg8[%208, %c0_92] : memref<64x512xf32, #tpu.memory_space<vmem>>, vector<8x512xf32>
    %210 = vector.broadcast %cst_81 : f32 to vector<8x512xf32>
    %211 = arith.mulf %210, %193 : vector<8x512xf32>
    %212 = arith.addf %211, %209 : vector<8x512xf32>
    %213 = vector.broadcast %cst_82 : f32 to vector<8x512xf32>
    %214 = arith.mulf %213, %205 : vector<8x512xf32>
    %215 = arith.addf %214, %212 : vector<8x512xf32>
    %216 = vector.broadcast %cst_83 : f32 to vector<8x512xf32>
    %217 = arith.cmpf oge, %215, %216 : vector<8x512xf32>
    %218 = arith.extui %217 : vector<8x512xi1> to vector<8x512xi32>
    %219 = arith.sitofp %218 : vector<8x512xi32> to vector<8x512xf32>
    %c24_i32_93 = arith.constant 24 : i32
    %220 = arith.addi %c24_i32_93, %207 : i32
    %221 = arith.index_cast %220 : i32 to index
    %c0_94 = arith.constant 0 : index
    %222 = vector.load %arg13[%221, %c0_94] : memref<88x512xf32, #tpu.memory_space<vmem>>, vector<8x512xf32>
    tpu.vector_store %arg13[%221, %c0_94], %219 {strides = array<i32>} : memref<88x512xf32, #tpu.memory_space<vmem>>, vector<8x512xf32>,
    %cst_95 = arith.constant 0.000000e+00 : f32
    %223 = vector.broadcast %cst_95 : f32 to vector<8x512xf32>
    %224 = arith.select %217, %223, %215 : vector<8x512xi1>, vector<8x512xf32>
    %c2_i32_96 = arith.constant 2 : i32
    %c8_i32_97 = arith.constant 8 : i32
    %225 = arith.muli %c2_i32_96, %c8_i32_97 : i32
    %226 = tpu.assume_multiple %225, 8 : i32
    %227 = arith.index_cast %226 : i32 to index
    %c0_98 = arith.constant 0 : index
    %228 = vector.load %arg8[%227, %c0_98] : memref<64x512xf32, #tpu.memory_space<vmem>>, vector<8x512xf32>
    %229 = vector.broadcast %cst_81 : f32 to vector<8x512xf32>
    %230 = arith.mulf %229, %212 : vector<8x512xf32>
    %231 = arith.addf %230, %228 : vector<8x512xf32>
    %232 = vector.broadcast %cst_82 : f32 to vector<8x512xf32>
    %233 = arith.mulf %232, %224 : vector<8x512xf32>
    %234 = arith.addf %233, %231 : vector<8x512xf32>
    %235 = vector.broadcast %cst_83 : f32 to vector<8x512xf32>
    %236 = arith.cmpf oge, %234, %235 : vector<8x512xf32>
    %237 = arith.extui %236 : vector<8x512xi1> to vector<8x512xi32>
    %238 = arith.sitofp %237 : vector<8x512xi32> to vector<8x512xf32>
    %c24_i32_99 = arith.constant 24 : i32
    %239 = arith.addi %c24_i32_99, %226 : i32
    %240 = arith.index_cast %239 : i32 to index
    %c0_100 = arith.constant 0 : index
    %241 = vector.load %arg13[%240, %c0_100] : memref<88x512xf32, #tpu.memory_space<vmem>>, vector<8x512xf32>
    tpu.vector_store %arg13[%240, %c0_100], %238 {strides = array<i32>} : memref<88x512xf32, #tpu.memory_space<vmem>>, vector<8x512xf32>,
    %cst_101 = arith.constant 0.000000e+00 : f32
    %242 = vector.broadcast %cst_101 : f32 to vector<8x512xf32>
    %243 = arith.select %236, %242, %234 : vector<8x512xi1>, vector<8x512xf32>
    %c3_i32_102 = arith.constant 3 : i32
    %c8_i32_103 = arith.constant 8 : i32
    %244 = arith.muli %c3_i32_102, %c8_i32_103 : i32
    %245 = tpu.assume_multiple %244, 8 : i32
    %246 = arith.index_cast %245 : i32 to index
    %c0_104 = arith.constant 0 : index
    %247 = vector.load %arg8[%246, %c0_104] : memref<64x512xf32, #tpu.memory_space<vmem>>, vector<8x512xf32>
    %248 = vector.broadcast %cst_81 : f32 to vector<8x512xf32>
    %249 = arith.mulf %248, %231 : vector<8x512xf32>
    %250 = arith.addf %249, %247 : vector<8x512xf32>
    %251 = vector.broadcast %cst_82 : f32 to vector<8x512xf32>
    %252 = arith.mulf %251, %243 : vector<8x512xf32>
    %253 = arith.addf %252, %250 : vector<8x512xf32>
    %254 = vector.broadcast %cst_83 : f32 to vector<8x512xf32>
    %255 = arith.cmpf oge, %253, %254 : vector<8x512xf32>
    %256 = arith.extui %255 : vector<8x512xi1> to vector<8x512xi32>
    %257 = arith.sitofp %256 : vector<8x512xi32> to vector<8x512xf32>
    %c24_i32_105 = arith.constant 24 : i32
    %258 = arith.addi %c24_i32_105, %245 : i32
    %259 = arith.index_cast %258 : i32 to index
    %c0_106 = arith.constant 0 : index
    %260 = vector.load %arg13[%259, %c0_106] : memref<88x512xf32, #tpu.memory_space<vmem>>, vector<8x512xf32>
    tpu.vector_store %arg13[%259, %c0_106], %257 {strides = array<i32>} : memref<88x512xf32, #tpu.memory_space<vmem>>, vector<8x512xf32>,
    %cst_107 = arith.constant 0.000000e+00 : f32
    %261 = vector.broadcast %cst_107 : f32 to vector<8x512xf32>
    %262 = arith.select %255, %261, %253 : vector<8x512xi1>, vector<8x512xf32>
    %c4_i32_108 = arith.constant 4 : i32
    %c8_i32_109 = arith.constant 8 : i32
    %263 = arith.muli %c4_i32_108, %c8_i32_109 : i32
    %264 = tpu.assume_multiple %263, 8 : i32
    %265 = arith.index_cast %264 : i32 to index
    %c0_110 = arith.constant 0 : index
    %266 = vector.load %arg8[%265, %c0_110] : memref<64x512xf32, #tpu.memory_space<vmem>>, vector<8x512xf32>
    %267 = vector.broadcast %cst_81 : f32 to vector<8x512xf32>
    %268 = arith.mulf %267, %250 : vector<8x512xf32>
    %269 = arith.addf %268, %266 : vector<8x512xf32>
    %270 = vector.broadcast %cst_82 : f32 to vector<8x512xf32>
    %271 = arith.mulf %270, %262 : vector<8x512xf32>
    %272 = arith.addf %271, %269 : vector<8x512xf32>
    %273 = vector.broadcast %cst_83 : f32 to vector<8x512xf32>
    %274 = arith.cmpf oge, %272, %273 : vector<8x512xf32>
    %275 = arith.extui %274 : vector<8x512xi1> to vector<8x512xi32>
    %276 = arith.sitofp %275 : vector<8x512xi32> to vector<8x512xf32>
    %c24_i32_111 = arith.constant 24 : i32
    %277 = arith.addi %c24_i32_111, %264 : i32
    %278 = arith.index_cast %277 : i32 to index
    %c0_112 = arith.constant 0 : index
    %279 = vector.load %arg13[%278, %c0_112] : memref<88x512xf32, #tpu.memory_space<vmem>>, vector<8x512xf32>
    tpu.vector_store %arg13[%278, %c0_112], %276 {strides = array<i32>} : memref<88x512xf32, #tpu.memory_space<vmem>>, vector<8x512xf32>,
    %cst_113 = arith.constant 0.000000e+00 : f32
    %280 = vector.broadcast %cst_113 : f32 to vector<8x512xf32>
    %281 = arith.select %274, %280, %272 : vector<8x512xi1>, vector<8x512xf32>
    %c5_i32_114 = arith.constant 5 : i32
    %c8_i32_115 = arith.constant 8 : i32
    %282 = arith.muli %c5_i32_114, %c8_i32_115 : i32
    %283 = tpu.assume_multiple %282, 8 : i32
    %284 = arith.index_cast %283 : i32 to index
    %c0_116 = arith.constant 0 : index
    %285 = vector.load %arg8[%284, %c0_116] : memref<64x512xf32, #tpu.memory_space<vmem>>, vector<8x512xf32>
    %286 = vector.broadcast %cst_81 : f32 to vector<8x512xf32>
    %287 = arith.mulf %286, %269 : vector<8x512xf32>
    %288 = arith.addf %287, %285 : vector<8x512xf32>
    %289 = vector.broadcast %cst_82 : f32 to vector<8x512xf32>
    %290 = arith.mulf %289, %281 : vector<8x512xf32>
    %291 = arith.addf %290, %288 : vector<8x512xf32>
    %292 = vector.broadcast %cst_83 : f32 to vector<8x512xf32>
    %293 = arith.cmpf oge, %291, %292 : vector<8x512xf32>
    %294 = arith.extui %293 : vector<8x512xi1> to vector<8x512xi32>
    %295 = arith.sitofp %294 : vector<8x512xi32> to vector<8x512xf32>
    %c24_i32_117 = arith.constant 24 : i32
    %296 = arith.addi %c24_i32_117, %283 : i32
    %297 = arith.index_cast %296 : i32 to index
    %c0_118 = arith.constant 0 : index
    %298 = vector.load %arg13[%297, %c0_118] : memref<88x512xf32, #tpu.memory_space<vmem>>, vector<8x512xf32>
    tpu.vector_store %arg13[%297, %c0_118], %295 {strides = array<i32>} : memref<88x512xf32, #tpu.memory_space<vmem>>, vector<8x512xf32>,
    %cst_119 = arith.constant 0.000000e+00 : f32
    %299 = vector.broadcast %cst_119 : f32 to vector<8x512xf32>
    %300 = arith.select %293, %299, %291 : vector<8x512xi1>, vector<8x512xf32>
    %c6_i32_120 = arith.constant 6 : i32
    %c8_i32_121 = arith.constant 8 : i32
    %301 = arith.muli %c6_i32_120, %c8_i32_121 : i32
    %302 = tpu.assume_multiple %301, 8 : i32
    %303 = arith.index_cast %302 : i32 to index
    %c0_122 = arith.constant 0 : index
    %304 = vector.load %arg8[%303, %c0_122] : memref<64x512xf32, #tpu.memory_space<vmem>>, vector<8x512xf32>
    %305 = vector.broadcast %cst_81 : f32 to vector<8x512xf32>
    %306 = arith.mulf %305, %288 : vector<8x512xf32>
    %307 = arith.addf %306, %304 : vector<8x512xf32>
    %308 = vector.broadcast %cst_82 : f32 to vector<8x512xf32>
    %309 = arith.mulf %308, %300 : vector<8x512xf32>
    %310 = arith.addf %309, %307 : vector<8x512xf32>
    %311 = vector.broadcast %cst_83 : f32 to vector<8x512xf32>
    %312 = arith.cmpf oge, %310, %311 : vector<8x512xf32>
    %313 = arith.extui %312 : vector<8x512xi1> to vector<8x512xi32>
    %314 = arith.sitofp %313 : vector<8x512xi32> to vector<8x512xf32>
    %c24_i32_123 = arith.constant 24 : i32
    %315 = arith.addi %c24_i32_123, %302 : i32
    %316 = arith.index_cast %315 : i32 to index
    %c0_124 = arith.constant 0 : index
    %317 = vector.load %arg13[%316, %c0_124] : memref<88x512xf32, #tpu.memory_space<vmem>>, vector<8x512xf32>
    tpu.vector_store %arg13[%316, %c0_124], %314 {strides = array<i32>} : memref<88x512xf32, #tpu.memory_space<vmem>>, vector<8x512xf32>,
    %cst_125 = arith.constant 0.000000e+00 : f32
    %318 = vector.broadcast %cst_125 : f32 to vector<8x512xf32>
    %319 = arith.select %312, %318, %310 : vector<8x512xi1>, vector<8x512xf32>
    %c7_i32_126 = arith.constant 7 : i32
    %c8_i32_127 = arith.constant 8 : i32
    %320 = arith.muli %c7_i32_126, %c8_i32_127 : i32
    %321 = tpu.assume_multiple %320, 8 : i32
    %322 = arith.index_cast %321 : i32 to index
    %c0_128 = arith.constant 0 : index
    %323 = vector.load %arg8[%322, %c0_128] : memref<64x512xf32, #tpu.memory_space<vmem>>, vector<8x512xf32>
    %324 = vector.broadcast %cst_81 : f32 to vector<8x512xf32>
    %325 = arith.mulf %324, %307 : vector<8x512xf32>
    %326 = arith.addf %325, %323 : vector<8x512xf32>
    %327 = vector.broadcast %cst_82 : f32 to vector<8x512xf32>
    %328 = arith.mulf %327, %319 : vector<8x512xf32>
    %329 = arith.addf %328, %326 : vector<8x512xf32>
    %330 = vector.broadcast %cst_83 : f32 to vector<8x512xf32>
    %331 = arith.cmpf oge, %329, %330 : vector<8x512xf32>
    %332 = arith.extui %331 : vector<8x512xi1> to vector<8x512xi32>
    %333 = arith.sitofp %332 : vector<8x512xi32> to vector<8x512xf32>
    %c24_i32_129 = arith.constant 24 : i32
    %334 = arith.addi %c24_i32_129, %321 : i32
    %335 = arith.index_cast %334 : i32 to index
    %c0_130 = arith.constant 0 : index
    %336 = vector.load %arg13[%335, %c0_130] : memref<88x512xf32, #tpu.memory_space<vmem>>, vector<8x512xf32>
    tpu.vector_store %arg13[%335, %c0_130], %333 {strides = array<i32>} : memref<88x512xf32, #tpu.memory_space<vmem>>, vector<8x512xf32>,
    %cst_131 = arith.constant 0.000000e+00 : f32
    %337 = vector.broadcast %cst_131 : f32 to vector<8x512xf32>
    %338 = arith.select %331, %337, %329 : vector<8x512xi1>, vector<8x512xf32>
    %c8_i32_132 = arith.constant 8 : i32
    %c0_133 = arith.constant 0 : index
    %c0_134 = arith.constant 0 : index
    %339 = vector.load %arg17[%c0_133, %c0_134] : memref<8x512xf32, #tpu.memory_space<vmem>>, vector<8x512xf32>
    tpu.vector_store %arg17[%c0_133, %c0_134], %326 {strides = array<i32>} : memref<8x512xf32, #tpu.memory_space<vmem>>, vector<8x512xf32>,
    %c0_135 = arith.constant 0 : index
    %c0_136 = arith.constant 0 : index
    %340 = vector.load %arg18[%c0_135, %c0_136] : memref<8x512xf32, #tpu.memory_space<vmem>>, vector<8x512xf32>
    tpu.vector_store %arg18[%c0_135, %c0_136], %338 {strides = array<i32>} : memref<8x512xf32, #tpu.memory_space<vmem>>, vector<8x512xf32>,
    %c0_137 = arith.constant 0 : index
    %c0_138 = arith.constant 0 : index
    %341 = vector.load %arg6[%c0_137, %c0_138] : memref<1x512xi32, #tpu.memory_space<vmem>>, vector<1x512xi32>
    %c16_139 = arith.constant 16 : index
    %c0_140 = arith.constant 0 : index
    %342 = vector.load %arg13[%c16_139, %c0_140] : memref<88x512xf32, #tpu.memory_space<vmem>>, vector<64x512xf32>
    %c8_141 = arith.constant 8 : index
    %c0_142 = arith.constant 0 : index
    %343 = vector.load %arg13[%c8_141, %c0_142] : memref<88x512xf32, #tpu.memory_space<vmem>>, vector<64x512xf32>
    %c2_i32_143 = arith.constant 2 : i32
    %344 = vector.broadcast %c2_i32_143 : i32 to vector<1x512xi32>
    %345 = arith.cmpi eq, %341, %344 : vector<1x512xi32>
    %346 = vector.shape_cast %345 : vector<1x512xi1> to vector<1x512xi1>
    %347 = vector.broadcast %346 : vector<1x512xi1> to vector<64x512xi1>
    %348 = arith.select %347, %343, %342 : vector<64x512xi1>, vector<64x512xf32>
    %c0_144 = arith.constant 0 : index
    %c0_145 = arith.constant 0 : index
    %349 = vector.load %arg13[%c0_144, %c0_145] : memref<88x512xf32, #tpu.memory_space<vmem>>, vector<64x512xf32>
    %c3_i32_146 = arith.constant 3 : i32
    %350 = vector.broadcast %c3_i32_146 : i32 to vector<1x512xi32>
    %351 = arith.cmpi eq, %341, %350 : vector<1x512xi32>
    %352 = vector.shape_cast %351 : vector<1x512xi1> to vector<1x512xi1>
    %353 = vector.broadcast %352 : vector<1x512xi1> to vector<64x512xi1>
    %354 = arith.select %353, %349, %348 : vector<64x512xi1>, vector<64x512xf32>
    %355 = arith.truncf %354 : vector<64x512xf32> to vector<64x512xbf16>
    %c0_147 = arith.constant 0 : index
    %c0_148 = arith.constant 0 : index
    %356 = vector.load %arg11[%c0_147, %c0_148] : memref<64x512xbf16, #tpu.memory_space<vmem>>, vector<64x512xbf16>
    tpu.vector_store %arg11[%c0_147, %c0_148], %355 {strides = array<i32>} : memref<64x512xbf16, #tpu.memory_space<vmem>>, vector<64x512xbf16>,
    %c64_149 = arith.constant 64 : index
    %c0_150 = arith.constant 0 : index
    %357 = vector.load %arg13[%c64_149, %c0_150] : memref<88x512xf32, #tpu.memory_space<vmem>>, vector<24x512xf32>
    %c0_151 = arith.constant 0 : index
    %c0_152 = arith.constant 0 : index
    %358 = vector.load %arg13[%c0_151, %c0_152] : memref<88x512xf32, #tpu.memory_space<vmem>>, vector<24x512xf32>
    tpu.vector_store %arg13[%c0_151, %c0_152], %357 {strides = array<i32>} : memref<88x512xf32, #tpu.memory_space<vmem>>, vector<24x512xf32>,
    %c0_153 = arith.constant 0 : index
    %c0_154 = arith.constant 0 : index
    %359 = vector.load %arg11[%c0_153, %c0_154] : memref<64x512xbf16, #tpu.memory_space<vmem>>, vector<64x512xbf16>
    %c0_155 = arith.constant 0 : index
    %c0_156 = arith.constant 0 : index
    %360 = vector.load %arg4[%c0_155, %c0_156] : memref<512x128xbf16, #tpu.memory_space<vmem>>, vector<512x128xbf16>
    %cst_157 = arith.constant dense<0.000000e+00> : vector<64x128xf32>
    %361 = tpu.matmul %359, %360, %cst_157 {dimension_numbers = #tpu.dot_dimension_numbers<[1], [0], [0], [1], [0, 0, 1, 1], [], []>} : vector<64x512xbf16>, vector<512x128xbf16>, vector<64x128xf32> -> vector<64x128xf32>
    %c0_158 = arith.constant 0 : index
    %c0_159 = arith.constant 0 : index
    %362 = vector.load %arg9[%c0_158, %c0_159] : memref<64x128xf32, #tpu.memory_space<vmem>>, vector<64x128xf32>
    tpu.vector_store %arg9[%c0_158, %c0_159], %361 {strides = array<i32>} : memref<64x128xf32, #tpu.memory_space<vmem>>, vector<64x128xf32>,
    %c0_160 = arith.constant 0 : index
    %c0_161 = arith.constant 0 : index
    %363 = vector.load %arg19[%c0_160, %c0_161] : memref<8x128xf32, #tpu.memory_space<vmem>>, vector<8x128xf32>
    %c0_162 = arith.constant 0 : index
    %c0_163 = arith.constant 0 : index
    %364 = vector.load %arg20[%c0_162, %c0_163] : memref<8x128xf32, #tpu.memory_space<vmem>>, vector<8x128xf32>
    %cst_164 = arith.constant 7.500000e-01 : f32
    %cst_165 = arith.constant 9.700000e-01 : f32
    %cst_166 = arith.constant 1.250000e+00 : f32
    %c0_i32_167 = arith.constant 0 : i32
    %c8_i32_168 = arith.constant 8 : i32
    %365 = arith.muli %c0_i32_167, %c8_i32_168 : i32
    %366 = tpu.assume_multiple %365, 8 : i32
    %367 = arith.index_cast %366 : i32 to index
    %c0_169 = arith.constant 0 : index
    %368 = vector.load %arg9[%367, %c0_169] : memref<64x128xf32, #tpu.memory_space<vmem>>, vector<8x128xf32>
    %369 = vector.broadcast %cst_164 : f32 to vector<8x128xf32>
    %370 = arith.mulf %369, %363 : vector<8x128xf32>
    %371 = arith.addf %370, %368 : vector<8x128xf32>
    %372 = vector.broadcast %cst_165 : f32 to vector<8x128xf32>
    %373 = arith.mulf %372, %364 : vector<8x128xf32>
    %374 = arith.addf %373, %371 : vector<8x128xf32>
    %375 = vector.broadcast %cst_166 : f32 to vector<8x128xf32>
    %376 = arith.cmpf oge, %374, %375 : vector<8x128xf32>
    %377 = arith.extui %376 : vector<8x128xi1> to vector<8x128xi32>
    %378 = arith.sitofp %377 : vector<8x128xi32> to vector<8x128xf32>
    %c8_i32_170 = arith.constant 8 : i32
    %379 = arith.addi %c8_i32_170, %366 : i32
    %380 = arith.index_cast %379 : i32 to index
    %c0_171 = arith.constant 0 : index
    %381 = vector.load %arg14[%380, %c0_171] : memref<72x128xf32, #tpu.memory_space<vmem>>, vector<8x128xf32>
    tpu.vector_store %arg14[%380, %c0_171], %378 {strides = array<i32>} : memref<72x128xf32, #tpu.memory_space<vmem>>, vector<8x128xf32>,
    %cst_172 = arith.constant 0.000000e+00 : f32
    %382 = vector.broadcast %cst_172 : f32 to vector<8x128xf32>
    %383 = arith.select %376, %382, %374 : vector<8x128xi1>, vector<8x128xf32>
    %c1_i32_173 = arith.constant 1 : i32
    %c8_i32_174 = arith.constant 8 : i32
    %384 = arith.muli %c1_i32_173, %c8_i32_174 : i32
    %385 = tpu.assume_multiple %384, 8 : i32
    %386 = arith.index_cast %385 : i32 to index
    %c0_175 = arith.constant 0 : index
    %387 = vector.load %arg9[%386, %c0_175] : memref<64x128xf32, #tpu.memory_space<vmem>>, vector<8x128xf32>
    %388 = vector.broadcast %cst_164 : f32 to vector<8x128xf32>
    %389 = arith.mulf %388, %371 : vector<8x128xf32>
    %390 = arith.addf %389, %387 : vector<8x128xf32>
    %391 = vector.broadcast %cst_165 : f32 to vector<8x128xf32>
    %392 = arith.mulf %391, %383 : vector<8x128xf32>
    %393 = arith.addf %392, %390 : vector<8x128xf32>
    %394 = vector.broadcast %cst_166 : f32 to vector<8x128xf32>
    %395 = arith.cmpf oge, %393, %394 : vector<8x128xf32>
    %396 = arith.extui %395 : vector<8x128xi1> to vector<8x128xi32>
    %397 = arith.sitofp %396 : vector<8x128xi32> to vector<8x128xf32>
    %c8_i32_176 = arith.constant 8 : i32
    %398 = arith.addi %c8_i32_176, %385 : i32
    %399 = arith.index_cast %398 : i32 to index
    %c0_177 = arith.constant 0 : index
    %400 = vector.load %arg14[%399, %c0_177] : memref<72x128xf32, #tpu.memory_space<vmem>>, vector<8x128xf32>
    tpu.vector_store %arg14[%399, %c0_177], %397 {strides = array<i32>} : memref<72x128xf32, #tpu.memory_space<vmem>>, vector<8x128xf32>,
    %cst_178 = arith.constant 0.000000e+00 : f32
    %401 = vector.broadcast %cst_178 : f32 to vector<8x128xf32>
    %402 = arith.select %395, %401, %393 : vector<8x128xi1>, vector<8x128xf32>
    %c2_i32_179 = arith.constant 2 : i32
    %c8_i32_180 = arith.constant 8 : i32
    %403 = arith.muli %c2_i32_179, %c8_i32_180 : i32
    %404 = tpu.assume_multiple %403, 8 : i32
    %405 = arith.index_cast %404 : i32 to index
    %c0_181 = arith.constant 0 : index
    %406 = vector.load %arg9[%405, %c0_181] : memref<64x128xf32, #tpu.memory_space<vmem>>, vector<8x128xf32>
    %407 = vector.broadcast %cst_164 : f32 to vector<8x128xf32>
    %408 = arith.mulf %407, %390 : vector<8x128xf32>
    %409 = arith.addf %408, %406 : vector<8x128xf32>
    %410 = vector.broadcast %cst_165 : f32 to vector<8x128xf32>
    %411 = arith.mulf %410, %402 : vector<8x128xf32>
    %412 = arith.addf %411, %409 : vector<8x128xf32>
    %413 = vector.broadcast %cst_166 : f32 to vector<8x128xf32>
    %414 = arith.cmpf oge, %412, %413 : vector<8x128xf32>
    %415 = arith.extui %414 : vector<8x128xi1> to vector<8x128xi32>
    %416 = arith.sitofp %415 : vector<8x128xi32> to vector<8x128xf32>
    %c8_i32_182 = arith.constant 8 : i32
    %417 = arith.addi %c8_i32_182, %404 : i32
    %418 = arith.index_cast %417 : i32 to index
    %c0_183 = arith.constant 0 : index
    %419 = vector.load %arg14[%418, %c0_183] : memref<72x128xf32, #tpu.memory_space<vmem>>, vector<8x128xf32>
    tpu.vector_store %arg14[%418, %c0_183], %416 {strides = array<i32>} : memref<72x128xf32, #tpu.memory_space<vmem>>, vector<8x128xf32>,
    %cst_184 = arith.constant 0.000000e+00 : f32
    %420 = vector.broadcast %cst_184 : f32 to vector<8x128xf32>
    %421 = arith.select %414, %420, %412 : vector<8x128xi1>, vector<8x128xf32>
    %c3_i32_185 = arith.constant 3 : i32
    %c8_i32_186 = arith.constant 8 : i32
    %422 = arith.muli %c3_i32_185, %c8_i32_186 : i32
    %423 = tpu.assume_multiple %422, 8 : i32
    %424 = arith.index_cast %423 : i32 to index
    %c0_187 = arith.constant 0 : index
    %425 = vector.load %arg9[%424, %c0_187] : memref<64x128xf32, #tpu.memory_space<vmem>>, vector<8x128xf32>
    %426 = vector.broadcast %cst_164 : f32 to vector<8x128xf32>
    %427 = arith.mulf %426, %409 : vector<8x128xf32>
    %428 = arith.addf %427, %425 : vector<8x128xf32>
    %429 = vector.broadcast %cst_165 : f32 to vector<8x128xf32>
    %430 = arith.mulf %429, %421 : vector<8x128xf32>
    %431 = arith.addf %430, %428 : vector<8x128xf32>
    %432 = vector.broadcast %cst_166 : f32 to vector<8x128xf32>
    %433 = arith.cmpf oge, %431, %432 : vector<8x128xf32>
    %434 = arith.extui %433 : vector<8x128xi1> to vector<8x128xi32>
    %435 = arith.sitofp %434 : vector<8x128xi32> to vector<8x128xf32>
    %c8_i32_188 = arith.constant 8 : i32
    %436 = arith.addi %c8_i32_188, %423 : i32
    %437 = arith.index_cast %436 : i32 to index
    %c0_189 = arith.constant 0 : index
    %438 = vector.load %arg14[%437, %c0_189] : memref<72x128xf32, #tpu.memory_space<vmem>>, vector<8x128xf32>
    tpu.vector_store %arg14[%437, %c0_189], %435 {strides = array<i32>} : memref<72x128xf32, #tpu.memory_space<vmem>>, vector<8x128xf32>,
    %cst_190 = arith.constant 0.000000e+00 : f32
    %439 = vector.broadcast %cst_190 : f32 to vector<8x128xf32>
    %440 = arith.select %433, %439, %431 : vector<8x128xi1>, vector<8x128xf32>
    %c4_i32_191 = arith.constant 4 : i32
    %c8_i32_192 = arith.constant 8 : i32
    %441 = arith.muli %c4_i32_191, %c8_i32_192 : i32
    %442 = tpu.assume_multiple %441, 8 : i32
    %443 = arith.index_cast %442 : i32 to index
    %c0_193 = arith.constant 0 : index
    %444 = vector.load %arg9[%443, %c0_193] : memref<64x128xf32, #tpu.memory_space<vmem>>, vector<8x128xf32>
    %445 = vector.broadcast %cst_164 : f32 to vector<8x128xf32>
    %446 = arith.mulf %445, %428 : vector<8x128xf32>
    %447 = arith.addf %446, %444 : vector<8x128xf32>
    %448 = vector.broadcast %cst_165 : f32 to vector<8x128xf32>
    %449 = arith.mulf %448, %440 : vector<8x128xf32>
    %450 = arith.addf %449, %447 : vector<8x128xf32>
    %451 = vector.broadcast %cst_166 : f32 to vector<8x128xf32>
    %452 = arith.cmpf oge, %450, %451 : vector<8x128xf32>
    %453 = arith.extui %452 : vector<8x128xi1> to vector<8x128xi32>
    %454 = arith.sitofp %453 : vector<8x128xi32> to vector<8x128xf32>
    %c8_i32_194 = arith.constant 8 : i32
    %455 = arith.addi %c8_i32_194, %442 : i32
    %456 = arith.index_cast %455 : i32 to index
    %c0_195 = arith.constant 0 : index
    %457 = vector.load %arg14[%456, %c0_195] : memref<72x128xf32, #tpu.memory_space<vmem>>, vector<8x128xf32>
    tpu.vector_store %arg14[%456, %c0_195], %454 {strides = array<i32>} : memref<72x128xf32, #tpu.memory_space<vmem>>, vector<8x128xf32>,
    %cst_196 = arith.constant 0.000000e+00 : f32
    %458 = vector.broadcast %cst_196 : f32 to vector<8x128xf32>
    %459 = arith.select %452, %458, %450 : vector<8x128xi1>, vector<8x128xf32>
    %c5_i32_197 = arith.constant 5 : i32
    %c8_i32_198 = arith.constant 8 : i32
    %460 = arith.muli %c5_i32_197, %c8_i32_198 : i32
    %461 = tpu.assume_multiple %460, 8 : i32
    %462 = arith.index_cast %461 : i32 to index
    %c0_199 = arith.constant 0 : index
    %463 = vector.load %arg9[%462, %c0_199] : memref<64x128xf32, #tpu.memory_space<vmem>>, vector<8x128xf32>
    %464 = vector.broadcast %cst_164 : f32 to vector<8x128xf32>
    %465 = arith.mulf %464, %447 : vector<8x128xf32>
    %466 = arith.addf %465, %463 : vector<8x128xf32>
    %467 = vector.broadcast %cst_165 : f32 to vector<8x128xf32>
    %468 = arith.mulf %467, %459 : vector<8x128xf32>
    %469 = arith.addf %468, %466 : vector<8x128xf32>
    %470 = vector.broadcast %cst_166 : f32 to vector<8x128xf32>
    %471 = arith.cmpf oge, %469, %470 : vector<8x128xf32>
    %472 = arith.extui %471 : vector<8x128xi1> to vector<8x128xi32>
    %473 = arith.sitofp %472 : vector<8x128xi32> to vector<8x128xf32>
    %c8_i32_200 = arith.constant 8 : i32
    %474 = arith.addi %c8_i32_200, %461 : i32
    %475 = arith.index_cast %474 : i32 to index
    %c0_201 = arith.constant 0 : index
    %476 = vector.load %arg14[%475, %c0_201] : memref<72x128xf32, #tpu.memory_space<vmem>>, vector<8x128xf32>
    tpu.vector_store %arg14[%475, %c0_201], %473 {strides = array<i32>} : memref<72x128xf32, #tpu.memory_space<vmem>>, vector<8x128xf32>,
    %cst_202 = arith.constant 0.000000e+00 : f32
    %477 = vector.broadcast %cst_202 : f32 to vector<8x128xf32>
    %478 = arith.select %471, %477, %469 : vector<8x128xi1>, vector<8x128xf32>
    %c6_i32_203 = arith.constant 6 : i32
    %c8_i32_204 = arith.constant 8 : i32
    %479 = arith.muli %c6_i32_203, %c8_i32_204 : i32
    %480 = tpu.assume_multiple %479, 8 : i32
    %481 = arith.index_cast %480 : i32 to index
    %c0_205 = arith.constant 0 : index
    %482 = vector.load %arg9[%481, %c0_205] : memref<64x128xf32, #tpu.memory_space<vmem>>, vector<8x128xf32>
    %483 = vector.broadcast %cst_164 : f32 to vector<8x128xf32>
    %484 = arith.mulf %483, %466 : vector<8x128xf32>
    %485 = arith.addf %484, %482 : vector<8x128xf32>
    %486 = vector.broadcast %cst_165 : f32 to vector<8x128xf32>
    %487 = arith.mulf %486, %478 : vector<8x128xf32>
    %488 = arith.addf %487, %485 : vector<8x128xf32>
    %489 = vector.broadcast %cst_166 : f32 to vector<8x128xf32>
    %490 = arith.cmpf oge, %488, %489 : vector<8x128xf32>
    %491 = arith.extui %490 : vector<8x128xi1> to vector<8x128xi32>
    %492 = arith.sitofp %491 : vector<8x128xi32> to vector<8x128xf32>
    %c8_i32_206 = arith.constant 8 : i32
    %493 = arith.addi %c8_i32_206, %480 : i32
    %494 = arith.index_cast %493 : i32 to index
    %c0_207 = arith.constant 0 : index
    %495 = vector.load %arg14[%494, %c0_207] : memref<72x128xf32, #tpu.memory_space<vmem>>, vector<8x128xf32>
    tpu.vector_store %arg14[%494, %c0_207], %492 {strides = array<i32>} : memref<72x128xf32, #tpu.memory_space<vmem>>, vector<8x128xf32>,
    %cst_208 = arith.constant 0.000000e+00 : f32
    %496 = vector.broadcast %cst_208 : f32 to vector<8x128xf32>
    %497 = arith.select %490, %496, %488 : vector<8x128xi1>, vector<8x128xf32>
    %c7_i32_209 = arith.constant 7 : i32
    %c8_i32_210 = arith.constant 8 : i32
    %498 = arith.muli %c7_i32_209, %c8_i32_210 : i32
    %499 = tpu.assume_multiple %498, 8 : i32
    %500 = arith.index_cast %499 : i32 to index
    %c0_211 = arith.constant 0 : index
    %501 = vector.load %arg9[%500, %c0_211] : memref<64x128xf32, #tpu.memory_space<vmem>>, vector<8x128xf32>
    %502 = vector.broadcast %cst_164 : f32 to vector<8x128xf32>
    %503 = arith.mulf %502, %485 : vector<8x128xf32>
    %504 = arith.addf %503, %501 : vector<8x128xf32>
    %505 = vector.broadcast %cst_165 : f32 to vector<8x128xf32>
    %506 = arith.mulf %505, %497 : vector<8x128xf32>
    %507 = arith.addf %506, %504 : vector<8x128xf32>
    %508 = vector.broadcast %cst_166 : f32 to vector<8x128xf32>
    %509 = arith.cmpf oge, %507, %508 : vector<8x128xf32>
    %510 = arith.extui %509 : vector<8x128xi1> to vector<8x128xi32>
    %511 = arith.sitofp %510 : vector<8x128xi32> to vector<8x128xf32>
    %c8_i32_212 = arith.constant 8 : i32
    %512 = arith.addi %c8_i32_212, %499 : i32
    %513 = arith.index_cast %512 : i32 to index
    %c0_213 = arith.constant 0 : index
    %514 = vector.load %arg14[%513, %c0_213] : memref<72x128xf32, #tpu.memory_space<vmem>>, vector<8x128xf32>
    tpu.vector_store %arg14[%513, %c0_213], %511 {strides = array<i32>} : memref<72x128xf32, #tpu.memory_space<vmem>>, vector<8x128xf32>,
    %cst_214 = arith.constant 0.000000e+00 : f32
    %515 = vector.broadcast %cst_214 : f32 to vector<8x128xf32>
    %516 = arith.select %509, %515, %507 : vector<8x128xi1>, vector<8x128xf32>
    %c8_i32_215 = arith.constant 8 : i32
    %c0_216 = arith.constant 0 : index
    %c0_217 = arith.constant 0 : index
    %517 = vector.load %arg19[%c0_216, %c0_217] : memref<8x128xf32, #tpu.memory_space<vmem>>, vector<8x128xf32>
    tpu.vector_store %arg19[%c0_216, %c0_217], %504 {strides = array<i32>} : memref<8x128xf32, #tpu.memory_space<vmem>>, vector<8x128xf32>,
    %c0_218 = arith.constant 0 : index
    %c0_219 = arith.constant 0 : index
    %518 = vector.load %arg20[%c0_218, %c0_219] : memref<8x128xf32, #tpu.memory_space<vmem>>, vector<8x128xf32>
    tpu.vector_store %arg20[%c0_218, %c0_219], %516 {strides = array<i32>} : memref<8x128xf32, #tpu.memory_space<vmem>>, vector<8x128xf32>,
    %c0_220 = arith.constant 0 : index
    %c0_221 = arith.constant 0 : index
    %519 = vector.load %arg14[%c0_220, %c0_221] : memref<72x128xf32, #tpu.memory_space<vmem>>, vector<64x128xf32>
    %520 = arith.truncf %519 : vector<64x128xf32> to vector<64x128xbf16>
    %c0_222 = arith.constant 0 : index
    %c0_223 = arith.constant 0 : index
    %521 = vector.load %arg7[%c0_222, %c0_223] : memref<64x128xbf16, #tpu.memory_space<vmem>>, vector<64x128xbf16>
    tpu.vector_store %arg7[%c0_222, %c0_223], %520 {strides = array<i32>} : memref<64x128xbf16, #tpu.memory_space<vmem>>, vector<64x128xbf16>,
    %c64_224 = arith.constant 64 : index
    %c0_225 = arith.constant 0 : index
    %522 = vector.load %arg14[%c64_224, %c0_225] : memref<72x128xf32, #tpu.memory_space<vmem>>, vector<8x128xf32>
    %c0_226 = arith.constant 0 : index
    %c0_227 = arith.constant 0 : index
    %523 = vector.load %arg14[%c0_226, %c0_227] : memref<72x128xf32, #tpu.memory_space<vmem>>, vector<8x128xf32>
    tpu.vector_store %arg14[%c0_226, %c0_227], %522 {strides = array<i32>} : memref<72x128xf32, #tpu.memory_space<vmem>>, vector<8x128xf32>,
    return
  }
  func.func @transform_0(%arg0: i32) -> (i32, i32) {
    %c0_i32 = arith.constant 0 : i32
    %c0_i32_0 = arith.constant 0 : i32
    return %arg0, %c0_i32 : i32, i32
  }
  func.func @transform_1(%arg0: i32) -> (i32, i32) {
    %c0_i32 = arith.constant 0 : i32
    %c0_i32_0 = arith.constant 0 : i32
    %c0_i32_1 = arith.constant 0 : i32
    return %c0_i32, %c0_i32_0 : i32, i32
  }
  func.func @transform_2(%arg0: i32) -> (i32, i32) {
    %c0_i32 = arith.constant 0 : i32
    %c0_i32_0 = arith.constant 0 : i32
    %c0_i32_1 = arith.constant 0 : i32
    return %c0_i32, %c0_i32_0 : i32, i32
  }
  func.func @transform_3(%arg0: i32) -> (i32, i32) {
    %c0_i32 = arith.constant 0 : i32
    %c0_i32_0 = arith.constant 0 : i32
    %c0_i32_1 = arith.constant 0 : i32
    return %c0_i32, %c0_i32_0 : i32, i32
  }
  func.func @transform_4(%arg0: i32) -> (i32, i32) {
    %c0_i32 = arith.constant 0 : i32
    %c0_i32_0 = arith.constant 0 : i32
    %c0_i32_1 = arith.constant 0 : i32
    return %c0_i32, %c0_i32_0 : i32, i32
  }
  func.func @transform_5(%arg0: i32) -> (i32, i32) {
    %c0_i32 = arith.constant 0 : i32
    %c0_i32_0 = arith.constant 0 : i32
    %c0_i32_1 = arith.constant 0 : i32
    return %c0_i32, %c0_i32_0 : i32, i32
  }
  func.func @transform_6(%arg0: i32) -> (i32, i32) {
    %c0_i32 = arith.constant 0 : i32
    %c0_i32_0 = arith.constant 0 : i32
    return %arg0, %c0_i32 : i32, i32
  }
}

</mosaic_0001>

<bundles_post_ra>
// kernel: network_forward.1
= control target key start
LH: loop header
LB: loop body
LE: loop exit
PB: predicated region body
PF: predicated region fallthrough
CT: control target
= control target key end

     0   :  { %11 = vsyncpa [#allocation16], 0  ;;  %s16572_s0 = inlined_call_operand.vmem [shape: bf16[64,2432], index: 0, kind: input, shape index: {}]   ;;  %s16573_s1 = inlined_call_operand.hbm [shape: bf16[2432,512], index: 1, kind: input, shape index: {}]   ;;  %s16574_s2 = inlined_call_operand.hbm [shape: bf16[512,512], index: 2, kind: input, shape index: {}]   ;;  %s16575_s3 = inlined_call_operand.hbm [shape: bf16[512,128], index: 3, kind: input, shape index: {}]   ;;  %s16576_s4 = inlined_call_operand.hbm [shape: s32[1,512], index: 4, kind: input, shape index: {}]   ;;  %s16577_s5 = inlined_call_operand.hbm [shape: s32[1,512], index: 5, kind: input, shape index: {}]   ;;  %s16578_s6 = inlined_call_operand.vmem [shape: bf16[64,128], index: 6, kind: output, shape index: {}]  }
   0x1   :  { %12 = vsyncpa [#allocation18], 0 }
   0x2   :  { %13 = vsyncpa [#allocation21], 0  ;;  %s33_s23 = sshll.u32 %s16574_s2, 4  ;;  %s14250_s24 = smov [#allocation17]   ;;  %s34_s23 = int_to_ptr.hbm [resolvable:$true] %s33_s23 }
   0x3   :  { %s35_s25 = sshll.u32 %s14250_s24, 4  ;;  %s60_s28 = sshll.u32 %s16576_s4, 4  ;;  %s36_s25 = int_to_ptr.vmem [resolvable:$true] %s35_s25  ;;  %s61_s28 = int_to_ptr.hbm [resolvable:$true] %s60_s28 }
   0x4   :  { %s14251_s29 = smov 256   ;;  %s14252_s30 = smov 16  }
   0x5   :  { %41 = dma.hbm_to_vmem [thread:$0]  %s34_s23, 16384, %s36_s25, [#allocation18], %s14251_s29, %s14251_s29, %s14252_s30  }
   0x6   :  { %s14253_s7 = smov [#allocation20]   ;;  %s20_s11 = sshll.u32 %s16573_s1, 4  ;;  %s21_s11 = int_to_ptr.hbm [resolvable:$true] %s20_s11 }
   0x7   :  { %s62_s8 = sshll.u32 %s14253_s7, 4  ;;  %s46_s13 = sshll.u32 %s16575_s3, 4  ;;  %s63_s8 = int_to_ptr.vmem [resolvable:$true] %s62_s8  ;;  %s47_s13 = int_to_ptr.hbm [resolvable:$true] %s46_s13 }
   0x8   :  { %65 = dma.hbm_to_vmem [thread:$0]  %s61_s28, 64, %s63_s8, [#allocation21]  }
   0x9   :  { %s14254_s14 = smov [#allocation15]   ;;  %s14255_s4 = smov [#allocation19]  }
   0xa   :  { %s22_s15 = sshll.u32 %s14254_s14, 4  ;;  %s48_s16 = sshll.u32 %s14255_s4, 4  ;;  %s23_s15 = int_to_ptr.vmem [resolvable:$true] %s22_s15  ;;  %s49_s16 = int_to_ptr.vmem [resolvable:$true] %s48_s16 }
   0xb   :  { %28 = dma.hbm_to_vmem [thread:$0]  %s21_s11, 77824, %s23_s15, [#allocation16], %s14251_s29, %s14251_s29, %s14252_s30  }
   0xc   :  { %s14256_s17 = smov 64   ;;  %s14257_s18 = smov 4  }
   0xd   :  { %54 = dma.hbm_to_vmem [thread:$0]  %s47_s13, 4096, %s49_s16, [#allocation18], %s14256_s17, %s14256_s17, %s14257_s18  }
   0xe   :  { %s71_s20 = sshll.u32 %s16577_s5, 4  ;;  %s14258_s21 = smov [#allocation22]   ;;  %s72_s20 = int_to_ptr.hbm [resolvable:$true] %s71_s20 }
   0xf   :  { %s73_s22 = sshll.u32 %s14258_s21, 4  ;;  %s74_s22 = int_to_ptr.vmem [resolvable:$true] %s73_s22 }
  0x10   :  { %76 = dma.hbm_to_vmem [thread:$0]  %s72_s20, 64, %s74_s22, [#allocation21]  }
  0x11   :  { %14244 = dma.done.wait [#allocation16], 77824  }
  0x12   :  { %14245 = vsyncadd [#allocation16], 4294889472 }
  0x13   :  { %14246 = dma.done.wait [#allocation18], 20480  }
  0x14   :  { %14247 = vsyncadd [#allocation18], 4294946816 }
  0x15   :  { %14248 = dma.done.wait [#allocation21], 128  }
  0x16   :  { %14249 = vsyncadd [#allocation21], 4294967168  ;;  %v10055_v0 = vld [vmem:[#allocation15 + $0xe0] sm:$0xf]  ;;  %v13319_v1 = vld [vmem:[#allocation15 + $0xec] sm:$0xf0] }
  0x17   :  { %v10183_v2 = vld [vmem:[#allocation15 + $0x1e0] sm:$0xf]  ;;  %v10056_v3 = vor.u32 %v13319_v1, %v10055_v0  ;;  %v13351_v4 = vld [vmem:[#allocation15 + $0x1ec] sm:$0xf0] }
  0x18   :  { %v10311_v5 = vld [vmem:[#allocation15 + $0x2e0] sm:$0xf]  ;;  %v13383_v6 = vld [vmem:[#allocation15 + $0x2ec] sm:$0xf0]  ;;  %v10184_v7 = vor.u32 %v13351_v4, %v10183_v2 }
  0x19   :  { %v10312_v8 = vor.u32 %v13383_v6, %v10311_v5  ;;  %v10439_v9 = vld [vmem:[#allocation15 + $0x3e0] sm:$0xf]  ;;  %v13415_v10 = vld [vmem:[#allocation15 + $0x3ec] sm:$0xf0]  ;;  %4256 = vmatpush.bf16.msra.mxu0 %v10056_v3 }
  0x1a   :  { %v10039_v11 = vld [vmem:[#allocation15 + $0xc0] sm:$0xf]  ;;  %v10440_v12 = vor.u32 %v13415_v10, %v10439_v9  ;;  %v13315_v13 = vld [vmem:[#allocation15 + $0xcc] sm:$0xf0]  ;;  %4285 = vmatpush.bf16.msra.mxu1 %v10184_v7 }
  0x1b   :  { %v10167_v14 = vld [vmem:[#allocation15 + $0x1c0] sm:$0xf]  ;;  %v13347_v15 = vld [vmem:[#allocation15 + $0x1cc] sm:$0xf0]  ;;  %4314 = vmatpush.bf16.msra.mxu2 %v10312_v8  ;;  %v10040_v16 = vor.u32 %v13315_v13, %v10039_v11 }
  0x1c   :  { %v10168_v17 = vor.u32 %v13347_v15, %v10167_v14  ;;  %v10295_v18 = vld [vmem:[#allocation15 + $0x2c0] sm:$0xf]  ;;  %v13379_v19 = vld [vmem:[#allocation15 + $0x2cc] sm:$0xf0]  ;;  %4343 = vmatpush.bf16.msra.mxu3 %v10440_v12 }
  0x1d   :  { %v10423_v20 = vld [vmem:[#allocation15 + $0x3c0] sm:$0xf]  ;;  %v10296_v21 = vor.u32 %v13379_v19, %v10295_v18  ;;  %v13411_v22 = vld [vmem:[#allocation15 + $0x3cc] sm:$0xf0]  ;;  %4257 = vmatpush.bf16.msra.mxu0 %v10040_v16 }
  0x1e   :  { %v10023_v23 = vld [vmem:[#allocation15 + $0xa0] sm:$0xf]  ;;  %v13311_v24 = vld [vmem:[#allocation15 + $0xac] sm:$0xf0]  ;;  %v10424_v25 = vor.u32 %v13411_v22, %v10423_v20  ;;  %4286 = vmatpush.bf16.msra.mxu1 %v10168_v17 }
  0x1f   :  { %v10151_v26 = vld [vmem:[#allocation15 + $0x1a0] sm:$0xf]  ;;  %v13343_v27 = vld [vmem:[#allocation15 + $0x1ac] sm:$0xf0]  ;;  %v10024_v29 = vor.u32 %v13311_v24, %v10023_v23  ;;  %4315 = vmatpush.bf16.msra.mxu2 %v10296_v21 }
  0x20   :  { %v10279_v28 = vld [vmem:[#allocation15 + $0x2a0] sm:$0xf]  ;;  %v13375_v30 = vld [vmem:[#allocation15 + $0x2ac] sm:$0xf0]  ;;  %v10152_v33 = vor.u32 %v13343_v27, %v10151_v26  ;;  %4344 = vmatpush.bf16.msra.mxu3 %v10424_v25 }
  0x21   :  { %v10407_v31 = vld [vmem:[#allocation15 + $0x3a0] sm:$0xf]  ;;  %v13407_v32 = vld [vmem:[#allocation15 + $0x3ac] sm:$0xf0]  ;;  %v10280_v34 = vor.u32 %v13375_v30, %v10279_v28  ;;  %4258 = vmatpush.bf16.msra.mxu0 %v10024_v29  ;;  %v13222_v29 = vld [vmem:[%s16572_s0 + $0x48] sm:$0xf0] }
  0x22   :  { %v10007_v35 = vld [vmem:[#allocation15 + $0x80] sm:$0xf]  ;;  %v13307_v36 = vld [vmem:[#allocation15 + $0x8c] sm:$0xf0]  ;;  %v10408_v38 = vor.u32 %v13407_v32, %v10407_v31  ;;  %4287 = vmatpush.bf16.msra.mxu1 %v10152_v33  ;;  %v13213_v30 = vld [vmem:[%s16572_s0 + $0x4] sm:$0xf] }
  0x23   :  { %v10135_v37 = vld [vmem:[#allocation15 + $0x180] sm:$0xf]  ;;  %v13339_v39 = vld [vmem:[#allocation15 + $0x18c] sm:$0xf0]  ;;  %v10008_v44 = vor.u32 %v13307_v36, %v10007_v35  ;;  %4316 = vmatpush.bf16.msra.mxu2 %v10280_v34  ;;  %v9647_v35 = vld [vmem:[%s16572_s0 + $0x8] sm:$0xf] }
  0x24   :  { %v10263_v40 = vld [vmem:[#allocation15 + $0x280] sm:$0xf]  ;;  %v13371_v41 = vld [vmem:[#allocation15 + $0x28c] sm:$0xf0]  ;;  %v10136_v45 = vor.u32 %v13339_v39, %v10135_v37  ;;  %4345 = vmatpush.bf16.msra.mxu3 %v10408_v38 }
  0x25   :  { %v10391_v42 = vld [vmem:[#allocation15 + $0x380] sm:$0xf]  ;;  %v13403_v43 = vld [vmem:[#allocation15 + $0x38c] sm:$0xf0]  ;;  %v10264_v46 = vor.u32 %v13371_v41, %v10263_v40  ;;  %4259 = vmatpush.bf16.msra.mxu0 %v10008_v44  ;;  %v13223_v40 = vld [vmem:[%s16572_s0 + $0x50] sm:$0xf0] }
  0x26   :  { %v9991_v47 = vld [vmem:[#allocation15 + $0x60] sm:$0xf]  ;;  %v13303_v48 = vld [vmem:[#allocation15 + $0x6c] sm:$0xf0]  ;;  %v10392_v50 = vor.u32 %v13403_v43, %v10391_v42  ;;  %4288 = vmatpush.bf16.msra.mxu1 %v10136_v45  ;;  %v13214_v41 = vld [vmem:[%s16572_s0 + $0xc] sm:$0xf] }
  0x27   :  { %v10119_v49 = vld [vmem:[#allocation15 + $0x160] sm:$0xf]  ;;  %v13335_v51 = vld [vmem:[#allocation15 + $0x16c] sm:$0xf0]  ;;  %v9992_v56 = vor.u32 %v13303_v48, %v9991_v47  ;;  %4317 = vmatpush.bf16.msra.mxu2 %v10264_v46  ;;  %v9649_v42 = vld [vmem:[%s16572_s0 + $0x54] sm:$0xf0] }
  0x28   :  { %v10247_v52 = vld [vmem:[#allocation15 + $0x260] sm:$0xf]  ;;  %v13367_v53 = vld [vmem:[#allocation15 + $0x26c] sm:$0xf0]  ;;  %v10120_v57 = vor.u32 %v13335_v51, %v10119_v49  ;;  %4346 = vmatpush.bf16.msra.mxu3 %v10392_v50 }
  0x29   :  { %v10375_v54 = vld [vmem:[#allocation15 + $0x360] sm:$0xf]  ;;  %v13399_v55 = vld [vmem:[#allocation15 + $0x36c] sm:$0xf0]  ;;  %v10248_v58 = vor.u32 %v13367_v53, %v10247_v52  ;;  %4260 = vmatpush.bf16.msra.mxu0 %v9992_v56 }
  0x2a   :  { %v9975_v59 = vld [vmem:[#allocation15 + $0x40] sm:$0xf]  ;;  %v13299_v60 = vld [vmem:[#allocation15 + $0x4c] sm:$0xf0]  ;;  %v10376_v62 = vor.u32 %v13399_v55, %v10375_v54  ;;  %4289 = vmatpush.bf16.msra.mxu1 %v10120_v57  ;;  %v14340_v54 = vor.u32 %v13223_v40, %v9647_v35  ;;  %v14342_v57 = vor.u32 %v13214_v41, %v9649_v42  ;;  %v13242_v35 = vld [vmem:[%s16572_s0 + $0xe8] sm:$0xf0] }
  0x2b   :  { %v10103_v61 = vld [vmem:[#allocation15 + $0x140] sm:$0xf]  ;;  %v13331_v63 = vld [vmem:[#allocation15 + $0x14c] sm:$0xf0]  ;;  %v9976_v4 = vor.u32 %v13299_v60, %v9975_v59  ;;  %4318 = vmatpush.bf16.msra.mxu2 %v10248_v58 }
  0x2c   :  { %v10231_v0 = vld [vmem:[#allocation15 + $0x240] sm:$0xf]  ;;  %v13363_v1 = vld [vmem:[#allocation15 + $0x24c] sm:$0xf0]  ;;  %v10104_v5 = vor.u32 %v13331_v63, %v10103_v61  ;;  %4347 = vmatpush.bf16.msra.mxu3 %v10376_v62  ;;  %16729 = vst [vmem:[#allocation28_spill] sm:$0xff] %v14340_v54 }
  0x2d   :  { %v10359_v2 = vld [vmem:[#allocation15 + $0x340] sm:$0xf]  ;;  %v13395_v3 = vld [vmem:[#allocation15 + $0x34c] sm:$0xf0]  ;;  %v10232_v6 = vor.u32 %v13363_v1, %v10231_v0  ;;  %4261 = vmatpush.bf16.msra.mxu0 %v9976_v4  ;;  %16730 = vst [vmem:[#allocation29_spill] sm:$0xff] %v14342_v57 }
  0x2e   :  { %v9959_v7 = vld [vmem:[#allocation15 + $0x20] sm:$0xf]  ;;  %v13295_v8 = vld [vmem:[#allocation15 + $0x2c] sm:$0xf0]  ;;  %v10360_v10 = vor.u32 %v13395_v3, %v10359_v2  ;;  %4290 = vmatpush.bf16.msra.mxu1 %v10104_v5 }
  0x2f   :  { %v10087_v9 = vld [vmem:[#allocation15 + $0x120] sm:$0xf]  ;;  %v13327_v11 = vld [vmem:[#allocation15 + $0x12c] sm:$0xf0]  ;;  %v9960_v17 = vor.u32 %v13295_v8, %v9959_v7  ;;  %4319 = vmatpush.bf16.msra.mxu2 %v10232_v6 }
  0x30   :  { %v10215_v12 = vld [vmem:[#allocation15 + $0x220] sm:$0xf]  ;;  %v13359_v13 = vld [vmem:[#allocation15 + $0x22c] sm:$0xf0]  ;;  %v10088_v21 = vor.u32 %v13327_v11, %v10087_v9  ;;  %4348 = vmatpush.bf16.msra.mxu3 %v10360_v10 }
  0x31   :  { %v10343_v14 = vld [vmem:[#allocation15 + $0x320] sm:$0xf]  ;;  %v13391_v15 = vld [vmem:[#allocation15 + $0x32c] sm:$0xf0]  ;;  %v10216_v22 = vor.u32 %v13359_v13, %v10215_v12  ;;  %4262 = vmatpush.bf16.msra.mxu0 %v9960_v17 }
  0x32   :  { %v9943_v16 = vld [vmem:[#allocation15] sm:$0xf]  ;;  %v13291_v18 = vld [vmem:[#allocation15 + $0xc] sm:$0xf0]  ;;  %v10344_v26 = vor.u32 %v13391_v15, %v10343_v14  ;;  %4291 = vmatpush.bf16.msra.mxu1 %v10088_v21 }
  0x33   :  { %v10071_v19 = vld [vmem:[#allocation15 + $0x100] sm:$0xf]  ;;  %v13323_v20 = vld [vmem:[#allocation15 + $0x10c] sm:$0xf0]  ;;  %v9944_v34 = vor.u32 %v13291_v18, %v9943_v16  ;;  %4320 = vmatpush.bf16.msra.mxu2 %v10216_v22 }
  0x34   :  { %v10199_v23 = vld [vmem:[#allocation15 + $0x200] sm:$0xf]  ;;  %v13355_v24 = vld [vmem:[#allocation15 + $0x20c] sm:$0xf0]  ;;  %v10072_v38 = vor.u32 %v13323_v20, %v10071_v19  ;;  %4349 = vmatpush.bf16.msra.mxu3 %v10344_v26  ;;  %v9715_v19 = vld [vmem:[%s16572_s0 + $0x98] sm:$0xf] }
  0x35   :  { %v10327_v25 = vld [vmem:[#allocation15 + $0x300] sm:$0xf]  ;;  %v13387_v27 = vld [vmem:[#allocation15 + $0x30c] sm:$0xf0]  ;;  %v10200_v39 = vor.u32 %v13355_v24, %v10199_v23  ;;  %4263 = vmatpush.bf16.msra.mxu0 %v9944_v34  ;;  %v13241_v20 = vld [vmem:[%s16572_s0 + $0xe0] sm:$0xf0] }
  0x36   :  { %v9639_v28 = vld [vmem:[%s16572_s0] sm:$0xf]  ;;  %v9641_v31 = vld [vmem:[%s16572_s0 + $0x4c] sm:$0xf0]  ;;  %v10328_v43 = vor.u32 %v13387_v27, %v10327_v25  ;;  %4292 = vmatpush.bf16.msra.mxu1 %v10072_v38  ;;  %v13232_v26 = vld [vmem:[%s16572_s0 + $0x9c] sm:$0xf] }
  0x37   :  { %v10823_v32 = vld [vmem:[#allocation15 + $0x6e0] sm:$0xf]  ;;  %v13511_v33 = vld [vmem:[#allocation15 + $0x6ec] sm:$0xf0]  ;;  %v14336_v48 = vor.u32 %v13222_v29, %v9639_v28  ;;  %v14338_v53 = vor.u32 %v13213_v30, %v9641_v31  ;;  %4321 = vmatpush.bf16.msra.mxu2 %v10200_v39  ;;  %v9717_v27 = vld [vmem:[%s16572_s0 + $0xe4] sm:$0xf0] }
  0x38   :  { %v10951_v36 = vld [vmem:[#allocation15 + $0x7e0] sm:$0xf]  ;;  %v13543_v37 = vld [vmem:[#allocation15 + $0x7ec] sm:$0xf0]  ;;  %v10824_v44 = vor.u32 %v13511_v33, %v10823_v32  ;;  %4350 = vmatpush.bf16.msra.mxu3 %v10328_v43 }
  0x39   :  { %v10567_v45 = vld [vmem:[#allocation15 + $0x4e0] sm:$0xf]  ;;  %v13447_v46 = vld [vmem:[#allocation15 + $0x4ec] sm:$0xf0]  ;;  %16727 = vst [vmem:[#allocation26_spill] sm:$0xff] %v14336_v48  ;;  %v10952_v49 = vor.u32 %v13543_v37, %v10951_v36  ;;  %4264 = vmatmul.bf16.vlgmr.msra.gmra.mxu0 %v14336_v48  ;;  %4293 = vmatmul.bf16.vlgmr.msra.gmra.mxu1 %v14338_v53 }
  0x3a   :  { %v10695_v47 = vld [vmem:[#allocation15 + $0x5e0] sm:$0xf]  ;;  %v13479_v50 = vld [vmem:[#allocation15 + $0x5ec] sm:$0xf0]  ;;  %16728 = vst [vmem:[#allocation27_spill] sm:$0xff] %v14338_v53  ;;  %v10568_v58 = vor.u32 %v13447_v46, %v10567_v45  ;;  %4322 = vmatmul.bf16.vlgmr.msra.gmra.mxu2 %v14340_v54 }
  0x3b   :  { %v10807_v51 = vld [vmem:[#allocation15 + $0x6c0] sm:$0xf]  ;;  %v13507_v52 = vld [vmem:[#allocation15 + $0x6cc] sm:$0xf0]  ;;  %4430 = vmatpush.bf16.msrb.mxu2 %v10824_v44  ;;  %v10696_v59 = vor.u32 %v13479_v50, %v10695_v47  ;;  %4351 = vmatmul.bf16.vlgmr.msra.gmra.mxu3 %v14342_v57  ;;  %v13233_v36 = vld [vmem:[%s16572_s0 + $0xa4] sm:$0xf]  ;;  %v14372_v44 = vor.u32 %v13241_v20, %v9715_v19  ;;  %v14374_v50 = vor.u32 %v13232_v26, %v9717_v27 }
  0x3c   :  { %v10935_v55 = vld [vmem:[#allocation15 + $0x7c0] sm:$0xf]  ;;  %v13539_v56 = vld [vmem:[#allocation15 + $0x7cc] sm:$0xf0]  ;;  %v10808_v60 = vor.u32 %v13507_v52, %v10807_v51  ;;  %4459 = vmatpush.bf16.msrb.mxu3 %v10952_v49  ;;  %4372 = vmatpush.bf16.msrb.mxu0 %v10568_v58  ;;  %v13260_v27 = vld [vmem:[%s16572_s0 + $0x178] sm:$0xf0] }
  0x3d   :  { %v10551_v61 = vld [vmem:[#allocation15 + $0x4c0] sm:$0xf]  ;;  %v13443_v62 = vld [vmem:[#allocation15 + $0x4cc] sm:$0xf0]  ;;  %v10936_v0 = vor.u32 %v13539_v56, %v10935_v55  ;;  %4401 = vmatpush.bf16.msrb.mxu1 %v10696_v59  ;;  %16731 = vst [vmem:[#allocation30_spill] sm:$0xff] %v14372_v44 }
  0x3e   :  { %v10679_v63 = vld [vmem:[#allocation15 + $0x5c0] sm:$0xf]  ;;  %v13475_v1 = vld [vmem:[#allocation15 + $0x5cc] sm:$0xf0]  ;;  %v10552_v6 = vor.u32 %v13443_v62, %v10551_v61  ;;  %16732 = vst [vmem:[#allocation31_spill] sm:$0xff] %v14374_v50 }
  0x3f   :  { %v10791_v2 = vld [vmem:[#allocation15 + $0x6a0] sm:$0xf]  ;;  %v13503_v3 = vld [vmem:[#allocation15 + $0x6ac] sm:$0xf0]  ;;  %4431 = vmatpush.bf16.msrb.mxu2 %v10808_v60  ;;  %v10680_v7 = vor.u32 %v13475_v1, %v10679_v63 }
  0x40   :  { %v10919_v4 = vld [vmem:[#allocation15 + $0x7a0] sm:$0xf]  ;;  %v13535_v5 = vld [vmem:[#allocation15 + $0x7ac] sm:$0xf0]  ;;  %v10792_v8 = vor.u32 %v13503_v3, %v10791_v2  ;;  %4460 = vmatpush.bf16.msrb.mxu3 %v10936_v0  ;;  %4373 = vmatpush.bf16.msrb.mxu0 %v10552_v6 }
  0x41   :  { %v10535_v9 = vld [vmem:[#allocation15 + $0x4a0] sm:$0xf]  ;;  %v13439_v10 = vld [vmem:[#allocation15 + $0x4ac] sm:$0xf0]  ;;  %v10920_v12 = vor.u32 %v13535_v5, %v10919_v4  ;;  %4402 = vmatpush.bf16.msrb.mxu1 %v10680_v7 }
  0x42   :  { %v10663_v11 = vld [vmem:[#allocation15 + $0x5a0] sm:$0xf]  ;;  %v13471_v13 = vld [vmem:[#allocation15 + $0x5ac] sm:$0xf0]  ;;  %v10536_v18 = vor.u32 %v13439_v10, %v10535_v9 }
  0x43   :  { %v10775_v14 = vld [vmem:[#allocation15 + $0x680] sm:$0xf]  ;;  %v13499_v15 = vld [vmem:[#allocation15 + $0x68c] sm:$0xf0]  ;;  %4432 = vmatpush.bf16.msrb.mxu2 %v10792_v8  ;;  %v10664_v21 = vor.u32 %v13471_v13, %v10663_v11 }
  0x44   :  { %v10903_v16 = vld [vmem:[#allocation15 + $0x780] sm:$0xf]  ;;  %v13531_v17 = vld [vmem:[#allocation15 + $0x78c] sm:$0xf0]  ;;  %v10776_v22 = vor.u32 %v13499_v15, %v10775_v14  ;;  %4461 = vmatpush.bf16.msrb.mxu3 %v10920_v12  ;;  %4374 = vmatpush.bf16.msrb.mxu0 %v10536_v18 }
  0x45   :  { %v10519_v23 = vld [vmem:[#allocation15 + $0x480] sm:$0xf]  ;;  %v13435_v24 = vld [vmem:[#allocation15 + $0x48c] sm:$0xf0]  ;;  %v10904_v28 = vor.u32 %v13531_v17, %v10903_v16  ;;  %4403 = vmatpush.bf16.msrb.mxu1 %v10664_v21 }
  0x46   :  { %v10647_v25 = vld [vmem:[#allocation15 + $0x580] sm:$0xf]  ;;  %v13467_v29 = vld [vmem:[#allocation15 + $0x58c] sm:$0xf0]  ;;  %v10520_v38 = vor.u32 %v13435_v24, %v10519_v23 }
  0x47   :  { %v10759_v30 = vld [vmem:[#allocation15 + $0x660] sm:$0xf]  ;;  %v13495_v31 = vld [vmem:[#allocation15 + $0x66c] sm:$0xf0]  ;;  %4433 = vmatpush.bf16.msrb.mxu2 %v10776_v22  ;;  %v10648_v39 = vor.u32 %v13467_v29, %v10647_v25 }
  0x48   :  { %v9723_v32 = vld [vmem:[%s16572_s0 + $0xa0] sm:$0xf]  ;;  %v13527_v34 = vld [vmem:[#allocation15 + $0x76c] sm:$0xf0]  ;;  %v10760_v40 = vor.u32 %v13495_v31, %v10759_v30  ;;  %4462 = vmatpush.bf16.msrb.mxu3 %v10904_v28  ;;  %4375 = vmatpush.bf16.msrb.mxu0 %v10520_v38  ;;  %v13251_v28 = vld [vmem:[%s16572_s0 + $0x134] sm:$0xf] }
  0x49   :  { %v10887_v33 = vld [vmem:[#allocation15 + $0x760] sm:$0xf]  ;;  %v9725_v37 = vld [vmem:[%s16572_s0 + $0xec] sm:$0xf0]  ;;  %v14376_v51 = vor.u32 %v13242_v35, %v9723_v32  ;;  %4404 = vmatpush.bf16.msrb.mxu1 %v10648_v39  ;;  %4269 = vmatmul.bf16.gmra.mxu0 %v14372_v44  ;;  %v9799_v30 = vld [vmem:[%s16572_s0 + $0x138] sm:$0xf] }
  0x4a   :  { %v10503_v41 = vld [vmem:[#allocation15 + $0x460] sm:$0xf]  ;;  %v13431_v42 = vld [vmem:[#allocation15 + $0x46c] sm:$0xf0]  ;;  %v10888_v45 = vor.u32 %v13527_v34, %v10887_v33  ;;  %v14378_v56 = vor.u32 %v13233_v36, %v9725_v37  ;;  %4298 = vmatmul.bf16.gmra.mxu1 %v14374_v50  ;;  %v13261_v31 = vld [vmem:[%s16572_s0 + $0x180] sm:$0xf0] }
  0x4b   :  { %v10631_v43 = vld [vmem:[#allocation15 + $0x560] sm:$0xf]  ;;  %v13463_v46 = vld [vmem:[#allocation15 + $0x56c] sm:$0xf0]  ;;  %16733 = vst [vmem:[#allocation32_spill] sm:$0xff] %v14376_v51  ;;  %v10504_v58 = vor.u32 %v13431_v42, %v10503_v41  ;;  %4434 = vmatpush.bf16.msrb.mxu2 %v10760_v40  ;;  %v14412_v38 = vor.u32 %v13261_v31, %v9799_v30 }
  0x4c   :  { %v10743_v47 = vld [vmem:[#allocation15 + $0x640] sm:$0xf]  ;;  %v13491_v49 = vld [vmem:[#allocation15 + $0x64c] sm:$0xf0]  ;;  %16734 = vst [vmem:[#allocation33_spill] sm:$0xff] %v14378_v56  ;;  %v10632_v59 = vor.u32 %v13463_v46, %v10631_v43  ;;  %4463 = vmatpush.bf16.msrb.mxu3 %v10888_v45  ;;  %4327 = vmatmul.bf16.gmra.mxu2 %v14376_v51 }
  0x4d   :  { %v10871_v52 = vld [vmem:[#allocation15 + $0x740] sm:$0xf]  ;;  %v13523_v55 = vld [vmem:[#allocation15 + $0x74c] sm:$0xf0]  ;;  %v10744_v60 = vor.u32 %v13491_v49, %v10743_v47  ;;  %4356 = vmatmul.bf16.gmra.mxu3 %v14378_v56  ;;  %4376 = vmatpush.bf16.msrb.mxu0 %v10504_v58  ;;  %v13252_v33 = vld [vmem:[%s16572_s0 + $0x13c] sm:$0xf] }
  0x4e   :  { %v10487_v61 = vld [vmem:[#allocation15 + $0x440] sm:$0xf]  ;;  %v13427_v62 = vld [vmem:[#allocation15 + $0x44c] sm:$0xf0]  ;;  %v10872_v63 = vor.u32 %v13523_v55, %v10871_v52  ;;  %4405 = vmatpush.bf16.msrb.mxu1 %v10632_v59  ;;  %v9801_v34 = vld [vmem:[%s16572_s0 + $0x184] sm:$0xf0] }
  0x4f   :  { %v10615_v0 = vld [vmem:[#allocation15 + $0x540] sm:$0xf]  ;;  %v13459_v1 = vld [vmem:[#allocation15 + $0x54c] sm:$0xf0]  ;;  %v10488_v2 = vor.u32 %v13427_v62, %v10487_v61  ;;  %4435 = vmatpush.bf16.msrb.mxu2 %v10744_v60  ;;  %16737 = vst [vmem:[#allocation36_spill] sm:$0xff] %v14412_v38  ;;  %v14414_v39 = vor.u32 %v13252_v33, %v9801_v34 }
  0x50   :  { %v10727_v3 = vld [vmem:[#allocation15 + $0x620] sm:$0xf]  ;;  %v13487_v4 = vld [vmem:[#allocation15 + $0x62c] sm:$0xf0]  ;;  %v10616_v6 = vor.u32 %v13459_v1, %v10615_v0  ;;  %4464 = vmatpush.bf16.msrb.mxu3 %v10872_v63 }
  0x51   :  { %v10471_v5 = vld [vmem:[#allocation15 + $0x420] sm:$0xf]  ;;  %v10728_v7 = vor.u32 %v13487_v4, %v10727_v3  ;;  %v13423_v8 = vld [vmem:[#allocation15 + $0x42c] sm:$0xf0]  ;;  %4377 = vmatpush.bf16.msrb.mxu0 %v10488_v2  ;;  %16738 = vst [vmem:[#allocation37_spill] sm:$0xff] %v14414_v39 }
  0x52   :  { %v10855_v9 = vld [vmem:[#allocation15 + $0x720] sm:$0xf]  ;;  %v13519_v10 = vld [vmem:[#allocation15 + $0x72c] sm:$0xf0]  ;;  %v10472_v16 = vor.u32 %v13423_v8, %v10471_v5  ;;  %4406 = vmatpush.bf16.msrb.mxu1 %v10616_v6  ;;  %v9867_v8 = vld [vmem:[%s16572_s0 + $0x1c8] sm:$0xf] }
  0x53   :  { %v10856_v11 = vor.u32 %v13519_v10, %v10855_v9  ;;  %v10599_v12 = vld [vmem:[#allocation15 + $0x520] sm:$0xf]  ;;  %v13455_v13 = vld [vmem:[#allocation15 + $0x52c] sm:$0xf0]  ;;  %4436 = vmatpush.bf16.msrb.mxu2 %v10728_v7  ;;  %v13279_v9 = vld [vmem:[%s16572_s0 + $0x210] sm:$0xf0] }
  0x54   :  { %v10711_v14 = vld [vmem:[#allocation15 + $0x600] sm:$0xf]  ;;  %v13483_v15 = vld [vmem:[#allocation15 + $0x60c] sm:$0xf0]  ;;  %v10600_v19 = vor.u32 %v13455_v13, %v10599_v12  ;;  %v13270_v10 = vld [vmem:[%s16572_s0 + $0x1cc] sm:$0xf] }
  0x55   :  { %v10839_v17 = vld [vmem:[#allocation15 + $0x700] sm:$0xf]  ;;  %v13515_v18 = vld [vmem:[#allocation15 + $0x70c] sm:$0xf0]  ;;  %v10712_v20 = vor.u32 %v13483_v15, %v10711_v14  ;;  %4465 = vmatpush.bf16.msrb.mxu3 %v10856_v11  ;;  %4378 = vmatpush.bf16.msrb.mxu0 %v10472_v16  ;;  %v9869_v11 = vld [vmem:[%s16572_s0 + $0x214] sm:$0xf0]  ;;  %v14444_v16 = vor.u32 %v13279_v9, %v9867_v8 }
  0x56   :  { %v10455_v21 = vld [vmem:[#allocation15 + $0x400] sm:$0xf]  ;;  %v13419_v22 = vld [vmem:[#allocation15 + $0x40c] sm:$0xf0]  ;;  %v10840_v23 = vor.u32 %v13515_v18, %v10839_v17  ;;  %4407 = vmatpush.bf16.msrb.mxu1 %v10600_v19  ;;  %v13280_v13 = vld [vmem:[%s16572_s0 + $0x218] sm:$0xf0]  ;;  %v14446_v17 = vor.u32 %v13270_v10, %v9869_v11 }
  0x57   :  { %v10583_v24 = vld [vmem:[#allocation15 + $0x500] sm:$0xf]  ;;  %v13451_v25 = vld [vmem:[#allocation15 + $0x50c] sm:$0xf0]  ;;  %v10456_v32 = vor.u32 %v13419_v22, %v10455_v21  ;;  %4437 = vmatpush.bf16.msrb.mxu2 %v10712_v20  ;;  %v13271_v14 = vld [vmem:[%s16572_s0 + $0x1d4] sm:$0xf] }
  0x58   :  { %v9791_v26 = vld [vmem:[%s16572_s0 + $0x130] sm:$0xf]  ;;  %v9793_v29 = vld [vmem:[%s16572_s0 + $0x17c] sm:$0xf0]  ;;  %v10584_v35 = vor.u32 %v13451_v25, %v10583_v24  ;;  %16739 = vst [vmem:[#allocation38_spill] sm:$0xff] %v14444_v16 }
  0x59   :  { %v14408_v36 = vor.u32 %v13260_v27, %v9791_v26  ;;  %4466 = vmatpush.bf16.msrb.mxu3 %v10840_v23  ;;  %v14410_v37 = vor.u32 %v13251_v28, %v9793_v29  ;;  %4379 = vmatpush.bf16.msrb.mxu0 %v10456_v32  ;;  %v11335_v40 = vld [vmem:[#allocation15 + $0xae0] sm:$0xf]  ;;  %v13639_v41 = vld [vmem:[#allocation15 + $0xaec] sm:$0xf0]  ;;  %16740 = vst [vmem:[#allocation39_spill] sm:$0xff] %v14446_v17 }
  0x5a   :  { %4408 = vmatpush.bf16.msrb.mxu1 %v10584_v35  ;;  %v11079_v42 = vld [vmem:[#allocation15 + $0x8e0] sm:$0xf]  ;;  %v11336_v43 = vor.u32 %v13639_v41, %v11335_v40  ;;  %v13575_v45 = vld [vmem:[#allocation15 + $0x8ec] sm:$0xf0] }
  0x5b   :  { %16735 = vst [vmem:[#allocation34_spill] sm:$0xff] %v14408_v36  ;;  %4274 = vmatmul.bf16.gmra.mxu0 %v14408_v36  ;;  %4303 = vmatmul.bf16.gmra.mxu1 %v14410_v37  ;;  %v11463_v46 = vld [vmem:[#allocation15 + $0xbe0] sm:$0xf]  ;;  %v13671_v47 = vld [vmem:[#allocation15 + $0xbec] sm:$0xf0]  ;;  %v11080_v49 = vor.u32 %v13575_v45, %v11079_v42 }
  0x5c   :  { %16736 = vst [vmem:[#allocation35_spill] sm:$0xff] %v14410_v37  ;;  %4332 = vmatmul.bf16.gmra.mxu2 %v14412_v38  ;;  %v11464_v52 = vor.u32 %v13671_v47, %v11463_v46  ;;  %v11207_v55 = vld [vmem:[#allocation15 + $0x9e0] sm:$0xf]  ;;  %v13607_v58 = vld [vmem:[#allocation15 + $0x9ec] sm:$0xf0] }
  0x5d   :  { %4361 = vmatmul.bf16.gmra.mxu3 %v14414_v39  ;;  %v11319_v59 = vld [vmem:[#allocation15 + $0xac0] sm:$0xf]  ;;  %4546 = vmatpush.bf16.msra.mxu2 %v11336_v43  ;;  %v11208_v60 = vor.u32 %v13607_v58, %v11207_v55  ;;  %v13635_v61 = vld [vmem:[#allocation15 + $0xacc] sm:$0xf0]  ;;  %v13224_v55 = vld [vmem:[%s16572_s0 + $0x58] sm:$0xf0] }
  0x5e   :  { %v11063_v62 = vld [vmem:[#allocation15 + $0x8c0] sm:$0xf]  ;;  %v13571_v63 = vld [vmem:[#allocation15 + $0x8cc] sm:$0xf0]  ;;  %4488 = vmatpush.bf16.msra.mxu0 %v11080_v49  ;;  %4575 = vmatpush.bf16.msra.mxu3 %v11464_v52  ;;  %v11320_v0 = vor.u32 %v13635_v61, %v11319_v59  ;;  %v13215_v58 = vld [vmem:[%s16572_s0 + $0x14] sm:$0xf] }
  0x5f   :  { %v11064_v1 = vor.u32 %v13571_v63, %v11063_v62  ;;  %v11447_v2 = vld [vmem:[#allocation15 + $0xbc0] sm:$0xf]  ;;  %v13667_v3 = vld [vmem:[#allocation15 + $0xbcc] sm:$0xf0]  ;;  %4517 = vmatpush.bf16.msra.mxu1 %v11208_v60  ;;  %v9663_v60 = vld [vmem:[%s16572_s0 + $0x18] sm:$0xf] }
  0x60   :  { %v11191_v4 = vld [vmem:[#allocation15 + $0x9c0] sm:$0xf]  ;;  %v11448_v5 = vor.u32 %v13667_v3, %v11447_v2  ;;  %v13603_v6 = vld [vmem:[#allocation15 + $0x9cc] sm:$0xf0]  ;;  %v13225_v61 = vld [vmem:[%s16572_s0 + $0x60] sm:$0xf0] }
  0x61   :  { %v11192_v7 = vor.u32 %v13603_v6, %v11191_v4  ;;  %4547 = vmatpush.bf16.msra.mxu2 %v11320_v0  ;;  %v9875_v12 = vld [vmem:[%s16572_s0 + $0x1d0] sm:$0xf]  ;;  %v9877_v15 = vld [vmem:[%s16572_s0 + $0x21c] sm:$0xf0]  ;;  %v13216_v62 = vld [vmem:[%s16572_s0 + $0x1c] sm:$0xf]  ;;  %v14484_v2 = vor.u32 %v13225_v61, %v9663_v60 }
  0x62   :  { %4489 = vmatpush.bf16.msra.mxu0 %v11064_v1  ;;  %4576 = vmatpush.bf16.msra.mxu3 %v11448_v5  ;;  %v14448_v18 = vor.u32 %v13280_v13, %v9875_v12  ;;  %v14450_v19 = vor.u32 %v13271_v14, %v9877_v15  ;;  %v11303_v20 = vld [vmem:[#allocation15 + $0xaa0] sm:$0xf]  ;;  %v13631_v21 = vld [vmem:[#allocation15 + $0xaac] sm:$0xf0]  ;;  %v9665_v63 = vld [vmem:[%s16572_s0 + $0x64] sm:$0xf0] }
  0x63   :  { %4518 = vmatpush.bf16.msra.mxu1 %v11192_v7  ;;  %v11047_v22 = vld [vmem:[#allocation15 + $0x8a0] sm:$0xf]  ;;  %v11304_v23 = vor.u32 %v13631_v21, %v11303_v20  ;;  %v13567_v24 = vld [vmem:[#allocation15 + $0x8ac] sm:$0xf0]  ;;  %16745 = vst [vmem:[#allocation44_spill] sm:$0xff] %v14484_v2  ;;  %v14486_v3 = vor.u32 %v13216_v62, %v9665_v63 }
  0x64   :  { %16741 = vst [vmem:[#allocation40_spill] sm:$0xff] %v14448_v18  ;;  %v11431_v25 = vld [vmem:[#allocation15 + $0xba0] sm:$0xf]  ;;  %v13663_v26 = vld [vmem:[#allocation15 + $0xbac] sm:$0xf0]  ;;  %v11048_v27 = vor.u32 %v13567_v24, %v11047_v22 }
  0x65   :  { %16742 = vst [vmem:[#allocation41_spill] sm:$0xff] %v14450_v19  ;;  %v11432_v28 = vor.u32 %v13663_v26, %v11431_v25  ;;  %v11175_v29 = vld [vmem:[#allocation15 + $0x9a0] sm:$0xf]  ;;  %v13599_v30 = vld [vmem:[#allocation15 + $0x9ac] sm:$0xf0]  ;;  %4548 = vmatpush.bf16.msra.mxu2 %v11304_v23 }
  0x66   :  { %v11287_v31 = vld [vmem:[#allocation15 + $0xa80] sm:$0xf]  ;;  %v11176_v32 = vor.u32 %v13599_v30, %v11175_v29  ;;  %v13627_v33 = vld [vmem:[#allocation15 + $0xa8c] sm:$0xf0]  ;;  %4490 = vmatpush.bf16.msra.mxu0 %v11048_v27  ;;  %16746 = vst [vmem:[#allocation45_spill] sm:$0xff] %v14486_v3 }
  0x67   :  { %v11031_v34 = vld [vmem:[#allocation15 + $0x880] sm:$0xf]  ;;  %v13563_v35 = vld [vmem:[#allocation15 + $0x88c] sm:$0xf0]  ;;  %4577 = vmatpush.bf16.msra.mxu3 %v11432_v28  ;;  %v11288_v40 = vor.u32 %v13627_v33, %v11287_v31  ;;  %v13243_v33 = vld [vmem:[%s16572_s0 + $0xf0] sm:$0xf0] }
  0x68   :  { %v11032_v41 = vor.u32 %v13563_v35, %v11031_v34  ;;  %v11415_v42 = vld [vmem:[#allocation15 + $0xb80] sm:$0xf]  ;;  %v13659_v43 = vld [vmem:[#allocation15 + $0xb8c] sm:$0xf0]  ;;  %4519 = vmatpush.bf16.msra.mxu1 %v11176_v32  ;;  %v9731_v32 = vld [vmem:[%s16572_s0 + $0xa8] sm:$0xf] }
  0x69   :  { %v11159_v45 = vld [vmem:[#allocation15 + $0x980] sm:$0xf]  ;;  %v11416_v46 = vor.u32 %v13659_v43, %v11415_v42  ;;  %v13595_v47 = vld [vmem:[#allocation15 + $0x98c] sm:$0xf0]  ;;  %4549 = vmatpush.bf16.msra.mxu2 %v11288_v40  ;;  %v13234_v34 = vld [vmem:[%s16572_s0 + $0xac] sm:$0xf] }
  0x6a   :  { %v11160_v49 = vor.u32 %v13595_v47, %v11159_v45  ;;  %v9655_v52 = vld [vmem:[%s16572_s0 + $0x10] sm:$0xf]  ;;  %v9657_v59 = vld [vmem:[%s16572_s0 + $0x5c] sm:$0xf0]  ;;  %4491 = vmatpush.bf16.msra.mxu0 %v11032_v41  ;;  %v9733_v35 = vld [vmem:[%s16572_s0 + $0xf4] sm:$0xf0]  ;;  %v14516_v45 = vor.u32 %v13243_v33, %v9731_v32 }
  0x6b   :  { %4279 = vmatmul.bf16.gmra.mxu0 %v14444_v16  ;;  %4308 = vmatmul.bf16.gmra.mxu1 %v14446_v17  ;;  %v14480_v0 = vor.u32 %v13224_v55, %v9655_v52  ;;  %v14482_v1 = vor.u32 %v13215_v58, %v9657_v59  ;;  %v11271_v4 = vld [vmem:[#allocation15 + $0xa60] sm:$0xf]  ;;  %v13623_v5 = vld [vmem:[#allocation15 + $0xa6c] sm:$0xf0]  ;;  %v13244_v41 = vld [vmem:[%s16572_s0 + $0xf8] sm:$0xf0] }
  0x6c   :  { %4337 = vmatmul.bf16.gmra.mxu2 %v14448_v18  ;;  %4578 = vmatpush.bf16.msra.mxu3 %v11416_v46  ;;  %v11015_v6 = vld [vmem:[#allocation15 + $0x860] sm:$0xf]  ;;  %v11272_v7 = vor.u32 %v13623_v5, %v11271_v4  ;;  %v13559_v8 = vld [vmem:[#allocation15 + $0x86c] sm:$0xf0]  ;;  %v13235_v42 = vld [vmem:[%s16572_s0 + $0xb4] sm:$0xf]  ;;  %v14518_v46 = vor.u32 %v13234_v34, %v9733_v35 }
  0x6d   :  { %4366 = vmatmul.bf16.gmra.mxu3 %v14450_v19  ;;  %4520 = vmatpush.bf16.msra.mxu1 %v11160_v49  ;;  %16743 = vst [vmem:[#allocation42_spill] sm:$0xff] %v14480_v0  ;;  %v11399_v9 = vld [vmem:[#allocation15 + $0xb60] sm:$0xf]  ;;  %v13655_v10 = vld [vmem:[#allocation15 + $0xb6c] sm:$0xf0]  ;;  %v11016_v11 = vor.u32 %v13559_v8, %v11015_v6 }
  0x6e   :  { %16744 = vst [vmem:[#allocation43_spill] sm:$0xff] %v14482_v1  ;;  %v11400_v12 = vor.u32 %v13655_v10, %v11399_v9  ;;  %v11143_v13 = vld [vmem:[#allocation15 + $0x960] sm:$0xf]  ;;  %v13591_v14 = vld [vmem:[#allocation15 + $0x96c] sm:$0xf0]  ;;  %4550 = vmatpush.bf16.msra.mxu2 %v11272_v7 }
  0x6f   :  { %v11255_v15 = vld [vmem:[#allocation15 + $0xa40] sm:$0xf]  ;;  %v11144_v20 = vor.u32 %v13591_v14, %v11143_v13  ;;  %v13619_v21 = vld [vmem:[#allocation15 + $0xa4c] sm:$0xf0]  ;;  %4492 = vmatpush.bf16.msra.mxu0 %v11016_v11  ;;  %16747 = vst [vmem:[#allocation46_spill] sm:$0xff] %v14516_v45 }
  0x70   :  { %v10999_v22 = vld [vmem:[#allocation15 + $0x840] sm:$0xf]  ;;  %v13555_v23 = vld [vmem:[#allocation15 + $0x84c] sm:$0xf0]  ;;  %4579 = vmatpush.bf16.msra.mxu3 %v11400_v12  ;;  %v11256_v24 = vor.u32 %v13619_v21, %v11255_v15  ;;  %16748 = vst [vmem:[#allocation47_spill] sm:$0xff] %v14518_v46 }
  0x71   :  { %v11000_v25 = vor.u32 %v13555_v23, %v10999_v22  ;;  %v11383_v26 = vld [vmem:[#allocation15 + $0xb40] sm:$0xf]  ;;  %v13651_v27 = vld [vmem:[#allocation15 + $0xb4c] sm:$0xf0]  ;;  %4521 = vmatpush.bf16.msra.mxu1 %v11144_v20 }
  0x72   :  { %v11127_v28 = vld [vmem:[#allocation15 + $0x940] sm:$0xf]  ;;  %v11384_v29 = vor.u32 %v13651_v27, %v11383_v26  ;;  %v13587_v30 = vld [vmem:[#allocation15 + $0x94c] sm:$0xf0]  ;;  %4551 = vmatpush.bf16.msra.mxu2 %v11256_v24  ;;  %v13253_v26 = vld [vmem:[%s16572_s0 + $0x144] sm:$0xf] }
  0x73   :  { %v11128_v31 = vor.u32 %v13587_v30, %v11127_v28  ;;  %v9739_v40 = vld [vmem:[%s16572_s0 + $0xb0] sm:$0xf]  ;;  %4493 = vmatpush.bf16.msra.mxu0 %v11000_v25  ;;  %v9741_v43 = vld [vmem:[%s16572_s0 + $0xfc] sm:$0xf0]  ;;  %v13262_v25 = vld [vmem:[%s16572_s0 + $0x188] sm:$0xf0] }
  0x74   :  { %4580 = vmatpush.bf16.msra.mxu3 %v11384_v29  ;;  %v14520_v47 = vor.u32 %v13244_v41, %v9739_v40  ;;  %v14522_v49 = vor.u32 %v13235_v42, %v9741_v43  ;;  %v11239_v52 = vld [vmem:[#allocation15 + $0xa20] sm:$0xf]  ;;  %v13615_v55 = vld [vmem:[#allocation15 + $0xa2c] sm:$0xf0]  ;;  %v9815_v28 = vld [vmem:[%s16572_s0 + $0x148] sm:$0xf] }
  0x75   :  { %4522 = vmatpush.bf16.msra.mxu1 %v11128_v31  ;;  %v10983_v58 = vld [vmem:[#allocation15 + $0x820] sm:$0xf]  ;;  %v11240_v59 = vor.u32 %v13615_v55, %v11239_v52  ;;  %v13551_v60 = vld [vmem:[#allocation15 + $0x82c] sm:$0xf0]  ;;  %v13263_v29 = vld [vmem:[%s16572_s0 + $0x190] sm:$0xf0] }
  0x76   :  { %16749 = vst [vmem:[#allocation48_spill] sm:$0xff] %v14520_v47  ;;  %v11367_v61 = vld [vmem:[#allocation15 + $0xb20] sm:$0xf]  ;;  %v13647_v62 = vld [vmem:[#allocation15 + $0xb2c] sm:$0xf0]  ;;  %v10984_v63 = vor.u32 %v13551_v60, %v10983_v58  ;;  %v14556_v34 = vor.u32 %v13263_v29, %v9815_v28 }
  0x77   :  { %16750 = vst [vmem:[#allocation49_spill] sm:$0xff] %v14522_v49  ;;  %v11368_v4 = vor.u32 %v13647_v62, %v11367_v61  ;;  %v11111_v5 = vld [vmem:[#allocation15 + $0x920] sm:$0xf]  ;;  %v13583_v6 = vld [vmem:[#allocation15 + $0x92c] sm:$0xf0]  ;;  %4552 = vmatpush.bf16.msra.mxu2 %v11240_v59 }
  0x78   :  { %v11223_v7 = vld [vmem:[#allocation15 + $0xa00] sm:$0xf]  ;;  %v11112_v8 = vor.u32 %v13583_v6, %v11111_v5  ;;  %v13611_v9 = vld [vmem:[#allocation15 + $0xa0c] sm:$0xf0]  ;;  %4494 = vmatpush.bf16.msra.mxu0 %v10984_v63  ;;  %v13254_v30 = vld [vmem:[%s16572_s0 + $0x14c] sm:$0xf] }
  0x79   :  { %v10967_v10 = vld [vmem:[#allocation15 + $0x800] sm:$0xf]  ;;  %v13547_v11 = vld [vmem:[#allocation15 + $0x80c] sm:$0xf0]  ;;  %4581 = vmatpush.bf16.msra.mxu3 %v11368_v4  ;;  %v11224_v12 = vor.u32 %v13611_v9, %v11223_v7  ;;  %v9817_v31 = vld [vmem:[%s16572_s0 + $0x194] sm:$0xf0] }
  0x7a   :  { %v10968_v13 = vor.u32 %v13547_v11, %v10967_v10  ;;  %v11351_v14 = vld [vmem:[#allocation15 + $0xb00] sm:$0xf]  ;;  %v13643_v15 = vld [vmem:[#allocation15 + $0xb0c] sm:$0xf0]  ;;  %4523 = vmatpush.bf16.msra.mxu1 %v11112_v8  ;;  %16753 = vst [vmem:[#allocation52_spill] sm:$0xff] %v14556_v34  ;;  %v14558_v35 = vor.u32 %v13254_v30, %v9817_v31 }
  0x7b   :  { %4380 = vmatmul.bf16.vlgmr.msrb.gmra.mxu0 %v14480_v0  ;;  %4409 = vmatmul.bf16.vlgmr.msrb.gmra.mxu1 %v14482_v1  ;;  %v11095_v20 = vld [vmem:[#allocation15 + $0x900] sm:$0xf]  ;;  %v11352_v21 = vor.u32 %v13643_v15, %v11351_v14  ;;  %v13579_v22 = vld [vmem:[#allocation15 + $0x90c] sm:$0xf0]  ;;  %v9883_v61 = vld [vmem:[%s16572_s0 + $0x1d8] sm:$0xf] }
  0x7c   :  { %4438 = vmatmul.bf16.vlgmr.msrb.gmra.mxu2 %v14484_v2  ;;  %v11096_v23 = vor.u32 %v13579_v22, %v11095_v20  ;;  %v9807_v24 = vld [vmem:[%s16572_s0 + $0x140] sm:$0xf]  ;;  %v9809_v27 = vld [vmem:[%s16572_s0 + $0x18c] sm:$0xf0]  ;;  %4495 = vmatpush.bf16.msra.mxu0 %v10968_v13  ;;  %16754 = vst [vmem:[#allocation53_spill] sm:$0xff] %v14558_v35 }
  0x7d   :  { %4467 = vmatmul.bf16.vlgmr.msrb.gmra.mxu3 %v14486_v3  ;;  %4553 = vmatpush.bf16.msra.mxu2 %v11224_v12  ;;  %v14552_v32 = vor.u32 %v13262_v25, %v9807_v24  ;;  %v14554_v33 = vor.u32 %v13253_v26, %v9809_v27  ;;  %v11847_v40 = vld [vmem:[#allocation15 + $0xee0] sm:$0xf]  ;;  %v13767_v41 = vld [vmem:[#allocation15 + $0xeec] sm:$0xf0]  ;;  %v13281_v62 = vld [vmem:[%s16572_s0 + $0x220] sm:$0xf0] }
  0x7e   :  { %4582 = vmatpush.bf16.msra.mxu3 %v11352_v21  ;;  %4524 = vmatpush.bf16.msra.mxu1 %v11096_v23  ;;  %v11591_v42 = vld [vmem:[#allocation15 + $0xce0] sm:$0xf]  ;;  %v11848_v43 = vor.u32 %v13767_v41, %v11847_v40  ;;  %v13703_v52 = vld [vmem:[#allocation15 + $0xcec] sm:$0xf0]  ;;  %v13272_v10 = vld [vmem:[%s16572_s0 + $0x1dc] sm:$0xf]  ;;  %v14588_v25 = vor.u32 %v13281_v62, %v9883_v61 }
  0x7f   :  { %16751 = vst [vmem:[#allocation50_spill] sm:$0xff] %v14552_v32  ;;  %v11975_v55 = vld [vmem:[#allocation15 + $0xfe0] sm:$0xf]  ;;  %v13799_v58 = vld [vmem:[#allocation15 + $0xfec] sm:$0xf0]  ;;  %v11592_v59 = vor.u32 %v13703_v52, %v11591_v42 }
  0x80   :  { %16752 = vst [vmem:[#allocation51_spill] sm:$0xff] %v14554_v33  ;;  %v11976_v60 = vor.u32 %v13799_v58, %v11975_v55  ;;  %v11719_v63 = vld [vmem:[#allocation15 + $0xde0] sm:$0xf]  ;;  %v13735_v4 = vld [vmem:[#allocation15 + $0xdec] sm:$0xf0] }
  0x81   :  { %4662 = vmatpush.bf16.msrb.mxu2 %v11848_v43  ;;  %4604 = vmatpush.bf16.msrb.mxu0 %v11592_v59  ;;  %v11831_v5 = vld [vmem:[#allocation15 + $0xec0] sm:$0xf]  ;;  %v11720_v6 = vor.u32 %v13735_v4, %v11719_v63  ;;  %v13763_v7 = vld [vmem:[#allocation15 + $0xecc] sm:$0xf0]  ;;  %v9885_v15 = vld [vmem:[%s16572_s0 + $0x224] sm:$0xf0] }
  0x82   :  { %4691 = vmatpush.bf16.msrb.mxu3 %v11976_v60  ;;  %v11575_v8 = vld [vmem:[#allocation15 + $0xcc0] sm:$0xf]  ;;  %v13699_v9 = vld [vmem:[#allocation15 + $0xccc] sm:$0xf0]  ;;  %v11832_v11 = vor.u32 %v13763_v7, %v11831_v5  ;;  %v13282_v21 = vld [vmem:[%s16572_s0 + $0x228] sm:$0xf0]  ;;  %v14590_v26 = vor.u32 %v13272_v10, %v9885_v15 }
  0x83   :  { %v11576_v12 = vor.u32 %v13699_v9, %v11575_v8  ;;  %v11959_v13 = vld [vmem:[#allocation15 + $0xfc0] sm:$0xf]  ;;  %v13795_v14 = vld [vmem:[#allocation15 + $0xfcc] sm:$0xf0]  ;;  %4633 = vmatpush.bf16.msrb.mxu1 %v11720_v6  ;;  %v13273_v23 = vld [vmem:[%s16572_s0 + $0x1e4] sm:$0xf] }
  0x84   :  { %v9891_v20 = vld [vmem:[%s16572_s0 + $0x1e0] sm:$0xf]  ;;  %v11960_v22 = vor.u32 %v13795_v14, %v11959_v13  ;;  %v9893_v24 = vld [vmem:[%s16572_s0 + $0x22c] sm:$0xf0]  ;;  %16755 = vst [vmem:[#allocation54_spill] sm:$0xff] %v14588_v25 }
  0x85   :  { %4663 = vmatpush.bf16.msrb.mxu2 %v11832_v11  ;;  %4605 = vmatpush.bf16.msrb.mxu0 %v11576_v12  ;;  %16756 = vst [vmem:[#allocation55_spill] sm:$0xff] %v14590_v26  ;;  %v14592_v27 = vor.u32 %v13282_v21, %v9891_v20  ;;  %v14594_v28 = vor.u32 %v13273_v23, %v9893_v24  ;;  %v11703_v29 = vld [vmem:[#allocation15 + $0xdc0] sm:$0xf]  ;;  %v13731_v30 = vld [vmem:[#allocation15 + $0xdcc] sm:$0xf0] }
  0x86   :  { %4692 = vmatpush.bf16.msrb.mxu3 %v11960_v22  ;;  %v11704_v31 = vor.u32 %v13731_v30, %v11703_v29  ;;  %v11815_v40 = vld [vmem:[#allocation15 + $0xea0] sm:$0xf]  ;;  %v13759_v41 = vld [vmem:[#allocation15 + $0xeac] sm:$0xf0]  ;;  %v13226_v62 = vld [vmem:[%s16572_s0 + $0x68] sm:$0xf0] }
  0x87   :  { %16757 = vst [vmem:[#allocation56_spill] sm:$0xff] %v14592_v27  ;;  %v11816_v42 = vor.u32 %v13759_v41, %v11815_v40  ;;  %v11559_v43 = vld [vmem:[#allocation15 + $0xca0] sm:$0xf]  ;;  %v13695_v52 = vld [vmem:[#allocation15 + $0xcac] sm:$0xf0] }
  0x88   :  { %16758 = vst [vmem:[#allocation57_spill] sm:$0xff] %v14594_v28  ;;  %4634 = vmatpush.bf16.msrb.mxu1 %v11704_v31  ;;  %v11943_v55 = vld [vmem:[#allocation15 + $0xfa0] sm:$0xf]  ;;  %v11560_v58 = vor.u32 %v13695_v52, %v11559_v43  ;;  %v13791_v59 = vld [vmem:[#allocation15 + $0xfac] sm:$0xf0] }
  0x89   :  { %4664 = vmatpush.bf16.msrb.mxu2 %v11816_v42  ;;  %v11944_v60 = vor.u32 %v13791_v59, %v11943_v55  ;;  %v9671_v61 = vld [vmem:[%s16572_s0 + $0x20] sm:$0xf]  ;;  %v13727_v4 = vld [vmem:[#allocation15 + $0xdac] sm:$0xf0]  ;;  %v13217_v10 = vld [vmem:[%s16572_s0 + $0x24] sm:$0xf] }
  0x8a   :  { %4606 = vmatpush.bf16.msrb.mxu0 %v11560_v58  ;;  %v11687_v63 = vld [vmem:[#allocation15 + $0xda0] sm:$0xf]  ;;  %v13755_v7 = vld [vmem:[#allocation15 + $0xe8c] sm:$0xf0]  ;;  %v9679_v20 = vld [vmem:[%s16572_s0 + $0x28] sm:$0xf]  ;;  %v14624_v29 = vor.u32 %v13226_v62, %v9671_v61 }
  0x8b   :  { %4385 = vmatmul.bf16.gmra.mxu0 %v14516_v45  ;;  %4414 = vmatmul.bf16.gmra.mxu1 %v14518_v46  ;;  %v11799_v5 = vld [vmem:[#allocation15 + $0xe80] sm:$0xf]  ;;  %v11688_v6 = vor.u32 %v13727_v4, %v11687_v63  ;;  %v13691_v9 = vld [vmem:[#allocation15 + $0xc8c] sm:$0xf0]  ;;  %v13227_v21 = vld [vmem:[%s16572_s0 + $0x70] sm:$0xf0] }
  0x8c   :  { %4443 = vmatmul.bf16.gmra.mxu2 %v14520_v47  ;;  %4693 = vmatpush.bf16.msrb.mxu3 %v11944_v60  ;;  %v11543_v8 = vld [vmem:[#allocation15 + $0xc80] sm:$0xf]  ;;  %v11800_v11 = vor.u32 %v13755_v7, %v11799_v5  ;;  %v13787_v14 = vld [vmem:[#allocation15 + $0xf8c] sm:$0xf0]  ;;  %v13218_v23 = vld [vmem:[%s16572_s0 + $0x2c] sm:$0xf]  ;;  %v14628_v40 = vor.u32 %v13227_v21, %v9679_v20 }
  0x8d   :  { %4472 = vmatmul.bf16.gmra.mxu3 %v14522_v49  ;;  %v11544_v12 = vor.u32 %v13691_v9, %v11543_v8  ;;  %v11927_v13 = vld [vmem:[#allocation15 + $0xf80] sm:$0xf]  ;;  %v9673_v15 = vld [vmem:[%s16572_s0 + $0x6c] sm:$0xf0]  ;;  %4635 = vmatpush.bf16.msrb.mxu1 %v11688_v6  ;;  %v9681_v24 = vld [vmem:[%s16572_s0 + $0x74] sm:$0xf0] }
  0x8e   :  { %v11928_v22 = vor.u32 %v13787_v14, %v11927_v13  ;;  %4665 = vmatpush.bf16.msrb.mxu2 %v11800_v11  ;;  %16759 = vst [vmem:[#allocation58_spill] sm:$0xff] %v14624_v29  ;;  %v14626_v31 = vor.u32 %v13217_v10, %v9673_v15  ;;  %v14630_v42 = vor.u32 %v13218_v23, %v9681_v24  ;;  %v11671_v52 = vld [vmem:[#allocation15 + $0xd80] sm:$0xf]  ;;  %v13723_v55 = vld [vmem:[#allocation15 + $0xd8c] sm:$0xf0] }
  0x8f   :  { %4607 = vmatpush.bf16.msrb.mxu0 %v11544_v12  ;;  %16761 = vst [vmem:[#allocation60_spill] sm:$0xff] %v14628_v40  ;;  %v11672_v58 = vor.u32 %v13723_v55, %v11671_v52  ;;  %v11783_v59 = vld [vmem:[#allocation15 + $0xe60] sm:$0xf]  ;;  %v13751_v60 = vld [vmem:[#allocation15 + $0xe6c] sm:$0xf0] }
  0x90   :  { %4694 = vmatpush.bf16.msrb.mxu3 %v11928_v22  ;;  %16760 = vst [vmem:[#allocation59_spill] sm:$0xff] %v14626_v31  ;;  %v11784_v61 = vor.u32 %v13751_v60, %v11783_v59  ;;  %v11527_v62 = vld [vmem:[#allocation15 + $0xc60] sm:$0xf]  ;;  %v13687_v63 = vld [vmem:[#allocation15 + $0xc6c] sm:$0xf0] }
  0x91   :  { %16762 = vst [vmem:[#allocation61_spill] sm:$0xff] %v14630_v42  ;;  %4636 = vmatpush.bf16.msrb.mxu1 %v11672_v58  ;;  %v11911_v4 = vld [vmem:[#allocation15 + $0xf60] sm:$0xf]  ;;  %v11528_v6 = vor.u32 %v13687_v63, %v11527_v62  ;;  %v13783_v7 = vld [vmem:[#allocation15 + $0xf6c] sm:$0xf0] }
  0x92   :  { %4666 = vmatpush.bf16.msrb.mxu2 %v11784_v61  ;;  %v11912_v11 = vor.u32 %v13783_v7, %v11911_v4  ;;  %v9747_v15 = vld [vmem:[%s16572_s0 + $0xb8] sm:$0xf]  ;;  %v13245_v20 = vld [vmem:[%s16572_s0 + $0x100] sm:$0xf0]  ;;  %v11655_v21 = vld [vmem:[#allocation15 + $0xd60] sm:$0xf] }
  0x93   :  { %4608 = vmatpush.bf16.msrb.mxu0 %v11528_v6  ;;  %v13719_v22 = vld [vmem:[#allocation15 + $0xd6c] sm:$0xf0]  ;;  %v11767_v23 = vld [vmem:[#allocation15 + $0xe40] sm:$0xf]  ;;  %v13236_v52 = vld [vmem:[%s16572_s0 + $0xbc] sm:$0xf] }
  0x94   :  { %4695 = vmatpush.bf16.msrb.mxu3 %v11912_v11  ;;  %v11656_v24 = vor.u32 %v13719_v22, %v11655_v21  ;;  %v11895_v59 = vld [vmem:[#allocation15 + $0xf40] sm:$0xf]  ;;  %v13779_v60 = vld [vmem:[#allocation15 + $0xf4c] sm:$0xf0]  ;;  %v9749_v61 = vld [vmem:[%s16572_s0 + $0x104] sm:$0xf0] }
  0x95   :  { %v9755_v62 = vld [vmem:[%s16572_s0 + $0xc0] sm:$0xf]  ;;  %v13246_v63 = vld [vmem:[%s16572_s0 + $0x108] sm:$0xf0]  ;;  %v11896_v4 = vor.u32 %v13779_v60, %v11895_v59  ;;  %v9757_v6 = vld [vmem:[%s16572_s0 + $0x10c] sm:$0xf0] }
  0x96   :  { %4637 = vmatpush.bf16.msrb.mxu1 %v11656_v24  ;;  %v14666_v21 = vor.u32 %v13246_v63, %v9755_v62  ;;  %v11879_v59 = vld [vmem:[#allocation15 + $0xf20] sm:$0xf]  ;;  %v13775_v62 = vld [vmem:[#allocation15 + $0xf2c] sm:$0xf0] }
  0x98   :  { %4696 = vmatpush.bf16.msrb.mxu3 %v11896_v4  ;;  %16765 = vst [vmem:[#allocation64_spill] sm:$0xff] %v14666_v21 }
  0x9b   :  { %4390 = vmatmul.bf16.gmra.mxu0 %v14552_v32  ;;  %4419 = vmatmul.bf16.gmra.mxu1 %v14554_v33 }
  0x9c   :  { %4448 = vmatmul.bf16.gmra.mxu2 %v14556_v34 }
  0x9d   :  { %4477 = vmatmul.bf16.gmra.mxu3 %v14558_v35 }
  0xab   :  { %4395 = vmatmul.bf16.gmra.mxu0 %v14588_v25  ;;  %4424 = vmatmul.bf16.gmra.mxu1 %v14590_v26 }
  0xac   :  { %4453 = vmatmul.bf16.gmra.mxu2 %v14592_v27 }
  0xad   :  { %4482 = vmatmul.bf16.gmra.mxu3 %v14594_v28 }
  0xb6   :  { %v4265_v30 = vpop.f32.mrf.mxu0  ;;  %v4294_v41 = vpop.f32.mrf.mxu1 }
  0xb7   :  { %v4295_v43 = vadd.f32 %v4294_v41, %v4265_v30  ;;  %v13747_v30 = vld [vmem:[#allocation15 + $0xe4c] sm:$0xf0]  ;;  %v11511_v41 = vld [vmem:[#allocation15 + $0xc40] sm:$0xf] }
  0xb8   :  { %v11768_v55 = vor.u32 %v13747_v30, %v11767_v23 }
  0xba   :  { %4667 = vmatpush.bf16.msrb.mxu2 %v11768_v55  ;;  %v11495_v55 = vld [vmem:[#allocation15 + $0xc20] sm:$0xf] }
  0xbb   :  { %4496 = vmatmul.bf16.vlgmr.msra.gmra.mxu0 %v14624_v29  ;;  %4525 = vmatmul.bf16.vlgmr.msra.gmra.mxu1 %v14626_v31  ;;  %v12215_v31 = vld [vmem:[#allocation15 + $0x11c0] sm:$0xf] }
  0xbc   :  { %4554 = vmatmul.bf16.vlgmr.msra.gmra.mxu2 %v14628_v40 }
  0xbd   :  { %4583 = vmatmul.bf16.vlgmr.msra.gmra.mxu3 %v14630_v42  ;;  %v4323_v5 = vpop.f32.mrf.mxu2 }
  0xbe   :  { %v4324_v8 = vadd.f32 %v4323_v5, %v4295_v43  ;;  %v4352_v9 = vpop.f32.mrf.mxu3  ;;  %v4267_v10 = vpop.f32.mrf.mxu0  ;;  %v13683_v43 = vld [vmem:[#allocation15 + $0xc4c] sm:$0xf0]  ;;  %v13237_v5 = vld [vmem:[%s16572_s0 + $0xc4] sm:$0xf] }
  0xbf   :  { %v4296_v12 = vpop.f32.mrf.mxu1  ;;  %v11512_v58 = vor.u32 %v13683_v43, %v11511_v41  ;;  %v14668_v23 = vor.u32 %v13237_v5, %v9757_v6  ;;  %v11639_v41 = vld [vmem:[#allocation15 + $0xd40] sm:$0xf]  ;;  %v13715_v43 = vld [vmem:[#allocation15 + $0xd4c] sm:$0xf0]  ;;  %v11880_v6 = vor.u32 %v13775_v62, %v11879_v59 }
  0xc0   :  { %v14636_v13 = vadd.f32 %v4352_v9, %v4324_v8  ;;  %v4297_v14 = vadd.f32 %v4296_v12, %v4267_v10  ;;  %v14662_v8 = vor.u32 %v13245_v20, %v9747_v15  ;;  %v14664_v12 = vor.u32 %v13236_v52, %v9749_v61  ;;  %v13743_v20 = vld [vmem:[#allocation15 + $0xe2c] sm:$0xf0]  ;;  %v9825_v62 = vld [vmem:[%s16572_s0 + $0x19c] sm:$0xf0] }
  0xc1   :  { %4609 = vmatpush.bf16.msrb.mxu0 %v11512_v58  ;;  %16766 = vst [vmem:[#allocation65_spill] sm:$0xff] %v14668_v23  ;;  %v11640_v15 = vor.u32 %v13715_v43, %v11639_v41  ;;  %v13679_v58 = vld [vmem:[#allocation15 + $0xc2c] sm:$0xf0]  ;;  %4697 = vmatpush.bf16.msrb.mxu3 %v11880_v6  ;;  %v11623_v41 = vld [vmem:[#allocation15 + $0xd20] sm:$0xf] }
  0xc2   :  { %16763 = vst [vmem:[#allocation62_spill] sm:$0xff] %v14662_v8  ;;  %v11496_v61 = vor.u32 %v13679_v58, %v11495_v55  ;;  %v11735_v43 = vld [vmem:[#allocation15 + $0xe00] sm:$0xf]  ;;  %v13255_v55 = vld [vmem:[%s16572_s0 + $0x154] sm:$0xf] }
  0xc3   :  { %16764 = vst [vmem:[#allocation63_spill] sm:$0xff] %v14664_v12  ;;  %4638 = vmatpush.bf16.msrb.mxu1 %v11640_v15  ;;  %v13256_v6 = vld [vmem:[%s16572_s0 + $0x15c] sm:$0xf] }
  0xc5   :  { %v4325_v7 = vpop.f32.mrf.mxu2  ;;  %4610 = vmatpush.bf16.msrb.mxu0 %v11496_v61  ;;  %v13771_v61 = vld [vmem:[#allocation15 + $0xf0c] sm:$0xf0] }
  0xc6   :  { %v4326_v9 = vadd.f32 %v4325_v7, %v4297_v14  ;;  %v4354_v10 = vpop.f32.mrf.mxu3  ;;  %v4270_v11 = vpop.f32.mrf.mxu0  ;;  %v11751_v14 = vld [vmem:[#allocation15 + $0xe20] sm:$0xf] }
  0xc7   :  { %v4299_v22 = vpop.f32.mrf.mxu1  ;;  %v11752_v52 = vor.u32 %v13743_v20, %v11751_v14  ;;  %v13739_v14 = vld [vmem:[#allocation15 + $0xe0c] sm:$0xf0]  ;;  %v11479_v20 = vld [vmem:[#allocation15 + $0xc00] sm:$0xf] }
  0xc8   :  { %v14670_v24 = vadd.f32 %v4354_v10, %v4326_v9  ;;  %v4300_v30 = vadd.f32 %v4299_v22, %v4270_v11  ;;  %v9823_v11 = vld [vmem:[%s16572_s0 + $0x150] sm:$0xf]  ;;  %v13264_v22 = vld [vmem:[%s16572_s0 + $0x198] sm:$0xf0]  ;;  %v11736_v58 = vor.u32 %v13739_v14, %v11735_v43  ;;  %v11607_v43 = vld [vmem:[#allocation15 + $0xd00] sm:$0xf] }
  0xc9   :  { %4668 = vmatpush.bf16.msrb.mxu2 %v11752_v52  ;;  %v13675_v52 = vld [vmem:[#allocation15 + $0xc0c] sm:$0xf0] }
  0xca   :  { %v11480_v59 = vor.u32 %v13675_v52, %v11479_v20  ;;  %v13707_v14 = vld [vmem:[#allocation15 + $0xd0c] sm:$0xf0] }
  0xcb   :  { %4501 = vmatmul.bf16.gmra.mxu0 %v14662_v8  ;;  %4530 = vmatmul.bf16.gmra.mxu1 %v14664_v12 }
  0xcc   :  { %4559 = vmatmul.bf16.gmra.mxu2 %v14666_v21  ;;  %4611 = vmatpush.bf16.msrb.mxu0 %v11480_v59  ;;  %v13831_v59 = vld [vmem:[#allocation15 + $0x10ec] sm:$0xf0] }
  0xcd   :  { %4588 = vmatmul.bf16.gmra.mxu3 %v14668_v23  ;;  %4669 = vmatpush.bf16.msrb.mxu2 %v11736_v58  ;;  %v11608_v23 = vor.u32 %v13707_v14, %v11607_v43 }
  0xce   :  { %v4272_v5 = vpop.f32.mrf.mxu0 }
  0xcf   :  { %v4328_v60 = vpop.f32.mrf.mxu2  ;;  %v4301_v7 = vpop.f32.mrf.mxu1 }
  0xd0   :  { %v4329_v63 = vadd.f32 %v4328_v60, %v4300_v30  ;;  %v4357_v4 = vpop.f32.mrf.mxu3  ;;  %v4302_v10 = vadd.f32 %v4301_v7, %v4272_v5  ;;  %v13711_v30 = vld [vmem:[#allocation15 + $0xd2c] sm:$0xf0]  ;;  %v11863_v60 = vld [vmem:[#allocation15 + $0xf00] sm:$0xf]  ;;  %v9833_v7 = vld [vmem:[%s16572_s0 + $0x1a4] sm:$0xf0] }
  0xd1   :  { %v11624_v15 = vor.u32 %v13711_v30, %v11623_v41  ;;  %v11864_v5 = vor.u32 %v13771_v61, %v11863_v60  ;;  %v14702_v30 = vor.u32 %v13264_v22, %v9823_v11  ;;  %v14704_v60 = vor.u32 %v13255_v55, %v9825_v62  ;;  %v13895_v11 = vld [vmem:[#allocation15 + $0x12ec] sm:$0xf0]  ;;  %v12103_v22 = vld [vmem:[#allocation15 + $0x10e0] sm:$0xf]  ;;  %v13317_v62 = vld [vmem:[#allocation15 + $0xe4] sm:$0xf] }
  0xd2   :  { %v14676_v9 = vadd.f32 %v4357_v4, %v4329_v63  ;;  %v9831_v63 = vld [vmem:[%s16572_s0 + $0x158] sm:$0xf]  ;;  %v13265_v4 = vld [vmem:[%s16572_s0 + $0x1a0] sm:$0xf0]  ;;  %v14708_v12 = vor.u32 %v13256_v6, %v9833_v7 }
  0xd3   :  { %4639 = vmatpush.bf16.msrb.mxu1 %v11624_v15  ;;  %16767 = vst [vmem:[#allocation66_spill] sm:$0xff] %v14702_v30  ;;  %4698 = vmatpush.bf16.msrb.mxu3 %v11864_v5  ;;  %v14706_v61 = vor.u32 %v13265_v4, %v9831_v63  ;;  %v10057_v63 = vld [vmem:[#allocation15 + $0xf0] sm:$0xf0]  ;;  %v12104_v5 = vor.u32 %v13831_v59, %v12103_v22  ;;  %v12343_v22 = vld [vmem:[#allocation15 + $0x12c0] sm:$0xf] }
  0xd4   :  { %16768 = vst [vmem:[#allocation67_spill] sm:$0xff] %v14704_v60  ;;  %v10060_v6 = vor.u32 %v13317_v62, %v10057_v63  ;;  %v12087_v59 = vld [vmem:[#allocation15 + $0x10c0] sm:$0xf]  ;;  %v13827_v63 = vld [vmem:[#allocation15 + $0x10cc] sm:$0xf0] }
  0xd5   :  { %16769 = vst [vmem:[#allocation68_spill] sm:$0xff] %v14706_v61  ;;  %4720 = vmatpush.bf16.msra.mxu0 %v12104_v5  ;;  %v10041_v5 = vld [vmem:[#allocation15 + $0xd0] sm:$0xf0] }
  0xd6   :  { %16770 = vst [vmem:[#allocation69_spill] sm:$0xff] %v14708_v12 }
  0xd7   :  { %v4330_v41 = vpop.f32.mrf.mxu2  ;;  %4640 = vmatpush.bf16.msrb.mxu1 %v11608_v23  ;;  %4807 = vmatpush.bf16.msra.mxu3 %v10060_v6  ;;  %v9901_v6 = vld [vmem:[%s16572_s0 + $0x234] sm:$0xf0] }
  0xd8   :  { %v4331_v20 = vadd.f32 %v4330_v41, %v4302_v10  ;;  %v4359_v52 = vpop.f32.mrf.mxu3  ;;  %v4275_v15 = vpop.f32.mrf.mxu0  ;;  %v12359_v10 = vld [vmem:[#allocation15 + $0x12e0] sm:$0xf] }
  0xd9   :  { %v4304_v21 = vpop.f32.mrf.mxu1  ;;  %v12360_v55 = vor.u32 %v13895_v11, %v12359_v10  ;;  %v13863_v10 = vld [vmem:[#allocation15 + $0x11ec] sm:$0xf0] }
  0xda   :  { %v14710_v42 = vadd.f32 %v4359_v52, %v4331_v20  ;;  %v4305_v58 = vadd.f32 %v4304_v21, %v4275_v15  ;;  %v9899_v20 = vld [vmem:[%s16572_s0 + $0x1e8] sm:$0xf]  ;;  %v13283_v52 = vld [vmem:[%s16572_s0 + $0x230] sm:$0xf0]  ;;  %v12231_v15 = vld [vmem:[#allocation15 + $0x11e0] sm:$0xf] }
  0xdb   :  { %4506 = vmatmul.bf16.gmra.mxu0 %v14702_v30  ;;  %4535 = vmatmul.bf16.gmra.mxu1 %v14704_v60  ;;  %v12232_v11 = vor.u32 %v13863_v10, %v12231_v15  ;;  %v13275_v15 = vld [vmem:[%s16572_s0 + $0x1f4] sm:$0xf]  ;;  %v9909_v10 = vld [vmem:[%s16572_s0 + $0x23c] sm:$0xf0] }
  0xdc   :  { %4564 = vmatmul.bf16.gmra.mxu2 %v14706_v61 }
  0xdd   :  { %4593 = vmatmul.bf16.gmra.mxu3 %v14708_v12  ;;  %4778 = vmatpush.bf16.msra.mxu2 %v12360_v55  ;;  %v13891_v55 = vld [vmem:[#allocation15 + $0x12cc] sm:$0xf0] }
  0xde   :  { %v12344_v62 = vor.u32 %v13891_v55, %v12343_v22  ;;  %4749 = vmatpush.bf16.msra.mxu1 %v12232_v11  ;;  %v14742_v55 = vor.u32 %v13283_v52, %v9899_v20  ;;  %v13887_v52 = vld [vmem:[#allocation15 + $0x12ac] sm:$0xf0] }
  0xdf   :  { %v4333_v4 = vpop.f32.mrf.mxu2 }
  0xe0   :  { %v4334_v21 = vadd.f32 %v4333_v4, %v4305_v58  ;;  %v4362_v23 = vpop.f32.mrf.mxu3  ;;  %v4277_v7 = vpop.f32.mrf.mxu0  ;;  %v13274_v58 = vld [vmem:[%s16572_s0 + $0x1ec] sm:$0xf]  ;;  %v13313_v4 = vld [vmem:[#allocation15 + $0xc4] sm:$0xf]  ;;  %16771 = vst [vmem:[#allocation70_spill] sm:$0xff] %v14742_v55 }
  0xe1   :  { %v4306_v41 = vpop.f32.mrf.mxu1  ;;  %4779 = vmatpush.bf16.msra.mxu2 %v12344_v62  ;;  %v14744_v11 = vor.u32 %v13274_v58, %v9901_v6  ;;  %v13859_v62 = vld [vmem:[#allocation15 + $0x11cc] sm:$0xf0]  ;;  %v12071_v6 = vld [vmem:[#allocation15 + $0x10a0] sm:$0xf] }
  0xe2   :  { %v14716_v43 = vadd.f32 %v4362_v23, %v4334_v21  ;;  %v4307_v14 = vadd.f32 %v4306_v41, %v4277_v7  ;;  %v9907_v21 = vld [vmem:[%s16572_s0 + $0x1f0] sm:$0xf]  ;;  %v13284_v23 = vld [vmem:[%s16572_s0 + $0x238] sm:$0xf0]  ;;  %v12088_v7 = vor.u32 %v13827_v63, %v12087_v59  ;;  %v10044_v41 = vor.u32 %v13313_v4, %v10041_v5 }
  0xe3   :  { %16772 = vst [vmem:[#allocation71_spill] sm:$0xff] %v14744_v11  ;;  %v14746_v59 = vor.u32 %v13284_v23, %v9907_v21  ;;  %v14748_v4 = vor.u32 %v13275_v15, %v9909_v10  ;;  %v12216_v20 = vor.u32 %v13859_v62, %v12215_v31  ;;  %v13823_v21 = vld [vmem:[#allocation15 + $0x10ac] sm:$0xf0]  ;;  %v10025_v23 = vld [vmem:[#allocation15 + $0xb0] sm:$0xf0] }
  0xe4   :  { %4721 = vmatpush.bf16.msra.mxu0 %v12088_v7  ;;  %4808 = vmatpush.bf16.msra.mxu3 %v10044_v41  ;;  %v13228_v62 = vld [vmem:[%s16572_s0 + $0x78] sm:$0xf0] }
  0xe5   :  { %16773 = vst [vmem:[#allocation72_spill] sm:$0xff] %v14746_v59  ;;  %4750 = vmatpush.bf16.msra.mxu1 %v12216_v20  ;;  %v12199_v20 = vld [vmem:[#allocation15 + $0x11a0] sm:$0xf] }
  0xe6   :  { %16774 = vst [vmem:[#allocation73_spill] sm:$0xff] %v14748_v4 }
  0xe7   :  { %v4335_v22 = vpop.f32.mrf.mxu2 }
  0xe8   :  { %v4336_v12 = vadd.f32 %v4335_v22, %v4307_v14  ;;  %v4364_v61 = vpop.f32.mrf.mxu3  ;;  %v4280_v60 = vpop.f32.mrf.mxu0  ;;  %v12327_v14 = vld [vmem:[#allocation15 + $0x12a0] sm:$0xf] }
  0xe9   :  { %v4309_v63 = vpop.f32.mrf.mxu1  ;;  %v12328_v58 = vor.u32 %v13887_v52, %v12327_v14  ;;  %v13855_v14 = vld [vmem:[#allocation15 + $0x11ac] sm:$0xf0] }
  0xea   :  { %v14750_v5 = vadd.f32 %v4364_v61, %v4336_v12  ;;  %v4310_v40 = vadd.f32 %v4309_v63, %v4280_v60  ;;  %v13309_v12 = vld [vmem:[#allocation15 + $0xa4] sm:$0xf]  ;;  %v12072_v60 = vor.u32 %v13823_v21, %v12071_v6  ;;  %v9687_v63 = vld [vmem:[%s16572_s0 + $0x30] sm:$0xf]  ;;  %v12200_v52 = vor.u32 %v13855_v14, %v12199_v20  ;;  %v12055_v21 = vld [vmem:[#allocation15 + $0x1080] sm:$0xf] }
  0xeb   :  { %4511 = vmatmul.bf16.gmra.mxu0 %v14742_v55  ;;  %4540 = vmatmul.bf16.gmra.mxu1 %v14744_v11  ;;  %v10028_v31 = vor.u32 %v13309_v12, %v10025_v23  ;;  %v13883_v6 = vld [vmem:[#allocation15 + $0x128c] sm:$0xf0]  ;;  %v10009_v23 = vld [vmem:[#allocation15 + $0x90] sm:$0xf0]  ;;  %v13220_v20 = vld [vmem:[%s16572_s0 + $0x3c] sm:$0xf] }
  0xec   :  { %4569 = vmatmul.bf16.gmra.mxu2 %v14746_v59  ;;  %4722 = vmatpush.bf16.msra.mxu0 %v12072_v60  ;;  %v13305_v60 = vld [vmem:[#allocation15 + $0x84] sm:$0xf]  ;;  %v9697_v14 = vld [vmem:[%s16572_s0 + $0x84] sm:$0xf0]  ;;  %v13851_v55 = vld [vmem:[#allocation15 + $0x118c] sm:$0xf0] }
  0xed   :  { %4598 = vmatmul.bf16.gmra.mxu3 %v14748_v4  ;;  %4780 = vmatpush.bf16.msra.mxu2 %v12328_v58  ;;  %v12311_v58 = vld [vmem:[#allocation15 + $0x1280] sm:$0xf] }
  0xee   :  { %4809 = vmatpush.bf16.msra.mxu3 %v10028_v31  ;;  %v12312_v12 = vor.u32 %v13883_v6, %v12311_v58  ;;  %4751 = vmatpush.bf16.msra.mxu1 %v12200_v52  ;;  %v14782_v6 = vor.u32 %v13228_v62, %v9687_v63  ;;  %v13879_v62 = vld [vmem:[#allocation15 + $0x126c] sm:$0xf0] }
  0xef   :  { %v4338_v61 = vpop.f32.mrf.mxu2 }
  0xf0   :  { %v4339_v7 = vadd.f32 %v4338_v61, %v4310_v40  ;;  %v4367_v41 = vpop.f32.mrf.mxu3  ;;  %v4282_v15 = vpop.f32.mrf.mxu0  ;;  %v13219_v40 = vld [vmem:[%s16572_s0 + $0x34] sm:$0xf]  ;;  %v13819_v61 = vld [vmem:[#allocation15 + $0x108c] sm:$0xf0]  ;;  %16775 = vst [vmem:[#allocation74_spill] sm:$0xff] %v14782_v6 }
  0xf1   :  { %v4311_v10 = vpop.f32.mrf.mxu1  ;;  %v13229_v15 = vld [vmem:[%s16572_s0 + $0x80] sm:$0xf0]  ;;  %v12056_v31 = vor.u32 %v13819_v61, %v12055_v21  ;;  %4781 = vmatpush.bf16.msra.mxu2 %v12312_v12 }
  0xf2   :  { %v14756_v22 = vadd.f32 %v4367_v41, %v4339_v7  ;;  %v9689_v7 = vld [vmem:[%s16572_s0 + $0x7c] sm:$0xf0]  ;;  %v9695_v41 = vld [vmem:[%s16572_s0 + $0x38] sm:$0xf]  ;;  %v10012_v10 = vor.u32 %v13305_v60, %v10009_v23  ;;  %v14789_v60 = vor.u32 %v13220_v20, %v9697_v14  ;;  %v13301_v12 = vld [vmem:[#allocation15 + $0x64] sm:$0xf] }
  0xf3   :  { %4723 = vmatpush.bf16.msra.mxu0 %v12056_v31  ;;  %v14784_v11 = vor.u32 %v13219_v40, %v9689_v7  ;;  %v14786_v52 = vor.u32 %v13229_v15, %v9695_v41  ;;  %v12183_v23 = vld [vmem:[#allocation15 + $0x1180] sm:$0xf]  ;;  %v9993_v15 = vld [vmem:[#allocation15 + $0x70] sm:$0xf0] }
  0xf4   :  { %4810 = vmatpush.bf16.msra.mxu3 %v10012_v10  ;;  %16778 = vst [vmem:[#allocation77_spill] sm:$0xff] %v14789_v60  ;;  %v12184_v63 = vor.u32 %v13851_v55, %v12183_v23  ;;  %v9996_v55 = vor.u32 %v13301_v12, %v9993_v15  ;;  %v13247_v23 = vld [vmem:[%s16572_s0 + $0x110] sm:$0xf0] }
  0xf5   :  { %16776 = vst [vmem:[#allocation75_spill] sm:$0xff] %v14784_v11  ;;  %v9977_v15 = vld [vmem:[#allocation15 + $0x50] sm:$0xf0] }
  0xf6   :  { %16777 = vst [vmem:[#allocation76_spill] sm:$0xff] %v14786_v52  ;;  %4752 = vmatpush.bf16.msra.mxu1 %v12184_v63  ;;  %v13847_v63 = vld [vmem:[#allocation15 + $0x116c] sm:$0xf0] }
  0xf7   :  { %v4340_v58 = vpop.f32.mrf.mxu2 }
  0xf8   :  { %v4369_v4 = vpop.f32.mrf.mxu3  ;;  %v4381_v59 = vpop.f32.mrf.mxu0  ;;  %4811 = vmatpush.bf16.msra.mxu3 %v9996_v55 }
  0xf9   :  { %v4382_v21 = vadd.f32 %v4381_v59, %v14636_v13  ;;  %v4410_v61 = vpop.f32.mrf.mxu1  ;;  %v12295_v4 = vld [vmem:[#allocation15 + $0x1260] sm:$0xf]  ;;  %v13815_v59 = vld [vmem:[#allocation15 + $0x106c] sm:$0xf0] }
  0xfa   :  { %v12296_v40 = vor.u32 %v13879_v62, %v12295_v4  ;;  %v12039_v13 = vld [vmem:[#allocation15 + $0x1060] sm:$0xf] }
  0xfb   :  { %v4411_v28 = vadd.f32 %v4410_v61, %v4382_v21  ;;  %4612 = vmatmul.bf16.vlgmr.msrb.gmra.mxu0 %v14782_v6  ;;  %4641 = vmatmul.bf16.vlgmr.msrb.gmra.mxu1 %v14784_v11  ;;  %v12040_v41 = vor.u32 %v13815_v59, %v12039_v13  ;;  %v9763_v61 = vld [vmem:[%s16572_s0 + $0xc8] sm:$0xf]  ;;  %v13875_v13 = vld [vmem:[#allocation15 + $0x124c] sm:$0xf0]  ;;  %v12023_v59 = vld [vmem:[#allocation15 + $0x1040] sm:$0xf] }
  0xfc   :  { %4670 = vmatmul.bf16.vlgmr.msrb.gmra.mxu2 %v14786_v52  ;;  %v13843_v6 = vld [vmem:[#allocation15 + $0x114c] sm:$0xf0] }
  0xfd   :  { %4699 = vmatmul.bf16.vlgmr.msrb.gmra.mxu3 %v14789_v60  ;;  %4782 = vmatpush.bf16.msra.mxu2 %v12296_v40  ;;  %v12279_v40 = vld [vmem:[#allocation15 + $0x1240] sm:$0xf] }
  0xfe   :  { %4724 = vmatpush.bf16.msra.mxu0 %v12040_v41  ;;  %v12280_v12 = vor.u32 %v13875_v13, %v12279_v40  ;;  %v13297_v41 = vld [vmem:[#allocation15 + $0x44] sm:$0xf]  ;;  %v14822_v40 = vor.u32 %v13247_v23, %v9763_v61 }
  0xff   :  { %v4439_v7 = vpop.f32.mrf.mxu2 }
 0x100   :  { %v4440_v31 = vadd.f32 %v4439_v7, %v4411_v28  ;;  %v4468_v10 = vpop.f32.mrf.mxu3  ;;  %v4383_v20 = vpop.f32.mrf.mxu0  ;;  %v12167_v28 = vld [vmem:[#allocation15 + $0x1160] sm:$0xf]  ;;  %v13811_v7 = vld [vmem:[#allocation15 + $0x104c] sm:$0xf0]  ;;  %16779 = vst [vmem:[#allocation78_spill] sm:$0xff] %v14822_v40 }
 0x101   :  { %v4384_v14 = vadd.f32 %v4383_v20, %v14670_v24  ;;  %v4412_v58 = vpop.f32.mrf.mxu1  ;;  %v13238_v24 = vld [vmem:[%s16572_s0 + $0xcc] sm:$0xf]  ;;  %v12168_v62 = vor.u32 %v13847_v63, %v12167_v28  ;;  %v13248_v20 = vld [vmem:[%s16572_s0 + $0x118] sm:$0xf0]  ;;  %v12024_v55 = vor.u32 %v13811_v7, %v12023_v59  ;;  %v9773_v28 = vld [vmem:[%s16572_s0 + $0x11c] sm:$0xf0]  ;;  %4783 = vmatpush.bf16.msra.mxu2 %v12280_v12 }
 0x102   :  { %v14796_v21 = vadd.f32 %v4468_v10, %v4440_v31  ;;  %v9765_v31 = vld [vmem:[%s16572_s0 + $0x114] sm:$0xf0]  ;;  %v9771_v10 = vld [vmem:[%s16572_s0 + $0xd0] sm:$0xf]  ;;  %v12151_v12 = vld [vmem:[#allocation15 + $0x1140] sm:$0xf] }
 0x103   :  { %v4413_v4 = vadd.f32 %v4412_v58, %v4384_v14  ;;  %4753 = vmatpush.bf16.msra.mxu1 %v12168_v62  ;;  %v9980_v14 = vor.u32 %v13297_v41, %v9977_v15  ;;  %v13239_v58 = vld [vmem:[%s16572_s0 + $0xd4] sm:$0xf]  ;;  %4725 = vmatpush.bf16.msra.mxu0 %v12024_v55  ;;  %v14824_v62 = vor.u32 %v13238_v24, %v9765_v31  ;;  %v12007_v24 = vld [vmem:[#allocation15 + $0x1020] sm:$0xf]  ;;  %v13807_v31 = vld [vmem:[#allocation15 + $0x102c] sm:$0xf0] }
 0x104   :  { %v14826_v59 = vor.u32 %v13248_v20, %v9771_v10  ;;  %v14829_v15 = vor.u32 %v13239_v58, %v9773_v28  ;;  %v12152_v23 = vor.u32 %v13843_v6, %v12151_v12  ;;  %v12008_v20 = vor.u32 %v13807_v31, %v12007_v24  ;;  %v9961_v55 = vld [vmem:[#allocation15 + $0x30] sm:$0xf0]  ;;  %v13266_v12 = vld [vmem:[%s16572_s0 + $0x1a8] sm:$0xf0]  ;;  %v13867_v24 = vld [vmem:[#allocation15 + $0x120c] sm:$0xf0] }
 0x105   :  { %4812 = vmatpush.bf16.msra.mxu3 %v9980_v14  ;;  %16780 = vst [vmem:[#allocation79_spill] sm:$0xff] %v14824_v62  ;;  %v13803_v31 = vld [vmem:[#allocation15 + $0x100c] sm:$0xf0] }
 0x106   :  { %16781 = vst [vmem:[#allocation80_spill] sm:$0xff] %v14826_v59 }
 0x107   :  { %v4441_v63 = vpop.f32.mrf.mxu2  ;;  %16782 = vst [vmem:[#allocation81_spill] sm:$0xff] %v14829_v15  ;;  %4754 = vmatpush.bf16.msra.mxu1 %v12152_v23  ;;  %4726 = vmatpush.bf16.msra.mxu0 %v12008_v20  ;;  %v13839_v23 = vld [vmem:[#allocation15 + $0x112c] sm:$0xf0] }
 0x108   :  { %v4442_v13 = vadd.f32 %v4441_v63, %v4413_v4  ;;  %v4470_v60 = vpop.f32.mrf.mxu3  ;;  %v4386_v52 = vpop.f32.mrf.mxu0  ;;  %v12263_v4 = vld [vmem:[#allocation15 + $0x1220] sm:$0xf] }
 0x109   :  { %v4387_v7 = vadd.f32 %v4386_v52, %v14676_v9  ;;  %v4415_v41 = vpop.f32.mrf.mxu1  ;;  %v13871_v9 = vld [vmem:[#allocation15 + $0x122c] sm:$0xf0] }
 0x10a   :  { %v14831_v11 = vadd.f32 %v4470_v60, %v4442_v13  ;;  %v12264_v52 = vor.u32 %v13871_v9, %v12263_v4  ;;  %v13293_v60 = vld [vmem:[#allocation15 + $0x24] sm:$0xf]  ;;  %v12247_v4 = vld [vmem:[#allocation15 + $0x1200] sm:$0xf] }
 0x10b   :  { %v4416_v61 = vadd.f32 %v4415_v41, %v4387_v7  ;;  %4617 = vmatmul.bf16.gmra.mxu0 %v14822_v40  ;;  %4646 = vmatmul.bf16.gmra.mxu1 %v14824_v62  ;;  %v9964_v6 = vor.u32 %v13293_v60, %v9961_v55  ;;  %v9839_v41 = vld [vmem:[%s16572_s0 + $0x160] sm:$0xf]  ;;  %v13257_v60 = vld [vmem:[%s16572_s0 + $0x164] sm:$0xf] }
 0x10c   :  { %4675 = vmatmul.bf16.gmra.mxu2 %v14826_v59  ;;  %v13289_v55 = vld [vmem:[#allocation15 + $0x4] sm:$0xf] }
 0x10d   :  { %4704 = vmatmul.bf16.gmra.mxu3 %v14829_v15  ;;  %4784 = vmatpush.bf16.msra.mxu2 %v12264_v52 }
 0x10e   :  { %4813 = vmatpush.bf16.msra.mxu3 %v9964_v6  ;;  %v13267_v6 = vld [vmem:[%s16572_s0 + $0x1b0] sm:$0xf0] }
 0x10f   :  { %v4444_v10 = vpop.f32.mrf.mxu2 }
 0x110   :  { %v4445_v14 = vadd.f32 %v4444_v10, %v4416_v61  ;;  %v4473_v58 = vpop.f32.mrf.mxu3  ;;  %v4388_v28 = vpop.f32.mrf.mxu0  ;;  %v12135_v61 = vld [vmem:[#allocation15 + $0x1120] sm:$0xf]  ;;  %v12248_v10 = vor.u32 %v13867_v24, %v12247_v4  ;;  %v14864_v4 = vor.u32 %v13266_v12, %v9839_v41  ;;  %v13413_v12 = vld [vmem:[#allocation15 + $0x3e4] sm:$0xf] }
 0x111   :  { %v4389_v63 = vadd.f32 %v4388_v28, %v14710_v42  ;;  %v4417_v13 = vpop.f32.mrf.mxu1  ;;  %v12136_v52 = vor.u32 %v13839_v23, %v12135_v61  ;;  %v11991_v42 = vld [vmem:[#allocation15 + $0x1000] sm:$0xf]  ;;  %v9847_v28 = vld [vmem:[%s16572_s0 + $0x168] sm:$0xf]  ;;  %v9849_v61 = vld [vmem:[%s16572_s0 + $0x1b4] sm:$0xf0] }
 0x112   :  { %v14838_v7 = vadd.f32 %v4473_v58, %v4445_v14  ;;  %v11992_v20 = vor.u32 %v13803_v31, %v11991_v42  ;;  %v9945_v14 = vld [vmem:[#allocation15 + $0x10] sm:$0xf0]  ;;  %v9841_v58 = vld [vmem:[%s16572_s0 + $0x1ac] sm:$0xf0]  ;;  %4785 = vmatpush.bf16.msra.mxu2 %v12248_v10  ;;  %16783 = vst [vmem:[#allocation82_spill] sm:$0xff] %v14864_v4 }
 0x113   :  { %v4418_v9 = vadd.f32 %v4417_v13, %v4389_v63  ;;  %4755 = vmatpush.bf16.msra.mxu1 %v12136_v52  ;;  %v9948_v63 = vor.u32 %v13289_v55, %v9945_v14  ;;  %v13258_v13 = vld [vmem:[%s16572_s0 + $0x16c] sm:$0xf]  ;;  %v12119_v24 = vld [vmem:[#allocation15 + $0x1100] sm:$0xf]  ;;  %v13835_v42 = vld [vmem:[#allocation15 + $0x110c] sm:$0xf0]  ;;  %v14866_v55 = vor.u32 %v13257_v60, %v9841_v58  ;;  %v14868_v14 = vor.u32 %v13267_v6, %v9847_v28 }
 0x114   :  { %4727 = vmatpush.bf16.msra.mxu0 %v11992_v20  ;;  %v12120_v59 = vor.u32 %v13835_v42, %v12119_v24  ;;  %v14871_v27 = vor.u32 %v13258_v13, %v9849_v61  ;;  %v13349_v60 = vld [vmem:[#allocation15 + $0x1e4] sm:$0xf]  ;;  %v10569_v28 = vld [vmem:[#allocation15 + $0x4f0] sm:$0xf0]  ;;  %v9915_v24 = vld [vmem:[%s16572_s0 + $0x1f8] sm:$0xf] }
 0x115   :  { %4814 = vmatpush.bf16.msra.mxu3 %v9948_v63  ;;  %16784 = vst [vmem:[#allocation83_spill] sm:$0xff] %v14866_v55  ;;  %v13445_v58 = vld [vmem:[#allocation15 + $0x4e4] sm:$0xf] }
 0x116   :  { %16785 = vst [vmem:[#allocation84_spill] sm:$0xff] %v14868_v14  ;;  %v10572_v63 = vor.u32 %v13445_v58, %v10569_v28  ;;  %v13285_v42 = vld [vmem:[%s16572_s0 + $0x240] sm:$0xf0]  ;;  %v10169_v58 = vld [vmem:[#allocation15 + $0x1d0] sm:$0xf0] }
 0x117   :  { %v4446_v23 = vpop.f32.mrf.mxu2  ;;  %16786 = vst [vmem:[#allocation85_spill] sm:$0xff] %v14871_v27  ;;  %4756 = vmatpush.bf16.msra.mxu1 %v12120_v59  ;;  %v13441_v28 = vld [vmem:[#allocation15 + $0x4c4] sm:$0xf] }
 0x118   :  { %v4447_v31 = vadd.f32 %v4446_v23, %v4418_v9  ;;  %v4475_v15 = vpop.f32.mrf.mxu3  ;;  %v4391_v52 = vpop.f32.mrf.mxu0  ;;  %v10441_v9 = vld [vmem:[#allocation15 + $0x3f0] sm:$0xf0] }
 0x119   :  { %v4392_v62 = vadd.f32 %v4391_v52, %v14716_v43  ;;  %v4420_v40 = vpop.f32.mrf.mxu1  ;;  %v10444_v20 = vor.u32 %v13413_v12, %v10441_v9  ;;  %v10185_v43 = vld [vmem:[#allocation15 + $0x1f0] sm:$0xf0]  ;;  %4923 = vmatpush.bf16.msrb.mxu3 %v10572_v63  ;;  %v13409_v9 = vld [vmem:[#allocation15 + $0x3c4] sm:$0xf]  ;;  %v9923_v63 = vld [vmem:[%s16572_s0 + $0x200] sm:$0xf] }
 0x11a   :  { %v14873_v10 = vadd.f32 %v4475_v15, %v4447_v31  ;;  %v10188_v15 = vor.u32 %v13349_v60, %v10185_v43  ;;  %v13381_v31 = vld [vmem:[#allocation15 + $0x2e4] sm:$0xf]  ;;  %v10313_v52 = vld [vmem:[#allocation15 + $0x2f0] sm:$0xf0] }
 0x11b   :  { %v4421_v41 = vadd.f32 %v4420_v40, %v4392_v62  ;;  %4622 = vmatmul.bf16.gmra.mxu0 %v14864_v4  ;;  %4651 = vmatmul.bf16.gmra.mxu1 %v14866_v55  ;;  %v10316_v12 = vor.u32 %v13381_v31, %v10313_v52  ;;  %v10425_v60 = vld [vmem:[#allocation15 + $0x3d0] sm:$0xf0]  ;;  %v14906_v52 = vor.u32 %v13285_v42, %v9915_v24 }
 0x11c   :  { %4680 = vmatmul.bf16.gmra.mxu2 %v14868_v14  ;;  %4836 = vmatpush.bf16.msrb.mxu0 %v10188_v15  ;;  %v10428_v43 = vor.u32 %v13409_v9, %v10425_v60  ;;  %v9917_v15 = vld [vmem:[%s16572_s0 + $0x244] sm:$0xf0]  ;;  %v10297_v55 = vld [vmem:[#allocation15 + $0x2d0] sm:$0xf0] }
 0x11d   :  { %4709 = vmatmul.bf16.gmra.mxu3 %v14871_v27  ;;  %4894 = vmatpush.bf16.msrb.mxu2 %v10444_v20  ;;  %v13345_v20 = vld [vmem:[#allocation15 + $0x1c4] sm:$0xf]  ;;  %16787 = vst [vmem:[#allocation86_spill] sm:$0xff] %v14906_v52  ;;  %v10265_v4 = vld [vmem:[#allocation15 + $0x290] sm:$0xf0] }
 0x11e   :  { %4865 = vmatpush.bf16.msrb.mxu1 %v10316_v12 }
 0x11f   :  { %v4449_v6 = vpop.f32.mrf.mxu2 }
 0x120   :  { %v4450_v59 = vadd.f32 %v4449_v6, %v4421_v41  ;;  %v4478_v40 = vpop.f32.mrf.mxu3  ;;  %v4393_v62 = vpop.f32.mrf.mxu0  ;;  %v10553_v6 = vld [vmem:[#allocation15 + $0x4d0] sm:$0xf0] }
 0x121   :  { %v4394_v13 = vadd.f32 %v4393_v62, %v14750_v5  ;;  %v4422_v61 = vpop.f32.mrf.mxu1  ;;  %v13276_v5 = vld [vmem:[%s16572_s0 + $0x1fc] sm:$0xf]  ;;  %v10556_v62 = vor.u32 %v13441_v28, %v10553_v6  ;;  %4895 = vmatpush.bf16.msrb.mxu2 %v10428_v43  ;;  %v13377_v43 = vld [vmem:[#allocation15 + $0x2c4] sm:$0xf] }
 0x122   :  { %v14880_v23 = vadd.f32 %v4478_v40, %v4450_v59  ;;  %v13286_v59 = vld [vmem:[%s16572_s0 + $0x248] sm:$0xf0]  ;;  %v10172_v40 = vor.u32 %v13345_v20, %v10169_v58  ;;  %v14908_v12 = vor.u32 %v13276_v5, %v9917_v15  ;;  %v10300_v42 = vor.u32 %v13377_v43, %v10297_v55  ;;  %v10153_v15 = vld [vmem:[#allocation15 + $0x1b0] sm:$0xf0]  ;;  %v13373_v43 = vld [vmem:[#allocation15 + $0x2a4] sm:$0xf] }
 0x123   :  { %v4423_v41 = vadd.f32 %v4422_v61, %v4394_v13  ;;  %v13277_v13 = vld [vmem:[%s16572_s0 + $0x204] sm:$0xf]  ;;  %v9925_v61 = vld [vmem:[%s16572_s0 + $0x24c] sm:$0xf0]  ;;  %4924 = vmatpush.bf16.msrb.mxu3 %v10556_v62  ;;  %v14910_v20 = vor.u32 %v13286_v59, %v9923_v63  ;;  %v10537_v59 = vld [vmem:[#allocation15 + $0x4b0] sm:$0xf0] }
 0x124   :  { %4837 = vmatpush.bf16.msrb.mxu0 %v10172_v40  ;;  %16788 = vst [vmem:[#allocation87_spill] sm:$0xff] %v14908_v12  ;;  %v14913_v6 = vor.u32 %v13277_v13, %v9925_v61  ;;  %4866 = vmatpush.bf16.msrb.mxu1 %v10300_v42  ;;  %v13437_v63 = vld [vmem:[#allocation15 + $0x4a4] sm:$0xf]  ;;  %v10281_v42 = vld [vmem:[#allocation15 + $0x2b0] sm:$0xf0] }
 0x125   :  { %16789 = vst [vmem:[#allocation88_spill] sm:$0xff] %v14910_v20  ;;  %v10540_v13 = vor.u32 %v13437_v63, %v10537_v59  ;;  %v10137_v63 = vld [vmem:[#allocation15 + $0x190] sm:$0xf0]  ;;  %v13433_v59 = vld [vmem:[#allocation15 + $0x484] sm:$0xf] }
 0x126   :  { %16790 = vst [vmem:[#allocation89_spill] sm:$0xff] %v14913_v6 }
 0x127   :  { %v4451_v31 = vpop.f32.mrf.mxu2  ;;  %4925 = vmatpush.bf16.msrb.mxu3 %v10540_v13  ;;  %v9711_v13 = vld [vmem:[%s16572_s0 + $0x48] sm:$0xf] }
 0x128   :  { %v4452_v9 = vadd.f32 %v4451_v31, %v4423_v41  ;;  %v4480_v60 = vpop.f32.mrf.mxu3  ;;  %v4396_v27 = vpop.f32.mrf.mxu0  ;;  %v13405_v41 = vld [vmem:[#allocation15 + $0x3a4] sm:$0xf] }
 0x129   :  { %v4397_v58 = vadd.f32 %v4396_v27, %v14756_v22  ;;  %v4425_v28 = vpop.f32.mrf.mxu1  ;;  %v10409_v27 = vld [vmem:[#allocation15 + $0x3b0] sm:$0xf0]  ;;  %v13341_v22 = vld [vmem:[#allocation15 + $0x1a4] sm:$0xf] }
 0x12a   :  { %v14915_v14 = vadd.f32 %v4480_v60, %v4452_v9  ;;  %v10412_v5 = vor.u32 %v13405_v41, %v10409_v27  ;;  %v10156_v62 = vor.u32 %v13341_v22, %v10153_v15  ;;  %v10284_v41 = vor.u32 %v13373_v43, %v10281_v42  ;;  %v13401_v27 = vld [vmem:[#allocation15 + $0x384] sm:$0xf]  ;;  %v10393_v22 = vld [vmem:[#allocation15 + $0x390] sm:$0xf0] }
 0x12b   :  { %v4426_v24 = vadd.f32 %v4425_v28, %v4397_v58  ;;  %4627 = vmatmul.bf16.gmra.mxu0 %v14906_v52  ;;  %4656 = vmatmul.bf16.gmra.mxu1 %v14908_v12  ;;  %v9703_v58 = vld [vmem:[%s16572_s0 + $0x40] sm:$0xf]  ;;  %v13230_v28 = vld [vmem:[%s16572_s0 + $0x88] sm:$0xf0]  ;;  %v10396_v15 = vor.u32 %v13401_v27, %v10393_v22  ;;  %v13369_v52 = vld [vmem:[#allocation15 + $0x284] sm:$0xf] }
 0x12c   :  { %4685 = vmatmul.bf16.gmra.mxu2 %v14910_v20  ;;  %4838 = vmatpush.bf16.msrb.mxu0 %v10156_v62  ;;  %v9705_v62 = vld [vmem:[%s16572_s0 + $0x8c] sm:$0xf0]  ;;  %v14941_v43 = vor.u32 %v13230_v28, %v9703_v58  ;;  %v13397_v58 = vld [vmem:[#allocation15 + $0x364] sm:$0xf]  ;;  %v10377_v28 = vld [vmem:[#allocation15 + $0x370] sm:$0xf0] }
 0x12d   :  { %4714 = vmatmul.bf16.gmra.mxu3 %v14913_v6  ;;  %4896 = vmatpush.bf16.msrb.mxu2 %v10412_v5  ;;  %v13337_v5 = vld [vmem:[#allocation15 + $0x184] sm:$0xf] }
 0x12e   :  { %4867 = vmatpush.bf16.msrb.mxu1 %v10284_v41  ;;  %16791 = vst [vmem:[#allocation90_spill] sm:$0xff] %v14941_v43 }
 0x12f   :  { %v4454_v40 = vpop.f32.mrf.mxu2 }
 0x130   :  { %v4455_v61 = vadd.f32 %v4454_v40, %v4426_v24  ;;  %v4483_v31 = vpop.f32.mrf.mxu3  ;;  %v4398_v55 = vpop.f32.mrf.mxu0  ;;  %v13221_v24 = vld [vmem:[%s16572_s0 + $0x44] sm:$0xf]  ;;  %v10521_v40 = vld [vmem:[#allocation15 + $0x490] sm:$0xf0] }
 0x131   :  { %v4427_v9 = vpop.f32.mrf.mxu1  ;;  %v10524_v55 = vor.u32 %v13433_v59, %v10521_v40  ;;  %4897 = vmatpush.bf16.msrb.mxu2 %v10396_v15  ;;  %v14943_v22 = vor.u32 %v13221_v24, %v9705_v62  ;;  %v13333_v24 = vld [vmem:[#allocation15 + $0x164] sm:$0xf]  ;;  %v10380_v15 = vor.u32 %v13397_v58, %v10377_v28  ;;  %v10505_v59 = vld [vmem:[#allocation15 + $0x470] sm:$0xf0] }
 0x132   :  { %v14921_v60 = vadd.f32 %v4483_v31, %v4455_v61  ;;  %v13231_v61 = vld [vmem:[%s16572_s0 + $0x90] sm:$0xf0]  ;;  %v10140_v31 = vor.u32 %v13337_v5, %v10137_v63  ;;  %v10268_v5 = vor.u32 %v13369_v52, %v10265_v4  ;;  %v13393_v58 = vld [vmem:[#allocation15 + $0x344] sm:$0xf] }
 0x133   :  { %4926 = vmatpush.bf16.msrb.mxu3 %v10524_v55  ;;  %16792 = vst [vmem:[#allocation91_spill] sm:$0xff] %v14943_v22  ;;  %v14945_v6 = vor.u32 %v13231_v61, %v9711_v13  ;;  %v10121_v63 = vld [vmem:[#allocation15 + $0x170] sm:$0xf0]  ;;  %v9779_v55 = vld [vmem:[%s16572_s0 + $0xd8] sm:$0xf] }
 0x134   :  { %4839 = vmatpush.bf16.msrb.mxu0 %v10140_v31  ;;  %4868 = vmatpush.bf16.msrb.mxu1 %v10268_v5  ;;  %v10124_v62 = vor.u32 %v13333_v24, %v10121_v63  ;;  %v10361_v28 = vld [vmem:[#allocation15 + $0x350] sm:$0xf0]  ;;  %v13329_v24 = vld [vmem:[#allocation15 + $0x144] sm:$0xf] }
 0x135   :  { %16793 = vst [vmem:[#allocation92_spill] sm:$0xff] %v14945_v6  ;;  %4898 = vmatpush.bf16.msrb.mxu2 %v10380_v15  ;;  %v10364_v15 = vor.u32 %v13393_v58, %v10361_v28  ;;  %v10105_v63 = vld [vmem:[#allocation15 + $0x150] sm:$0xf0] }
 0x137   :  { %v4456_v9 = vpop.f32.mrf.mxu2 }
 0x138   :  { %v4485_v42 = vpop.f32.mrf.mxu3  ;;  %v4497_v27 = vpop.f32.mrf.mxu0  ;;  %4840 = vmatpush.bf16.msrb.mxu0 %v10124_v62  ;;  %v13249_v9 = vld [vmem:[%s16572_s0 + $0x120] sm:$0xf0]  ;;  %v9787_v62 = vld [vmem:[%s16572_s0 + $0xe0] sm:$0xf] }
 0x139   :  { %v4498_v20 = vadd.f32 %v4497_v27, %v14796_v21  ;;  %v4526_v12 = vpop.f32.mrf.mxu1  ;;  %v13429_v21 = vld [vmem:[#allocation15 + $0x464] sm:$0xf]  ;;  %v10249_v27 = vld [vmem:[#allocation15 + $0x270] sm:$0xf0]  ;;  %4899 = vmatpush.bf16.msrb.mxu2 %v10364_v15 }
 0x13a   :  { %v13365_v42 = vld [vmem:[#allocation15 + $0x264] sm:$0xf] }
 0x13b   :  { %v4527_v41 = vadd.f32 %v4526_v12, %v4498_v20  ;;  %4728 = vmatmul.bf16.vlgmr.msra.gmra.mxu0 %v14941_v43  ;;  %4757 = vmatmul.bf16.vlgmr.msra.gmra.mxu1 %v14943_v22  ;;  %v10508_v12 = vor.u32 %v13429_v21, %v10505_v59  ;;  %v10252_v5 = vor.u32 %v13365_v42, %v10249_v27  ;;  %v13425_v21 = vld [vmem:[#allocation15 + $0x444] sm:$0xf]  ;;  %v10489_v59 = vld [vmem:[#allocation15 + $0x450] sm:$0xf0] }
 0x13c   :  { %4786 = vmatmul.bf16.vlgmr.msra.gmra.mxu2 %v14945_v6 }
 0x13d   :  { %4815 = vmatmul.bf16.vlgmr.msra.gmra.mxu3 %v14336_v48  ;;  %4869 = vmatpush.bf16.msrb.mxu1 %v10252_v5  ;;  %v13361_v5 = vld [vmem:[#allocation15 + $0x244] sm:$0xf] }
 0x13e   :  { %4927 = vmatpush.bf16.msrb.mxu3 %v10508_v12  ;;  %v13250_v12 = vld [vmem:[%s16572_s0 + $0x128] sm:$0xf0] }
 0x13f   :  { %v4555_v40 = vpop.f32.mrf.mxu2  ;;  %v14977_v28 = vor.u32 %v13250_v12, %v9787_v62 }
 0x140   :  { %v4556_v20 = vadd.f32 %v4555_v40, %v4527_v41  ;;  %v4584_v13 = vpop.f32.mrf.mxu3  ;;  %v4499_v4 = vpop.f32.mrf.mxu0  ;;  %v9781_v40 = vld [vmem:[%s16572_s0 + $0x124] sm:$0xf0] }
 0x141   :  { %v4500_v52 = vadd.f32 %v4499_v4, %v14831_v11  ;;  %v4528_v61 = vpop.f32.mrf.mxu1  ;;  %v13240_v11 = vld [vmem:[%s16572_s0 + $0xdc] sm:$0xf]  ;;  %16796 = vst [vmem:[#allocation95_spill] sm:$0xff] %v14977_v28 }
 0x142   :  { %v14953_v31 = vadd.f32 %v4584_v13, %v4556_v20  ;;  %v10108_v20 = vor.u32 %v13329_v24, %v10105_v63  ;;  %v10492_v13 = vor.u32 %v13425_v21, %v10489_v59  ;;  %v14975_v58 = vor.u32 %v13240_v11, %v9781_v40  ;;  %v10233_v24 = vld [vmem:[#allocation15 + $0x250] sm:$0xf0]  ;;  %v13325_v11 = vld [vmem:[#allocation15 + $0x124] sm:$0xf] }
 0x143   :  { %v4529_v41 = vadd.f32 %v4528_v61, %v4500_v52  ;;  %v14973_v52 = vor.u32 %v13249_v9, %v9779_v55  ;;  %v10236_v55 = vor.u32 %v13361_v5, %v10233_v24  ;;  %v13389_v9 = vld [vmem:[#allocation15 + $0x324] sm:$0xf]  ;;  %v10089_v63 = vld [vmem:[#allocation15 + $0x130] sm:$0xf0] }
 0x144   :  { %4841 = vmatpush.bf16.msrb.mxu0 %v10108_v20  ;;  %4928 = vmatpush.bf16.msrb.mxu3 %v10492_v13  ;;  %16795 = vst [vmem:[#allocation94_spill] sm:$0xff] %v14975_v58  ;;  %v13421_v21 = vld [vmem:[#allocation15 + $0x424] sm:$0xf]  ;;  %v10473_v59 = vld [vmem:[#allocation15 + $0x430] sm:$0xf0]  ;;  %v10092_v62 = vor.u32 %v13325_v11, %v10089_v63 }
 0x145   :  { %16794 = vst [vmem:[#allocation93_spill] sm:$0xff] %v14973_v52  ;;  %4870 = vmatpush.bf16.msrb.mxu1 %v10236_v55  ;;  %v13357_v5 = vld [vmem:[#allocation15 + $0x224] sm:$0xf]  ;;  %v10217_v24 = vld [vmem:[#allocation15 + $0x230] sm:$0xf0] }
 0x146   :  { %v10073_v11 = vld [vmem:[#allocation15 + $0x110] sm:$0xf0] }
 0x147   :  { %v4557_v4 = vpop.f32.mrf.mxu2 }
 0x148   :  { %v4558_v61 = vadd.f32 %v4557_v4, %v4529_v41  ;;  %v4586_v42 = vpop.f32.mrf.mxu3  ;;  %v4502_v27 = vpop.f32.mrf.mxu0  ;;  %v10345_v41 = vld [vmem:[#allocation15 + $0x330] sm:$0xf0]  ;;  %4842 = vmatpush.bf16.msrb.mxu0 %v10092_v62  ;;  %v9857_v62 = vld [vmem:[%s16572_s0 + $0x1bc] sm:$0xf0] }
 0x149   :  { %v4503_v48 = vadd.f32 %v4502_v27, %v14838_v7  ;;  %v4531_v6 = vpop.f32.mrf.mxu1  ;;  %v10348_v7 = vor.u32 %v13389_v9, %v10345_v41  ;;  %v13268_v27 = vld [vmem:[%s16572_s0 + $0x1b8] sm:$0xf0]  ;;  %v10220_v9 = vor.u32 %v13357_v5, %v10217_v24  ;;  %v10329_v41 = vld [vmem:[#allocation15 + $0x310] sm:$0xf0] }
 0x14a   :  { %v14980_v22 = vadd.f32 %v4586_v42, %v4558_v61  ;;  %v9855_v42 = vld [vmem:[%s16572_s0 + $0x170] sm:$0xf]  ;;  %v10201_v5 = vld [vmem:[#allocation15 + $0x210] sm:$0xf0] }
 0x14b   :  { %v4532_v15 = vadd.f32 %v4531_v6, %v4503_v48  ;;  %4733 = vmatmul.bf16.gmra.mxu0 %v14973_v52  ;;  %4762 = vmatmul.bf16.gmra.mxu1 %v14975_v58  ;;  %v10476_v48 = vor.u32 %v13421_v21, %v10473_v59  ;;  %v13417_v59 = vld [vmem:[#allocation15 + $0x404] sm:$0xf] }
 0x14c   :  { %4791 = vmatmul.bf16.gmra.mxu2 %v14977_v28  ;;  %4871 = vmatpush.bf16.msrb.mxu1 %v10220_v9 }
 0x14d   :  { %4820 = vmatmul.bf16.gmra.mxu3 %v14372_v44  ;;  %4900 = vmatpush.bf16.msrb.mxu2 %v10348_v7  ;;  %v13259_v7 = vld [vmem:[%s16572_s0 + $0x174] sm:$0xf] }
 0x14e   :  { %4929 = vmatpush.bf16.msrb.mxu3 %v10476_v48  ;;  %v9863_v48 = vld [vmem:[%s16572_s0 + $0x178] sm:$0xf] }
 0x14f   :  { %v4560_v40 = vpop.f32.mrf.mxu2 }
 0x150   :  { %v4561_v6 = vadd.f32 %v4560_v40, %v4532_v15  ;;  %v4589_v12 = vpop.f32.mrf.mxu3  ;;  %v4504_v20 = vpop.f32.mrf.mxu0  ;;  %v13385_v15 = vld [vmem:[#allocation15 + $0x304] sm:$0xf]  ;;  %v10457_v40 = vld [vmem:[#allocation15 + $0x410] sm:$0xf0] }
 0x151   :  { %v4505_v13 = vadd.f32 %v4504_v20, %v14873_v10  ;;  %v4533_v4 = vpop.f32.mrf.mxu1  ;;  %v13321_v10 = vld [vmem:[#allocation15 + $0x104] sm:$0xf]  ;;  %v10332_v63 = vor.u32 %v13385_v15, %v10329_v41 }
 0x152   :  { %v14987_v61 = vadd.f32 %v4589_v12, %v4561_v6  ;;  %v10076_v21 = vor.u32 %v13321_v10, %v10073_v11  ;;  %v13269_v6 = vld [vmem:[%s16572_s0 + $0x1c0] sm:$0xf0]  ;;  %v10460_v12 = vor.u32 %v13417_v59, %v10457_v40  ;;  %v15009_v10 = vor.u32 %v13259_v7, %v9857_v62 }
 0x153   :  { %v4534_v55 = vadd.f32 %v4533_v4, %v4505_v13  ;;  %4901 = vmatpush.bf16.msrb.mxu2 %v10332_v63  ;;  %v15007_v13 = vor.u32 %v13268_v27, %v9855_v42  ;;  %v13353_v4 = vld [vmem:[#allocation15 + $0x204] sm:$0xf]  ;;  %v15011_v11 = vor.u32 %v13269_v6, %v9863_v48  ;;  %v10953_v27 = vld [vmem:[#allocation15 + $0x7f0] sm:$0xf0] }
 0x154   :  { %4843 = vmatpush.bf16.msrb.mxu0 %v10076_v21  ;;  %4930 = vmatpush.bf16.msrb.mxu3 %v10460_v12  ;;  %16798 = vst [vmem:[#allocation97_spill] sm:$0xff] %v15009_v10  ;;  %v10204_v44 = vor.u32 %v13353_v4, %v10201_v5  ;;  %v13541_v42 = vld [vmem:[#allocation15 + $0x7e4] sm:$0xf]  ;;  %v10697_v21 = vld [vmem:[#allocation15 + $0x5f0] sm:$0xf0] }
 0x155   :  { %16797 = vst [vmem:[#allocation96_spill] sm:$0xff] %v15007_v13  ;;  %v10956_v7 = vor.u32 %v13541_v42, %v10953_v27  ;;  %v13573_v40 = vld [vmem:[#allocation15 + $0x8e4] sm:$0xf] }
 0x156   :  { %16799 = vst [vmem:[#allocation98_spill] sm:$0xff] %v15011_v11  ;;  %4872 = vmatpush.bf16.msrb.mxu1 %v10204_v44  ;;  %v13537_v27 = vld [vmem:[#allocation15 + $0x7c4] sm:$0xf] }
 0x157   :  { %v4562_v20 = vpop.f32.mrf.mxu2  ;;  %5010 = vmatpush.bf16.msra.mxu2 %v10956_v7  ;;  %v13473_v7 = vld [vmem:[#allocation15 + $0x5c4] sm:$0xf] }
 0x158   :  { %v4563_v24 = vadd.f32 %v4562_v20, %v4534_v55  ;;  %v4591_v15 = vpop.f32.mrf.mxu3  ;;  %v4507_v41 = vpop.f32.mrf.mxu0  ;;  %v13477_v55 = vld [vmem:[#allocation15 + $0x5e4] sm:$0xf] }
 0x159   :  { %v4508_v28 = vadd.f32 %v4507_v41, %v14880_v23  ;;  %v4536_v9 = vpop.f32.mrf.mxu1  ;;  %v11081_v23 = vld [vmem:[#allocation15 + $0x8f0] sm:$0xf0]  ;;  %v10700_v48 = vor.u32 %v13477_v55, %v10697_v21  ;;  %v13509_v41 = vld [vmem:[#allocation15 + $0x6e4] sm:$0xf] }
 0x15a   :  { %v15014_v59 = vadd.f32 %v4591_v15, %v4563_v24  ;;  %v11084_v6 = vor.u32 %v13573_v40, %v11081_v23  ;;  %v9931_v24 = vld [vmem:[%s16572_s0 + $0x208] sm:$0xf]  ;;  %v13287_v15 = vld [vmem:[%s16572_s0 + $0x250] sm:$0xf0]  ;;  %v13569_v23 = vld [vmem:[#allocation15 + $0x8c4] sm:$0xf] }
 0x15b   :  { %v4537_v63 = vadd.f32 %v4536_v9, %v4508_v28  ;;  %4738 = vmatmul.bf16.gmra.mxu0 %v15007_v13  ;;  %4767 = vmatmul.bf16.gmra.mxu1 %v15009_v10  ;;  %v10825_v9 = vld [vmem:[#allocation15 + $0x6f0] sm:$0xf0] }
 0x15c   :  { %4796 = vmatmul.bf16.gmra.mxu2 %v15011_v11  ;;  %4952 = vmatpush.bf16.msra.mxu0 %v10700_v48  ;;  %v10828_v42 = vor.u32 %v13509_v41, %v10825_v9  ;;  %v10937_v55 = vld [vmem:[#allocation15 + $0x7d0] sm:$0xf0]  ;;  %v9933_v48 = vld [vmem:[%s16572_s0 + $0x254] sm:$0xf0] }
 0x15d   :  { %4825 = vmatmul.bf16.gmra.mxu3 %v14408_v36  ;;  %v10940_v21 = vor.u32 %v13537_v27, %v10937_v55  ;;  %v10681_v40 = vld [vmem:[#allocation15 + $0x5d0] sm:$0xf0] }
 0x15e   :  { %5039 = vmatpush.bf16.msra.mxu3 %v11084_v6  ;;  %v9939_v6 = vld [vmem:[%s16572_s0 + $0x210] sm:$0xf]  ;;  %4981 = vmatpush.bf16.msra.mxu1 %v10828_v42  ;;  %v13505_v42 = vld [vmem:[#allocation15 + $0x6c4] sm:$0xf] }
 0x15f   :  { %v4565_v62 = vpop.f32.mrf.mxu2  ;;  %5011 = vmatpush.bf16.msra.mxu2 %v10940_v21 }
 0x160   :  { %v4566_v44 = vadd.f32 %v4565_v62, %v4537_v63  ;;  %v4594_v28 = vpop.f32.mrf.mxu3  ;;  %v4509_v12 = vpop.f32.mrf.mxu0  ;;  %v11065_v62 = vld [vmem:[#allocation15 + $0x8d0] sm:$0xf0] }
 0x161   :  { %v4510_v20 = vadd.f32 %v4509_v12, %v14915_v14  ;;  %v4538_v4 = vpop.f32.mrf.mxu1  ;;  %v13278_v14 = vld [vmem:[%s16572_s0 + $0x20c] sm:$0xf]  ;;  %v11068_v12 = vor.u32 %v13569_v23, %v11065_v62  ;;  %v13565_v23 = vld [vmem:[#allocation15 + $0x8a4] sm:$0xf]  ;;  %v11049_v62 = vld [vmem:[#allocation15 + $0x8b0] sm:$0xf0] }
 0x162   :  { %v15021_v5 = vadd.f32 %v4594_v28, %v4566_v44  ;;  %v13288_v44 = vld [vmem:[%s16572_s0 + $0x258] sm:$0xf0]  ;;  %v10684_v28 = vor.u32 %v13473_v7, %v10681_v40  ;;  %v15043_v55 = vor.u32 %v13278_v14, %v9933_v48  ;;  %v10809_v7 = vld [vmem:[#allocation15 + $0x6d0] sm:$0xf0]  ;;  %v13469_v14 = vld [vmem:[#allocation15 + $0x5a4] sm:$0xf] }
 0x163   :  { %v4539_v63 = vadd.f32 %v4538_v4, %v4510_v20  ;;  %v15041_v4 = vor.u32 %v13287_v15, %v9931_v24  ;;  %5040 = vmatpush.bf16.msra.mxu3 %v11068_v12  ;;  %v15045_v36 = vor.u32 %v13288_v44, %v9939_v6  ;;  %v10812_v24 = vor.u32 %v13505_v42, %v10809_v7  ;;  %v13533_v15 = vld [vmem:[#allocation15 + $0x7a4] sm:$0xf]  ;;  %v10665_v40 = vld [vmem:[#allocation15 + $0x5b0] sm:$0xf0] }
 0x164   :  { %4953 = vmatpush.bf16.msra.mxu0 %v10684_v28  ;;  %16801 = vst [vmem:[#allocation100_spill] sm:$0xff] %v15043_v55  ;;  %v10668_v6 = vor.u32 %v13469_v14, %v10665_v40  ;;  %v13529_v42 = vld [vmem:[#allocation15 + $0x784] sm:$0xf]  ;;  %v10905_v7 = vld [vmem:[#allocation15 + $0x790] sm:$0xf0] }
 0x165   :  { %16800 = vst [vmem:[#allocation99_spill] sm:$0xff] %v15041_v4  ;;  %4982 = vmatpush.bf16.msra.mxu1 %v10812_v24  ;;  %v13465_v24 = vld [vmem:[#allocation15 + $0x584] sm:$0xf]  ;;  %v11033_v14 = vld [vmem:[#allocation15 + $0x890] sm:$0xf0] }
 0x166   :  { %16802 = vst [vmem:[#allocation101_spill] sm:$0xff] %v15045_v36 }
 0x167   :  { %v4567_v20 = vpop.f32.mrf.mxu2 }
 0x168   :  { %v4568_v41 = vadd.f32 %v4567_v20, %v4539_v63  ;;  %v4596_v9 = vpop.f32.mrf.mxu3  ;;  %v4512_v27 = vpop.f32.mrf.mxu0  ;;  %v10921_v63 = vld [vmem:[#allocation15 + $0x7b0] sm:$0xf0]  ;;  %4954 = vmatpush.bf16.msra.mxu0 %v10668_v6 }
 0x169   :  { %v4513_v11 = vadd.f32 %v4512_v27, %v14921_v60  ;;  %v4541_v10 = vpop.f32.mrf.mxu1  ;;  %v10924_v60 = vor.u32 %v13533_v15, %v10921_v63  ;;  %v10908_v15 = vor.u32 %v13529_v42, %v10905_v7  ;;  %v10649_v63 = vld [vmem:[#allocation15 + $0x590] sm:$0xf0] }
 0x16a   :  { %v15048_v58 = vadd.f32 %v4596_v9, %v4568_v41  ;;  %v13501_v41 = vld [vmem:[#allocation15 + $0x6a4] sm:$0xf]  ;;  %v10793_v9 = vld [vmem:[#allocation15 + $0x6b0] sm:$0xf0] }
 0x16b   :  { %v4542_v21 = vadd.f32 %v4541_v10, %v4513_v11  ;;  %4743 = vmatmul.bf16.gmra.mxu0 %v15041_v4  ;;  %4772 = vmatmul.bf16.gmra.mxu1 %v15043_v55  ;;  %v11052_v10 = vor.u32 %v13565_v23, %v11049_v62  ;;  %v10796_v27 = vor.u32 %v13501_v41, %v10793_v9  ;;  %v13461_v41 = vld [vmem:[#allocation15 + $0x564] sm:$0xf]  ;;  %v11017_v42 = vld [vmem:[#allocation15 + $0x870] sm:$0xf0] }
 0x16c   :  { %4801 = vmatmul.bf16.gmra.mxu2 %v15045_v36 }
 0x16d   :  { %4830 = vmatmul.bf16.gmra.mxu3 %v14444_v16  ;;  %5012 = vmatpush.bf16.msra.mxu2 %v10924_v60  ;;  %v13561_v16 = vld [vmem:[#allocation15 + $0x884] sm:$0xf] }
 0x16e   :  { %5041 = vmatpush.bf16.msra.mxu3 %v11052_v10  ;;  %4983 = vmatpush.bf16.msra.mxu1 %v10796_v27  ;;  %v11036_v40 = vor.u32 %v13561_v16, %v11033_v14  ;;  %v13497_v10 = vld [vmem:[#allocation15 + $0x684] sm:$0xf]  ;;  %v10633_v27 = vld [vmem:[#allocation15 + $0x570] sm:$0xf0] }
 0x16f   :  { %v4570_v48 = vpop.f32.mrf.mxu2  ;;  %v13525_v16 = vld [vmem:[#allocation15 + $0x764] sm:$0xf] }
 0x170   :  { %v4571_v11 = vadd.f32 %v4570_v48, %v4542_v21  ;;  %v4599_v44 = vpop.f32.mrf.mxu3  ;;  %v4514_v28 = vpop.f32.mrf.mxu0  ;;  %v10652_v21 = vor.u32 %v13465_v24, %v10649_v63  ;;  %v10636_v24 = vor.u32 %v13461_v41, %v10633_v27  ;;  %v10617_v41 = vld [vmem:[#allocation15 + $0x550] sm:$0xf0] }
 0x171   :  { %v4543_v12 = vpop.f32.mrf.mxu1  ;;  %5013 = vmatpush.bf16.msra.mxu2 %v10908_v15  ;;  %v11001_v27 = vld [vmem:[#allocation15 + $0x850] sm:$0xf0] }
 0x172   :  { %v15054_v20 = vadd.f32 %v4599_v44, %v4571_v11  ;;  %4955 = vmatpush.bf16.msra.mxu0 %v10652_v21  ;;  %5042 = vmatpush.bf16.msra.mxu3 %v11036_v40  ;;  %v10777_v11 = vld [vmem:[#allocation15 + $0x690] sm:$0xf0] }
 0x173   :  { %v10780_v28 = vor.u32 %v13497_v10, %v10777_v11  ;;  %v10889_v12 = vld [vmem:[#allocation15 + $0x770] sm:$0xf0]  ;;  %v13521_v11 = vld [vmem:[#allocation15 + $0x744] sm:$0xf] }
 0x174   :  { %v10892_v9 = vor.u32 %v13525_v16, %v10889_v12  ;;  %v13457_v16 = vld [vmem:[#allocation15 + $0x544] sm:$0xf] }
 0x175   :  { %4984 = vmatpush.bf16.msra.mxu1 %v10780_v28  ;;  %v10873_v28 = vld [vmem:[#allocation15 + $0x750] sm:$0xf0] }
 0x176   :  { %5014 = vmatpush.bf16.msra.mxu2 %v10892_v9  ;;  %4956 = vmatpush.bf16.msra.mxu0 %v10636_v24  ;;  %v10876_v12 = vor.u32 %v13521_v11, %v10873_v28  ;;  %v10620_v9 = vor.u32 %v13457_v16, %v10617_v41  ;;  %v10601_v11 = vld [vmem:[#allocation15 + $0x530] sm:$0xf0]  ;;  %v13549_v28 = vld [vmem:[#allocation15 + $0x824] sm:$0xf] }
 0x177   :  { %v4572_v60 = vpop.f32.mrf.mxu2  ;;  %v10985_v16 = vld [vmem:[#allocation15 + $0x830] sm:$0xf0] }
 0x178   :  { %v4601_v23 = vpop.f32.mrf.mxu3  ;;  %v4613_v62 = vpop.f32.mrf.mxu0 }
 0x179   :  { %v4614_v48 = vadd.f32 %v4613_v62, %v14953_v31  ;;  %v4642_v6 = vpop.f32.mrf.mxu1  ;;  %v13557_v31 = vld [vmem:[#allocation15 + $0x864] sm:$0xf] }
 0x17a   :  { %v11020_v15 = vor.u32 %v13557_v31, %v11017_v42  ;;  %v13493_v62 = vld [vmem:[#allocation15 + $0x664] sm:$0xf]  ;;  %5015 = vmatpush.bf16.msra.mxu2 %v10876_v12  ;;  %4957 = vmatpush.bf16.msra.mxu0 %v10620_v9 }
 0x17b   :  { %v4643_v44 = vadd.f32 %v4642_v6, %v4614_v48  ;;  %4844 = vmatmul.bf16.vlgmr.msrb.gmra.mxu0 %v14338_v53  ;;  %4873 = vmatmul.bf16.vlgmr.msrb.gmra.mxu1 %v14340_v54  ;;  %v10761_v48 = vld [vmem:[#allocation15 + $0x670] sm:$0xf0] }
 0x17c   :  { %4902 = vmatmul.bf16.vlgmr.msrb.gmra.mxu2 %v14342_v57  ;;  %5043 = vmatpush.bf16.msra.mxu3 %v11020_v15  ;;  %v10764_v10 = vor.u32 %v13493_v62, %v10761_v48  ;;  %v13517_v48 = vld [vmem:[#allocation15 + $0x724] sm:$0xf] }
 0x17d   :  { %4931 = vmatmul.bf16.vlgmr.msrb.gmra.mxu3 %v14480_v0 }
 0x17e   :  { %4985 = vmatpush.bf16.msra.mxu1 %v10764_v10  ;;  %v13453_v10 = vld [vmem:[#allocation15 + $0x524] sm:$0xf] }
 0x17f   :  { %v4671_v7 = vpop.f32.mrf.mxu2  ;;  %v10604_v41 = vor.u32 %v13453_v10, %v10601_v11  ;;  %v13545_v11 = vld [vmem:[#allocation15 + $0x804] sm:$0xf] }
 0x180   :  { %v4672_v63 = vadd.f32 %v4671_v7, %v4643_v44  ;;  %v4700_v14 = vpop.f32.mrf.mxu3  ;;  %v4615_v21 = vpop.f32.mrf.mxu0  ;;  %v13553_v44 = vld [vmem:[#allocation15 + $0x844] sm:$0xf] }
 0x181   :  { %v4616_v40 = vadd.f32 %v4615_v21, %v14980_v22  ;;  %v4644_v60 = vpop.f32.mrf.mxu1  ;;  %v11004_v31 = vor.u32 %v13553_v44, %v11001_v27  ;;  %v13489_v21 = vld [vmem:[#allocation15 + $0x644] sm:$0xf]  ;;  %v10988_v44 = vor.u32 %v13549_v28, %v10985_v16  ;;  %4958 = vmatpush.bf16.msra.mxu0 %v10604_v41  ;;  %v10969_v28 = vld [vmem:[#allocation15 + $0x810] sm:$0xf0] }
 0x182   :  { %v15062_v23 = vadd.f32 %v4700_v14, %v4672_v63  ;;  %v13481_v16 = vld [vmem:[#allocation15 + $0x604] sm:$0xf] }
 0x183   :  { %v4645_v6 = vadd.f32 %v4644_v60, %v4616_v40  ;;  %5044 = vmatpush.bf16.msra.mxu3 %v11004_v31  ;;  %v10745_v40 = vld [vmem:[#allocation15 + $0x650] sm:$0xf0] }
 0x184   :  { %v10748_v62 = vor.u32 %v13489_v21, %v10745_v40 }
 0x186   :  { %4986 = vmatpush.bf16.msra.mxu1 %v10748_v62  ;;  %v10841_v62 = vld [vmem:[#allocation15 + $0x710] sm:$0xf0] }
 0x187   :  { %v4673_v22 = vpop.f32.mrf.mxu2  ;;  %5045 = vmatpush.bf16.msra.mxu3 %v10988_v44 }
 0x188   :  { %v4674_v42 = vadd.f32 %v4673_v22, %v4645_v6  ;;  %v4702_v7 = vpop.f32.mrf.mxu3  ;;  %v4618_v24 = vpop.f32.mrf.mxu0  ;;  %v10857_v6 = vld [vmem:[#allocation15 + $0x730] sm:$0xf0] }
 0x189   :  { %v4619_v15 = vadd.f32 %v4618_v24, %v14987_v61  ;;  %v4647_v63 = vpop.f32.mrf.mxu1  ;;  %v10860_v61 = vor.u32 %v13517_v48, %v10857_v6  ;;  %v13485_v24 = vld [vmem:[#allocation15 + $0x624] sm:$0xf]  ;;  %v10585_v6 = vld [vmem:[#allocation15 + $0x510] sm:$0xf0] }
 0x18a   :  { %v15065_v14 = vadd.f32 %v4702_v7, %v4674_v42  ;;  %v13449_v48 = vld [vmem:[#allocation15 + $0x504] sm:$0xf] }
 0x18b   :  { %v4648_v60 = vadd.f32 %v4647_v63, %v4619_v15  ;;  %4849 = vmatmul.bf16.gmra.mxu0 %v14374_v50  ;;  %4878 = vmatmul.bf16.gmra.mxu1 %v14376_v51  ;;  %v10729_v15 = vld [vmem:[#allocation15 + $0x630] sm:$0xf0]  ;;  %v13513_v63 = vld [vmem:[#allocation15 + $0x704] sm:$0xf] }
 0x18c   :  { %4907 = vmatmul.bf16.gmra.mxu2 %v14378_v56  ;;  %v10732_v40 = vor.u32 %v13485_v24, %v10729_v15  ;;  %v10844_v10 = vor.u32 %v13513_v63, %v10841_v62  ;;  %v13669_v15 = vld [vmem:[#allocation15 + $0xbe4] sm:$0xf]  ;;  %v11465_v63 = vld [vmem:[#allocation15 + $0xbf0] sm:$0xf0] }
 0x18d   :  { %4936 = vmatmul.bf16.gmra.mxu3 %v14516_v45  ;;  %5016 = vmatpush.bf16.msra.mxu2 %v10860_v61  ;;  %v10972_v61 = vor.u32 %v13545_v11, %v10969_v28  ;;  %v11209_v62 = vld [vmem:[#allocation15 + $0x9f0] sm:$0xf0] }
 0x18e   :  { %4987 = vmatpush.bf16.msra.mxu1 %v10732_v40  ;;  %v11468_v40 = vor.u32 %v13669_v15, %v11465_v63  ;;  %v13601_v15 = vld [vmem:[#allocation15 + $0x9c4] sm:$0xf] }
 0x18f   :  { %v4676_v12 = vpop.f32.mrf.mxu2  ;;  %5046 = vmatpush.bf16.msra.mxu3 %v10972_v61 }
 0x190   :  { %v4677_v27 = vadd.f32 %v4676_v12, %v4648_v60  ;;  %v4705_v9 = vpop.f32.mrf.mxu3  ;;  %v4620_v31 = vpop.f32.mrf.mxu0  ;;  %v10588_v60 = vor.u32 %v13449_v48, %v10585_v6  ;;  %v10713_v12 = vld [vmem:[#allocation15 + $0x610] sm:$0xf0]  ;;  %v13701_v48 = vld [vmem:[#allocation15 + $0xce4] sm:$0xf] }
 0x191   :  { %v4621_v22 = vadd.f32 %v4620_v31, %v15014_v59  ;;  %v4649_v42 = vpop.f32.mrf.mxu1  ;;  %5017 = vmatpush.bf16.msra.mxu2 %v10844_v10 }
 0x192   :  { %v15072_v7 = vadd.f32 %v4705_v9, %v4677_v27  ;;  %4959 = vmatpush.bf16.msra.mxu0 %v10588_v60  ;;  %v10716_v9 = vor.u32 %v13481_v16, %v10713_v12 }
 0x193   :  { %v4650_v21 = vadd.f32 %v4649_v42, %v4621_v22 }
 0x194   :  { %4988 = vmatpush.bf16.msra.mxu1 %v10716_v9 }
 0x195   :  { %5126 = vmatpush.bf16.msrb.mxu2 %v11468_v40 }
 0x197   :  { %v4678_v59 = vpop.f32.mrf.mxu2 }
 0x198   :  { %v4679_v41 = vadd.f32 %v4678_v59, %v4650_v21  ;;  %v4707_v44 = vpop.f32.mrf.mxu3  ;;  %v4623_v27 = vpop.f32.mrf.mxu0  ;;  %v13605_v21 = vld [vmem:[#allocation15 + $0x9e4] sm:$0xf] }
 0x199   :  { %v4624_v31 = vadd.f32 %v4623_v27, %v15021_v5  ;;  %v4652_v22 = vpop.f32.mrf.mxu1  ;;  %v11593_v5 = vld [vmem:[#allocation15 + $0xcf0] sm:$0xf0]  ;;  %v11212_v10 = vor.u32 %v13605_v21, %v11209_v62  ;;  %v13697_v62 = vld [vmem:[#allocation15 + $0xcc4] sm:$0xf] }
 0x19a   :  { %v15075_v42 = vadd.f32 %v4707_v44, %v4679_v41  ;;  %v11596_v60 = vor.u32 %v13701_v48, %v11593_v5  ;;  %v13637_v44 = vld [vmem:[#allocation15 + $0xae4] sm:$0xf]  ;;  %v11337_v27 = vld [vmem:[#allocation15 + $0xaf0] sm:$0xf0] }
 0x19b   :  { %v4653_v24 = vadd.f32 %v4652_v22, %v4624_v31  ;;  %4854 = vmatmul.bf16.gmra.mxu0 %v14410_v37  ;;  %4883 = vmatmul.bf16.gmra.mxu1 %v14412_v38  ;;  %v11340_v9 = vor.u32 %v13637_v44, %v11337_v27  ;;  %v13665_v31 = vld [vmem:[#allocation15 + $0xbc4] sm:$0xf]  ;;  %v11449_v22 = vld [vmem:[#allocation15 + $0xbd0] sm:$0xf0] }
 0x19c   :  { %4912 = vmatmul.bf16.gmra.mxu2 %v14414_v39  ;;  %5068 = vmatpush.bf16.msrb.mxu0 %v11212_v10  ;;  %v11452_v21 = vor.u32 %v13665_v31, %v11449_v22  ;;  %v11577_v48 = vld [vmem:[#allocation15 + $0xcd0] sm:$0xf0]  ;;  %v13661_v44 = vld [vmem:[#allocation15 + $0xba4] sm:$0xf] }
 0x19d   :  { %4941 = vmatmul.bf16.gmra.mxu3 %v14552_v32  ;;  %5097 = vmatpush.bf16.msrb.mxu1 %v11340_v9  ;;  %v11580_v10 = vor.u32 %v13697_v62, %v11577_v48  ;;  %v13597_v27 = vld [vmem:[#allocation15 + $0x9a4] sm:$0xf]  ;;  %v11177_v31 = vld [vmem:[#allocation15 + $0x9b0] sm:$0xf0] }
 0x19e   :  { %5155 = vmatpush.bf16.msrb.mxu3 %v11596_v60  ;;  %5127 = vmatpush.bf16.msrb.mxu2 %v11452_v21  ;;  %v13693_v22 = vld [vmem:[#allocation15 + $0xca4] sm:$0xf]  ;;  %v11180_v21 = vor.u32 %v13597_v27, %v11177_v31  ;;  %v11417_v27 = vld [vmem:[#allocation15 + $0xb90] sm:$0xf0] }
 0x19f   :  { %v4681_v6 = vpop.f32.mrf.mxu2  ;;  %v11161_v31 = vld [vmem:[#allocation15 + $0x990] sm:$0xf0] }
 0x1a0   :  { %v4682_v11 = vadd.f32 %v4681_v6, %v4653_v24  ;;  %v4710_v28 = vpop.f32.mrf.mxu3  ;;  %v4625_v61 = vpop.f32.mrf.mxu0  ;;  %v11193_v24 = vld [vmem:[#allocation15 + $0x9d0] sm:$0xf0] }
 0x1a1   :  { %v4626_v59 = vadd.f32 %v4625_v61, %v15048_v58  ;;  %v4654_v16 = vpop.f32.mrf.mxu1  ;;  %v11196_v6 = vor.u32 %v13601_v15, %v11193_v24  ;;  %v11561_v15 = vld [vmem:[#allocation15 + $0xcb0] sm:$0xf0] }
 0x1a2   :  { %v15082_v12 = vadd.f32 %v4710_v28, %v4682_v11  ;;  %5156 = vmatpush.bf16.msrb.mxu3 %v11580_v10  ;;  %v11564_v24 = vor.u32 %v13693_v22, %v11561_v15 }
 0x1a3   :  { %v4655_v41 = vadd.f32 %v4654_v16, %v4626_v59  ;;  %5069 = vmatpush.bf16.msrb.mxu0 %v11196_v6  ;;  %v13633_v59 = vld [vmem:[#allocation15 + $0xac4] sm:$0xf]  ;;  %v11321_v16 = vld [vmem:[#allocation15 + $0xad0] sm:$0xf0] }
 0x1a6   :  { %5157 = vmatpush.bf16.msrb.mxu3 %v11564_v24  ;;  %v13625_v24 = vld [vmem:[#allocation15 + $0xa84] sm:$0xf] }
 0x1a7   :  { %v4683_v63 = vpop.f32.mrf.mxu2  ;;  %5070 = vmatpush.bf16.msrb.mxu0 %v11180_v21  ;;  %v11545_v21 = vld [vmem:[#allocation15 + $0xc90] sm:$0xf0] }
 0x1a8   :  { %v4684_v40 = vadd.f32 %v4683_v63, %v4655_v41  ;;  %v4712_v5 = vpop.f32.mrf.mxu3  ;;  %v4628_v58 = vpop.f32.mrf.mxu0  ;;  %v11324_v41 = vor.u32 %v13633_v59, %v11321_v16  ;;  %v13629_v16 = vld [vmem:[#allocation15 + $0xaa4] sm:$0xf] }
 0x1a9   :  { %v4629_v60 = vadd.f32 %v4628_v58, %v15054_v20  ;;  %v4657_v11 = vpop.f32.mrf.mxu1  ;;  %v11433_v20 = vld [vmem:[#allocation15 + $0xbb0] sm:$0xf0] }
 0x1aa   :  { %v15085_v28 = vadd.f32 %v4712_v5, %v4684_v40  ;;  %v11436_v9 = vor.u32 %v13661_v44, %v11433_v20  ;;  %5098 = vmatpush.bf16.msrb.mxu1 %v11324_v41  ;;  %v11305_v44 = vld [vmem:[#allocation15 + $0xab0] sm:$0xf0]  ;;  %v13657_v41 = vld [vmem:[#allocation15 + $0xb84] sm:$0xf] }
 0x1ab   :  { %v4658_v61 = vadd.f32 %v4657_v11, %v4629_v60  ;;  %4859 = vmatmul.bf16.gmra.mxu0 %v14446_v17  ;;  %4888 = vmatmul.bf16.gmra.mxu1 %v14448_v18  ;;  %v11308_v20 = vor.u32 %v13629_v16, %v11305_v44  ;;  %v6900_v44 = vld [vmem:[#allocation20] sm:$0xf] }
 0x1ac   :  { %4917 = vmatmul.bf16.gmra.mxu2 %v14450_v19  ;;  %vm6937_vm1 = vcmp.eq.s32.totalorder %v6900_v44, 2  ;;  %vm6983_vm2 = vcmp.eq.s32.totalorder %v6900_v44, 3 }
 0x1ad   :  { %4946 = vmatmul.bf16.gmra.mxu3 %v14588_v25  ;;  %5128 = vmatpush.bf16.msrb.mxu2 %v11436_v9  ;;  %v11420_v9 = vor.u32 %v13657_v41, %v11417_v27 }
 0x1ae   :  { %5099 = vmatpush.bf16.msrb.mxu1 %v11308_v20 }
 0x1af   :  { %v4686_v63 = vpop.f32.mrf.mxu2 }
 0x1b0   :  { %v4687_v62 = vadd.f32 %v4686_v63, %v4658_v61  ;;  %v4715_v48 = vpop.f32.mrf.mxu3  ;;  %v4630_v40 = vpop.f32.mrf.mxu0  ;;  %v13593_v61 = vld [vmem:[#allocation15 + $0x984] sm:$0xf] }
 0x1b1   :  { %v4659_v5 = vpop.f32.mrf.mxu1  ;;  %v11164_v15 = vor.u32 %v13593_v61, %v11161_v31  ;;  %v13689_v63 = vld [vmem:[#allocation15 + $0xc84] sm:$0xf]  ;;  %5129 = vmatpush.bf16.msrb.mxu2 %v11420_v9 }
 0x1b2   :  { %v15091_v58 = vadd.f32 %v4715_v48, %v4687_v62  ;;  %v11289_v62 = vld [vmem:[#allocation15 + $0xa90] sm:$0xf0]  ;;  %v13653_v40 = vld [vmem:[#allocation15 + $0xb64] sm:$0xf] }
 0x1b3   :  { %v11292_v48 = vor.u32 %v13625_v24, %v11289_v62  ;;  %v11401_v5 = vld [vmem:[#allocation15 + $0xb70] sm:$0xf0]  ;;  %5071 = vmatpush.bf16.msrb.mxu0 %v11164_v15  ;;  %v16661_v24 = vmov 0  }
 0x1b5   :  { %5100 = vmatpush.bf16.msrb.mxu1 %v11292_v48 }
 0x1b7   :  { %v4688_v6 = vpop.f32.mrf.mxu2 }
 0x1b8   :  { %v4717_v10 = vpop.f32.mrf.mxu3  ;;  %v4729_v60 = vpop.f32.mrf.mxu0  ;;  %v13589_v6 = vld [vmem:[#allocation15 + $0x964] sm:$0xf] }
 0x1b9   :  { %v4730_v11 = vadd.f32 %v4729_v60, %v15062_v23  ;;  %v4758_v59 = vpop.f32.mrf.mxu1  ;;  %v11548_v23 = vor.u32 %v13689_v63, %v11545_v21  ;;  %v11404_v10 = vor.u32 %v13653_v40, %v11401_v5  ;;  %v11145_v60 = vld [vmem:[#allocation15 + $0x970] sm:$0xf0] }
 0x1ba   :  { %v11148_v41 = vor.u32 %v13589_v6, %v11145_v60 }
 0x1bb   :  { %v4759_v22 = vadd.f32 %v4758_v59, %v4730_v11  ;;  %4960 = vmatmul.bf16.vlgmr.msra.gmra.mxu0 %v14482_v1  ;;  %4989 = vmatmul.bf16.vlgmr.msra.gmra.mxu1 %v14484_v2  ;;  %v13685_v11 = vld [vmem:[#allocation15 + $0xc64] sm:$0xf]  ;;  %v11529_v59 = vld [vmem:[#allocation15 + $0xc70] sm:$0xf0] }
 0x1bc   :  { %5018 = vmatmul.bf16.vlgmr.msra.gmra.mxu2 %v14486_v3  ;;  %5158 = vmatpush.bf16.msrb.mxu3 %v11548_v23  ;;  %v11532_v27 = vor.u32 %v13685_v11, %v11529_v59  ;;  %v15103_v23 = vsel %vm6937_vm1, 1, %v16661_v24  ;;  %v13621_v11 = vld [vmem:[#allocation15 + $0xa64] sm:$0xf]  ;;  %v11273_v59 = vld [vmem:[#allocation15 + $0xa70] sm:$0xf0]  ;;  %v16804_v3 = vmov 0  }
 0x1bd   :  { %5047 = vmatmul.bf16.vlgmr.msra.gmra.mxu3 %v14624_v29  ;;  %5130 = vmatpush.bf16.msrb.mxu2 %v11404_v10  ;;  %16803 = vst [vmem:[#allocation102_spill] sm:$0xff] %v15103_v23  ;;  %v15112_v2 = vsel %vm6983_vm2, 1, %v16804_v3 }
 0x1be   :  { %5072 = vmatpush.bf16.msrb.mxu0 %v11148_v41  ;;  %16805 = vst [vmem:[#allocation103_spill] sm:$0xff] %v15112_v2 }
 0x1bf   :  { %v4787_v16 = vpop.f32.mrf.mxu2 }
 0x1c0   :  { %v4788_v61 = vadd.f32 %v4787_v16, %v4759_v22  ;;  %v15098_v31 = vpop.f32.mrf.mxu3  ;;  %v4731_v63 = vpop.f32.mrf.mxu0  ;;  %5159 = vmatpush.bf16.msrb.mxu3 %v11532_v27  ;;  %v13649_v16 = vld [vmem:[#allocation15 + $0xb44] sm:$0xf]  ;;  %v11276_v27 = vor.u32 %v13621_v11, %v11273_v59  ;;  %v11369_v11 = vld [vmem:[#allocation15 + $0xb30] sm:$0xf0] }
 0x1c1   :  { %v4732_v20 = vadd.f32 %v4731_v63, %v15065_v14  ;;  %v4760_v21 = vpop.f32.mrf.mxu1  ;;  %v6939_v14 = vperm.slane %v15103_v23, 0  ;;  %v11385_v63 = vld [vmem:[#allocation15 + $0xb50] sm:$0xf0]  ;;  %v13581_v59 = vld [vmem:[#allocation15 + $0x924] sm:$0xf] }
 0x1c2   :  { %vm6523_vm0 = vcmp.ge.f32.partialorder %v4788_v61, 1.25  ;;  %v6556_v62 = vmul.f32 0.75, %v4788_v61  ;;  %5101 = vmatpush.bf16.msrb.mxu1 %v11276_v27 }
 0x1c3   :  { %v4761_v9 = vadd.f32 %v4760_v21, %v4732_v20  ;;  %v6545_v15 = vsel %vm6523_vm0, 0.0, %v4788_v61  ;;  %v13585_v20 = vld [vmem:[#allocation15 + $0x944] sm:$0xf]  ;;  %v11129_v21 = vld [vmem:[#allocation15 + $0x950] sm:$0xf0]  ;;  %vm15117_vm3 = vcmp.eq.s32.totalorder %v6939_v14, 1 }
 0x1c4   :  { %v6564_v40 = vmul.f32 0.97, %v6545_v15  ;;  %v11388_v15 = vor.u32 %v13649_v16, %v11385_v63  ;;  %v11132_v29 = vor.u32 %v13585_v20, %v11129_v21  ;;  %v13677_v63 = vld [vmem:[#allocation15 + $0xc24] sm:$0xf]  ;;  %v16671_v20 = vmov 0.0  }
 0x1c5   :  { %v15123_v21 = vsel %vm6523_vm0, 1.0, %v16671_v20 }
 0x1c6   :  { %5131 = vmatpush.bf16.msrb.mxu2 %v11388_v15  ;;  %5073 = vmatpush.bf16.msrb.mxu0 %v11132_v29 }
 0x1c7   :  { %v4789_v22 = vpop.f32.mrf.mxu2 }
 0x1c8   :  { %v4790_v5 = vadd.f32 %v4789_v22, %v4761_v9  ;;  %v15106_v48 = vpop.f32.mrf.mxu3  ;;  %v4734_v6 = vpop.f32.mrf.mxu0  ;;  %v13681_v9 = vld [vmem:[#allocation15 + $0xc44] sm:$0xf]  ;;  %v11513_v22 = vld [vmem:[#allocation15 + $0xc50] sm:$0xf0] }
 0x1c9   :  { %v4735_v10 = vadd.f32 %v4734_v6, %v15072_v7  ;;  %v4763_v60 = vpop.f32.mrf.mxu1  ;;  %v11257_v6 = vld [vmem:[#allocation15 + $0xa50] sm:$0xf0] }
 0x1ca   :  { %v6560_v41 = vadd.f32 %v6556_v62, %v4790_v5  ;;  %v11516_v62 = vor.u32 %v13681_v9, %v11513_v22  ;;  %v13617_v5 = vld [vmem:[#allocation15 + $0xa44] sm:$0xf] }
 0x1cb   :  { %v4764_v24 = vadd.f32 %v4763_v60, %v4735_v10  ;;  %4965 = vmatmul.bf16.gmra.mxu0 %v14518_v46  ;;  %4994 = vmatmul.bf16.gmra.mxu1 %v14520_v47  ;;  %v11260_v10 = vor.u32 %v13617_v5, %v11257_v6  ;;  %v13645_v60 = vld [vmem:[#allocation15 + $0xb24] sm:$0xf]  ;;  %v11497_v5 = vld [vmem:[#allocation15 + $0xc30] sm:$0xf0] }
 0x1cc   :  { %v6568_v7 = vadd.f32 %v6564_v40, %v6560_v41  ;;  %5023 = vmatmul.bf16.gmra.mxu2 %v14522_v49  ;;  %v11372_v44 = vor.u32 %v13645_v60, %v11369_v11  ;;  %v11113_v40 = vld [vmem:[#allocation15 + $0x930] sm:$0xf0]  ;;  %5160 = vmatpush.bf16.msrb.mxu3 %v11516_v62  ;;  %v6605_v3 = vmul.f32 0.75, %v6560_v41  ;;  %v11500_v60 = vor.u32 %v13677_v63, %v11497_v5  ;;  %v13613_v41 = vld [vmem:[#allocation15 + $0xa24] sm:$0xf] }
 0x1cd   :  { %5052 = vmatmul.bf16.gmra.mxu3 %v14662_v8  ;;  %v11116_v14 = vor.u32 %v13581_v59, %v11113_v40  ;;  %5102 = vmatpush.bf16.msrb.mxu1 %v11260_v10  ;;  %v11241_v40 = vld [vmem:[#allocation15 + $0xa30] sm:$0xf0]  ;;  %v13609_v49 = vld [vmem:[#allocation15 + $0xa04] sm:$0xf] }
 0x1ce   :  { %vm6572_vm4 = vcmp.ge.f32.partialorder %v6568_v7, 1.25  ;;  %5132 = vmatpush.bf16.msrb.mxu2 %v11372_v44  ;;  %v11244_v29 = vor.u32 %v13613_v41, %v11241_v40  ;;  %v11353_v44 = vld [vmem:[#allocation15 + $0xb10] sm:$0xf0]  ;;  %v13673_v40 = vld [vmem:[#allocation15 + $0xc04] sm:$0xf] }
 0x1cf   :  { %v4792_v27 = vpop.f32.mrf.mxu2  ;;  %v15126_v9 = vsel %vm6572_vm4, 1.0, %v16671_v20  ;;  %v6594_v22 = vsel %vm6572_vm4, 0.0, %v6568_v7  ;;  %v6985_v7 = vperm.slane %v15112_v2, 0  ;;  %5074 = vmatpush.bf16.msrb.mxu0 %v11116_v14  ;;  %v11225_v2 = vld [vmem:[#allocation15 + $0xa10] sm:$0xf0] }
 0x1d0   :  { %v4793_v6 = vadd.f32 %v4792_v27, %v4764_v24  ;;  %v15132_v15 = vpop.f32.mrf.mxu3  ;;  %v4736_v61 = vpop.f32.mrf.mxu0  ;;  %v6613_v59 = vmul.f32 0.97, %v6594_v22  ;;  %5161 = vmatpush.bf16.msrb.mxu3 %v11500_v60  ;;  %v13641_v22 = vld [vmem:[#allocation15 + $0xb04] sm:$0xf] }
 0x1d1   :  { %v4737_v11 = vadd.f32 %v4736_v61, %v15075_v42  ;;  %v4765_v8 = vpop.f32.mrf.mxu1  ;;  %vm15136_vm5 = vcmp.eq.s32.totalorder %v6985_v7, 1  ;;  %5103 = vmatpush.bf16.msrb.mxu1 %v11244_v29  ;;  %v16810_v42 = vmov 0.0   ;;  %v11356_v60 = vor.u32 %v13641_v22, %v11353_v44  ;;  %v11097_v29 = vld [vmem:[#allocation15 + $0x910] sm:$0xf0] }
 0x1d2   :  { %v6609_v62 = vadd.f32 %v6605_v3, %v4793_v6  ;;  %v11228_v44 = vor.u32 %v13609_v49, %v11225_v2 }
 0x1d3   :  { %v4766_v24 = vadd.f32 %v4765_v8, %v4737_v11  ;;  %v13577_v11 = vld [vmem:[#allocation15 + $0x904] sm:$0xf]  ;;  %5133 = vmatpush.bf16.msrb.mxu2 %v11356_v60 }
 0x1d4   :  { %v6617_v27 = vadd.f32 %v6613_v59, %v6609_v62  ;;  %v6654_v14 = vmul.f32 0.75, %v6609_v62  ;;  %v11100_v41 = vor.u32 %v13577_v11, %v11097_v29  ;;  %v12105_v11 = vld [vmem:[#allocation15 + $0x10f0] sm:$0xf0] }
 0x1d5   :  { %5104 = vmatpush.bf16.msrb.mxu1 %v11228_v44 }
 0x1d6   :  { %vm6621_vm6 = vcmp.ge.f32.partialorder %v6617_v27, 1.25  ;;  %5075 = vmatpush.bf16.msrb.mxu0 %v11100_v41 }
 0x1d7   :  { %v15141_v10 = vsel %vm6621_vm6, 1.0, %v16810_v42  ;;  %v6643_v63 = vsel %vm6621_vm6, 0.0, %v6617_v27  ;;  %v4794_v3 = vpop.f32.mrf.mxu2  ;;  %v11481_v27 = vld [vmem:[#allocation15 + $0xc10] sm:$0xf0] }
 0x1d8   :  { %v6959_v8 = vsel %vm15117_vm3, %v15126_v9, %v15141_v10  ;;  %v4795_v5 = vadd.f32 %v4794_v3, %v4766_v24  ;;  %v15147_v6 = vpop.f32.mrf.mxu3  ;;  %v4739_v61 = vpop.f32.mrf.mxu0  ;;  %v6662_v47 = vmul.f32 0.97, %v6643_v63  ;;  %v11484_v3 = vor.u32 %v13673_v40, %v11481_v27 }
 0x1d9   :  { %v15152_v7 = vsel %vm15136_vm5, %v15123_v21, %v6959_v8  ;;  %v4740_v59 = vadd.f32 %v4739_v61, %v15082_v12  ;;  %v4768_v62 = vpop.f32.mrf.mxu1  ;;  %v13797_v12 = vld [vmem:[#allocation15 + $0xfe4] sm:$0xf]  ;;  %v11977_v8 = vld [vmem:[#allocation15 + $0xff0] sm:$0xf0] }
 0x1da   :  { %v6658_v24 = vadd.f32 %v6654_v14, %v4795_v5  ;;  %v13733_v61 = vld [vmem:[#allocation15 + $0xde4] sm:$0xf]  ;;  %5162 = vmatpush.bf16.msrb.mxu3 %v11484_v3  ;;  %v11980_v63 = vor.u32 %v13797_v12, %v11977_v8  ;;  %v11721_v14 = vld [vmem:[#allocation15 + $0xdf0] sm:$0xf0] }
 0x1db   :  { %v4769_v22 = vadd.f32 %v4768_v62, %v4740_v59  ;;  %4970 = vmatmul.bf16.gmra.mxu0 %v14554_v33  ;;  %4999 = vmatmul.bf16.gmra.mxu1 %v14556_v34  ;;  %v13829_v5 = vld [vmem:[#allocation15 + $0x10e4] sm:$0xf]  ;;  %v11724_v49 = vor.u32 %v13733_v61, %v11721_v14  ;;  %v11849_v8 = vld [vmem:[#allocation15 + $0xef0] sm:$0xf0] }
 0x1dc   :  { %v6666_v23 = vadd.f32 %v6662_v47, %v6658_v24  ;;  %5028 = vmatmul.bf16.gmra.mxu2 %v14558_v35  ;;  %v6703_v59 = vmul.f32 0.75, %v6658_v24  ;;  %v12108_v27 = vor.u32 %v13829_v5, %v12105_v11  ;;  %v13765_v12 = vld [vmem:[#allocation15 + $0xee4] sm:$0xf]  ;;  %v11705_v35 = vld [vmem:[#allocation15 + $0xdd0] sm:$0xf0] }
 0x1dd   :  { %5057 = vmatmul.bf16.gmra.mxu3 %v14702_v30  ;;  %5242 = vmatpush.bf16.msra.mxu2 %v11980_v63  ;;  %v11852_v14 = vor.u32 %v13765_v12, %v11849_v8  ;;  %v11961_v30 = vld [vmem:[#allocation15 + $0xfd0] sm:$0xf0]  ;;  %v13729_v63 = vld [vmem:[#allocation15 + $0xdc4] sm:$0xf] }
 0x1de   :  { %vm6670_vm7 = vcmp.ge.f32.partialorder %v6666_v23, 1.25  ;;  %5184 = vmatpush.bf16.msra.mxu0 %v11724_v49  ;;  %5271 = vmatpush.bf16.msra.mxu3 %v12108_v27  ;;  %v13825_v34 = vld [vmem:[#allocation15 + $0x10c4] sm:$0xf]  ;;  %v11833_v12 = vld [vmem:[#allocation15 + $0xed0] sm:$0xf0] }
 0x1df   :  { %v4797_v60 = vpop.f32.mrf.mxu2  ;;  %v15160_v2 = vsel %vm6670_vm7, 1.0, %v16810_v42  ;;  %v6692_v47 = vsel %vm6670_vm7, 0.0, %v6666_v23  ;;  %5213 = vmatpush.bf16.msra.mxu1 %v11852_v14 }
 0x1e0   :  { %v4798_v29 = vadd.f32 %v4797_v60, %v4769_v22  ;;  %v6963_v62 = vsel %vm15117_vm3, %v15141_v10, %v15160_v2  ;;  %v15166_v41 = vpop.f32.mrf.mxu3  ;;  %v4741_v40 = vpop.f32.mrf.mxu0  ;;  %v6711_v22 = vmul.f32 0.97, %v6692_v47  ;;  %v13793_v60 = vld [vmem:[#allocation15 + $0xfc4] sm:$0xf] }
 0x1e1   :  { %v15171_v3 = vsel %vm15136_vm5, %v15126_v9, %v6963_v62  ;;  %v4742_v23 = vadd.f32 %v4741_v40, %v15085_v28  ;;  %v4770_v44 = vpop.f32.mrf.mxu1  ;;  %v11964_v11 = vor.u32 %v13793_v60, %v11961_v30  ;;  %v11708_v62 = vor.u32 %v13729_v63, %v11705_v35  ;;  %v16813_v60 = vld [vmem:[#allocation56_spill] sm:$0xff]  ;;  %v16814_v63 = vld [vmem:[#allocation57_spill] sm:$0xff] }
 0x1e2   :  { %16811 = vst [vmem:[#allocation104_spill] sm:$0xff] %v15171_v3  ;;  %v6707_v24 = vadd.f32 %v6703_v59, %v4798_v29  ;;  %v12089_v3 = vld [vmem:[#allocation15 + $0x10d0] sm:$0xf0] }
 0x1e3   :  { %v4771_v61 = vadd.f32 %v4770_v44, %v4742_v23  ;;  %5243 = vmatpush.bf16.msra.mxu2 %v11964_v11  ;;  %v12092_v28 = vor.u32 %v13825_v34, %v12089_v3  ;;  %5185 = vmatpush.bf16.msra.mxu0 %v11708_v62  ;;  %v11945_v11 = vld [vmem:[#allocation15 + $0xfb0] sm:$0xf0] }
 0x1e4   :  { %v6715_v5 = vadd.f32 %v6711_v22, %v6707_v24  ;;  %v6752_v59 = vmul.f32 0.75, %v6707_v24  ;;  %v13761_v22 = vld [vmem:[#allocation15 + $0xec4] sm:$0xf] }
 0x1e5   :  { %5272 = vmatpush.bf16.msra.mxu3 %v12092_v28  ;;  %v11689_v28 = vld [vmem:[#allocation15 + $0xdb0] sm:$0xf0] }
 0x1e6   :  { %vm6719_vm8 = vcmp.ge.f32.partialorder %v6715_v5, 1.25 }
 0x1e7   :  { %v15175_v47 = vsel %vm6719_vm8, 1.0, %v16810_v42  ;;  %v6741_v49 = vsel %vm6719_vm8, 0.0, %v6715_v5  ;;  %v4799_v29 = vpop.f32.mrf.mxu2  ;;  %v16815_v5 = vld [vmem:[#allocation70_spill] sm:$0xff] }
 0x1e8   :  { %v6967_v30 = vsel %vm15117_vm3, %v15160_v2, %v15175_v47  ;;  %v4800_v40 = vadd.f32 %v4799_v29, %v4771_v61  ;;  %v15181_v27 = vpop.f32.mrf.mxu3  ;;  %v4744_v35 = vpop.f32.mrf.mxu0  ;;  %v6760_v44 = vmul.f32 0.97, %v6741_v49  ;;  %v11836_v61 = vor.u32 %v13761_v22, %v11833_v12  ;;  %v13821_v49 = vld [vmem:[#allocation15 + $0x10a4] sm:$0xf] }
 0x1e9   :  { %v15186_v34 = vsel %vm15136_vm5, %v15141_v10, %v6967_v30  ;;  %v4745_v3 = vadd.f32 %v4744_v35, %v15091_v58  ;;  %v4773_v23 = vpop.f32.mrf.mxu1  ;;  %v13789_v10 = vld [vmem:[#allocation15 + $0xfa4] sm:$0xf]  ;;  %v12073_v35 = vld [vmem:[#allocation15 + $0x10b0] sm:$0xf0] }
 0x1ea   :  { %16812 = vst [vmem:[#allocation105_spill] sm:$0xff] %v15186_v34  ;;  %v6756_v24 = vadd.f32 %v6752_v59, %v4800_v40  ;;  %5214 = vmatpush.bf16.msra.mxu1 %v11836_v61  ;;  %v13725_v58 = vld [vmem:[#allocation15 + $0xda4] sm:$0xf]  ;;  %v11948_v62 = vor.u32 %v13789_v10, %v11945_v11  ;;  %v12076_v61 = vor.u32 %v13821_v49, %v12073_v35  ;;  %v12057_v35 = vld [vmem:[#allocation15 + $0x1090] sm:$0xf0] }
 0x1eb   :  { %v4774_v8 = vadd.f32 %v4773_v23, %v4745_v3  ;;  %4975 = vmatmul.bf16.gmra.mxu0 %v14590_v26  ;;  %5004 = vmatmul.bf16.gmra.mxu1 %v16813_v60  ;;  %v11692_v40 = vor.u32 %v13725_v58, %v11689_v28  ;;  %v13817_v49 = vld [vmem:[#allocation15 + $0x1084] sm:$0xf] }
 0x1ec   :  { %v6764_v14 = vadd.f32 %v6760_v44, %v6756_v24  ;;  %5033 = vmatmul.bf16.gmra.mxu2 %v16814_v63  ;;  %v6801_v23 = vmul.f32 0.75, %v6756_v24  ;;  %5273 = vmatpush.bf16.msra.mxu3 %v12076_v61  ;;  %v13757_v24 = vld [vmem:[#allocation15 + $0xea4] sm:$0xf] }
 0x1ed   :  { %5062 = vmatmul.bf16.gmra.mxu3 %v16815_v5  ;;  %5244 = vmatpush.bf16.msra.mxu2 %v11948_v62  ;;  %v11929_v5 = vld [vmem:[#allocation15 + $0xf90] sm:$0xf0]  ;;  %v13721_v63 = vld [vmem:[#allocation15 + $0xd84] sm:$0xf] }
 0x1ee   :  { %vm6768_vm9 = vcmp.ge.f32.partialorder %v6764_v14, 1.25  ;;  %5186 = vmatpush.bf16.msra.mxu0 %v11692_v40  ;;  %v11673_v62 = vld [vmem:[#allocation15 + $0xd90] sm:$0xf0] }
 0x1ef   :  { %v4802_v29 = vpop.f32.mrf.mxu2  ;;  %v12393_v59 = vsel %vm6768_vm9, 1.0, %v16810_v42  ;;  %v6790_v30 = vsel %vm6768_vm9, 0.0, %v6764_v14  ;;  %v11676_v34 = vor.u32 %v13721_v63, %v11673_v62  ;;  %v11657_v62 = vld [vmem:[#allocation15 + $0xd70] sm:$0xf0] }
 0x1f0   :  { %v4803_v3 = vadd.f32 %v4802_v29, %v4774_v8  ;;  %v6971_v44 = vsel %vm15117_vm3, %v15175_v47, %v12393_v59  ;;  %v15197_v22 = vpop.f32.mrf.mxu3  ;;  %v4746_v12 = vpop.f32.mrf.mxu0  ;;  %v6809_v58 = vmul.f32 0.97, %v6790_v30  ;;  %v11817_v8 = vld [vmem:[#allocation15 + $0xeb0] sm:$0xf0]  ;;  %v13785_v29 = vld [vmem:[#allocation15 + $0xf84] sm:$0xf] }
 0x1f1   :  { %v15202_v10 = vsel %vm15136_vm5, %v15160_v2, %v6971_v44  ;;  %v4775_v11 = vpop.f32.mrf.mxu1  ;;  %v11820_v28 = vor.u32 %v13757_v24, %v11817_v8  ;;  %v11932_v12 = vor.u32 %v13785_v29, %v11929_v5  ;;  %v12060_v2 = vor.u32 %v13817_v49, %v12057_v35  ;;  %v16819_v24 = vld [vmem:[#allocation60_spill] sm:$0xff]  ;;  %v16820_v8 = vld [vmem:[#allocation61_spill] sm:$0xff]  ;;  %v11913_v29 = vld [vmem:[#allocation15 + $0xf70] sm:$0xf0] }
 0x1f2   :  { %16816 = vst [vmem:[#allocation106_spill] sm:$0xff] %v15202_v10  ;;  %v6805_v14 = vadd.f32 %v6801_v23, %v4803_v3  ;;  %5187 = vmatpush.bf16.msra.mxu0 %v11676_v34  ;;  %v11801_v11 = vld [vmem:[#allocation15 + $0xe90] sm:$0xf0]  ;;  %v10143_v10 = vld [vmem:[#allocation15 + $0x188] sm:$0xf] }
 0x1f3   :  { %5215 = vmatpush.bf16.msra.mxu1 %v11820_v28  ;;  %5245 = vmatpush.bf16.msra.mxu2 %v11932_v12  ;;  %v13781_v28 = vld [vmem:[#allocation15 + $0xf64] sm:$0xf]  ;;  %v12041_v49 = vld [vmem:[#allocation15 + $0x1070] sm:$0xf0] }
 0x1f4   :  { %v6813_v60 = vadd.f32 %v6809_v58, %v6805_v14  ;;  %5274 = vmatpush.bf16.msra.mxu3 %v12060_v2  ;;  %v16818_v58 = vld [vmem:[#allocation59_spill] sm:$0xff]  ;;  %v11916_v12 = vor.u32 %v13781_v28, %v11913_v29  ;;  %v13777_v29 = vld [vmem:[#allocation15 + $0xf44] sm:$0xf] }
 0x1f6   :  { %vm6817_vm10 = vcmp.ge.f32.partialorder %v6813_v60, 1.25  ;;  %v13753_v60 = vld [vmem:[#allocation15 + $0xe84] sm:$0xf] }
 0x1f7   :  { %v12397_v40 = vsel %vm6817_vm10, 1.0, %v16810_v42  ;;  %v4804_v30 = vpop.f32.mrf.mxu2  ;;  %v11804_v34 = vor.u32 %v13753_v60, %v11801_v11  ;;  %5246 = vmatpush.bf16.msra.mxu2 %v11916_v12  ;;  %v13749_v60 = vld [vmem:[#allocation15 + $0xe64] sm:$0xf]  ;;  %v11785_v11 = vld [vmem:[#allocation15 + $0xe70] sm:$0xf0] }
 0x1f8   :  { %v6975_v3 = vsel %vm15117_vm3, %v12393_v59, %v12397_v40  ;;  %v4833_v23 = vpop.f32.mrf.mxu3  ;;  %v4845_v44 = vpop.f32.mrf.mxu0  ;;  %v16821_v59 = vld [vmem:[#allocation74_spill] sm:$0xff]  ;;  %v11788_v28 = vor.u32 %v13749_v60, %v11785_v11  ;;  %v16822_v60 = vld [vmem:[#allocation63_spill] sm:$0xff] }
 0x1f9   :  { %v15210_v5 = vsel %vm15136_vm5, %v15175_v47, %v6975_v3  ;;  %v4846_v63 = vadd.f32 %v4845_v44, %v15098_v31  ;;  %v4874_v61 = vpop.f32.mrf.mxu1  ;;  %5216 = vmatpush.bf16.msra.mxu1 %v11804_v34  ;;  %v13717_v47 = vld [vmem:[#allocation15 + $0xd64] sm:$0xf] }
 0x1fa   :  { %16817 = vst [vmem:[#allocation107_spill] sm:$0xff] %v15210_v5  ;;  %v13813_v31 = vld [vmem:[#allocation15 + $0x1064] sm:$0xf]  ;;  %v11660_v2 = vor.u32 %v13717_v47, %v11657_v62  ;;  %v11641_v62 = vld [vmem:[#allocation15 + $0xd50] sm:$0xf0] }
 0x1fb   :  { %v4875_v14 = vadd.f32 %v4874_v61, %v4846_v63  ;;  %5076 = vmatmul.bf16.vlgmr.msrb.gmra.mxu0 %v16818_v58  ;;  %5105 = vmatmul.bf16.vlgmr.msrb.gmra.mxu1 %v16819_v24  ;;  %v12044_v40 = vor.u32 %v13813_v31, %v12041_v49  ;;  %v12025_v31 = vld [vmem:[#allocation15 + $0x1050] sm:$0xf0]  ;;  %v13705_v24 = vld [vmem:[#allocation15 + $0xd04] sm:$0xf] }
 0x1fc   :  { %5134 = vmatmul.bf16.vlgmr.msrb.gmra.mxu2 %v16820_v8  ;;  %5188 = vmatpush.bf16.msra.mxu0 %v11660_v2  ;;  %v13713_v8 = vld [vmem:[#allocation15 + $0xd44] sm:$0xf] }
 0x1fd   :  { %5163 = vmatmul.bf16.vlgmr.msrb.gmra.mxu3 %v16821_v59  ;;  %v11897_v59 = vld [vmem:[#allocation15 + $0xf50] sm:$0xf0]  ;;  %5217 = vmatpush.bf16.msra.mxu1 %v11788_v28  ;;  %v11644_v12 = vor.u32 %v13713_v8, %v11641_v62  ;;  %v16823_v8 = vld [vmem:[#allocation64_spill] sm:$0xff]  ;;  %v16824_v28 = vld [vmem:[#allocation65_spill] sm:$0xff] }
 0x1fe   :  { %5275 = vmatpush.bf16.msra.mxu3 %v12044_v40  ;;  %v11900_v47 = vor.u32 %v13777_v29, %v11897_v59  ;;  %v11769_v59 = vld [vmem:[#allocation15 + $0xe50] sm:$0xf0]  ;;  %v16825_v29 = vld [vmem:[#allocation78_spill] sm:$0xff]  ;;  %v13709_v62 = vld [vmem:[#allocation15 + $0xd24] sm:$0xf] }
 0x1ff   :  { %v4903_v35 = vpop.f32.mrf.mxu2  ;;  %v13857_v5 = vld [vmem:[#allocation15 + $0x11c4] sm:$0xf] }
 0x200   :  { %v4904_v30 = vadd.f32 %v4903_v35, %v4875_v14  ;;  %v4932_v3 = vpop.f32.mrf.mxu3  ;;  %v4847_v23 = vpop.f32.mrf.mxu0  ;;  %v13809_v14 = vld [vmem:[#allocation15 + $0x1044] sm:$0xf]  ;;  %5247 = vmatpush.bf16.msra.mxu2 %v11900_v47  ;;  %5189 = vmatpush.bf16.msra.mxu0 %v11644_v12  ;;  %v11881_v47 = vld [vmem:[#allocation15 + $0xf30] sm:$0xf0] }
 0x201   :  { %v4848_v44 = vadd.f32 %v4847_v23, %v15106_v48  ;;  %v4876_v63 = vpop.f32.mrf.mxu1  ;;  %v12028_v49 = vor.u32 %v13809_v14, %v12025_v31  ;;  %v11625_v14 = vld [vmem:[#allocation15 + $0xd30] sm:$0xf0]  ;;  %v13805_v31 = vld [vmem:[#allocation15 + $0x1024] sm:$0xf] }
 0x202   :  { %v15218_v61 = vadd.f32 %v4932_v3, %v4904_v30  ;;  %v12009_v12 = vld [vmem:[#allocation15 + $0x1030] sm:$0xf0] }
 0x203   :  { %v4877_v34 = vadd.f32 %v4876_v63, %v4848_v44  ;;  %5276 = vmatpush.bf16.msra.mxu3 %v12028_v49  ;;  %v13745_v44 = vld [vmem:[#allocation15 + $0xe44] sm:$0xf] }
 0x204   :  { %v11772_v11 = vor.u32 %v13745_v44, %v11769_v59 }
 0x206   :  { %5218 = vmatpush.bf16.msra.mxu1 %v11772_v11  ;;  %v13741_v11 = vld [vmem:[#allocation15 + $0xe24] sm:$0xf] }
 0x207   :  { %v4905_v48 = vpop.f32.mrf.mxu2 }
 0x208   :  { %v4906_v35 = vadd.f32 %v4905_v48, %v4877_v34  ;;  %v4934_v2 = vpop.f32.mrf.mxu3  ;;  %v4850_v40 = vpop.f32.mrf.mxu0  ;;  %v13773_v34 = vld [vmem:[#allocation15 + $0xf24] sm:$0xf]  ;;  %v11628_v48 = vor.u32 %v13709_v62, %v11625_v14  ;;  %v11609_v62 = vld [vmem:[#allocation15 + $0xd10] sm:$0xf0] }
 0x209   :  { %v4851_v30 = vadd.f32 %v4850_v40, %v15132_v15  ;;  %v4879_v3 = vpop.f32.mrf.mxu1  ;;  %v11884_v15 = vor.u32 %v13773_v34, %v11881_v47  ;;  %v13769_v34 = vld [vmem:[#allocation15 + $0xf04] sm:$0xf] }
 0x20a   :  { %v15221_v23 = vadd.f32 %v4934_v2, %v4906_v35  ;;  %v12012_v35 = vor.u32 %v13805_v31, %v12009_v12  ;;  %5190 = vmatpush.bf16.msra.mxu0 %v11628_v48  ;;  %v13801_v31 = vld [vmem:[#allocation15 + $0x1004] sm:$0xf]  ;;  %v11993_v12 = vld [vmem:[#allocation15 + $0x1010] sm:$0xf0] }
 0x20b   :  { %v4880_v63 = vadd.f32 %v4879_v3, %v4851_v30  ;;  %5081 = vmatmul.bf16.gmra.mxu0 %v16822_v60  ;;  %5110 = vmatmul.bf16.gmra.mxu1 %v16823_v8  ;;  %v11865_v8 = vld [vmem:[#allocation15 + $0xf10] sm:$0xf0] }
 0x20c   :  { %5139 = vmatmul.bf16.gmra.mxu2 %v16824_v28  ;;  %5277 = vmatpush.bf16.msra.mxu3 %v12012_v35  ;;  %v11868_v14 = vor.u32 %v13769_v34, %v11865_v8  ;;  %v11737_v48 = vld [vmem:[#allocation15 + $0xe10] sm:$0xf0]  ;;  %v16829_v34 = vld [vmem:[#allocation82_spill] sm:$0xff] }
 0x20d   :  { %5168 = vmatmul.bf16.gmra.mxu3 %v16825_v29  ;;  %5248 = vmatpush.bf16.msra.mxu2 %v11884_v15  ;;  %v11753_v29 = vld [vmem:[#allocation15 + $0xe30] sm:$0xf0]  ;;  %v11996_v15 = vor.u32 %v13801_v31, %v11993_v12  ;;  %v10191_v12 = vld [vmem:[#allocation15 + $0x1e8] sm:$0xf] }
 0x20e   :  { %v11756_v28 = vor.u32 %v13741_v11, %v11753_v29  ;;  %v16826_v8 = vld [vmem:[#allocation67_spill] sm:$0xff]  ;;  %v16828_v11 = vld [vmem:[#allocation69_spill] sm:$0xff] }
 0x20f   :  { %v4908_v49 = vpop.f32.mrf.mxu2  ;;  %v12233_v31 = vld [vmem:[#allocation15 + $0x11f0] sm:$0xf0] }
 0x210   :  { %v4909_v2 = vadd.f32 %v4908_v49, %v4880_v63  ;;  %v4937_v40 = vpop.f32.mrf.mxu3  ;;  %v4852_v30 = vpop.f32.mrf.mxu0  ;;  %v11612_v63 = vor.u32 %v13705_v24, %v11609_v62  ;;  %5219 = vmatpush.bf16.msra.mxu1 %v11756_v28  ;;  %5278 = vmatpush.bf16.msra.mxu3 %v11996_v15  ;;  %v13737_v49 = vld [vmem:[#allocation15 + $0xe04] sm:$0xf]  ;;  %v16827_v28 = vld [vmem:[#allocation68_spill] sm:$0xff]  ;;  %v10063_v62 = vld [vmem:[#allocation15 + $0xe8] sm:$0xf] }
 0x211   :  { %v4853_v3 = vadd.f32 %v4852_v30, %v15147_v6  ;;  %v4881_v44 = vpop.f32.mrf.mxu1  ;;  %5249 = vmatpush.bf16.msra.mxu2 %v11868_v14  ;;  %v11740_v30 = vor.u32 %v13737_v49, %v11737_v48  ;;  %v13861_v14 = vld [vmem:[#allocation15 + $0x11e4] sm:$0xf] }
 0x212   :  { %v15228_v59 = vadd.f32 %v4937_v40, %v4909_v2  ;;  %5191 = vmatpush.bf16.msra.mxu0 %v11612_v63 }
 0x213   :  { %v4882_v47 = vadd.f32 %v4881_v44, %v4853_v3 }
 0x214   :  { %5220 = vmatpush.bf16.msra.mxu1 %v11740_v30 }
 0x217   :  { %v4910_v6 = vpop.f32.mrf.mxu2 }
 0x218   :  { %v4911_v35 = vadd.f32 %v4910_v6, %v4882_v47  ;;  %v4939_v2 = vpop.f32.mrf.mxu3  ;;  %v4855_v40 = vpop.f32.mrf.mxu0  ;;  %v13320_v47 = vld [vmem:[#allocation15 + $0xf4] sm:$0xf0]  ;;  %v12236_v6 = vor.u32 %v13861_v14, %v12233_v31  ;;  %v12217_v31 = vld [vmem:[#allocation15 + $0x11d0] sm:$0xf0] }
 0x219   :  { %v4856_v29 = vadd.f32 %v4855_v40, %v15166_v41  ;;  %v4884_v3 = vpop.f32.mrf.mxu1  ;;  %v10064_v63 = vor.u32 %v13320_v47, %v10063_v62  ;;  %v13352_v41 = vld [vmem:[#allocation15 + $0x1f4] sm:$0xf0] }
 0x21a   :  { %v15231_v44 = vadd.f32 %v4939_v2, %v4911_v35  ;;  %v10192_v49 = vor.u32 %v13352_v41, %v10191_v12  ;;  %5300 = vmatpush.bf16.msrb.mxu0 %v12236_v6  ;;  %v13348_v12 = vld [vmem:[#allocation15 + $0x1d4] sm:$0xf0] }
 0x21b   :  { %v4885_v24 = vadd.f32 %v4884_v3, %v4856_v29  ;;  %5086 = vmatmul.bf16.gmra.mxu0 %v16826_v8  ;;  %5115 = vmatmul.bf16.gmra.mxu1 %v16827_v28  ;;  %v13893_v3 = vld [vmem:[#allocation15 + $0x12e4] sm:$0xf]  ;;  %v13316_v28 = vld [vmem:[#allocation15 + $0xd4] sm:$0xf0] }
 0x21c   :  { %5144 = vmatmul.bf16.gmra.mxu2 %v16828_v11  ;;  %5387 = vmatpush.bf16.msrb.mxu3 %v10192_v49  ;;  %v10047_v11 = vld [vmem:[#allocation15 + $0xc8] sm:$0xf] }
 0x21d   :  { %5173 = vmatmul.bf16.gmra.mxu3 %v16829_v34  ;;  %5358 = vmatpush.bf16.msrb.mxu2 %v10064_v63  ;;  %v12361_v34 = vld [vmem:[#allocation15 + $0x12f0] sm:$0xf0]  ;;  %v10048_v14 = vor.u32 %v13316_v28, %v10047_v11  ;;  %v12220_v63 = vor.u32 %v13857_v5, %v12217_v31  ;;  %v16831_v5 = vld [vmem:[#allocation72_spill] sm:$0xff]  ;;  %v13853_v31 = vld [vmem:[#allocation15 + $0x11a4] sm:$0xf] }
 0x21e   :  { %v12364_v47 = vor.u32 %v13893_v3, %v12361_v34  ;;  %v12345_v28 = vld [vmem:[#allocation15 + $0x12d0] sm:$0xf0]  ;;  %v16832_v3 = vld [vmem:[#allocation73_spill] sm:$0xff] }
 0x21f   :  { %v4913_v15 = vpop.f32.mrf.mxu2  ;;  %5301 = vmatpush.bf16.msrb.mxu0 %v12220_v63  ;;  %v13344_v63 = vld [vmem:[#allocation15 + $0x1b4] sm:$0xf0] }
 0x220   :  { %v4914_v48 = vadd.f32 %v4913_v15, %v4885_v24  ;;  %v4942_v35 = vpop.f32.mrf.mxu3  ;;  %v4857_v2 = vpop.f32.mrf.mxu0  ;;  %v10175_v24 = vld [vmem:[#allocation15 + $0x1c8] sm:$0xf]  ;;  %5329 = vmatpush.bf16.msrb.mxu1 %v12364_v47 }
 0x221   :  { %v4858_v40 = vadd.f32 %v4857_v2, %v15181_v27  ;;  %v4886_v30 = vpop.f32.mrf.mxu1  ;;  %v10176_v41 = vor.u32 %v13348_v12, %v10175_v24  ;;  %5359 = vmatpush.bf16.msrb.mxu2 %v10048_v14  ;;  %v13889_v2 = vld [vmem:[#allocation15 + $0x12c4] sm:$0xf]  ;;  %v16833_v47 = vld [vmem:[#allocation86_spill] sm:$0xff]  ;;  %v13312_v14 = vld [vmem:[#allocation15 + $0xb4] sm:$0xf0] }
 0x222   :  { %v15238_v29 = vadd.f32 %v4942_v35, %v4914_v48  ;;  %v12201_v24 = vld [vmem:[#allocation15 + $0x11b0] sm:$0xf0]  ;;  %v10159_v12 = vld [vmem:[#allocation15 + $0x1a8] sm:$0xf] }
 0x223   :  { %v4887_v62 = vadd.f32 %v4886_v30, %v4858_v40  ;;  %5388 = vmatpush.bf16.msrb.mxu3 %v10176_v41  ;;  %v16830_v40 = vld [vmem:[#allocation71_spill] sm:$0xff]  ;;  %v12348_v30 = vor.u32 %v13889_v2, %v12345_v28  ;;  %v13885_v28 = vld [vmem:[#allocation15 + $0x12a4] sm:$0xf] }
 0x225   :  { %5330 = vmatpush.bf16.msrb.mxu1 %v12348_v30  ;;  %v12329_v30 = vld [vmem:[#allocation15 + $0x12b0] sm:$0xf0] }
 0x227   :  { %v4915_v27 = vpop.f32.mrf.mxu2 }
 0x228   :  { %v4916_v15 = vadd.f32 %v4915_v27, %v4887_v62  ;;  %v4944_v6 = vpop.f32.mrf.mxu3  ;;  %v4860_v49 = vpop.f32.mrf.mxu0  ;;  %v10031_v62 = vld [vmem:[#allocation15 + $0xa8] sm:$0xf]  ;;  %v12204_v27 = vor.u32 %v13853_v31, %v12201_v24  ;;  %v13340_v31 = vld [vmem:[#allocation15 + $0x194] sm:$0xf0] }
 0x229   :  { %v4861_v48 = vadd.f32 %v4860_v49, %v15197_v22  ;;  %v4889_v34 = vpop.f32.mrf.mxu1  ;;  %v10032_v22 = vor.u32 %v13312_v14, %v10031_v62  ;;  %v13308_v62 = vld [vmem:[#allocation15 + $0x94] sm:$0xf0]  ;;  %v13849_v14 = vld [vmem:[#allocation15 + $0x1184] sm:$0xf]  ;;  %v10144_v24 = vor.u32 %v13340_v31, %v10143_v10  ;;  %v9999_v10 = vld [vmem:[#allocation15 + $0x68] sm:$0xf] }
 0x22a   :  { %v15241_v35 = vadd.f32 %v4944_v6, %v4916_v15  ;;  %v10160_v15 = vor.u32 %v13344_v63, %v10159_v12  ;;  %5302 = vmatpush.bf16.msrb.mxu0 %v12204_v27 }
 0x22b   :  { %v4890_v11 = vadd.f32 %v4889_v34, %v4861_v48  ;;  %5091 = vmatmul.bf16.gmra.mxu0 %v16830_v40  ;;  %5120 = vmatmul.bf16.gmra.mxu1 %v16831_v5  ;;  %v12185_v40 = vld [vmem:[#allocation15 + $0x1190] sm:$0xf0] }
 0x22c   :  { %5149 = vmatmul.bf16.gmra.mxu2 %v16832_v3  ;;  %5389 = vmatpush.bf16.msrb.mxu3 %v10160_v15  ;;  %v10015_v3 = vld [vmem:[#allocation15 + $0x88] sm:$0xf]  ;;  %v13881_v15 = vld [vmem:[#allocation15 + $0x1284] sm:$0xf] }
 0x22d   :  { %5178 = vmatmul.bf16.gmra.mxu3 %v16833_v47  ;;  %5360 = vmatpush.bf16.msrb.mxu2 %v10032_v22  ;;  %v12332_v47 = vor.u32 %v13885_v28, %v12329_v30  ;;  %v10016_v5 = vor.u32 %v13308_v62, %v10015_v3  ;;  %v12169_v30 = vld [vmem:[#allocation15 + $0x1170] sm:$0xf0]  ;;  %v13336_v62 = vld [vmem:[#allocation15 + $0x174] sm:$0xf0] }
 0x22f   :  { %v4918_v41 = vpop.f32.mrf.mxu2  ;;  %5331 = vmatpush.bf16.msrb.mxu1 %v12332_v47  ;;  %v16836_v47 = vld [vmem:[#allocation77_spill] sm:$0xff] }
 0x230   :  { %v4919_v6 = vadd.f32 %v4918_v41, %v4890_v11  ;;  %v4947_v49 = vpop.f32.mrf.mxu3  ;;  %v4862_v48 = vpop.f32.mrf.mxu0  ;;  %v12188_v11 = vor.u32 %v13849_v14, %v12185_v40  ;;  %5390 = vmatpush.bf16.msrb.mxu3 %v10144_v24  ;;  %v13304_v40 = vld [vmem:[#allocation15 + $0x74] sm:$0xf0] }
 0x231   :  { %v4891_v34 = vpop.f32.mrf.mxu1  ;;  %5361 = vmatpush.bf16.msrb.mxu2 %v10016_v5  ;;  %v16834_v48 = vld [vmem:[#allocation75_spill] sm:$0xff]  ;;  %v13845_v5 = vld [vmem:[#allocation15 + $0x1164] sm:$0xf]  ;;  %v10000_v28 = vor.u32 %v13304_v40, %v9999_v10  ;;  %v9983_v40 = vld [vmem:[#allocation15 + $0x48] sm:$0xf] }
 0x232   :  { %v15247_v2 = vadd.f32 %v4947_v49, %v4919_v6  ;;  %5303 = vmatpush.bf16.msrb.mxu0 %v12188_v11  ;;  %v12313_v6 = vld [vmem:[#allocation15 + $0x1290] sm:$0xf0]  ;;  %v16835_v34 = vld [vmem:[#allocation76_spill] sm:$0xff]  ;;  %v12172_v31 = vor.u32 %v13845_v5, %v12169_v30 }
 0x233   :  { %v12316_v3 = vor.u32 %v13881_v15, %v12313_v6  ;;  %v13877_v15 = vld [vmem:[#allocation15 + $0x1264] sm:$0xf]  ;;  %v12297_v6 = vld [vmem:[#allocation15 + $0x1270] sm:$0xf0] }
 0x234   :  { %v12300_v10 = vor.u32 %v13877_v15, %v12297_v6  ;;  %v12153_v30 = vld [vmem:[#allocation15 + $0x1150] sm:$0xf0] }
 0x235   :  { %5332 = vmatpush.bf16.msrb.mxu1 %v12316_v3  ;;  %5362 = vmatpush.bf16.msrb.mxu2 %v10000_v28  ;;  %v16837_v15 = vld [vmem:[#allocation79_spill] sm:$0xff] }
 0x236   :  { %5304 = vmatpush.bf16.msrb.mxu0 %v12172_v31 }
 0x237   :  { %v4920_v22 = vpop.f32.mrf.mxu2 }
 0x238   :  { %v4949_v12 = vpop.f32.mrf.mxu3  ;;  %v4961_v63 = vpop.f32.mrf.mxu0 }
 0x239   :  { %v4962_v41 = vadd.f32 %v4961_v63, %v15218_v61  ;;  %v4990_v27 = vpop.f32.mrf.mxu1  ;;  %v10127_v61 = vld [vmem:[#allocation15 + $0x168] sm:$0xf]  ;;  %5333 = vmatpush.bf16.msrb.mxu1 %v12300_v10  ;;  %v16839_v10 = vld [vmem:[#allocation81_spill] sm:$0xff] }
 0x23a   :  { %v10128_v11 = vor.u32 %v13336_v62, %v10127_v61  ;;  %v13332_v61 = vld [vmem:[#allocation15 + $0x154] sm:$0xf0] }
 0x23b   :  { %v4991_v49 = vadd.f32 %v4990_v27, %v4962_v41  ;;  %5192 = vmatmul.bf16.vlgmr.msra.gmra.mxu0 %v16834_v48  ;;  %5221 = vmatmul.bf16.vlgmr.msra.gmra.mxu1 %v16835_v34  ;;  %v10655_v34 = vld [vmem:[#allocation15 + $0x588] sm:$0xf] }
 0x23c   :  { %5250 = vmatmul.bf16.vlgmr.msra.gmra.mxu2 %v16836_v47  ;;  %5391 = vmatpush.bf16.msrb.mxu3 %v10128_v11  ;;  %v13841_v47 = vld [vmem:[#allocation15 + $0x1144] sm:$0xf] }
 0x23d   :  { %5279 = vmatmul.bf16.vlgmr.msra.gmra.mxu3 %v14941_v43  ;;  %v13300_v43 = vld [vmem:[#allocation15 + $0x54] sm:$0xf0]  ;;  %v12156_v28 = vor.u32 %v13841_v47, %v12153_v30  ;;  %v12137_v30 = vld [vmem:[#allocation15 + $0x1130] sm:$0xf0] }
 0x23e   :  { %v9984_v5 = vor.u32 %v13300_v43, %v9983_v40  ;;  %v12281_v43 = vld [vmem:[#allocation15 + $0x1250] sm:$0xf0]  ;;  %v16838_v47 = vld [vmem:[#allocation80_spill] sm:$0xff] }
 0x23f   :  { %v5019_v14 = vpop.f32.mrf.mxu2  ;;  %5305 = vmatpush.bf16.msrb.mxu0 %v12156_v28  ;;  %v13296_v40 = vld [vmem:[#allocation15 + $0x34] sm:$0xf0] }
 0x240   :  { %v5020_v24 = vadd.f32 %v5019_v14, %v4991_v49  ;;  %v5048_v22 = vpop.f32.mrf.mxu3  ;;  %v4963_v12 = vpop.f32.mrf.mxu0  ;;  %v10111_v49 = vld [vmem:[#allocation15 + $0x148] sm:$0xf]  ;;  %5363 = vmatpush.bf16.msrb.mxu2 %v9984_v5  ;;  %v13837_v5 = vld [vmem:[#allocation15 + $0x1124] sm:$0xf] }
 0x241   :  { %v4964_v63 = vadd.f32 %v4963_v12, %v15221_v23  ;;  %v4992_v41 = vpop.f32.mrf.mxu1  ;;  %v10112_v62 = vor.u32 %v13332_v61, %v10111_v49  ;;  %v10095_v49 = vld [vmem:[#allocation15 + $0x128] sm:$0xf]  ;;  %v13328_v61 = vld [vmem:[#allocation15 + $0x134] sm:$0xf0] }
 0x242   :  { %v15255_v27 = vadd.f32 %v5048_v22, %v5020_v24 }
 0x243   :  { %v4993_v3 = vadd.f32 %v4992_v41, %v4964_v63  ;;  %5392 = vmatpush.bf16.msrb.mxu3 %v10112_v62  ;;  %v13873_v63 = vld [vmem:[#allocation15 + $0x1244] sm:$0xf]  ;;  %v12140_v62 = vor.u32 %v13837_v5, %v12137_v30  ;;  %v12121_v5 = vld [vmem:[#allocation15 + $0x1110] sm:$0xf0] }
 0x244   :  { %v12284_v6 = vor.u32 %v13873_v63, %v12281_v43  ;;  %v13869_v43 = vld [vmem:[#allocation15 + $0x1224] sm:$0xf] }
 0x245   :  { %5306 = vmatpush.bf16.msrb.mxu0 %v12140_v62  ;;  %v12249_v62 = vld [vmem:[#allocation15 + $0x1210] sm:$0xf0] }
 0x246   :  { %5334 = vmatpush.bf16.msrb.mxu1 %v12284_v6  ;;  %v12265_v6 = vld [vmem:[#allocation15 + $0x1230] sm:$0xf0] }
 0x247   :  { %v5021_v23 = vpop.f32.mrf.mxu2 }
 0x248   :  { %v5022_v14 = vadd.f32 %v5021_v23, %v4993_v3  ;;  %v5050_v31 = vpop.f32.mrf.mxu3  ;;  %v4966_v11 = vpop.f32.mrf.mxu0  ;;  %v9967_v3 = vld [vmem:[#allocation15 + $0x28] sm:$0xf]  ;;  %v10096_v23 = vor.u32 %v13328_v61, %v10095_v49  ;;  %v13324_v61 = vld [vmem:[#allocation15 + $0x114] sm:$0xf0] }
 0x249   :  { %v4967_v24 = vadd.f32 %v4966_v11, %v15228_v59  ;;  %v4995_v22 = vpop.f32.mrf.mxu1  ;;  %v9968_v59 = vor.u32 %v13296_v40, %v9967_v3  ;;  %v9951_v3 = vld [vmem:[#allocation15 + $0x8] sm:$0xf] }
 0x24a   :  { %v15258_v12 = vadd.f32 %v5050_v31, %v5022_v14  ;;  %5393 = vmatpush.bf16.msrb.mxu3 %v10096_v23  ;;  %v10079_v49 = vld [vmem:[#allocation15 + $0x108] sm:$0xf] }
 0x24b   :  { %v4996_v41 = vadd.f32 %v4995_v22, %v4967_v24  ;;  %5197 = vmatmul.bf16.gmra.mxu0 %v16837_v15  ;;  %5226 = vmatmul.bf16.gmra.mxu1 %v16838_v47  ;;  %v13833_v47 = vld [vmem:[#allocation15 + $0x1104] sm:$0xf] }
 0x24c   :  { %5255 = vmatmul.bf16.gmra.mxu2 %v16839_v10  ;;  %v13292_v10 = vld [vmem:[#allocation15 + $0x14] sm:$0xf0] }
 0x24d   :  { %5284 = vmatmul.bf16.gmra.mxu3 %v14973_v52  ;;  %5364 = vmatpush.bf16.msrb.mxu2 %v9968_v59  ;;  %v12268_v52 = vor.u32 %v13869_v43, %v12265_v6  ;;  %v9952_v30 = vor.u32 %v13292_v10, %v9951_v3  ;;  %v10080_v59 = vor.u32 %v13324_v61, %v10079_v49  ;;  %v16840_v10 = vld [vmem:[#allocation83_spill] sm:$0xff]  ;;  %v16842_v6 = vld [vmem:[#allocation85_spill] sm:$0xff]  ;;  %v10575_v3 = vld [vmem:[#allocation15 + $0x4e8] sm:$0xf] }
 0x24e   :  { %v10703_v49 = vld [vmem:[#allocation15 + $0x5e8] sm:$0xf] }
 0x24f   :  { %v5024_v28 = vpop.f32.mrf.mxu2  ;;  %5335 = vmatpush.bf16.msrb.mxu1 %v12268_v52  ;;  %5394 = vmatpush.bf16.msrb.mxu3 %v10080_v59  ;;  %v16841_v52 = vld [vmem:[#allocation84_spill] sm:$0xff] }
 0x250   :  { %v5025_v14 = vadd.f32 %v5024_v28, %v4996_v41  ;;  %v5053_v31 = vpop.f32.mrf.mxu3  ;;  %v4968_v11 = vpop.f32.mrf.mxu0  ;;  %v12124_v41 = vor.u32 %v13833_v47, %v12121_v5  ;;  %v13865_v28 = vld [vmem:[#allocation15 + $0x1204] sm:$0xf]  ;;  %v10319_v5 = vld [vmem:[#allocation15 + $0x2e8] sm:$0xf] }
 0x251   :  { %v4969_v24 = vadd.f32 %v4968_v11, %v15231_v44  ;;  %v4997_v22 = vpop.f32.mrf.mxu1  ;;  %5365 = vmatpush.bf16.msrb.mxu2 %v9952_v30  ;;  %v12252_v11 = vor.u32 %v13865_v28, %v12249_v62 }
 0x252   :  { %v15265_v63 = vadd.f32 %v5053_v31, %v5025_v14  ;;  %5307 = vmatpush.bf16.msrb.mxu0 %v12124_v41  ;;  %v13384_v41 = vld [vmem:[#allocation15 + $0x2f4] sm:$0xf0] }
 0x253   :  { %v4998_v40 = vadd.f32 %v4997_v22, %v4969_v24  ;;  %5336 = vmatpush.bf16.msrb.mxu1 %v12252_v11  ;;  %v10320_v59 = vor.u32 %v13384_v41, %v10319_v5  ;;  %v13380_v41 = vld [vmem:[#allocation15 + $0x2d4] sm:$0xf0] }
 0x256   :  { %5416 = vmatpush.bf16.msra.mxu0 %v10320_v59 }
 0x257   :  { %v5026_v44 = vpop.f32.mrf.mxu2 }
 0x258   :  { %v5027_v23 = vadd.f32 %v5026_v44, %v4998_v40  ;;  %v5055_v14 = vpop.f32.mrf.mxu3  ;;  %v4971_v31 = vpop.f32.mrf.mxu0  ;;  %v13448_v40 = vld [vmem:[#allocation15 + $0x4f4] sm:$0xf0] }
 0x259   :  { %v4972_v24 = vadd.f32 %v4971_v31, %v15238_v29  ;;  %v5000_v22 = vpop.f32.mrf.mxu1  ;;  %v10576_v30 = vor.u32 %v13448_v40, %v10575_v3  ;;  %v13480_v29 = vld [vmem:[#allocation15 + $0x5f4] sm:$0xf0] }
 0x25a   :  { %v15268_v43 = vadd.f32 %v5055_v14, %v5027_v23  ;;  %v10704_v44 = vor.u32 %v13480_v29, %v10703_v49  ;;  %v13476_v49 = vld [vmem:[#allocation15 + $0x5d4] sm:$0xf0] }
 0x25b   :  { %v5001_v47 = vadd.f32 %v5000_v22, %v4972_v24  ;;  %5202 = vmatmul.bf16.gmra.mxu0 %v16840_v10  ;;  %5231 = vmatmul.bf16.gmra.mxu1 %v16841_v52  ;;  %v10447_v24 = vld [vmem:[#allocation15 + $0x3e8] sm:$0xf]  ;;  %v13416_v22 = vld [vmem:[#allocation15 + $0x3f4] sm:$0xf0] }
 0x25c   :  { %5260 = vmatmul.bf16.gmra.mxu2 %v16842_v6  ;;  %5503 = vmatpush.bf16.msra.mxu3 %v10704_v44  ;;  %v10448_v40 = vor.u32 %v13416_v22, %v10447_v24  ;;  %v13444_v6 = vld [vmem:[#allocation15 + $0x4d4] sm:$0xf0]  ;;  %v10303_v52 = vld [vmem:[#allocation15 + $0x2c8] sm:$0xf]  ;;  %v16845_v22 = vld [vmem:[#allocation89_spill] sm:$0xff] }
 0x25d   :  { %5289 = vmatmul.bf16.gmra.mxu3 %v15007_v13  ;;  %5474 = vmatpush.bf16.msra.mxu2 %v10576_v30  ;;  %v10559_v13 = vld [vmem:[#allocation15 + $0x4c8] sm:$0xf]  ;;  %v10304_v30 = vor.u32 %v13380_v41, %v10303_v52  ;;  %v16844_v52 = vld [vmem:[#allocation88_spill] sm:$0xff] }
 0x25e   :  { %v10560_v5 = vor.u32 %v13444_v6, %v10559_v13  ;;  %5445 = vmatpush.bf16.msra.mxu1 %v10448_v40  ;;  %v13412_v13 = vld [vmem:[#allocation15 + $0x3d4] sm:$0xf0] }
 0x25f   :  { %v5029_v61 = vpop.f32.mrf.mxu2  ;;  %5417 = vmatpush.bf16.msra.mxu0 %v10304_v30  ;;  %v13440_v40 = vld [vmem:[#allocation15 + $0x4b4] sm:$0xf0] }
 0x260   :  { %v5030_v28 = vadd.f32 %v5029_v61, %v5001_v47  ;;  %v5058_v62 = vpop.f32.mrf.mxu3  ;;  %v4973_v23 = vpop.f32.mrf.mxu0  ;;  %v10687_v47 = vld [vmem:[#allocation15 + $0x5c8] sm:$0xf]  ;;  %v13376_v41 = vld [vmem:[#allocation15 + $0x2b4] sm:$0xf0] }
 0x261   :  { %v4974_v14 = vadd.f32 %v4973_v23, %v15241_v35  ;;  %v5002_v31 = vpop.f32.mrf.mxu1  ;;  %v10688_v29 = vor.u32 %v13476_v49, %v10687_v47  ;;  %5475 = vmatpush.bf16.msra.mxu2 %v10560_v5  ;;  %v10287_v5 = vld [vmem:[#allocation15 + $0x2a8] sm:$0xf]  ;;  %v13472_v49 = vld [vmem:[#allocation15 + $0x5b4] sm:$0xf0] }
 0x262   :  { %v15275_v11 = vadd.f32 %v5058_v62, %v5030_v28  ;;  %v10671_v47 = vld [vmem:[#allocation15 + $0x5a8] sm:$0xf]  ;;  %v13628_v10 = vld [vmem:[#allocation15 + $0xa94] sm:$0xf0] }
 0x263   :  { %v5003_v3 = vadd.f32 %v5002_v31, %v4974_v14  ;;  %5504 = vmatpush.bf16.msra.mxu3 %v10688_v29  ;;  %v10431_v14 = vld [vmem:[#allocation15 + $0x3c8] sm:$0xf]  ;;  %v16843_v31 = vld [vmem:[#allocation87_spill] sm:$0xff]  ;;  %v10288_v29 = vor.u32 %v13376_v41, %v10287_v5  ;;  %v13468_v5 = vld [vmem:[#allocation15 + $0x594] sm:$0xf0] }
 0x264   :  { %v10432_v24 = vor.u32 %v13412_v13, %v10431_v14  ;;  %v10415_v14 = vld [vmem:[#allocation15 + $0x3a8] sm:$0xf]  ;;  %v13408_v13 = vld [vmem:[#allocation15 + $0x3b4] sm:$0xf0]  ;;  %v10656_v41 = vor.u32 %v13468_v5, %v10655_v34 }
 0x265   :  { %5418 = vmatpush.bf16.msra.mxu0 %v10288_v29  ;;  %v10511_v34 = vld [vmem:[#allocation15 + $0x468] sm:$0xf] }
 0x266   :  { %5446 = vmatpush.bf16.msra.mxu1 %v10432_v24  ;;  %v10416_v24 = vor.u32 %v13408_v13, %v10415_v14  ;;  %v16848_v14 = vld [vmem:[#allocation26_spill] sm:$0xff] }
 0x267   :  { %v5031_v35 = vpop.f32.mrf.mxu2 }
 0x268   :  { %v5032_v61 = vadd.f32 %v5031_v35, %v5003_v3  ;;  %v5060_v59 = vpop.f32.mrf.mxu3  ;;  %v4976_v44 = vpop.f32.mrf.mxu0  ;;  %v10543_v3 = vld [vmem:[#allocation15 + $0x4a8] sm:$0xf]  ;;  %v10672_v35 = vor.u32 %v13472_v49, %v10671_v47 }
 0x269   :  { %v4977_v28 = vadd.f32 %v4976_v44, %v15247_v2  ;;  %v5005_v62 = vpop.f32.mrf.mxu1  ;;  %v10544_v2 = vor.u32 %v13440_v40, %v10543_v3  ;;  %v13436_v3 = vld [vmem:[#allocation15 + $0x494] sm:$0xf0]  ;;  %v10271_v40 = vld [vmem:[#allocation15 + $0x288] sm:$0xf] }
 0x26a   :  { %v15278_v23 = vadd.f32 %v5060_v59, %v5032_v61  ;;  %5505 = vmatpush.bf16.msra.mxu3 %v10672_v35  ;;  %5447 = vmatpush.bf16.msra.mxu1 %v10416_v24  ;;  %v10399_v35 = vld [vmem:[#allocation15 + $0x388] sm:$0xf]  ;;  %v13368_v24 = vld [vmem:[#allocation15 + $0x274] sm:$0xf0] }
 0x26b   :  { %v5006_v6 = vadd.f32 %v5005_v62, %v4977_v28  ;;  %5207 = vmatmul.bf16.gmra.mxu0 %v16843_v31  ;;  %5236 = vmatmul.bf16.gmra.mxu1 %v16844_v52  ;;  %v13372_v52 = vld [vmem:[#allocation15 + $0x294] sm:$0xf0] }
 0x26c   :  { %5265 = vmatmul.bf16.gmra.mxu2 %v16845_v22  ;;  %v13668_v31 = vld [vmem:[#allocation15 + $0xbd4] sm:$0xf0] }
 0x26d   :  { %5294 = vmatmul.bf16.gmra.mxu3 %v15041_v4  ;;  %5476 = vmatpush.bf16.msra.mxu2 %v10544_v2  ;;  %v10527_v4 = vld [vmem:[#allocation15 + $0x488] sm:$0xf] }
 0x26e   :  { %v10528_v22 = vor.u32 %v13436_v3, %v10527_v4  ;;  %5506 = vmatpush.bf16.msra.mxu3 %v10656_v41  ;;  %v13464_v3 = vld [vmem:[#allocation15 + $0x574] sm:$0xf0] }
 0x26f   :  { %v5034_v30 = vpop.f32.mrf.mxu2 }
 0x270   :  { %v5035_v61 = vadd.f32 %v5034_v30, %v5006_v6  ;;  %v5063_v59 = vpop.f32.mrf.mxu3  ;;  %v4978_v44 = vpop.f32.mrf.mxu0  ;;  %v10272_v6 = vor.u32 %v13372_v52, %v10271_v40  ;;  %v13432_v52 = vld [vmem:[#allocation15 + $0x474] sm:$0xf0] }
 0x271   :  { %v5007_v28 = vpop.f32.mrf.mxu1  ;;  %5477 = vmatpush.bf16.msra.mxu2 %v10528_v22  ;;  %v16846_v44 = vld [vmem:[#allocation91_spill] sm:$0xff]  ;;  %v10255_v22 = vld [vmem:[#allocation15 + $0x268] sm:$0xf]  ;;  %v10512_v13 = vor.u32 %v13432_v52, %v10511_v34 }
 0x272   :  { %v15284_v62 = vadd.f32 %v5063_v59, %v5035_v61  ;;  %5419 = vmatpush.bf16.msra.mxu0 %v10272_v6  ;;  %v13404_v61 = vld [vmem:[#allocation15 + $0x394] sm:$0xf0]  ;;  %v10256_v5 = vor.u32 %v13368_v24, %v10255_v22  ;;  %v10495_v52 = vld [vmem:[#allocation15 + $0x448] sm:$0xf] }
 0x273   :  { %v10400_v4 = vor.u32 %v13404_v61, %v10399_v35  ;;  %v16847_v28 = vld [vmem:[#allocation92_spill] sm:$0xff]  ;;  %v10383_v35 = vld [vmem:[#allocation15 + $0x368] sm:$0xf] }
 0x274   :  { %v13400_v61 = vld [vmem:[#allocation15 + $0x374] sm:$0xf0] }
 0x275   :  { %5448 = vmatpush.bf16.msra.mxu1 %v10400_v4  ;;  %5478 = vmatpush.bf16.msra.mxu2 %v10512_v13  ;;  %v10384_v34 = vor.u32 %v13400_v61, %v10383_v35  ;;  %v13364_v24 = vld [vmem:[#allocation15 + $0x254] sm:$0xf0]  ;;  %v16849_v35 = vld [vmem:[#allocation94_spill] sm:$0xff] }
 0x276   :  { %5420 = vmatpush.bf16.msra.mxu0 %v10256_v5 }
 0x277   :  { %v5036_v2 = vpop.f32.mrf.mxu2 }
 0x278   :  { %v5065_v47 = vpop.f32.mrf.mxu3  ;;  %v5077_v49 = vpop.f32.mrf.mxu0 }
 0x279   :  { %v5078_v30 = vadd.f32 %v5077_v49, %v15255_v27  ;;  %v5106_v29 = vpop.f32.mrf.mxu1  ;;  %v10639_v27 = vld [vmem:[#allocation15 + $0x568] sm:$0xf]  ;;  %5449 = vmatpush.bf16.msra.mxu1 %v10384_v34 }
 0x27a   :  { %v10640_v6 = vor.u32 %v13464_v3, %v10639_v27  ;;  %v13460_v27 = vld [vmem:[#allocation15 + $0x554] sm:$0xf0]  ;;  %v16851_v34 = vld [vmem:[#allocation30_spill] sm:$0xff] }
 0x27b   :  { %v5107_v59 = vadd.f32 %v5106_v29, %v5078_v30  ;;  %5308 = vmatmul.bf16.vlgmr.msrb.gmra.mxu0 %v16846_v44  ;;  %5337 = vmatmul.bf16.vlgmr.msrb.gmra.mxu1 %v16847_v28 }
 0x27c   :  { %5366 = vmatmul.bf16.vlgmr.msrb.gmra.mxu2 %v16848_v14  ;;  %5507 = vmatpush.bf16.msra.mxu3 %v10640_v6  ;;  %v10239_v14 = vld [vmem:[#allocation15 + $0x248] sm:$0xf] }
 0x27d   :  { %5395 = vmatmul.bf16.vlgmr.msrb.gmra.mxu3 %v14338_v53  ;;  %v13428_v53 = vld [vmem:[#allocation15 + $0x454] sm:$0xf0]  ;;  %v10240_v13 = vor.u32 %v13364_v24, %v10239_v14  ;;  %v16850_v14 = vld [vmem:[#allocation95_spill] sm:$0xff] }
 0x27e   :  { %v10496_v22 = vor.u32 %v13428_v53, %v10495_v52  ;;  %v13396_v53 = vld [vmem:[#allocation15 + $0x354] sm:$0xf0] }
 0x27f   :  { %v5135_v40 = vpop.f32.mrf.mxu2  ;;  %5421 = vmatpush.bf16.msra.mxu0 %v10240_v13  ;;  %v13424_v52 = vld [vmem:[#allocation15 + $0x434] sm:$0xf0] }
 0x280   :  { %v5136_v41 = vadd.f32 %v5135_v40, %v5107_v59  ;;  %v5164_v2 = vpop.f32.mrf.mxu3  ;;  %v5079_v47 = vpop.f32.mrf.mxu0  ;;  %v10623_v59 = vld [vmem:[#allocation15 + $0x548] sm:$0xf]  ;;  %5479 = vmatpush.bf16.msra.mxu2 %v10496_v22  ;;  %v13360_v24 = vld [vmem:[#allocation15 + $0x234] sm:$0xf0] }
 0x281   :  { %v5080_v49 = vadd.f32 %v5079_v47, %v15258_v12  ;;  %v5108_v30 = vpop.f32.mrf.mxu1  ;;  %v10624_v3 = vor.u32 %v13460_v27, %v10623_v59  ;;  %v10223_v22 = vld [vmem:[#allocation15 + $0x228] sm:$0xf]  ;;  %v13456_v27 = vld [vmem:[#allocation15 + $0x534] sm:$0xf0] }
 0x282   :  { %v15292_v29 = vadd.f32 %v5164_v2, %v5136_v41  ;;  %v10607_v59 = vld [vmem:[#allocation15 + $0x528] sm:$0xf] }
 0x283   :  { %v5109_v4 = vadd.f32 %v5108_v30, %v5080_v49  ;;  %5508 = vmatpush.bf16.msra.mxu3 %v10624_v3  ;;  %v10367_v49 = vld [vmem:[#allocation15 + $0x348] sm:$0xf]  ;;  %v10224_v3 = vor.u32 %v13360_v24, %v10223_v22  ;;  %v13356_v22 = vld [vmem:[#allocation15 + $0x214] sm:$0xf0] }
 0x284   :  { %v10368_v61 = vor.u32 %v13396_v53, %v10367_v49  ;;  %v10351_v53 = vld [vmem:[#allocation15 + $0x328] sm:$0xf] }
 0x285   :  { %5422 = vmatpush.bf16.msra.mxu0 %v10224_v3  ;;  %v13388_v3 = vld [vmem:[#allocation15 + $0x314] sm:$0xf0] }
 0x286   :  { %5450 = vmatpush.bf16.msra.mxu1 %v10368_v61  ;;  %v13392_v61 = vld [vmem:[#allocation15 + $0x334] sm:$0xf0] }
 0x287   :  { %v5137_v12 = vpop.f32.mrf.mxu2 }
 0x288   :  { %v5138_v40 = vadd.f32 %v5137_v12, %v5109_v4  ;;  %v5166_v5 = vpop.f32.mrf.mxu3  ;;  %v5082_v6 = vpop.f32.mrf.mxu0  ;;  %v10479_v4 = vld [vmem:[#allocation15 + $0x428] sm:$0xf]  ;;  %v10608_v12 = vor.u32 %v13456_v27, %v10607_v59  ;;  %v13452_v27 = vld [vmem:[#allocation15 + $0x514] sm:$0xf0] }
 0x289   :  { %v5083_v41 = vadd.f32 %v5082_v6, %v15265_v63  ;;  %v5111_v2 = vpop.f32.mrf.mxu1  ;;  %v10480_v63 = vor.u32 %v13424_v52, %v10479_v4  ;;  %v10463_v4 = vld [vmem:[#allocation15 + $0x408] sm:$0xf] }
 0x28a   :  { %v15295_v47 = vadd.f32 %v5166_v5, %v5138_v40  ;;  %5509 = vmatpush.bf16.msra.mxu3 %v10608_v12  ;;  %v10591_v59 = vld [vmem:[#allocation15 + $0x508] sm:$0xf] }
 0x28b   :  { %v5112_v30 = vadd.f32 %v5111_v2, %v5083_v41  ;;  %5313 = vmatmul.bf16.gmra.mxu0 %v16849_v35  ;;  %5342 = vmatmul.bf16.gmra.mxu1 %v16850_v14  ;;  %v10207_v14 = vld [vmem:[#allocation15 + $0x208] sm:$0xf] }
 0x28c   :  { %5371 = vmatmul.bf16.gmra.mxu2 %v16851_v34  ;;  %v13420_v34 = vld [vmem:[#allocation15 + $0x414] sm:$0xf0]  ;;  %v11327_v35 = vld [vmem:[#allocation15 + $0xac8] sm:$0xf] }
 0x28d   :  { %5400 = vmatmul.bf16.gmra.mxu3 %v14374_v50  ;;  %5480 = vmatpush.bf16.msra.mxu2 %v10480_v63  ;;  %v10352_v50 = vor.u32 %v13392_v61, %v10351_v53  ;;  %v10464_v24 = vor.u32 %v13420_v34, %v10463_v4  ;;  %v10592_v63 = vor.u32 %v13452_v27, %v10591_v59  ;;  %v16852_v34 = vld [vmem:[#allocation97_spill] sm:$0xff]  ;;  %v16854_v61 = vld [vmem:[#allocation34_spill] sm:$0xff] }
 0x28e   :  { %v11087_v4 = vld [vmem:[#allocation15 + $0x8e8] sm:$0xf] }
 0x28f   :  { %v5140_v13 = vpop.f32.mrf.mxu2  ;;  %5451 = vmatpush.bf16.msra.mxu1 %v10352_v50  ;;  %5510 = vmatpush.bf16.msra.mxu3 %v10592_v63  ;;  %v16853_v50 = vld [vmem:[#allocation98_spill] sm:$0xff] }
 0x290   :  { %v5141_v40 = vadd.f32 %v5140_v13, %v5112_v30  ;;  %v5169_v5 = vpop.f32.mrf.mxu3  ;;  %v5084_v6 = vpop.f32.mrf.mxu0  ;;  %v10208_v30 = vor.u32 %v13356_v22, %v10207_v14  ;;  %v10335_v13 = vld [vmem:[#allocation15 + $0x308] sm:$0xf] }
 0x291   :  { %v5085_v41 = vadd.f32 %v5084_v6, %v15268_v43  ;;  %v5113_v2 = vpop.f32.mrf.mxu1  ;;  %5481 = vmatpush.bf16.msra.mxu2 %v10464_v24  ;;  %v10336_v6 = vor.u32 %v13388_v3, %v10335_v13  ;;  %v10831_v22 = vld [vmem:[#allocation15 + $0x6e8] sm:$0xf] }
 0x292   :  { %v15302_v49 = vadd.f32 %v5169_v5, %v5141_v40  ;;  %5423 = vmatpush.bf16.msra.mxu0 %v10208_v30  ;;  %v13512_v30 = vld [vmem:[#allocation15 + $0x6f4] sm:$0xf0]  ;;  %v11215_v59 = vld [vmem:[#allocation15 + $0x9e8] sm:$0xf] }
 0x293   :  { %v5114_v52 = vadd.f32 %v5113_v2, %v5085_v41  ;;  %5452 = vmatpush.bf16.msra.mxu1 %v10336_v6  ;;  %v10832_v63 = vor.u32 %v13512_v30, %v10831_v22  ;;  %v13508_v30 = vld [vmem:[#allocation15 + $0x6d4] sm:$0xf0] }
 0x296   :  { %5532 = vmatpush.bf16.msrb.mxu0 %v10832_v63 }
 0x297   :  { %v5142_v43 = vpop.f32.mrf.mxu2 }
 0x298   :  { %v5143_v12 = vadd.f32 %v5142_v43, %v5114_v52  ;;  %v5171_v40 = vpop.f32.mrf.mxu3  ;;  %v5087_v5 = vpop.f32.mrf.mxu0  ;;  %v13576_v52 = vld [vmem:[#allocation15 + $0x8f4] sm:$0xf0] }
 0x299   :  { %v5088_v41 = vadd.f32 %v5087_v5, %v15275_v11  ;;  %v5116_v2 = vpop.f32.mrf.mxu1  ;;  %v11088_v24 = vor.u32 %v13576_v52, %v11087_v4  ;;  %v13608_v11 = vld [vmem:[#allocation15 + $0x9f4] sm:$0xf0] }
 0x29a   :  { %v15305_v53 = vadd.f32 %v5171_v40, %v5143_v12  ;;  %v11216_v43 = vor.u32 %v13608_v11, %v11215_v59  ;;  %v13604_v59 = vld [vmem:[#allocation15 + $0x9d4] sm:$0xf0] }
 0x29b   :  { %v5117_v14 = vadd.f32 %v5116_v2, %v5088_v41  ;;  %5318 = vmatmul.bf16.gmra.mxu0 %v16852_v34  ;;  %5347 = vmatmul.bf16.gmra.mxu1 %v16853_v50  ;;  %v10959_v41 = vld [vmem:[#allocation15 + $0x7e8] sm:$0xf]  ;;  %v13544_v2 = vld [vmem:[#allocation15 + $0x7f4] sm:$0xf0] }
 0x29c   :  { %5376 = vmatmul.bf16.gmra.mxu2 %v16854_v61  ;;  %5619 = vmatpush.bf16.msrb.mxu3 %v11216_v43  ;;  %v10960_v52 = vor.u32 %v13544_v2, %v10959_v41  ;;  %v13572_v61 = vld [vmem:[#allocation15 + $0x8d4] sm:$0xf0]  ;;  %v10815_v50 = vld [vmem:[#allocation15 + $0x6c8] sm:$0xf] }
 0x29d   :  { %5405 = vmatmul.bf16.gmra.mxu3 %v14410_v37  ;;  %5590 = vmatpush.bf16.msrb.mxu2 %v11088_v24  ;;  %v11071_v37 = vld [vmem:[#allocation15 + $0x8c8] sm:$0xf]  ;;  %v10816_v24 = vor.u32 %v13508_v30, %v10815_v50  ;;  %v13568_v2 = vld [vmem:[#allocation15 + $0x8b4] sm:$0xf0] }
 0x29e   :  { %v11072_v22 = vor.u32 %v13572_v61, %v11071_v37  ;;  %5561 = vmatpush.bf16.msrb.mxu1 %v10960_v52  ;;  %v13540_v37 = vld [vmem:[#allocation15 + $0x7d4] sm:$0xf0]  ;;  %v16855_v50 = vld [vmem:[#allocation38_spill] sm:$0xff] }
 0x29f   :  { %v5145_v27 = vpop.f32.mrf.mxu2  ;;  %5533 = vmatpush.bf16.msrb.mxu0 %v10816_v24  ;;  %v11055_v41 = vld [vmem:[#allocation15 + $0x8a8] sm:$0xf]  ;;  %v13504_v52 = vld [vmem:[#allocation15 + $0x6b4] sm:$0xf0] }
 0x2a0   :  { %v5146_v13 = vadd.f32 %v5145_v27, %v5117_v14  ;;  %v5174_v3 = vpop.f32.mrf.mxu3  ;;  %v5089_v12 = vpop.f32.mrf.mxu0  ;;  %v11199_v14 = vld [vmem:[#allocation15 + $0x9c8] sm:$0xf]  ;;  %v13600_v30 = vld [vmem:[#allocation15 + $0x9b4] sm:$0xf0] }
 0x2a1   :  { %v5090_v40 = vadd.f32 %v5089_v12, %v15278_v23  ;;  %v5118_v5 = vpop.f32.mrf.mxu1  ;;  %v11200_v11 = vor.u32 %v13604_v59, %v11199_v14  ;;  %5591 = vmatpush.bf16.msrb.mxu2 %v11072_v22  ;;  %v11183_v22 = vld [vmem:[#allocation15 + $0x9a8] sm:$0xf]  ;;  %v13700_v34 = vld [vmem:[#allocation15 + $0xcd4] sm:$0xf0] }
 0x2a2   :  { %v15312_v6 = vadd.f32 %v5174_v3, %v5146_v13  ;;  %v11184_v24 = vor.u32 %v13600_v30, %v11183_v22 }
 0x2a3   :  { %v5119_v4 = vadd.f32 %v5118_v5, %v5090_v40  ;;  %5620 = vmatpush.bf16.msrb.mxu3 %v11200_v11  ;;  %v10943_v40 = vld [vmem:[#allocation15 + $0x7c8] sm:$0xf] }
 0x2a4   :  { %v10944_v5 = vor.u32 %v13540_v37, %v10943_v40  ;;  %v11039_v37 = vld [vmem:[#allocation15 + $0x888] sm:$0xf] }
 0x2a6   :  { %5562 = vmatpush.bf16.msrb.mxu1 %v10944_v5  ;;  %v13564_v5 = vld [vmem:[#allocation15 + $0x894] sm:$0xf0] }
 0x2a7   :  { %v5147_v23 = vpop.f32.mrf.mxu2  ;;  %5621 = vmatpush.bf16.msrb.mxu3 %v11184_v24  ;;  %v13532_v24 = vld [vmem:[#allocation15 + $0x794] sm:$0xf0] }
 0x2a8   :  { %v5148_v27 = vadd.f32 %v5147_v23, %v5119_v4  ;;  %v5176_v63 = vpop.f32.mrf.mxu3  ;;  %v5092_v43 = vpop.f32.mrf.mxu0  ;;  %v10799_v4 = vld [vmem:[#allocation15 + $0x6a8] sm:$0xf] }
 0x2a9   :  { %v5093_v13 = vadd.f32 %v5092_v43, %v15284_v62  ;;  %v5121_v3 = vpop.f32.mrf.mxu1  ;;  %v11056_v62 = vor.u32 %v13568_v2, %v11055_v41  ;;  %v10800_v59 = vor.u32 %v13504_v52, %v10799_v4  ;;  %v10783_v41 = vld [vmem:[#allocation15 + $0x688] sm:$0xf]  ;;  %v11040_v2 = vor.u32 %v13564_v5, %v11039_v37  ;;  %v13596_v4 = vld [vmem:[#allocation15 + $0x994] sm:$0xf0] }
 0x2aa   :  { %v15315_v12 = vadd.f32 %v5176_v63, %v5148_v27 }
 0x2ab   :  { %v5122_v61 = vadd.f32 %v5121_v3, %v5093_v13  ;;  %5323 = vmatmul.bf16.gmra.mxu0 %v15043_v55  ;;  %5352 = vmatmul.bf16.gmra.mxu1 %v15045_v36  ;;  %v10927_v13 = vld [vmem:[#allocation15 + $0x7a8] sm:$0xf]  ;;  %v13536_v3 = vld [vmem:[#allocation15 + $0x7b4] sm:$0xf0] }
 0x2ac   :  { %5381 = vmatmul.bf16.gmra.mxu2 %v16855_v50  ;;  %5534 = vmatpush.bf16.msrb.mxu0 %v10800_v59  ;;  %v10928_v40 = vor.u32 %v13536_v3, %v10927_v13  ;;  %v11167_v50 = vld [vmem:[#allocation15 + $0x988] sm:$0xf]  ;;  %v13592_v3 = vld [vmem:[#allocation15 + $0x974] sm:$0xf0] }
 0x2ad   :  { %5410 = vmatmul.bf16.gmra.mxu3 %v14446_v17  ;;  %5592 = vmatpush.bf16.msrb.mxu2 %v11056_v62  ;;  %v13500_v17 = vld [vmem:[#allocation15 + $0x694] sm:$0xf0]  ;;  %v11168_v52 = vor.u32 %v13596_v4, %v11167_v50  ;;  %v10911_v59 = vld [vmem:[#allocation15 + $0x788] sm:$0xf] }
 0x2ae   :  { %5563 = vmatpush.bf16.msrb.mxu1 %v10928_v40  ;;  %v13560_v50 = vld [vmem:[#allocation15 + $0x874] sm:$0xf0]  ;;  %v11151_v13 = vld [vmem:[#allocation15 + $0x968] sm:$0xf] }
 0x2af   :  { %v5150_v14 = vpop.f32.mrf.mxu2  ;;  %5622 = vmatpush.bf16.msrb.mxu3 %v11168_v52  ;;  %v11152_v5 = vor.u32 %v13592_v3, %v11151_v13  ;;  %v13528_v52 = vld [vmem:[#allocation15 + $0x774] sm:$0xf0]  ;;  %v11583_v55 = vld [vmem:[#allocation15 + $0xcc8] sm:$0xf] }
 0x2b0   :  { %v5151_v11 = vadd.f32 %v5150_v14, %v5122_v61  ;;  %v5179_v23 = vpop.f32.mrf.mxu3  ;;  %v5094_v27 = vpop.f32.mrf.mxu0  ;;  %v10784_v61 = vor.u32 %v13500_v17, %v10783_v41  ;;  %v11023_v17 = vld [vmem:[#allocation15 + $0x868] sm:$0xf] }
 0x2b1   :  { %v5123_v63 = vpop.f32.mrf.mxu1  ;;  %5593 = vmatpush.bf16.msrb.mxu2 %v11040_v2  ;;  %v11024_v27 = vor.u32 %v13560_v50, %v11023_v17  ;;  %v13492_v17 = vld [vmem:[#allocation15 + $0x654] sm:$0xf0]  ;;  %v11135_v50 = vld [vmem:[#allocation15 + $0x948] sm:$0xf] }
 0x2b2   :  { %v15321_v43 = vadd.f32 %v5179_v23, %v5151_v11  ;;  %5535 = vmatpush.bf16.msrb.mxu0 %v10784_v61  ;;  %v10912_v11 = vor.u32 %v13532_v24, %v10911_v59  ;;  %v10767_v23 = vld [vmem:[#allocation15 + $0x668] sm:$0xf]  ;;  %v13496_v63 = vld [vmem:[#allocation15 + $0x674] sm:$0xf0] }
 0x2b3   :  { %v10768_v37 = vor.u32 %v13496_v63, %v10767_v23  ;;  %5623 = vmatpush.bf16.msrb.mxu3 %v11152_v5  ;;  %v10895_v61 = vld [vmem:[#allocation15 + $0x768] sm:$0xf]  ;;  %v13556_v59 = vld [vmem:[#allocation15 + $0x854] sm:$0xf0] }
 0x2b4   :  { %5564 = vmatpush.bf16.msrb.mxu1 %v10912_v11  ;;  %v10751_v24 = vld [vmem:[#allocation15 + $0x648] sm:$0xf]  ;;  %v13588_v23 = vld [vmem:[#allocation15 + $0x954] sm:$0xf0] }
 0x2b5   :  { %5594 = vmatpush.bf16.msrb.mxu2 %v11024_v27  ;;  %v10752_v63 = vor.u32 %v13492_v17, %v10751_v24  ;;  %v11136_v13 = vor.u32 %v13588_v23, %v11135_v50  ;;  %v10735_v24 = vld [vmem:[#allocation15 + $0x628] sm:$0xf]  ;;  %v13488_v17 = vld [vmem:[#allocation15 + $0x634] sm:$0xf0] }
 0x2b6   :  { %5536 = vmatpush.bf16.msrb.mxu0 %v10768_v37  ;;  %v11119_v50 = vld [vmem:[#allocation15 + $0x928] sm:$0xf]  ;;  %v13584_v23 = vld [vmem:[#allocation15 + $0x934] sm:$0xf0] }
 0x2b7   :  { %v5152_v62 = vpop.f32.mrf.mxu2  ;;  %5624 = vmatpush.bf16.msrb.mxu3 %v11136_v13  ;;  %v10736_v13 = vor.u32 %v13488_v17, %v10735_v24  ;;  %v11103_v24 = vld [vmem:[#allocation15 + $0x908] sm:$0xf]  ;;  %v13580_v17 = vld [vmem:[#allocation15 + $0x914] sm:$0xf0] }
 0x2b8   :  { %v5181_v22 = vpop.f32.mrf.mxu3  ;;  %v15323_v30 = vpop.f32.mrf.mxu0  ;;  %v10896_v62 = vor.u32 %v13528_v52, %v10895_v61  ;;  %v10879_v61 = vld [vmem:[#allocation15 + $0x748] sm:$0xf]  ;;  %v13524_v52 = vld [vmem:[#allocation15 + $0x754] sm:$0xf0] }
 0x2b9   :  { %v15325_v14 = vpop.f32.mrf.mxu1  ;;  %v11007_v22 = vld [vmem:[#allocation15 + $0x848] sm:$0xf] }
 0x2ba   :  { %v11008_v11 = vor.u32 %v13556_v59, %v11007_v22  ;;  %5565 = vmatpush.bf16.msrb.mxu1 %v10896_v62  ;;  %5537 = vmatpush.bf16.msrb.mxu0 %v10752_v63  ;;  %v10880_v22 = vor.u32 %v13524_v52, %v10879_v61  ;;  %v10991_v62 = vld [vmem:[#allocation15 + $0x828] sm:$0xf]  ;;  %v13552_v59 = vld [vmem:[#allocation15 + $0x834] sm:$0xf0] }
 0x2bb   :  { %5424 = vmatmul.bf16.vlgmr.msra.gmra.mxu0 %v14340_v54  ;;  %5453 = vmatmul.bf16.vlgmr.msra.gmra.mxu1 %v14342_v57  ;;  %v13484_v57 = vld [vmem:[#allocation15 + $0x614] sm:$0xf0] }
 0x2bc   :  { %5482 = vmatmul.bf16.vlgmr.msra.gmra.mxu2 %v14480_v0 }
 0x2bd   :  { %5511 = vmatmul.bf16.vlgmr.msra.gmra.mxu3 %v14482_v1  ;;  %5595 = vmatpush.bf16.msrb.mxu2 %v11008_v11  ;;  %v10992_v11 = vor.u32 %v13552_v59, %v10991_v62  ;;  %v11120_v1 = vor.u32 %v13584_v23, %v11119_v50  ;;  %v13548_v59 = vld [vmem:[#allocation15 + $0x814] sm:$0xf0]  ;;  %v11104_v50 = vor.u32 %v13580_v17, %v11103_v24  ;;  %v10847_v23 = vld [vmem:[#allocation15 + $0x708] sm:$0xf] }
 0x2be   :  { %5566 = vmatpush.bf16.msrb.mxu1 %v10880_v22  ;;  %5538 = vmatpush.bf16.msrb.mxu0 %v10736_v13  ;;  %v10863_v22 = vld [vmem:[#allocation15 + $0x728] sm:$0xf]  ;;  %v13640_v17 = vld [vmem:[#allocation15 + $0xaf4] sm:$0xf0] }
 0x2bf   :  { %v15331_v40 = vpop.f32.mrf.mxu2  ;;  %5625 = vmatpush.bf16.msrb.mxu3 %v11120_v1  ;;  %v13516_v1 = vld [vmem:[#allocation15 + $0x714] sm:$0xf0] }
 0x2c0   :  { %v15333_v41 = vpop.f32.mrf.mxu3  ;;  %v15335_v2 = vpop.f32.mrf.mxu0 }
 0x2c1   :  { %v15337_v4 = vpop.f32.mrf.mxu1  ;;  %5596 = vmatpush.bf16.msrb.mxu2 %v10992_v11 }
 0x2c3   :  { %5626 = vmatpush.bf16.msrb.mxu3 %v11104_v50  ;;  %v11727_v50 = vld [vmem:[#allocation15 + $0xde8] sm:$0xf] }
 0x2c7   :  { %v15339_v3 = vpop.f32.mrf.mxu2 }
 0x2c8   :  { %v15341_v27 = vpop.f32.mrf.mxu3  ;;  %v15343_v37 = vpop.f32.mrf.mxu0 }
 0x2c9   :  { %v15345_v5 = vpop.f32.mrf.mxu1 }
 0x2cb   :  { %5429 = vmatmul.bf16.gmra.mxu0 %v14376_v51  ;;  %5458 = vmatmul.bf16.gmra.mxu1 %v14378_v56  ;;  %v10719_v56 = vld [vmem:[#allocation15 + $0x608] sm:$0xf] }
 0x2cc   :  { %5487 = vmatmul.bf16.gmra.mxu2 %v14516_v45  ;;  %v10975_v45 = vld [vmem:[#allocation15 + $0x808] sm:$0xf]  ;;  %v10720_v51 = vor.u32 %v13484_v57, %v10719_v56 }
 0x2cd   :  { %5516 = vmatmul.bf16.gmra.mxu3 %v14518_v46  ;;  %v13520_v46 = vld [vmem:[#allocation15 + $0x734] sm:$0xf0]  ;;  %v10976_v36 = vor.u32 %v13548_v59, %v10975_v45  ;;  %v11599_v45 = vld [vmem:[#allocation15 + $0xce8] sm:$0xf] }
 0x2ce   :  { %v10864_v62 = vor.u32 %v13520_v46, %v10863_v22  ;;  %5539 = vmatpush.bf16.msrb.mxu0 %v10720_v51  ;;  %v10848_v46 = vor.u32 %v13516_v1, %v10847_v23  ;;  %v11343_v59 = vld [vmem:[#allocation15 + $0xae8] sm:$0xf]  ;;  %v13736_v23 = vld [vmem:[#allocation15 + $0xdf4] sm:$0xf0] }
 0x2cf   :  { %v15351_v63 = vpop.f32.mrf.mxu2  ;;  %5597 = vmatpush.bf16.msrb.mxu2 %v10976_v36  ;;  %v11344_v1 = vor.u32 %v13640_v17, %v11343_v59  ;;  %v13636_v59 = vld [vmem:[#allocation15 + $0xad4] sm:$0xf0]  ;;  %v11711_v17 = vld [vmem:[#allocation15 + $0xdc8] sm:$0xf] }
 0x2d0   :  { %v15353_v0 = vpop.f32.mrf.mxu3  ;;  %v15355_v61 = vpop.f32.mrf.mxu0  ;;  %5567 = vmatpush.bf16.msrb.mxu1 %v10864_v62  ;;  %v13704_v62 = vld [vmem:[#allocation15 + $0xcf4] sm:$0xf0] }
 0x2d1   :  { %v15357_v52 = vpop.f32.mrf.mxu1  ;;  %v11600_v24 = vor.u32 %v13704_v62, %v11599_v45  ;;  %v11584_v62 = vor.u32 %v13700_v34, %v11583_v55 }
 0x2d2   :  { %5648 = vmatpush.bf16.msra.mxu0 %v11344_v1 }
 0x2d3   :  { %5706 = vmatpush.bf16.msra.mxu2 %v11600_v24 }
 0x2d4   :  { %5568 = vmatpush.bf16.msrb.mxu1 %v10848_v46  ;;  %v11728_v46 = vor.u32 %v13736_v23, %v11727_v50  ;;  %v13732_v50 = vld [vmem:[#allocation15 + $0xdd4] sm:$0xf0]  ;;  %v11455_v23 = vld [vmem:[#allocation15 + $0xbc8] sm:$0xf] }
 0x2d5   :  { %v11456_v1 = vor.u32 %v13668_v31, %v11455_v23  ;;  %v13696_v23 = vld [vmem:[#allocation15 + $0xcb4] sm:$0xf0] }
 0x2d6   :  { %5735 = vmatpush.bf16.msra.mxu3 %v11728_v46 }
 0x2d7   :  { %v15359_v11 = vpop.f32.mrf.mxu2  ;;  %5707 = vmatpush.bf16.msra.mxu2 %v11584_v62  ;;  %v5196_v62 = vadd.f32 %v15335_v2, %v15295_v47 }
 0x2d8   :  { %v15361_v13 = vpop.f32.mrf.mxu3  ;;  %v15363_v54 = vpop.f32.mrf.mxu0 }
 0x2d9   :  { %v15365_v22 = vpop.f32.mrf.mxu1 }
 0x2db   :  { %5434 = vmatmul.bf16.gmra.mxu0 %v14412_v38  ;;  %5463 = vmatmul.bf16.gmra.mxu1 %v14414_v39  ;;  %v13672_v39 = vld [vmem:[#allocation15 + $0xbf4] sm:$0xf0]  ;;  %v14261_v38 = vmov 0.0|0.0  }
 0x2dc   :  { %5492 = vmatmul.bf16.gmra.mxu2 %v14552_v32  ;;  %v11471_v32 = vld [vmem:[#allocation15 + $0xbe8] sm:$0xf]  ;;  %7041 = vst [vmem:[#allocation4] sm:$0xff] %v14261_v38 }
 0x2dd   :  { %5521 = vmatmul.bf16.gmra.mxu3 %v14554_v33  ;;  %v11472_v33 = vor.u32 %v13672_v39, %v11471_v32  ;;  %v11328_v39 = vor.u32 %v13636_v59, %v11327_v35  ;;  %v11712_v32 = vor.u32 %v13732_v50, %v11711_v17  ;;  %7042 = vst [vmem:[#allocation4 + $0x8] sm:$0xff] %v14261_v38  ;;  %v16856_v59 = vld [vmem:[#allocation102_spill] sm:$0xff] }
 0x2de   :  { %8934 = vst [vmem:[#allocation5] sm:$0xff] %v14261_v38  ;;  %v6940_v17 = vperm.slane %v16856_v59, 1 }
 0x2df   :  { %v15371_v57 = vpop.f32.mrf.mxu2  ;;  %5677 = vmatpush.bf16.msra.mxu1 %v11472_v33  ;;  %5736 = vmatpush.bf16.msra.mxu3 %v11712_v32  ;;  %8935 = vst [vmem:[#allocation5 + $0x8] sm:$0xff] %v14261_v38  ;;  %v5194_v33 = vadd.f32 %v15323_v30, %v15292_v29  ;;  %v16857_v29 = vld [vmem:[#allocation103_spill] sm:$0xff]  ;;  %v11567_v32 = vld [vmem:[#allocation15 + $0xca8] sm:$0xf] }
 0x2e0   :  { %v15373_v51 = vpop.f32.mrf.mxu3  ;;  %v15375_v56 = vpop.f32.mrf.mxu0  ;;  %5649 = vmatpush.bf16.msra.mxu0 %v11328_v39  ;;  %v6986_v30 = vperm.slane %v16857_v29, 1  ;;  %v13664_v29 = vld [vmem:[#allocation15 + $0xbb4] sm:$0xf0]  ;;  %vm15410_vm11 = vcmp.eq.s32.totalorder %v6940_v17, 1 }
 0x2e1   :  { %v15377_v36 = vpop.f32.mrf.mxu1  ;;  %v5223_v34 = vadd.f32 %v15325_v14, %v5194_v33  ;;  %v13632_v14 = vld [vmem:[#allocation15 + $0xab4] sm:$0xf0]  ;;  %v11695_v33 = vld [vmem:[#allocation15 + $0xda8] sm:$0xf] }
 0x2e2   :  { %vm15418_vm13 = vcmp.eq.s32.totalorder %v6986_v30, 1 }
 0x2e3   :  { %5678 = vmatpush.bf16.msra.mxu1 %v11456_v1  ;;  %v5252_v38 = vadd.f32 %v15331_v40, %v5223_v34  ;;  %v11311_v1 = vld [vmem:[#allocation15 + $0xaa8] sm:$0xf]  ;;  %v5225_v40 = vadd.f32 %v15337_v4, %v5196_v62  ;;  %v13724_v62 = vld [vmem:[#allocation15 + $0xd94] sm:$0xf0] }
 0x2e4   :  { %v11312_v2 = vor.u32 %v13632_v14, %v11311_v1  ;;  %v11679_v4 = vld [vmem:[#allocation15 + $0xd88] sm:$0xf]  ;;  %v6951_v1 = vsel %vm15117_vm3, 0.0, %v15123_v21 }
 0x2e5   :  { %v5281_v50 = vadd.f32 %v15333_v41, %v5252_v38  ;;  %v13692_v38 = vld [vmem:[#allocation15 + $0xc94] sm:$0xf0]  ;;  %v6997_v30 = vsel %vm15136_vm5, 0.0, %v6951_v1 }
 0x2e6   :  { %5650 = vmatpush.bf16.msra.mxu0 %v11312_v2 }
 0x2e7   :  { %v15379_v28 = vpop.f32.mrf.mxu2 }
 0x2e8   :  { %v15381_v44 = vpop.f32.mrf.mxu3  ;;  %v15383_v45 = vpop.f32.mrf.mxu0 }
 0x2e9   :  { %v15385_v24 = vpop.f32.mrf.mxu1 }
 0x2eb   :  { %5439 = vmatmul.bf16.gmra.mxu0 %v14448_v18  ;;  %5468 = vmatmul.bf16.gmra.mxu1 %v14450_v19  ;;  %v11439_v19 = vld [vmem:[#allocation15 + $0xba8] sm:$0xf] }
 0x2ec   :  { %5497 = vmatmul.bf16.gmra.mxu2 %v14588_v25  ;;  %v11568_v25 = vor.u32 %v13696_v23, %v11567_v32  ;;  %v11551_v18 = vld [vmem:[#allocation15 + $0xc88] sm:$0xf]  ;;  %v11440_v41 = vor.u32 %v13664_v29, %v11439_v19  ;;  %v16858_v23 = vld [vmem:[#allocation44_spill] sm:$0xff]  ;;  %v16861_v19 = vld [vmem:[#allocation45_spill] sm:$0xff] }
 0x2ed   :  { %5526 = vmatmul.bf16.gmra.mxu3 %v14590_v26  ;;  %v11552_v15 = vor.u32 %v13692_v38, %v11551_v18  ;;  %v16862_v29 = vld [vmem:[#allocation58_spill] sm:$0xff]  ;;  %v5199_v18 = vadd.f32 %v15343_v37, %v15302_v49 }
 0x2ee   :  { %5708 = vmatpush.bf16.msra.mxu2 %v11568_v25  ;;  %5679 = vmatpush.bf16.msra.mxu1 %v11440_v41 }
 0x2ef   :  { %v15393_v55 = vpop.f32.mrf.mxu2 }
 0x2f0   :  { %v15395_v35 = vpop.f32.mrf.mxu3  ;;  %v5210_v31 = vpop.f32.mrf.mxu0 }
 0x2f1   :  { %v5239_v46 = vpop.f32.mrf.mxu1 }
 0x2f2   :  { %v13728_v46 = vld [vmem:[#allocation15 + $0xdb4] sm:$0xf0]  ;;  %5709 = vmatpush.bf16.msra.mxu2 %v11552_v15 }
 0x2f3   :  { %v11696_v59 = vor.u32 %v13728_v46, %v11695_v33 }
 0x2f5   :  { %5737 = vmatpush.bf16.msra.mxu3 %v11696_v59 }
 0x2f7   :  { %v5268_v39 = vpop.f32.mrf.mxu2 }
 0x2f8   :  { %v5297_v26 = vpop.f32.mrf.mxu3  ;;  %v5309_v31 = vpop.f32.mrf.mxu0  ;;  %v11295_v39 = vld [vmem:[#allocation15 + $0xa88] sm:$0xf] }
 0x2f9   :  { %v5310_v34 = vadd.f32 %v5309_v31, %v5281_v50  ;;  %v5338_v47 = vpop.f32.mrf.mxu1  ;;  %v5254_v26 = vadd.f32 %v15339_v3, %v5225_v40  ;;  %v11423_v50 = vld [vmem:[#allocation15 + $0xb88] sm:$0xf]  ;;  %v11680_v3 = vor.u32 %v13724_v62, %v11679_v4  ;;  %v13660_v31 = vld [vmem:[#allocation15 + $0xb94] sm:$0xf0]  ;;  %v11296_v17 = vor.u32 %v13628_v10, %v11295_v39 }
 0x2fa   :  { %v11424_v33 = vor.u32 %v13660_v31, %v11423_v50  ;;  %v5201_v62 = vadd.f32 %v15355_v61, %v15305_v53 }
 0x2fb   :  { %v5339_v32 = vadd.f32 %v5338_v47, %v5310_v34  ;;  %5540 = vmatmul.bf16.vlgmr.msrb.gmra.mxu0 %v16858_v23  ;;  %5569 = vmatmul.bf16.vlgmr.msrb.gmra.mxu1 %v16861_v19  ;;  %v5283_v46 = vadd.f32 %v15341_v27, %v5254_v26  ;;  %v5228_v47 = vadd.f32 %v15345_v5, %v5199_v18 }
 0x2fc   :  { %5598 = vmatmul.bf16.vlgmr.msrb.gmra.mxu2 %v16862_v29  ;;  %5738 = vmatpush.bf16.msra.mxu3 %v11680_v3 }
 0x2fd   :  { %vm6524_vm12 = vcmp.ge.f32.partialorder %v5339_v32, 1.25  ;;  %5627 = vmatmul.bf16.vlgmr.msrb.gmra.mxu3 %v16818_v58  ;;  %5651 = vmatpush.bf16.msra.mxu0 %v11296_v17  ;;  %v5257_v39 = vadd.f32 %v15351_v63, %v5228_v47  ;;  %v6557_v26 = vmul.f32 0.75, %v5339_v32  ;;  %v13688_v17 = vld [vmem:[#allocation15 + $0xc74] sm:$0xf0]  ;;  %v11407_v47 = vld [vmem:[#allocation15 + $0xb68] sm:$0xf] }
 0x2fe   :  { %v15425_v14 = vsel %vm6524_vm12, 1.0, %v16810_v42  ;;  %v6546_v38 = vsel %vm6524_vm12, 0.0, %v5339_v32  ;;  %5680 = vmatpush.bf16.msra.mxu1 %v11424_v33  ;;  %v11279_v32 = vld [vmem:[#allocation15 + $0xa68] sm:$0xf] }
 0x2ff   :  { %v6952_v49 = vsel %vm15410_vm11, 0.0, %v15425_v14  ;;  %v5367_v37 = vpop.f32.mrf.mxu2  ;;  %v6565_v50 = vmul.f32 0.97, %v6546_v38  ;;  %v5286_v5 = vadd.f32 %v15353_v0, %v5257_v39  ;;  %v13720_v0 = vld [vmem:[#allocation15 + $0xd74] sm:$0xf0] }
 0x300   :  { %v6998_v10 = vsel %vm15418_vm13, 0.0, %v6952_v49  ;;  %v5396_v40 = vpop.f32.mrf.mxu3  ;;  %v5311_v34 = vpop.f32.mrf.mxu0  ;;  %v5230_v49 = vadd.f32 %v15357_v52, %v5201_v62  ;;  %v13656_v38 = vld [vmem:[#allocation15 + $0xb74] sm:$0xf0]  ;;  %v11519_v39 = vld [vmem:[#allocation15 + $0xc48] sm:$0xf] }
 0x301   :  { %v7027_v15 = vpack.c.bf16 %v6998_v10, %v6997_v30  ;;  %v15436_v2 = vadd.f32 %v5396_v40, %v5367_v37  ;;  %v5312_v27 = vadd.f32 %v5311_v34, %v5283_v46  ;;  %v5340_v41 = vpop.f32.mrf.mxu1  ;;  %v11535_v46 = vld [vmem:[#allocation15 + $0xc68] sm:$0xf]  ;;  %v13624_v30 = vld [vmem:[#allocation15 + $0xa74] sm:$0xf0] }
 0x302   :  { %v11536_v63 = vor.u32 %v13688_v17, %v11535_v46  ;;  %v11663_v10 = vld [vmem:[#allocation15 + $0xd68] sm:$0xf]  ;;  %v11280_v34 = vor.u32 %v13624_v30, %v11279_v32  ;;  %v5204_v46 = vadd.f32 %v15363_v54, %v15312_v6 }
 0x303   :  { %7043 = vst [vmem:[#allocation4 + $0x10] sm:$0xff] %v7027_v15  ;;  %v5341_v4 = vadd.f32 %v5340_v41, %v5312_v27  ;;  %v5259_v15 = vadd.f32 %v15359_v11, %v5230_v49  ;;  %v11664_v41 = vor.u32 %v13720_v0, %v11663_v10  ;;  %v11263_v11 = vld [vmem:[#allocation15 + $0xa48] sm:$0xf]  ;;  %v16867_v49 = vld [vmem:[#allocation49_spill] sm:$0xff]  ;;  %v13652_v10 = vld [vmem:[#allocation15 + $0xb54] sm:$0xf0] }
 0x304   :  { %5710 = vmatpush.bf16.msra.mxu2 %v11536_v63  ;;  %v13620_v63 = vld [vmem:[#allocation15 + $0xa54] sm:$0xf0]  ;;  %v11647_v32 = vld [vmem:[#allocation15 + $0xd48] sm:$0xf]  ;;  %5652 = vmatpush.bf16.msra.mxu0 %v11280_v34 }
 0x305   :  { %v6561_v1 = vadd.f32 %v6557_v26, %v5341_v4  ;;  %v11264_v20 = vor.u32 %v13620_v63, %v11263_v11  ;;  %5739 = vmatpush.bf16.msra.mxu3 %v11664_v41  ;;  %v5206_v11 = vadd.f32 %v15375_v56, %v15315_v12 }
 0x307   :  { %v6569_v3 = vadd.f32 %v6565_v50, %v6561_v1  ;;  %v5369_v31 = vpop.f32.mrf.mxu2  ;;  %v6606_v18 = vmul.f32 0.75, %v6561_v1  ;;  %v16865_v50 = vld [vmem:[#allocation48_spill] sm:$0xff]  ;;  %v11408_v1 = vor.u32 %v13656_v38, %v11407_v47 }
 0x308   :  { %v5398_v33 = vpop.f32.mrf.mxu3  ;;  %v5314_v37 = vpop.f32.mrf.mxu0  ;;  %5653 = vmatpush.bf16.msra.mxu0 %v11264_v20  ;;  %v13648_v20 = vld [vmem:[#allocation15 + $0xb34] sm:$0xf0] }
 0x309   :  { %v15444_v40 = vadd.f32 %v5398_v33, %v5369_v31  ;;  %v5315_v53 = vadd.f32 %v5314_v37, %v5286_v5  ;;  %v5343_v61 = vpop.f32.mrf.mxu1  ;;  %vm6573_vm14 = vcmp.ge.f32.partialorder %v6569_v3, 1.25  ;;  %v13684_v5 = vld [vmem:[#allocation15 + $0xc54] sm:$0xf0]  ;;  %v16868_v33 = vld [vmem:[#allocation62_spill] sm:$0xff]  ;;  %5681 = vmatpush.bf16.msra.mxu1 %v11408_v1 }
 0x30a   :  { %v15448_v27 = vsel %vm6573_vm14, 1.0, %v16810_v42  ;;  %v6595_v52 = vsel %vm6573_vm14, 0.0, %v6569_v3  ;;  %v16866_v3 = vsel %vm15117_vm3, %v15123_v21, %v15126_v9  ;;  %v11520_v37 = vor.u32 %v13684_v5, %v11519_v39  ;;  %v13716_v21 = vld [vmem:[#allocation15 + $0xd54] sm:$0xf0]  ;;  %v11391_v9 = vld [vmem:[#allocation15 + $0xb48] sm:$0xf] }
 0x30b   :  { %v5344_v26 = vadd.f32 %v5343_v61, %v5315_v53  ;;  %v6614_v4 = vmul.f32 0.97, %v6595_v52  ;;  %v6956_v62 = vsel %vm15410_vm11, %v15425_v14, %v15448_v27  ;;  %5545 = vmatmul.bf16.gmra.mxu0 %v16865_v50  ;;  %v7001_v31 = vsel %vm15136_vm5, 0.0, %v16866_v3  ;;  %5574 = vmatmul.bf16.gmra.mxu1 %v16867_v49  ;;  %v11503_v1 = vld [vmem:[#allocation15 + $0xc28] sm:$0xf] }
 0x30c   :  { %v7002_v17 = vsel %vm15418_vm13, 0.0, %v6956_v62  ;;  %5603 = vmatmul.bf16.gmra.mxu2 %v16868_v33  ;;  %v11648_v54 = vor.u32 %v13716_v21, %v11647_v32  ;;  %v11392_v6 = vor.u32 %v13652_v10, %v11391_v9  ;;  %v5288_v53 = vadd.f32 %v15361_v13, %v5259_v15  ;;  %v13680_v5 = vld [vmem:[#allocation15 + $0xc34] sm:$0xf0] }
 0x30d   :  { %v6610_v16 = vadd.f32 %v6606_v18, %v5344_v26  ;;  %v7029_v30 = vpack.c.bf16 %v7002_v17, %v7001_v31  ;;  %5632 = vmatmul.bf16.gmra.mxu3 %v16822_v60  ;;  %5711 = vmatpush.bf16.msra.mxu2 %v11520_v37  ;;  %v5233_v52 = vadd.f32 %v15365_v22, %v5204_v46  ;;  %v11247_v46 = vld [vmem:[#allocation15 + $0xa28] sm:$0xf]  ;;  %v13616_v17 = vld [vmem:[#allocation15 + $0xa34] sm:$0xf0] }
 0x30e   :  { %5740 = vmatpush.bf16.msra.mxu3 %v11648_v54  ;;  %5682 = vmatpush.bf16.msra.mxu1 %v11392_v6  ;;  %v11504_v31 = vor.u32 %v13680_v5, %v11503_v1  ;;  %v11248_v32 = vor.u32 %v13616_v17, %v11247_v46  ;;  %v13676_v54 = vld [vmem:[#allocation15 + $0xc14] sm:$0xf0]  ;;  %v5235_v6 = vadd.f32 %v15377_v36, %v5206_v11 }
 0x30f   :  { %v6618_v61 = vadd.f32 %v6614_v4, %v6610_v16  ;;  %7045 = vst [vmem:[#allocation4 + $0x20] sm:$0xff] %v7029_v30  ;;  %v5372_v0 = vpop.f32.mrf.mxu2  ;;  %v6655_v62 = vmul.f32 0.75, %v6610_v16  ;;  %v5262_v13 = vadd.f32 %v15371_v57, %v5233_v52  ;;  %v11631_v57 = vld [vmem:[#allocation15 + $0xd28] sm:$0xf]  ;;  %v13712_v16 = vld [vmem:[#allocation15 + $0xd34] sm:$0xf0] }
 0x310   :  { %v5401_v47 = vpop.f32.mrf.mxu3  ;;  %v5316_v18 = vpop.f32.mrf.mxu0  ;;  %v11375_v30 = vld [vmem:[#allocation15 + $0xb28] sm:$0xf]  ;;  %v11632_v21 = vor.u32 %v13712_v16, %v11631_v57  ;;  %5654 = vmatpush.bf16.msra.mxu0 %v11248_v32  ;;  %v16870_v57 = vld [vmem:[#allocation53_spill] sm:$0xff]  ;;  %v16872_v32 = vld [vmem:[#allocation104_spill] sm:$0xff] }
 0x311   :  { %vm6622_vm15 = vcmp.ge.f32.partialorder %v6618_v61, 1.25  ;;  %v15471_v34 = vadd.f32 %v5401_v47, %v5372_v0  ;;  %v5317_v38 = vadd.f32 %v5316_v18, %v5288_v53  ;;  %v5345_v39 = vpop.f32.mrf.mxu1  ;;  %5712 = vmatpush.bf16.msra.mxu2 %v11504_v31  ;;  %v11376_v9 = vor.u32 %v13648_v20, %v11375_v30  ;;  %v11231_v0 = vld [vmem:[#allocation15 + $0xa08] sm:$0xf]  ;;  %v13612_v47 = vld [vmem:[#allocation15 + $0xa14] sm:$0xf0] }
 0x312   :  { %v15474_v41 = vsel %vm6622_vm15, 1.0, %v16810_v42  ;;  %v6644_v26 = vsel %vm6622_vm15, 0.0, %v6618_v61  ;;  %v5291_v12 = vadd.f32 %v15373_v51, %v5262_v13  ;;  %5741 = vmatpush.bf16.msra.mxu3 %v11632_v21  ;;  %v11615_v18 = vld [vmem:[#allocation15 + $0xd08] sm:$0xf]  ;;  %v5264_v13 = vadd.f32 %v15379_v28, %v5235_v6  ;;  %v13832_v20 = vld [vmem:[#allocation15 + $0x10f4] sm:$0xf0] }
 0x313   :  { %v6663_v15 = vmul.f32 0.97, %v6644_v26  ;;  %v6960_v22 = vsel %vm15410_vm11, %v15448_v27, %v15474_v41  ;;  %v5346_v4 = vadd.f32 %v5345_v39, %v5317_v38  ;;  %5683 = vmatpush.bf16.msra.mxu1 %v11376_v9  ;;  %v11232_v39 = vor.u32 %v13612_v47, %v11231_v0  ;;  %v13708_v26 = vld [vmem:[#allocation15 + $0xd14] sm:$0xf0]  ;;  %v12111_v30 = vld [vmem:[#allocation15 + $0x10e8] sm:$0xf] }
 0x314   :  { %v7006_v3 = vsel %vm15418_vm13, %v15425_v14, %v6960_v22  ;;  %v11487_v14 = vld [vmem:[#allocation15 + $0xc08] sm:$0xf]  ;;  %v11616_v22 = vor.u32 %v13708_v26, %v11615_v18  ;;  %v5209_v28 = vadd.f32 %v15383_v45, %v15321_v43  ;;  %v12112_v43 = vor.u32 %v13832_v20, %v12111_v30  ;;  %v13768_v45 = vld [vmem:[#allocation15 + $0xef4] sm:$0xf0] }
 0x315   :  { %v7031_v37 = vpack.c.bf16 %v7006_v3, %v15152_v7  ;;  %v6659_v63 = vadd.f32 %v6655_v62, %v5346_v4  ;;  %v11488_v61 = vor.u32 %v13676_v54, %v11487_v14  ;;  %v11359_v62 = vld [vmem:[#allocation15 + $0xb08] sm:$0xf]  ;;  %v13644_v4 = vld [vmem:[#allocation15 + $0xb14] sm:$0xf0]  ;;  %5655 = vmatpush.bf16.msra.mxu0 %v11232_v39 }
 0x316   :  { %v16869_v3 = vld [vmem:[#allocation52_spill] sm:$0xff]  ;;  %v11360_v31 = vor.u32 %v13644_v4, %v11359_v62  ;;  %v11855_v21 = vld [vmem:[#allocation15 + $0xee8] sm:$0xf]  ;;  %5742 = vmatpush.bf16.msra.mxu3 %v11616_v22  ;;  %v5238_v6 = vadd.f32 %v15385_v24, %v5209_v28  ;;  %v16873_v28 = vld [vmem:[#allocation105_spill] sm:$0xff] }
 0x317   :  { %7047 = vst [vmem:[#allocation4 + $0x30] sm:$0xff] %v7031_v37  ;;  %v6667_v56 = vadd.f32 %v6663_v15, %v6659_v63  ;;  %v5374_v10 = vpop.f32.mrf.mxu2  ;;  %5713 = vmatpush.bf16.msra.mxu2 %v11488_v61  ;;  %v6704_v5 = vmul.f32 0.75, %v6659_v63  ;;  %v16871_v37 = vld [vmem:[#allocation66_spill] sm:$0xff]  ;;  %v11856_v14 = vor.u32 %v13768_v45, %v11855_v21  ;;  %v13800_v39 = vld [vmem:[#allocation15 + $0xff4] sm:$0xf0] }
 0x318   :  { %v5403_v53 = vpop.f32.mrf.mxu3  ;;  %v5319_v7 = vpop.f32.mrf.mxu0  ;;  %5684 = vmatpush.bf16.msra.mxu1 %v11360_v31  ;;  %v12239_v9 = vld [vmem:[#allocation15 + $0x11e8] sm:$0xf]  ;;  %v5267_v18 = vadd.f32 %v15393_v55, %v5238_v6  ;;  %v13828_v22 = vld [vmem:[#allocation15 + $0x10d4] sm:$0xf0] }
 0x319   :  { %v15489_v52 = vadd.f32 %v5403_v53, %v5374_v10  ;;  %v5320_v38 = vadd.f32 %v5319_v7, %v5291_v12  ;;  %v5348_v51 = vpop.f32.mrf.mxu1  ;;  %vm6671_vm0 = vcmp.ge.f32.partialorder %v6667_v56, 1.25  ;;  %v13864_v12 = vld [vmem:[#allocation15 + $0x11f4] sm:$0xf0]  ;;  %5764 = vmatpush.bf16.msrb.mxu0 %v11856_v14 }
 0x31a   :  { %v15493_v36 = vsel %vm6671_vm0, 1.0, %v16810_v42  ;;  %v6693_v15 = vsel %vm6671_vm0, 0.0, %v6667_v56  ;;  %v12240_v54 = vor.u32 %v13864_v12, %v12239_v9  ;;  %v5296_v30 = vadd.f32 %v15395_v35, %v5267_v18  ;;  %v13796_v14 = vld [vmem:[#allocation15 + $0xfd4] sm:$0xf0]  ;;  %v16875_v18 = vld [vmem:[#allocation57_spill] sm:$0xff] }
 0x31b   :  { %v5349_v1 = vadd.f32 %v5348_v51, %v5320_v38  ;;  %v6964_v11 = vsel %vm15410_vm11, %v15474_v41, %v15493_v36  ;;  %5550 = vmatmul.bf16.gmra.mxu0 %v16869_v3  ;;  %v6712_v46 = vmul.f32 0.97, %v6693_v15  ;;  %5579 = vmatmul.bf16.gmra.mxu1 %v16870_v57  ;;  %v11983_v51 = vld [vmem:[#allocation15 + $0xfe8] sm:$0xf] }
 0x31c   :  { %v7010_v17 = vsel %vm15418_vm13, %v15448_v27, %v6964_v11  ;;  %5608 = vmatmul.bf16.gmra.mxu2 %v16871_v37  ;;  %v5293_v27 = vadd.f32 %v15381_v44, %v5264_v13  ;;  %5851 = vmatpush.bf16.msrb.mxu3 %v12240_v54  ;;  %v11984_v13 = vor.u32 %v13800_v39, %v11983_v51  ;;  %v12095_v15 = vld [vmem:[#allocation15 + $0x10c8] sm:$0xf] }
 0x31d   :  { %v6708_v63 = vadd.f32 %v6704_v5, %v5349_v1  ;;  %v7033_v16 = vpack.c.bf16 %v7010_v17, %v16872_v32  ;;  %5637 = vmatmul.bf16.gmra.mxu3 %v16826_v8  ;;  %5822 = vmatpush.bf16.msrb.mxu2 %v12112_v43  ;;  %v12096_v4 = vor.u32 %v13828_v22, %v12095_v15  ;;  %v11839_v1 = vld [vmem:[#allocation15 + $0xec8] sm:$0xf]  ;;  %v13764_v5 = vld [vmem:[#allocation15 + $0xed4] sm:$0xf0] }
 0x31e   :  { %v12223_v11 = vld [vmem:[#allocation15 + $0x11c8] sm:$0xf]  ;;  %5793 = vmatpush.bf16.msrb.mxu1 %v11984_v13  ;;  %v13860_v32 = vld [vmem:[#allocation15 + $0x11d4] sm:$0xf0] }
 0x31f   :  { %v6716_v56 = vadd.f32 %v6712_v46, %v6708_v63  ;;  %7049 = vst [vmem:[#allocation4 + $0x40] sm:$0xff] %v7033_v16  ;;  %v5377_v10 = vpop.f32.mrf.mxu2  ;;  %v6753_v26 = vmul.f32 0.75, %v6708_v63  ;;  %v11840_v63 = vor.u32 %v13764_v5, %v11839_v1  ;;  %v12224_v16 = vor.u32 %v13860_v32, %v12223_v11  ;;  %v16877_v39 = vld [vmem:[#allocation106_spill] sm:$0xff]  ;;  %v13824_v13 = vld [vmem:[#allocation15 + $0x10b4] sm:$0xf0] }
 0x320   :  { %v5406_v53 = vpop.f32.mrf.mxu3  ;;  %v5321_v7 = vpop.f32.mrf.mxu0  ;;  %v11823_v15 = vld [vmem:[#allocation15 + $0xea8] sm:$0xf]  ;;  %v13856_v1 = vld [vmem:[#allocation15 + $0x11b4] sm:$0xf0] }
 0x321   :  { %vm6720_vm1 = vcmp.ge.f32.partialorder %v6716_v56, 1.25  ;;  %v15511_v61 = vadd.f32 %v5406_v53, %v5377_v10  ;;  %v5322_v0 = vadd.f32 %v5321_v7, %v5293_v27  ;;  %v5350_v47 = vpop.f32.mrf.mxu1  ;;  %5823 = vmatpush.bf16.msrb.mxu2 %v12096_v4  ;;  %5765 = vmatpush.bf16.msrb.mxu0 %v11840_v63  ;;  %v11967_v10 = vld [vmem:[#allocation15 + $0xfc8] sm:$0xf]  ;;  %v16874_v53 = vld [vmem:[#allocation56_spill] sm:$0xff] }
 0x322   :  { %v15515_v44 = vsel %vm6720_vm1, 1.0, %v16810_v42  ;;  %v6742_v38 = vsel %vm6720_vm1, 0.0, %v6716_v56  ;;  %5852 = vmatpush.bf16.msrb.mxu3 %v12224_v16  ;;  %v11968_v7 = vor.u32 %v13796_v14, %v11967_v10  ;;  %v12207_v4 = vld [vmem:[#allocation15 + $0x11a8] sm:$0xf]  ;;  %v13756_v10 = vld [vmem:[#allocation15 + $0xe94] sm:$0xf0] }
 0x323   :  { %v6968_v24 = vsel %vm15410_vm11, %v15493_v36, %v15515_v44  ;;  %v5351_v62 = vadd.f32 %v5350_v47, %v5322_v0  ;;  %v6761_v31 = vmul.f32 0.97, %v6742_v38  ;;  %v16876_v38 = vld [vmem:[#allocation70_spill] sm:$0xff] }
 0x324   :  { %v7014_v55 = vsel %vm15418_vm13, %v15474_v41, %v6968_v24  ;;  %v16878_v24 = vld [vmem:[#allocation71_spill] sm:$0xff]  ;;  %5794 = vmatpush.bf16.msrb.mxu1 %v11968_v7  ;;  %v11951_v16 = vld [vmem:[#allocation15 + $0xfa8] sm:$0xf] }
 0x325   :  { %v7035_v46 = vpack.c.bf16 %v7014_v55, %v16873_v28  ;;  %v6757_v17 = vadd.f32 %v6753_v26, %v5351_v62  ;;  %v12079_v62 = vld [vmem:[#allocation15 + $0x10a8] sm:$0xf]  ;;  %v13760_v55 = vld [vmem:[#allocation15 + $0xeb4] sm:$0xf0] }
 0x326   :  { %v12080_v22 = vor.u32 %v13824_v13, %v12079_v62  ;;  %v11824_v11 = vor.u32 %v13760_v55, %v11823_v15  ;;  %v12191_v14 = vld [vmem:[#allocation15 + $0x1188] sm:$0xf]  ;;  %v16880_v62 = vld [vmem:[#allocation60_spill] sm:$0xff]  ;;  %v16881_v15 = vld [vmem:[#allocation61_spill] sm:$0xff] }
 0x327   :  { %7051 = vst [vmem:[#allocation4 + $0x50] sm:$0xff] %v7035_v46  ;;  %v6765_v20 = vadd.f32 %v6761_v31, %v6757_v17  ;;  %v5379_v21 = vpop.f32.mrf.mxu2  ;;  %v6802_v6 = vmul.f32 0.75, %v6757_v17  ;;  %v12208_v31 = vor.u32 %v13856_v1, %v12207_v4  ;;  %v12047_v55 = vld [vmem:[#allocation15 + $0x1068] sm:$0xf]  ;;  %v13816_v4 = vld [vmem:[#allocation15 + $0x1074] sm:$0xf0] }
 0x328   :  { %v5408_v41 = vpop.f32.mrf.mxu3  ;;  %v5324_v43 = vpop.f32.mrf.mxu0  ;;  %5824 = vmatpush.bf16.msrb.mxu2 %v12080_v22  ;;  %5766 = vmatpush.bf16.msrb.mxu0 %v11824_v11  ;;  %v16882_v22 = vld [vmem:[#allocation74_spill] sm:$0xff]  ;;  %v13848_v11 = vld [vmem:[#allocation15 + $0x1174] sm:$0xf0] }
 0x329   :  { %v15526_v45 = vadd.f32 %v5408_v41, %v5379_v21  ;;  %v5325_v9 = vadd.f32 %v5324_v43, %v5296_v30  ;;  %v5353_v12 = vpop.f32.mrf.mxu1  ;;  %vm6769_vm2 = vcmp.ge.f32.partialorder %v6765_v20, 1.25  ;;  %5853 = vmatpush.bf16.msrb.mxu3 %v12208_v31  ;;  %v13792_v30 = vld [vmem:[#allocation15 + $0xfb4] sm:$0xf0]  ;;  %v12063_v41 = vld [vmem:[#allocation15 + $0x1088] sm:$0xf] }
 0x32a   :  { %v12394_v27 = vsel %vm6769_vm2, 1.0, %v16810_v42  ;;  %v6791_v56 = vsel %vm6769_vm2, 0.0, %v6765_v20  ;;  %v11952_v21 = vor.u32 %v13792_v30, %v11951_v16  ;;  %v13820_v43 = vld [vmem:[#allocation15 + $0x1094] sm:$0xf0]  ;;  %v11791_v1 = vld [vmem:[#allocation15 + $0xe68] sm:$0xf] }
 0x32b   :  { %v5354_v54 = vadd.f32 %v5353_v12, %v5325_v9  ;;  %v6972_v35 = vsel %vm15410_vm11, %v15515_v44, %v12394_v27  ;;  %5555 = vmatmul.bf16.gmra.mxu0 %v16874_v53  ;;  %v6810_v0 = vmul.f32 0.97, %v6791_v56  ;;  %5584 = vmatmul.bf16.gmra.mxu1 %v16875_v18  ;;  %v11807_v9 = vld [vmem:[#allocation15 + $0xe88] sm:$0xf]  ;;  %v12064_v56 = vor.u32 %v13820_v43, %v12063_v41  ;;  %v13784_v43 = vld [vmem:[#allocation15 + $0xf74] sm:$0xf0] }
 0x32c   :  { %v7018_v47 = vsel %vm15418_vm13, %v15493_v36, %v6972_v35  ;;  %5613 = vmatmul.bf16.gmra.mxu2 %v16876_v38  ;;  %5795 = vmatpush.bf16.msrb.mxu1 %v11952_v21  ;;  %v11808_v7 = vor.u32 %v13756_v10, %v11807_v9  ;;  %v11919_v41 = vld [vmem:[#allocation15 + $0xf68] sm:$0xf]  ;;  %v13812_v10 = vld [vmem:[#allocation15 + $0x1054] sm:$0xf0] }
 0x32d   :  { %v6806_v51 = vadd.f32 %v6802_v6, %v5354_v54  ;;  %v7037_v26 = vpack.c.bf16 %v7018_v47, %v16877_v39  ;;  %5642 = vmatmul.bf16.gmra.mxu3 %v16878_v24  ;;  %v13852_v54 = vld [vmem:[#allocation15 + $0x1194] sm:$0xf0]  ;;  %v16879_v6 = vld [vmem:[#allocation107_spill] sm:$0xff]  ;;  %5825 = vmatpush.bf16.msrb.mxu2 %v12064_v56  ;;  %v12031_v56 = vld [vmem:[#allocation15 + $0x1048] sm:$0xf] }
 0x32e   :  { %5767 = vmatpush.bf16.msrb.mxu0 %v11808_v7  ;;  %v13788_v39 = vld [vmem:[#allocation15 + $0xf94] sm:$0xf0] }
 0x32f   :  { %v6814_v5 = vadd.f32 %v6810_v0, %v6806_v51  ;;  %7053 = vst [vmem:[#allocation4 + $0x60] sm:$0xff] %v7037_v26  ;;  %v5382_v36 = vpop.f32.mrf.mxu2  ;;  %v12192_v0 = vor.u32 %v13852_v54, %v12191_v14  ;;  %v11775_v14 = vld [vmem:[#allocation15 + $0xe48] sm:$0xf]  ;;  %v12032_v54 = vor.u32 %v13812_v10, %v12031_v56  ;;  %v13844_v7 = vld [vmem:[#allocation15 + $0x1154] sm:$0xf0] }
 0x330   :  { %v5411_v28 = vpop.f32.mrf.mxu3  ;;  %v5326_v46 = vpop.f32.mrf.mxu0 }
 0x331   :  { %vm6818_vm3 = vcmp.ge.f32.partialorder %v6814_v5, 1.25  ;;  %v15540_v17 = vadd.f32 %v5411_v28, %v5382_v36  ;;  %v5355_v63 = vpop.f32.mrf.mxu1  ;;  %5854 = vmatpush.bf16.msrb.mxu3 %v12192_v0  ;;  %v12048_v5 = vor.u32 %v13816_v4, %v12047_v55  ;;  %v13752_v36 = vld [vmem:[#allocation15 + $0xe74] sm:$0xf0] }
 0x332   :  { %v12398_v32 = vsel %vm6818_vm3, 1.0, %v16810_v42  ;;  %v11792_v28 = vor.u32 %v13752_v36, %v11791_v1  ;;  %v16883_v4 = vld [vmem:[#allocation64_spill] sm:$0xff]  ;;  %v16885_v36 = vld [vmem:[#allocation78_spill] sm:$0xff] }
 0x333   :  { %v6976_v20 = vsel %vm15410_vm11, %v12394_v27, %v12398_v32  ;;  %5826 = vmatpush.bf16.msrb.mxu2 %v12048_v5  ;;  %v16884_v5 = vld [vmem:[#allocation65_spill] sm:$0xff] }
 0x334   :  { %v7022_v12 = vsel %vm15418_vm13, %v15515_v44, %v6976_v20  ;;  %v11935_v44 = vld [vmem:[#allocation15 + $0xf88] sm:$0xf]  ;;  %5768 = vmatpush.bf16.msrb.mxu0 %v11792_v28 }
 0x335   :  { %v7039_v35 = vpack.c.bf16 %v7022_v12, %v16879_v6  ;;  %v11936_v13 = vor.u32 %v13788_v39, %v11935_v44  ;;  %v11920_v12 = vor.u32 %v13784_v43, %v11919_v41  ;;  %v13748_v6 = vld [vmem:[#allocation15 + $0xe54] sm:$0xf0]  ;;  %v11759_v28 = vld [vmem:[#allocation15 + $0xe28] sm:$0xf] }
 0x336   :  { %v11776_v0 = vor.u32 %v13748_v6, %v11775_v14  ;;  %v11887_v14 = vld [vmem:[#allocation15 + $0xf28] sm:$0xf] }
 0x337   :  { %7055 = vst [vmem:[#allocation4 + $0x70] sm:$0xff] %v7039_v35  ;;  %v5384_v25 = vpop.f32.mrf.mxu2  ;;  %5796 = vmatpush.bf16.msrb.mxu1 %v11936_v13  ;;  %v12159_v35 = vld [vmem:[#allocation15 + $0x1148] sm:$0xf]  ;;  %5827 = vmatpush.bf16.msrb.mxu2 %v12032_v54  ;;  %v13780_v13 = vld [vmem:[#allocation15 + $0xf54] sm:$0xf0] }
 0x338   :  { %v5413_v27 = vpop.f32.mrf.mxu3  ;;  %v5425_v47 = vpop.f32.mrf.mxu0  ;;  %v12160_v25 = vor.u32 %v13844_v7, %v12159_v35  ;;  %5769 = vmatpush.bf16.msrb.mxu0 %v11776_v0  ;;  %v13776_v54 = vld [vmem:[#allocation15 + $0xf34] sm:$0xf0]  ;;  %v11999_v6 = vld [vmem:[#allocation15 + $0x1008] sm:$0xf] }
 0x339   :  { %v5426_v51 = vadd.f32 %v5425_v47, %v15436_v2  ;;  %v5454_v59 = vpop.f32.mrf.mxu1  ;;  %v12175_v2 = vld [vmem:[#allocation15 + $0x1168] sm:$0xf]  ;;  %v11888_v7 = vor.u32 %v13776_v54, %v11887_v14  ;;  %v13804_v0 = vld [vmem:[#allocation15 + $0x1014] sm:$0xf0]  ;;  %v13382_v14 = vld [vmem:[#allocation15 + $0x2ec] sm:$0xf] }
 0x33a   :  { %v12176_v46 = vor.u32 %v13848_v11, %v12175_v2  ;;  %v16886_v2 = vld [vmem:[#allocation79_spill] sm:$0xff]  ;;  %v12015_v11 = vld [vmem:[#allocation15 + $0x1028] sm:$0xf] }
 0x33b   :  { %v5455_v26 = vadd.f32 %v5454_v59, %v5426_v51  ;;  %5656 = vmatmul.bf16.vlgmr.msra.gmra.mxu0 %v16880_v62  ;;  %5685 = vmatmul.bf16.vlgmr.msra.gmra.mxu1 %v16881_v15 }
 0x33c   :  { %5714 = vmatmul.bf16.vlgmr.msra.gmra.mxu2 %v16882_v22  ;;  %5855 = vmatpush.bf16.msrb.mxu3 %v12176_v46  ;;  %v13744_v46 = vld [vmem:[#allocation15 + $0xe34] sm:$0xf0] }
 0x33d   :  { %5743 = vmatmul.bf16.vlgmr.msra.gmra.mxu3 %v16834_v48  ;;  %5797 = vmatpush.bf16.msrb.mxu1 %v11920_v12 }
 0x33f   :  { %v5483_v31 = vpop.f32.mrf.mxu2 }
 0x340   :  { %v5484_v63 = vadd.f32 %v5483_v31, %v5455_v26  ;;  %v5512_v32 = vpop.f32.mrf.mxu3  ;;  %v5427_v16 = vpop.f32.mrf.mxu0  ;;  %5856 = vmatpush.bf16.msrb.mxu3 %v12160_v25  ;;  %v11903_v26 = vld [vmem:[#allocation15 + $0xf48] sm:$0xf]  ;;  %v13808_v31 = vld [vmem:[#allocation15 + $0x1034] sm:$0xf0] }
 0x341   :  { %v5428_v30 = vadd.f32 %v5427_v16, %v15444_v40  ;;  %v5456_v20 = vpop.f32.mrf.mxu1  ;;  %v11904_v1 = vor.u32 %v13780_v13, %v11903_v26  ;;  %v11743_v25 = vld [vmem:[#allocation15 + $0xe08] sm:$0xf]  ;;  %v13772_v13 = vld [vmem:[#allocation15 + $0xf14] sm:$0xf0] }
 0x342   :  { %v15555_v21 = vadd.f32 %v5512_v32, %v5484_v63  ;;  %v12143_v63 = vld [vmem:[#allocation15 + $0x1128] sm:$0xf]  ;;  %v13840_v32 = vld [vmem:[#allocation15 + $0x1134] sm:$0xf0] }
 0x343   :  { %v5457_v9 = vadd.f32 %v5456_v20, %v5428_v30  ;;  %5798 = vmatpush.bf16.msrb.mxu1 %v11904_v1  ;;  %v11760_v30 = vor.u32 %v13744_v46, %v11759_v28  ;;  %v12144_v20 = vor.u32 %v13840_v32, %v12143_v63  ;;  %v11871_v26 = vld [vmem:[#allocation15 + $0xf08] sm:$0xf]  ;;  %v16887_v32 = vld [vmem:[#allocation68_spill] sm:$0xff] }
 0x345   :  { %5770 = vmatpush.bf16.msrb.mxu0 %v11760_v30  ;;  %5857 = vmatpush.bf16.msrb.mxu3 %v12144_v20  ;;  %v16889_v30 = vld [vmem:[#allocation82_spill] sm:$0xff]  ;;  %v16890_v20 = vld [vmem:[#allocation83_spill] sm:$0xff] }
 0x347   :  { %v5485_v40 = vpop.f32.mrf.mxu2  ;;  %5799 = vmatpush.bf16.msrb.mxu1 %v11888_v7 }
 0x348   :  { %v5486_v27 = vadd.f32 %v5485_v40, %v5457_v9  ;;  %v5514_v47 = vpop.f32.mrf.mxu3  ;;  %v5430_v51 = vpop.f32.mrf.mxu0  ;;  %v13740_v40 = vld [vmem:[#allocation15 + $0xe14] sm:$0xf0] }
 0x349   :  { %v5431_v59 = vadd.f32 %v5430_v51, %v15471_v34  ;;  %v5459_v44 = vpop.f32.mrf.mxu1  ;;  %v12016_v34 = vor.u32 %v13808_v31, %v12015_v11  ;;  %v12127_v51 = vld [vmem:[#allocation15 + $0x1108] sm:$0xf]  ;;  %v11872_v31 = vor.u32 %v13772_v13, %v11871_v26  ;;  %v13346_v26 = vld [vmem:[#allocation15 + $0x1cc] sm:$0xf]  ;;  %v10177_v13 = vld [vmem:[#allocation15 + $0x1d8] sm:$0xf0] }
 0x34a   :  { %v15558_v39 = vadd.f32 %v5514_v47, %v5486_v27  ;;  %v12000_v27 = vor.u32 %v13804_v0, %v11999_v6  ;;  %v11744_v47 = vor.u32 %v13740_v40, %v11743_v25 }
 0x34b   :  { %v5460_v55 = vadd.f32 %v5459_v44, %v5431_v59  ;;  %5661 = vmatmul.bf16.gmra.mxu0 %v16883_v4  ;;  %5690 = vmatmul.bf16.gmra.mxu1 %v16884_v5  ;;  %v13836_v59 = vld [vmem:[#allocation15 + $0x1114] sm:$0xf0] }
 0x34c   :  { %5719 = vmatmul.bf16.gmra.mxu2 %v16885_v36  ;;  %v12128_v44 = vor.u32 %v13836_v59, %v12127_v51  ;;  %5771 = vmatpush.bf16.msrb.mxu0 %v11744_v47  ;;  %v13318_v51 = vld [vmem:[#allocation15 + $0xec] sm:$0xf]  ;;  %v10065_v59 = vld [vmem:[#allocation15 + $0xf8] sm:$0xf0] }
 0x34d   :  { %5748 = vmatmul.bf16.gmra.mxu3 %v16886_v2  ;;  %5828 = vmatpush.bf16.msrb.mxu2 %v12016_v34 }
 0x34e   :  { %5858 = vmatpush.bf16.msrb.mxu3 %v12128_v44  ;;  %5800 = vmatpush.bf16.msrb.mxu1 %v11872_v31  ;;  %v13378_v31 = vld [vmem:[#allocation15 + $0x2cc] sm:$0xf] }
 0x34f   :  { %v5488_v16 = vpop.f32.mrf.mxu2 }
 0x350   :  { %v5489_v41 = vadd.f32 %v5488_v16, %v5460_v55  ;;  %v5517_v43 = vpop.f32.mrf.mxu3  ;;  %v5432_v9 = vpop.f32.mrf.mxu0  ;;  %v16888_v16 = vld [vmem:[#allocation69_spill] sm:$0xff] }
 0x351   :  { %v5433_v12 = vadd.f32 %v5432_v9, %v15489_v52  ;;  %v5461_v56 = vpop.f32.mrf.mxu1  ;;  %5829 = vmatpush.bf16.msrb.mxu2 %v12000_v27  ;;  %v12367_v9 = vld [vmem:[#allocation15 + $0x12e8] sm:$0xf] }
 0x352   :  { %v15565_v10 = vadd.f32 %v5517_v43, %v5489_v41  ;;  %v13350_v41 = vld [vmem:[#allocation15 + $0x1ec] sm:$0xf]  ;;  %v10193_v43 = vld [vmem:[#allocation15 + $0x1f8] sm:$0xf0] }
 0x353   :  { %v5462_v35 = vadd.f32 %v5461_v56, %v5433_v12  ;;  %v10196_v12 = vor.u32 %v13350_v41, %v10193_v43  ;;  %v13896_v56 = vld [vmem:[#allocation15 + $0x12f4] sm:$0xf0] }
 0x354   :  { %v12368_v6 = vor.u32 %v13896_v56, %v12367_v9 }
 0x355   :  { %5938 = vmatpush.bf16.msra.mxu2 %v10196_v12 }
 0x356   :  { %5880 = vmatpush.bf16.msra.mxu0 %v12368_v6 }
 0x357   :  { %v5490_v52 = vpop.f32.mrf.mxu2 }
 0x358   :  { %v5491_v55 = vadd.f32 %v5490_v52, %v5462_v35  ;;  %v5519_v1 = vpop.f32.mrf.mxu3  ;;  %v5435_v11 = vpop.f32.mrf.mxu0  ;;  %v10068_v52 = vor.u32 %v13318_v51, %v10065_v59  ;;  %v10161_v51 = vld [vmem:[#allocation15 + $0x1b8] sm:$0xf0]  ;;  %v12335_v59 = vld [vmem:[#allocation15 + $0x12a8] sm:$0xf] }
 0x359   :  { %v5436_v28 = vadd.f32 %v5435_v11, %v15511_v61  ;;  %v5464_v34 = vpop.f32.mrf.mxu1  ;;  %v10321_v61 = vld [vmem:[#allocation15 + $0x2f8] sm:$0xf0]  ;;  %v13892_v11 = vld [vmem:[#allocation15 + $0x12d4] sm:$0xf0] }
 0x35a   :  { %v15568_v46 = vadd.f32 %v5519_v1, %v5491_v55  ;;  %v10324_v35 = vor.u32 %v13382_v14, %v10321_v61  ;;  %v12351_v55 = vld [vmem:[#allocation15 + $0x12c8] sm:$0xf]  ;;  %v10180_v1 = vor.u32 %v13346_v26, %v10177_v13  ;;  %5909 = vmatpush.bf16.msra.mxu1 %v10068_v52  ;;  %v13314_v61 = vld [vmem:[#allocation15 + $0xcc] sm:$0xf]  ;;  %v10289_v26 = vld [vmem:[#allocation15 + $0x2b8] sm:$0xf0] }
 0x35b   :  { %v5465_v63 = vadd.f32 %v5464_v34, %v5436_v28  ;;  %5666 = vmatmul.bf16.gmra.mxu0 %v16887_v32  ;;  %5695 = vmatmul.bf16.gmra.mxu1 %v16888_v16  ;;  %v10305_v28 = vld [vmem:[#allocation15 + $0x2d8] sm:$0xf0]  ;;  %v12352_v34 = vor.u32 %v13892_v11, %v12351_v55  ;;  %v13374_v52 = vld [vmem:[#allocation15 + $0x2ac] sm:$0xf] }
 0x35c   :  { %5724 = vmatmul.bf16.gmra.mxu2 %v16889_v30  ;;  %5967 = vmatpush.bf16.msra.mxu3 %v10324_v35  ;;  %v16891_v35 = vld [vmem:[#allocation72_spill] sm:$0xff] }
 0x35d   :  { %5753 = vmatmul.bf16.gmra.mxu3 %v16890_v20  ;;  %5939 = vmatpush.bf16.msra.mxu2 %v10180_v1  ;;  %v10292_v1 = vor.u32 %v13374_v52, %v10289_v26 }
 0x35e   :  { %5881 = vmatpush.bf16.msra.mxu0 %v12352_v34 }
 0x35f   :  { %v5493_v54 = vpop.f32.mrf.mxu2 }
 0x360   :  { %v5494_v7 = vadd.f32 %v5493_v54, %v5465_v63  ;;  %v5522_v0 = vpop.f32.mrf.mxu3  ;;  %v5437_v25 = vpop.f32.mrf.mxu0  ;;  %v10308_v63 = vor.u32 %v13378_v31, %v10305_v28  ;;  %v10049_v54 = vld [vmem:[#allocation15 + $0xd8] sm:$0xf0] }
 0x361   :  { %v5438_v40 = vadd.f32 %v5437_v25, %v15526_v45  ;;  %v5466_v27 = vpop.f32.mrf.mxu1  ;;  %v16893_v25 = vld [vmem:[#allocation86_spill] sm:$0xff] }
 0x362   :  { %v15575_v47 = vadd.f32 %v5522_v0, %v5494_v7  ;;  %5968 = vmatpush.bf16.msra.mxu3 %v10308_v63  ;;  %v10052_v7 = vor.u32 %v13314_v61, %v10049_v54  ;;  %v16892_v0 = vld [vmem:[#allocation73_spill] sm:$0xff]  ;;  %v13884_v54 = vld [vmem:[#allocation15 + $0x1294] sm:$0xf0] }
 0x363   :  { %v5467_v44 = vadd.f32 %v5466_v27, %v5438_v40  ;;  %v16894_v40 = vld [vmem:[#allocation87_spill] sm:$0xff]  ;;  %v13342_v27 = vld [vmem:[#allocation15 + $0x1ac] sm:$0xf] }
 0x364   :  { %5910 = vmatpush.bf16.msra.mxu1 %v10052_v7  ;;  %v13370_v7 = vld [vmem:[#allocation15 + $0x28c] sm:$0xf] }
 0x366   :  { %5969 = vmatpush.bf16.msra.mxu3 %v10292_v1 }
 0x367   :  { %v5495_v45 = vpop.f32.mrf.mxu2 }
 0x368   :  { %v5496_v41 = vadd.f32 %v5495_v45, %v5467_v44  ;;  %v5524_v43 = vpop.f32.mrf.mxu3  ;;  %v5440_v9 = vpop.f32.mrf.mxu0  ;;  %v13888_v44 = vld [vmem:[#allocation15 + $0x12b4] sm:$0xf0]  ;;  %v13310_v45 = vld [vmem:[#allocation15 + $0xac] sm:$0xf] }
 0x369   :  { %v5441_v12 = vadd.f32 %v5440_v9, %v15540_v17  ;;  %v5469_v56 = vpop.f32.mrf.mxu1  ;;  %v10164_v17 = vor.u32 %v13342_v27, %v10161_v51  ;;  %v12336_v55 = vor.u32 %v13888_v44, %v12335_v59  ;;  %v13338_v9 = vld [vmem:[#allocation15 + $0x18c] sm:$0xf]  ;;  %v10273_v27 = vld [vmem:[#allocation15 + $0x298] sm:$0xf0] }
 0x36a   :  { %v15578_v14 = vadd.f32 %v5524_v43, %v5496_v41  ;;  %v10033_v41 = vld [vmem:[#allocation15 + $0xb8] sm:$0xf0]  ;;  %v10276_v51 = vor.u32 %v13370_v7, %v10273_v27 }
 0x36b   :  { %v5470_v6 = vadd.f32 %v5469_v56, %v5441_v12  ;;  %5671 = vmatmul.bf16.gmra.mxu0 %v16891_v35  ;;  %5700 = vmatmul.bf16.gmra.mxu1 %v16892_v0  ;;  %v10036_v43 = vor.u32 %v13310_v45, %v10033_v41  ;;  %v10145_v12 = vld [vmem:[#allocation15 + $0x198] sm:$0xf0]  ;;  %v12319_v56 = vld [vmem:[#allocation15 + $0x1288] sm:$0xf]  ;;  %v16898_v45 = vld [vmem:[#allocation91_spill] sm:$0xff] }
 0x36c   :  { %5729 = vmatmul.bf16.gmra.mxu2 %v16893_v25  ;;  %5882 = vmatpush.bf16.msra.mxu0 %v12336_v55  ;;  %v10148_v61 = vor.u32 %v13338_v9, %v10145_v12  ;;  %v10017_v55 = vld [vmem:[#allocation15 + $0x98] sm:$0xf0]  ;;  %v13334_v41 = vld [vmem:[#allocation15 + $0x16c] sm:$0xf]  ;;  %v12303_v9 = vld [vmem:[#allocation15 + $0x1268] sm:$0xf] }
 0x36d   :  { %5758 = vmatmul.bf16.gmra.mxu3 %v16894_v40  ;;  %5940 = vmatpush.bf16.msra.mxu2 %v10164_v17  ;;  %v13498_v40 = vld [vmem:[#allocation15 + $0x68c] sm:$0xf] }
 0x36e   :  { %5911 = vmatpush.bf16.msra.mxu1 %v10036_v43  ;;  %5970 = vmatpush.bf16.msra.mxu3 %v10276_v51  ;;  %v10129_v43 = vld [vmem:[#allocation15 + $0x178] sm:$0xf0] }
 0x36f   :  { %v5498_v13 = vpop.f32.mrf.mxu2  ;;  %v10132_v12 = vor.u32 %v13334_v41, %v10129_v43  ;;  %v13330_v41 = vld [vmem:[#allocation15 + $0x14c] sm:$0xf]  ;;  %v10113_v43 = vld [vmem:[#allocation15 + $0x158] sm:$0xf0] }
 0x370   :  { %v5499_v11 = vadd.f32 %v5498_v13, %v5470_v6  ;;  %v5527_v31 = vpop.f32.mrf.mxu3  ;;  %v5442_v28 = vpop.f32.mrf.mxu0  ;;  %v12320_v6 = vor.u32 %v13884_v54, %v12319_v56  ;;  %v13306_v13 = vld [vmem:[#allocation15 + $0x8c] sm:$0xf]  ;;  %v13880_v56 = vld [vmem:[#allocation15 + $0x1274] sm:$0xf0] }
 0x371   :  { %v5471_v34 = vpop.f32.mrf.mxu1  ;;  %5941 = vmatpush.bf16.msra.mxu2 %v10148_v61  ;;  %v16896_v28 = vld [vmem:[#allocation77_spill] sm:$0xff]  ;;  %v10257_v61 = vld [vmem:[#allocation15 + $0x278] sm:$0xf0]  ;;  %v12304_v7 = vor.u32 %v13880_v56, %v12303_v9  ;;  %v10116_v9 = vor.u32 %v13330_v41, %v10113_v43  ;;  %v13876_v56 = vld [vmem:[#allocation15 + $0x1254] sm:$0xf0] }
 0x372   :  { %v15584_v63 = vadd.f32 %v5527_v31, %v5499_v11  ;;  %5883 = vmatpush.bf16.msra.mxu0 %v12320_v6  ;;  %v16895_v11 = vld [vmem:[#allocation76_spill] sm:$0xff]  ;;  %v10020_v31 = vor.u32 %v13306_v13, %v10017_v55  ;;  %v16897_v34 = vld [vmem:[#allocation90_spill] sm:$0xff]  ;;  %v16901_v41 = vld [vmem:[#allocation93_spill] sm:$0xff] }
 0x373   :  { %v10001_v13 = vld [vmem:[#allocation15 + $0x78] sm:$0xf0]  ;;  %v16902_v43 = vld [vmem:[#allocation94_spill] sm:$0xff] }
 0x374   :  { %5912 = vmatpush.bf16.msra.mxu1 %v10020_v31 }
 0x375   :  { %5942 = vmatpush.bf16.msra.mxu2 %v10132_v12 }
 0x376   :  { %5884 = vmatpush.bf16.msra.mxu0 %v12304_v7 }
 0x377   :  { %v5500_v59 = vpop.f32.mrf.mxu2 }
 0x378   :  { %v5529_v17 = vpop.f32.mrf.mxu3  ;;  %v5541_v44 = vpop.f32.mrf.mxu0 }
 0x379   :  { %v5542_v52 = vadd.f32 %v5541_v44, %v15555_v21  ;;  %v5570_v26 = vpop.f32.mrf.mxu1  ;;  %v13366_v21 = vld [vmem:[#allocation15 + $0x26c] sm:$0xf]  ;;  %5943 = vmatpush.bf16.msra.mxu2 %v10116_v9  ;;  %v10097_v9 = vld [vmem:[#allocation15 + $0x138] sm:$0xf0] }
 0x37a   :  { %v10260_v27 = vor.u32 %v13366_v21, %v10257_v61  ;;  %v10241_v21 = vld [vmem:[#allocation15 + $0x258] sm:$0xf0] }
 0x37b   :  { %v5571_v1 = vadd.f32 %v5570_v26, %v5542_v52  ;;  %5772 = vmatmul.bf16.vlgmr.msrb.gmra.mxu0 %v16895_v11  ;;  %5801 = vmatmul.bf16.vlgmr.msrb.gmra.mxu1 %v16896_v28  ;;  %v13302_v26 = vld [vmem:[#allocation15 + $0x6c] sm:$0xf] }
 0x37c   :  { %5830 = vmatmul.bf16.vlgmr.msrb.gmra.mxu2 %v16897_v34  ;;  %5971 = vmatpush.bf16.msra.mxu3 %v10260_v27  ;;  %v10004_v31 = vor.u32 %v13302_v26, %v10001_v13  ;;  %v16899_v13 = vld [vmem:[#allocation80_spill] sm:$0xff]  ;;  %v12255_v34 = vld [vmem:[#allocation15 + $0x1208] sm:$0xf]  ;;  %v13410_v28 = vld [vmem:[#allocation15 + $0x3cc] sm:$0xf] }
 0x37d   :  { %5859 = vmatmul.bf16.vlgmr.msrb.gmra.mxu3 %v16898_v45  ;;  %v12287_v45 = vld [vmem:[#allocation15 + $0x1248] sm:$0xf] }
 0x37e   :  { %5913 = vmatpush.bf16.msra.mxu1 %v10004_v31  ;;  %v12288_v12 = vor.u32 %v13876_v56, %v12287_v45  ;;  %v16900_v45 = vld [vmem:[#allocation81_spill] sm:$0xff]  ;;  %v12271_v56 = vld [vmem:[#allocation15 + $0x1228] sm:$0xf] }
 0x37f   :  { %v5599_v54 = vpop.f32.mrf.mxu2 }
 0x380   :  { %v5600_v6 = vadd.f32 %v5599_v54, %v5571_v1  ;;  %v5628_v51 = vpop.f32.mrf.mxu3  ;;  %v5543_v59 = vpop.f32.mrf.mxu0  ;;  %v13362_v1 = vld [vmem:[#allocation15 + $0x24c] sm:$0xf]  ;;  %5885 = vmatpush.bf16.msra.mxu0 %v12288_v12  ;;  %v10225_v12 = vld [vmem:[#allocation15 + $0x238] sm:$0xf0] }
 0x381   :  { %v5544_v17 = vadd.f32 %v5543_v59, %v15558_v39  ;;  %v5572_v44 = vpop.f32.mrf.mxu1  ;;  %v10244_v61 = vor.u32 %v13362_v1, %v10241_v21  ;;  %v13872_v1 = vld [vmem:[#allocation15 + $0x1234] sm:$0xf0]  ;;  %v13358_v21 = vld [vmem:[#allocation15 + $0x22c] sm:$0xf] }
 0x382   :  { %v15592_v52 = vadd.f32 %v5628_v51, %v5600_v6 }
 0x383   :  { %v5573_v55 = vadd.f32 %v5572_v44, %v5544_v17  ;;  %5972 = vmatpush.bf16.msra.mxu3 %v10244_v61  ;;  %v13298_v17 = vld [vmem:[#allocation15 + $0x4c] sm:$0xf]  ;;  %v9985_v44 = vld [vmem:[#allocation15 + $0x58] sm:$0xf0] }
 0x384   :  { %v9988_v31 = vor.u32 %v13298_v17, %v9985_v44 }
 0x386   :  { %5914 = vmatpush.bf16.msra.mxu1 %v9988_v31  ;;  %v13294_v31 = vld [vmem:[#allocation15 + $0x2c] sm:$0xf] }
 0x387   :  { %v5601_v39 = vpop.f32.mrf.mxu2 }
 0x388   :  { %v5602_v54 = vadd.f32 %v5601_v39, %v5573_v55  ;;  %v5630_v7 = vpop.f32.mrf.mxu3  ;;  %v5546_v27 = vpop.f32.mrf.mxu0  ;;  %v13326_v55 = vld [vmem:[#allocation15 + $0x12c] sm:$0xf]  ;;  %v12272_v39 = vor.u32 %v13872_v1, %v12271_v56  ;;  %v13868_v56 = vld [vmem:[#allocation15 + $0x1214] sm:$0xf0] }
 0x389   :  { %v5547_v6 = vadd.f32 %v5546_v27, %v15565_v10  ;;  %v5575_v51 = vpop.f32.mrf.mxu1  ;;  %v10100_v10 = vor.u32 %v13326_v55, %v10097_v9  ;;  %v13322_v55 = vld [vmem:[#allocation15 + $0x10c] sm:$0xf] }
 0x38a   :  { %v15595_v59 = vadd.f32 %v5630_v7, %v5602_v54  ;;  %v10228_v54 = vor.u32 %v13358_v21, %v10225_v12  ;;  %5886 = vmatpush.bf16.msra.mxu0 %v12272_v39  ;;  %v13354_v21 = vld [vmem:[#allocation15 + $0x20c] sm:$0xf]  ;;  %v10209_v12 = vld [vmem:[#allocation15 + $0x218] sm:$0xf0] }
 0x38b   :  { %v5576_v26 = vadd.f32 %v5575_v51, %v5547_v6  ;;  %5777 = vmatmul.bf16.gmra.mxu0 %v16899_v13  ;;  %5806 = vmatmul.bf16.gmra.mxu1 %v16900_v45  ;;  %v10081_v45 = vld [vmem:[#allocation15 + $0x118] sm:$0xf0] }
 0x38c   :  { %5835 = vmatmul.bf16.gmra.mxu2 %v16901_v41  ;;  %5973 = vmatpush.bf16.msra.mxu3 %v10228_v54  ;;  %v10084_v1 = vor.u32 %v13322_v55, %v10081_v45  ;;  %v9953_v39 = vld [vmem:[#allocation15 + $0x18] sm:$0xf0]  ;;  %v16906_v55 = vld [vmem:[#allocation97_spill] sm:$0xff] }
 0x38d   :  { %5864 = vmatmul.bf16.gmra.mxu3 %v16902_v43  ;;  %5944 = vmatpush.bf16.msra.mxu2 %v10100_v10  ;;  %v9969_v43 = vld [vmem:[#allocation15 + $0x38] sm:$0xf0]  ;;  %v10212_v10 = vor.u32 %v13354_v21, %v10209_v12  ;;  %v13510_v12 = vld [vmem:[#allocation15 + $0x6ec] sm:$0xf] }
 0x38e   :  { %v9972_v41 = vor.u32 %v13294_v31, %v9969_v43  ;;  %v16903_v45 = vld [vmem:[#allocation84_spill] sm:$0xff] }
 0x38f   :  { %v5604_v61 = vpop.f32.mrf.mxu2  ;;  %v16905_v31 = vld [vmem:[#allocation96_spill] sm:$0xff] }
 0x390   :  { %v5605_v7 = vadd.f32 %v5604_v61, %v5576_v26  ;;  %v5633_v27 = vpop.f32.mrf.mxu3  ;;  %v5548_v6 = vpop.f32.mrf.mxu0  ;;  %v12256_v26 = vor.u32 %v13868_v56, %v12255_v34  ;;  %5915 = vmatpush.bf16.msra.mxu1 %v9972_v41  ;;  %5974 = vmatpush.bf16.msra.mxu3 %v10212_v10  ;;  %v13290_v61 = vld [vmem:[#allocation15 + $0xc] sm:$0xf]  ;;  %v16904_v41 = vld [vmem:[#allocation85_spill] sm:$0xff]  ;;  %v10449_v21 = vld [vmem:[#allocation15 + $0x3f8] sm:$0xf0] }
 0x391   :  { %v5549_v51 = vadd.f32 %v5548_v6, %v15568_v46  ;;  %v5577_v17 = vpop.f32.mrf.mxu1  ;;  %5945 = vmatpush.bf16.msra.mxu2 %v10084_v1  ;;  %v9956_v6 = vor.u32 %v13290_v61, %v9953_v39  ;;  %v13478_v56 = vld [vmem:[#allocation15 + $0x5ec] sm:$0xf] }
 0x392   :  { %v15602_v44 = vadd.f32 %v5633_v27, %v5605_v7  ;;  %5887 = vmatpush.bf16.msra.mxu0 %v12256_v26  ;;  %v13414_v1 = vld [vmem:[#allocation15 + $0x3ec] sm:$0xf] }
 0x393   :  { %v5578_v9 = vadd.f32 %v5577_v17, %v5549_v51 }
 0x394   :  { %5916 = vmatpush.bf16.msra.mxu1 %v9956_v6 }
 0x397   :  { %v5606_v46 = vpop.f32.mrf.mxu2 }
 0x398   :  { %v5607_v54 = vadd.f32 %v5606_v46, %v5578_v9  ;;  %v5635_v7 = vpop.f32.mrf.mxu3  ;;  %v5551_v27 = vpop.f32.mrf.mxu0  ;;  %v10705_v9 = vld [vmem:[#allocation15 + $0x5f8] sm:$0xf0]  ;;  %v10452_v46 = vor.u32 %v13414_v1, %v10449_v21 }
 0x399   :  { %v5552_v43 = vadd.f32 %v5551_v27, %v15575_v47  ;;  %v5580_v51 = vpop.f32.mrf.mxu1  ;;  %v10708_v26 = vor.u32 %v13478_v56, %v10705_v9  ;;  %v10833_v47 = vld [vmem:[#allocation15 + $0x6f8] sm:$0xf0] }
 0x39a   :  { %v15605_v17 = vadd.f32 %v5635_v7, %v5607_v54  ;;  %v10836_v61 = vor.u32 %v13510_v12, %v10833_v47  ;;  %5996 = vmatpush.bf16.msrb.mxu0 %v10452_v46  ;;  %v10433_v21 = vld [vmem:[#allocation15 + $0x3d8] sm:$0xf0] }
 0x39b   :  { %v5581_v34 = vadd.f32 %v5580_v51, %v5552_v43  ;;  %5782 = vmatmul.bf16.gmra.mxu0 %v16903_v45  ;;  %5811 = vmatmul.bf16.gmra.mxu1 %v16904_v41  ;;  %v13446_v51 = vld [vmem:[#allocation15 + $0x4ec] sm:$0xf]  ;;  %v10689_v41 = vld [vmem:[#allocation15 + $0x5d8] sm:$0xf0] }
 0x39c   :  { %5840 = vmatmul.bf16.gmra.mxu2 %v16905_v31  ;;  %6083 = vmatpush.bf16.msrb.mxu3 %v10836_v61  ;;  %v13474_v31 = vld [vmem:[#allocation15 + $0x5cc] sm:$0xf]  ;;  %v10817_v12 = vld [vmem:[#allocation15 + $0x6d8] sm:$0xf0] }
 0x39d   :  { %5869 = vmatmul.bf16.gmra.mxu3 %v16906_v55  ;;  %6054 = vmatpush.bf16.msrb.mxu2 %v10708_v26  ;;  %v10577_v55 = vld [vmem:[#allocation15 + $0x4f8] sm:$0xf0]  ;;  %v10692_v1 = vor.u32 %v13474_v31, %v10689_v41  ;;  %v10436_v26 = vor.u32 %v13410_v28, %v10433_v21  ;;  %v16908_v28 = vld [vmem:[#allocation89_spill] sm:$0xff]  ;;  %v13406_v21 = vld [vmem:[#allocation15 + $0x3ac] sm:$0xf] }
 0x39e   :  { %v10580_v9 = vor.u32 %v13446_v51, %v10577_v55  ;;  %v10561_v41 = vld [vmem:[#allocation15 + $0x4d8] sm:$0xf0]  ;;  %v16909_v51 = vld [vmem:[#allocation99_spill] sm:$0xff] }
 0x39f   :  { %v5609_v10 = vpop.f32.mrf.mxu2  ;;  %5997 = vmatpush.bf16.msrb.mxu0 %v10436_v26  ;;  %v10801_v26 = vld [vmem:[#allocation15 + $0x6b8] sm:$0xf0] }
 0x3a0   :  { %v5610_v39 = vadd.f32 %v5609_v10, %v5581_v34  ;;  %v5638_v54 = vpop.f32.mrf.mxu3  ;;  %v5553_v7 = vpop.f32.mrf.mxu0  ;;  %v13506_v34 = vld [vmem:[#allocation15 + $0x6cc] sm:$0xf]  ;;  %6025 = vmatpush.bf16.msrb.mxu1 %v10580_v9  ;;  %v16910_v9 = vld [vmem:[#allocation100_spill] sm:$0xff] }
 0x3a1   :  { %v5554_v27 = vadd.f32 %v5553_v7, %v15578_v14  ;;  %v5582_v6 = vpop.f32.mrf.mxu1  ;;  %v10820_v47 = vor.u32 %v13506_v34, %v10817_v12  ;;  %6055 = vmatpush.bf16.msrb.mxu2 %v10692_v1  ;;  %v13442_v7 = vld [vmem:[#allocation15 + $0x4cc] sm:$0xf]  ;;  %v10673_v1 = vld [vmem:[#allocation15 + $0x5b8] sm:$0xf0] }
 0x3a2   :  { %v15612_v43 = vadd.f32 %v5638_v54, %v5610_v39  ;;  %v10417_v34 = vld [vmem:[#allocation15 + $0x3b8] sm:$0xf0]  ;;  %v13502_v12 = vld [vmem:[#allocation15 + $0x6ac] sm:$0xf] }
 0x3a3   :  { %v5583_v56 = vadd.f32 %v5582_v6, %v5554_v27  ;;  %6084 = vmatpush.bf16.msrb.mxu3 %v10820_v47  ;;  %v16907_v27 = vld [vmem:[#allocation88_spill] sm:$0xff]  ;;  %v10564_v6 = vor.u32 %v13442_v7, %v10561_v41  ;;  %v13438_v41 = vld [vmem:[#allocation15 + $0x4ac] sm:$0xf] }
 0x3a5   :  { %6026 = vmatpush.bf16.msrb.mxu1 %v10564_v6  ;;  %v10545_v6 = vld [vmem:[#allocation15 + $0x4b8] sm:$0xf0] }
 0x3a7   :  { %v5611_v14 = vpop.f32.mrf.mxu2 }
 0x3a8   :  { %v5612_v10 = vadd.f32 %v5611_v14, %v5583_v56  ;;  %v5640_v46 = vpop.f32.mrf.mxu3  ;;  %v5556_v61 = vpop.f32.mrf.mxu0  ;;  %v13470_v56 = vld [vmem:[#allocation15 + $0x5ac] sm:$0xf]  ;;  %v10420_v14 = vor.u32 %v13406_v21, %v10417_v34  ;;  %v10785_v21 = vld [vmem:[#allocation15 + $0x698] sm:$0xf0] }
 0x3a9   :  { %v5557_v39 = vadd.f32 %v5556_v61, %v15584_v63  ;;  %v5585_v55 = vpop.f32.mrf.mxu1  ;;  %v10676_v63 = vor.u32 %v13470_v56, %v10673_v1  ;;  %v10657_v56 = vld [vmem:[#allocation15 + $0x598] sm:$0xf0]  ;;  %v13402_v1 = vld [vmem:[#allocation15 + $0x38c] sm:$0xf]  ;;  %v10788_v34 = vor.u32 %v13498_v40, %v10785_v21 }
 0x3aa   :  { %v15615_v54 = vadd.f32 %v5640_v46, %v5612_v10  ;;  %v10804_v10 = vor.u32 %v13502_v12, %v10801_v26  ;;  %5998 = vmatpush.bf16.msrb.mxu0 %v10420_v14  ;;  %v16914_v40 = vld [vmem:[#allocation28_spill] sm:$0xff] }
 0x3ab   :  { %v5586_v31 = vadd.f32 %v5585_v55, %v5557_v39  ;;  %5787 = vmatmul.bf16.gmra.mxu0 %v16907_v27  ;;  %5816 = vmatmul.bf16.gmra.mxu1 %v16908_v28  ;;  %v10401_v27 = vld [vmem:[#allocation15 + $0x398] sm:$0xf0] }
 0x3ac   :  { %5845 = vmatmul.bf16.gmra.mxu2 %v16909_v51  ;;  %6085 = vmatpush.bf16.msrb.mxu3 %v10804_v10  ;;  %v13466_v51 = vld [vmem:[#allocation15 + $0x58c] sm:$0xf] }
 0x3ad   :  { %5874 = vmatmul.bf16.gmra.mxu3 %v16910_v9  ;;  %6056 = vmatpush.bf16.msrb.mxu2 %v10676_v63  ;;  %v10548_v9 = vor.u32 %v13438_v41, %v10545_v6  ;;  %v10660_v28 = vor.u32 %v13466_v51, %v10657_v56  ;;  %v13434_v10 = vld [vmem:[#allocation15 + $0x48c] sm:$0xf]  ;;  %v10385_v56 = vld [vmem:[#allocation15 + $0x378] sm:$0xf0] }
 0x3ae   :  { %v13398_v41 = vld [vmem:[#allocation15 + $0x36c] sm:$0xf] }
 0x3af   :  { %v5614_v47 = vpop.f32.mrf.mxu2  ;;  %6027 = vmatpush.bf16.msrb.mxu1 %v10548_v9  ;;  %v16913_v9 = vld [vmem:[#allocation27_spill] sm:$0xff] }
 0x3b0   :  { %v5615_v46 = vadd.f32 %v5614_v47, %v5586_v31  ;;  %v5643_v61 = vpop.f32.mrf.mxu3  ;;  %v5558_v39 = vpop.f32.mrf.mxu0  ;;  %v10404_v31 = vor.u32 %v13402_v1, %v10401_v27  ;;  %6086 = vmatpush.bf16.msrb.mxu3 %v10788_v34  ;;  %v13462_v27 = vld [vmem:[#allocation15 + $0x56c] sm:$0xf]  ;;  %v10769_v1 = vld [vmem:[#allocation15 + $0x678] sm:$0xf0] }
 0x3b1   :  { %v5587_v55 = vpop.f32.mrf.mxu1  ;;  %6057 = vmatpush.bf16.msrb.mxu2 %v10660_v28  ;;  %v16911_v39 = vld [vmem:[#allocation92_spill] sm:$0xff] }
 0x3b2   :  { %v15621_v7 = vadd.f32 %v5643_v61, %v5615_v46  ;;  %5999 = vmatpush.bf16.msrb.mxu0 %v10404_v31  ;;  %v10529_v46 = vld [vmem:[#allocation15 + $0x498] sm:$0xf0]  ;;  %v16912_v55 = vld [vmem:[#allocation26_spill] sm:$0xff]  ;;  %v10388_v31 = vor.u32 %v13398_v41, %v10385_v56 }
 0x3b3   :  { %v10532_v51 = vor.u32 %v13434_v10, %v10529_v46  ;;  %v10641_v28 = vld [vmem:[#allocation15 + $0x578] sm:$0xf0]  ;;  %v13430_v46 = vld [vmem:[#allocation15 + $0x46c] sm:$0xf] }
 0x3b4   :  { %v10644_v6 = vor.u32 %v13462_v27, %v10641_v28  ;;  %v10625_v27 = vld [vmem:[#allocation15 + $0x558] sm:$0xf0]  ;;  %v13394_v28 = vld [vmem:[#allocation15 + $0x34c] sm:$0xf] }
 0x3b5   :  { %6028 = vmatpush.bf16.msrb.mxu1 %v10532_v51  ;;  %v10513_v51 = vld [vmem:[#allocation15 + $0x478] sm:$0xf0] }
 0x3b6   :  { %6058 = vmatpush.bf16.msrb.mxu2 %v10644_v6  ;;  %6000 = vmatpush.bf16.msrb.mxu0 %v10388_v31  ;;  %v10369_v56 = vld [vmem:[#allocation15 + $0x358] sm:$0xf0] }
 0x3b7   :  { %v5616_v63 = vpop.f32.mrf.mxu2  ;;  %v10372_v6 = vor.u32 %v13394_v28, %v10369_v56  ;;  %v16918_v28 = vld [vmem:[#allocation32_spill] sm:$0xff]  ;;  %v13390_v56 = vld [vmem:[#allocation15 + $0x32c] sm:$0xf] }
 0x3b8   :  { %v5645_v12 = vpop.f32.mrf.mxu3  ;;  %v5657_v26 = vpop.f32.mrf.mxu0 }
 0x3b9   :  { %v5658_v47 = vadd.f32 %v5657_v26, %v15592_v52  ;;  %v5686_v14 = vpop.f32.mrf.mxu1  ;;  %v13494_v52 = vld [vmem:[#allocation15 + $0x66c] sm:$0xf] }
 0x3ba   :  { %v10772_v34 = vor.u32 %v13494_v52, %v10769_v1  ;;  %v10753_v52 = vld [vmem:[#allocation15 + $0x658] sm:$0xf0]  ;;  %6001 = vmatpush.bf16.msrb.mxu0 %v10372_v6 }
 0x3bb   :  { %v5687_v61 = vadd.f32 %v5686_v14, %v5658_v47  ;;  %5888 = vmatmul.bf16.vlgmr.msra.gmra.mxu0 %v16911_v39  ;;  %5917 = vmatmul.bf16.vlgmr.msra.gmra.mxu1 %v16912_v55  ;;  %v10737_v6 = vld [vmem:[#allocation15 + $0x638] sm:$0xf0]  ;;  %v13626_v39 = vld [vmem:[#allocation15 + $0xa8c] sm:$0xf] }
 0x3bc   :  { %5946 = vmatmul.bf16.vlgmr.msra.gmra.mxu2 %v16913_v9  ;;  %6087 = vmatpush.bf16.msrb.mxu3 %v10772_v34  ;;  %v10516_v9 = vor.u32 %v13430_v46, %v10513_v51  ;;  %v16915_v51 = vld [vmem:[#allocation95_spill] sm:$0xff] }
 0x3bd   :  { %5975 = vmatmul.bf16.vlgmr.msra.gmra.mxu3 %v16914_v40  ;;  %v13458_v40 = vld [vmem:[#allocation15 + $0x54c] sm:$0xf] }
 0x3be   :  { %v10628_v41 = vor.u32 %v13458_v40, %v10625_v27  ;;  %6029 = vmatpush.bf16.msrb.mxu1 %v10516_v9  ;;  %v16916_v40 = vld [vmem:[#allocation30_spill] sm:$0xff]  ;;  %v16917_v27 = vld [vmem:[#allocation31_spill] sm:$0xff] }
 0x3bf   :  { %v5715_v21 = vpop.f32.mrf.mxu2 }
 0x3c0   :  { %v5716_v63 = vadd.f32 %v5715_v21, %v5687_v61  ;;  %v5744_v12 = vpop.f32.mrf.mxu3  ;;  %v5659_v26 = vpop.f32.mrf.mxu0  ;;  %v13490_v61 = vld [vmem:[#allocation15 + $0x64c] sm:$0xf]  ;;  %6059 = vmatpush.bf16.msrb.mxu2 %v10628_v41  ;;  %v10609_v41 = vld [vmem:[#allocation15 + $0x538] sm:$0xf0] }
 0x3c1   :  { %v5660_v47 = vadd.f32 %v5659_v26, %v15595_v59  ;;  %v5688_v14 = vpop.f32.mrf.mxu1  ;;  %v10756_v1 = vor.u32 %v13490_v61, %v10753_v52  ;;  %v10353_v61 = vld [vmem:[#allocation15 + $0x338] sm:$0xf0]  ;;  %v13486_v52 = vld [vmem:[#allocation15 + $0x62c] sm:$0xf] }
 0x3c2   :  { %v15629_v10 = vadd.f32 %v5744_v12, %v5716_v63 }
 0x3c3   :  { %v5689_v55 = vadd.f32 %v5688_v14, %v5660_v47  ;;  %6088 = vmatpush.bf16.msrb.mxu3 %v10756_v1  ;;  %v13426_v47 = vld [vmem:[#allocation15 + $0x44c] sm:$0xf]  ;;  %v10497_v14 = vld [vmem:[#allocation15 + $0x458] sm:$0xf0] }
 0x3c4   :  { %v10500_v9 = vor.u32 %v13426_v47, %v10497_v14 }
 0x3c6   :  { %6030 = vmatpush.bf16.msrb.mxu1 %v10500_v9  ;;  %v13422_v9 = vld [vmem:[#allocation15 + $0x42c] sm:$0xf] }
 0x3c7   :  { %v5717_v59 = vpop.f32.mrf.mxu2 }
 0x3c8   :  { %v5718_v21 = vadd.f32 %v5717_v59, %v5689_v55  ;;  %v5746_v31 = vpop.f32.mrf.mxu3  ;;  %v5662_v34 = vpop.f32.mrf.mxu0  ;;  %v13454_v55 = vld [vmem:[#allocation15 + $0x52c] sm:$0xf]  ;;  %v10356_v59 = vor.u32 %v13390_v56, %v10353_v61  ;;  %v10337_v56 = vld [vmem:[#allocation15 + $0x318] sm:$0xf0] }
 0x3c9   :  { %v5663_v63 = vadd.f32 %v5662_v34, %v15602_v44  ;;  %v5691_v12 = vpop.f32.mrf.mxu1  ;;  %v10612_v44 = vor.u32 %v13454_v55, %v10609_v41  ;;  %v10593_v41 = vld [vmem:[#allocation15 + $0x518] sm:$0xf0] }
 0x3ca   :  { %v15632_v26 = vadd.f32 %v5746_v31, %v5718_v21  ;;  %v10740_v21 = vor.u32 %v13486_v52, %v10737_v6  ;;  %6002 = vmatpush.bf16.msrb.mxu0 %v10356_v59  ;;  %v13482_v52 = vld [vmem:[#allocation15 + $0x60c] sm:$0xf]  ;;  %v10721_v6 = vld [vmem:[#allocation15 + $0x618] sm:$0xf0] }
 0x3cb   :  { %v5692_v46 = vadd.f32 %v5691_v12, %v5663_v63  ;;  %5893 = vmatmul.bf16.gmra.mxu0 %v16915_v51  ;;  %5922 = vmatmul.bf16.gmra.mxu1 %v16916_v40  ;;  %v10481_v40 = vld [vmem:[#allocation15 + $0x438] sm:$0xf0]  ;;  %v13386_v51 = vld [vmem:[#allocation15 + $0x30c] sm:$0xf] }
 0x3cc   :  { %5951 = vmatmul.bf16.gmra.mxu2 %v16917_v27  ;;  %6089 = vmatpush.bf16.msrb.mxu3 %v10740_v21  ;;  %v13450_v27 = vld [vmem:[#allocation15 + $0x50c] sm:$0xf]  ;;  %v10484_v55 = vor.u32 %v13422_v9, %v10481_v40  ;;  %v10465_v59 = vld [vmem:[#allocation15 + $0x418] sm:$0xf0] }
 0x3cd   :  { %5980 = vmatmul.bf16.gmra.mxu3 %v16918_v28  ;;  %6060 = vmatpush.bf16.msrb.mxu2 %v10612_v44  ;;  %v10596_v61 = vor.u32 %v13450_v27, %v10593_v41  ;;  %v10724_v44 = vor.u32 %v13482_v52, %v10721_v6  ;;  %v16919_v40 = vld [vmem:[#allocation98_spill] sm:$0xff]  ;;  %v16922_v41 = vld [vmem:[#allocation36_spill] sm:$0xff] }
 0x3ce   :  { %6031 = vmatpush.bf16.msrb.mxu1 %v10484_v55  ;;  %v16920_v27 = vld [vmem:[#allocation34_spill] sm:$0xff]  ;;  %v16921_v55 = vld [vmem:[#allocation35_spill] sm:$0xff]  ;;  %v10961_v52 = vld [vmem:[#allocation15 + $0x7f8] sm:$0xf0] }
 0x3cf   :  { %v5720_v1 = vpop.f32.mrf.mxu2  ;;  %v13638_v6 = vld [vmem:[#allocation15 + $0xaec] sm:$0xf] }
 0x3d0   :  { %v5721_v31 = vadd.f32 %v5720_v1, %v5692_v46  ;;  %v5749_v34 = vpop.f32.mrf.mxu3  ;;  %v5664_v63 = vpop.f32.mrf.mxu0  ;;  %v10340_v46 = vor.u32 %v13386_v51, %v10337_v56  ;;  %6090 = vmatpush.bf16.msrb.mxu3 %v10724_v44  ;;  %v13418_v1 = vld [vmem:[#allocation15 + $0x40c] sm:$0xf] }
 0x3d1   :  { %v5665_v12 = vadd.f32 %v5664_v63, %v15605_v17  ;;  %v5693_v47 = vpop.f32.mrf.mxu1  ;;  %6061 = vmatpush.bf16.msrb.mxu2 %v10596_v61  ;;  %v10468_v63 = vor.u32 %v13418_v1, %v10465_v59  ;;  %v13606_v56 = vld [vmem:[#allocation15 + $0x9ec] sm:$0xf] }
 0x3d2   :  { %v15639_v14 = vadd.f32 %v5749_v34, %v5721_v31  ;;  %6003 = vmatpush.bf16.msrb.mxu0 %v10340_v46  ;;  %v13542_v61 = vld [vmem:[#allocation15 + $0x7ec] sm:$0xf] }
 0x3d3   :  { %v5694_v28 = vadd.f32 %v5693_v47, %v5665_v12  ;;  %6032 = vmatpush.bf16.msrb.mxu1 %v10468_v63 }
 0x3d7   :  { %v5722_v17 = vpop.f32.mrf.mxu2 }
 0x3d8   :  { %v5723_v21 = vadd.f32 %v5722_v17, %v5694_v28  ;;  %v5751_v31 = vpop.f32.mrf.mxu3  ;;  %v5667_v34 = vpop.f32.mrf.mxu0  ;;  %v11217_v28 = vld [vmem:[#allocation15 + $0x9f8] sm:$0xf0]  ;;  %v10964_v17 = vor.u32 %v13542_v61, %v10961_v52 }
 0x3d9   :  { %v5668_v12 = vadd.f32 %v5667_v34, %v15612_v43  ;;  %v5696_v47 = vpop.f32.mrf.mxu1  ;;  %v11220_v46 = vor.u32 %v13606_v56, %v11217_v28  ;;  %v11345_v43 = vld [vmem:[#allocation15 + $0xaf8] sm:$0xf0]  ;;  %v13602_v56 = vld [vmem:[#allocation15 + $0x9cc] sm:$0xf] }
 0x3da   :  { %v15642_v9 = vadd.f32 %v5751_v31, %v5723_v21  ;;  %v11348_v1 = vor.u32 %v13638_v6, %v11345_v43  ;;  %6112 = vmatpush.bf16.msra.mxu0 %v10964_v17  ;;  %v11201_v28 = vld [vmem:[#allocation15 + $0x9d8] sm:$0xf0] }
 0x3db   :  { %v5697_v51 = vadd.f32 %v5696_v47, %v5668_v12  ;;  %5898 = vmatmul.bf16.gmra.mxu0 %v16919_v40  ;;  %5927 = vmatmul.bf16.gmra.mxu1 %v16920_v27  ;;  %v13574_v47 = vld [vmem:[#allocation15 + $0x8ec] sm:$0xf]  ;;  %v11089_v27 = vld [vmem:[#allocation15 + $0x8f8] sm:$0xf0]  ;;  %v11204_v61 = vor.u32 %v13602_v56, %v11201_v28  ;;  %v16925_v56 = vld [vmem:[#allocation39_spill] sm:$0xff] }
 0x3dc   :  { %5956 = vmatmul.bf16.gmra.mxu2 %v16921_v55  ;;  %6199 = vmatpush.bf16.msra.mxu3 %v11348_v1  ;;  %v13538_v40 = vld [vmem:[#allocation15 + $0x7cc] sm:$0xf]  ;;  %v10945_v52 = vld [vmem:[#allocation15 + $0x7d8] sm:$0xf0] }
 0x3dd   :  { %5985 = vmatmul.bf16.gmra.mxu3 %v16922_v41  ;;  %6170 = vmatpush.bf16.msra.mxu2 %v11220_v46  ;;  %v11092_v41 = vor.u32 %v13574_v47, %v11089_v27  ;;  %v11329_v6 = vld [vmem:[#allocation15 + $0xad8] sm:$0xf0]  ;;  %v10948_v46 = vor.u32 %v13538_v40, %v10945_v52  ;;  %v16923_v27 = vld [vmem:[#allocation101_spill] sm:$0xff]  ;;  %v16924_v40 = vld [vmem:[#allocation38_spill] sm:$0xff] }
 0x3de   :  { %v16926_v28 = vld [vmem:[#allocation40_spill] sm:$0xff]  ;;  %v13534_v52 = vld [vmem:[#allocation15 + $0x7ac] sm:$0xf] }
 0x3df   :  { %v5725_v44 = vpop.f32.mrf.mxu2  ;;  %6141 = vmatpush.bf16.msra.mxu1 %v11092_v41  ;;  %6113 = vmatpush.bf16.msra.mxu0 %v10948_v46  ;;  %v11313_v46 = vld [vmem:[#allocation15 + $0xab8] sm:$0xf0] }
 0x3e0   :  { %v5726_v59 = vadd.f32 %v5725_v44, %v5697_v51  ;;  %v5754_v21 = vpop.f32.mrf.mxu3  ;;  %v5669_v31 = vpop.f32.mrf.mxu0  ;;  %v13634_v51 = vld [vmem:[#allocation15 + $0xacc] sm:$0xf] }
 0x3e1   :  { %v5670_v34 = vadd.f32 %v5669_v31, %v15615_v54  ;;  %v5698_v63 = vpop.f32.mrf.mxu1  ;;  %v11332_v43 = vor.u32 %v13634_v51, %v11329_v6  ;;  %6171 = vmatpush.bf16.msra.mxu2 %v11204_v61  ;;  %v11185_v61 = vld [vmem:[#allocation15 + $0x9b8] sm:$0xf0]  ;;  %v13630_v6 = vld [vmem:[#allocation15 + $0xaac] sm:$0xf] }
 0x3e2   :  { %v15649_v12 = vadd.f32 %v5754_v21, %v5726_v59  ;;  %v10929_v51 = vld [vmem:[#allocation15 + $0x7b8] sm:$0xf0] }
 0x3e3   :  { %v5699_v55 = vadd.f32 %v5698_v63, %v5670_v34  ;;  %6200 = vmatpush.bf16.msra.mxu3 %v11332_v43  ;;  %v13570_v34 = vld [vmem:[#allocation15 + $0x8cc] sm:$0xf]  ;;  %v11073_v63 = vld [vmem:[#allocation15 + $0x8d8] sm:$0xf0] }
 0x3e4   :  { %v11076_v41 = vor.u32 %v13570_v34, %v11073_v63  ;;  %v13566_v63 = vld [vmem:[#allocation15 + $0x8ac] sm:$0xf] }
 0x3e6   :  { %6142 = vmatpush.bf16.msra.mxu1 %v11076_v41  ;;  %v11057_v41 = vld [vmem:[#allocation15 + $0x8b8] sm:$0xf0] }
 0x3e7   :  { %v5727_v54 = vpop.f32.mrf.mxu2 }
 0x3e8   :  { %v5728_v44 = vadd.f32 %v5727_v54, %v5699_v55  ;;  %v5756_v17 = vpop.f32.mrf.mxu3  ;;  %v5672_v1 = vpop.f32.mrf.mxu0  ;;  %v13598_v55 = vld [vmem:[#allocation15 + $0x9ac] sm:$0xf]  ;;  %v10932_v54 = vor.u32 %v13534_v52, %v10929_v51  ;;  %v11297_v52 = vld [vmem:[#allocation15 + $0xa98] sm:$0xf0] }
 0x3e9   :  { %v5673_v59 = vadd.f32 %v5672_v1, %v15621_v7  ;;  %v5701_v21 = vpop.f32.mrf.mxu1  ;;  %v11188_v7 = vor.u32 %v13598_v55, %v11185_v61  ;;  %v13530_v55 = vld [vmem:[#allocation15 + $0x78c] sm:$0xf]  ;;  %v11300_v51 = vor.u32 %v13626_v39, %v11297_v52 }
 0x3ea   :  { %v15652_v31 = vadd.f32 %v5756_v17, %v5728_v44  ;;  %v11316_v44 = vor.u32 %v13630_v6, %v11313_v46  ;;  %6114 = vmatpush.bf16.msra.mxu0 %v10932_v54  ;;  %v13590_v39 = vld [vmem:[#allocation15 + $0x96c] sm:$0xf] }
 0x3eb   :  { %v5702_v47 = vadd.f32 %v5701_v21, %v5673_v59  ;;  %5903 = vmatmul.bf16.gmra.mxu0 %v16923_v27  ;;  %5932 = vmatmul.bf16.gmra.mxu1 %v16924_v40  ;;  %v11060_v40 = vor.u32 %v13566_v63, %v11057_v41  ;;  %v10913_v27 = vld [vmem:[#allocation15 + $0x798] sm:$0xf0]  ;;  %v16928_v63 = vld [vmem:[#allocation42_spill] sm:$0xff]  ;;  %v16929_v41 = vld [vmem:[#allocation43_spill] sm:$0xff] }
 0x3ec   :  { %5961 = vmatmul.bf16.gmra.mxu2 %v16925_v56  ;;  %6201 = vmatpush.bf16.msra.mxu3 %v11316_v44  ;;  %v13594_v56 = vld [vmem:[#allocation15 + $0x98c] sm:$0xf] }
 0x3ed   :  { %5990 = vmatmul.bf16.gmra.mxu3 %v16926_v28  ;;  %6172 = vmatpush.bf16.msra.mxu2 %v11188_v7  ;;  %v11169_v28 = vld [vmem:[#allocation15 + $0x998] sm:$0xf0]  ;;  %v13562_v44 = vld [vmem:[#allocation15 + $0x88c] sm:$0xf] }
 0x3ee   :  { %v11172_v61 = vor.u32 %v13594_v56, %v11169_v28  ;;  %6143 = vmatpush.bf16.msra.mxu1 %v11060_v40  ;;  %v13526_v40 = vld [vmem:[#allocation15 + $0x76c] sm:$0xf]  ;;  %v10897_v28 = vld [vmem:[#allocation15 + $0x778] sm:$0xf0] }
 0x3ef   :  { %v5730_v43 = vpop.f32.mrf.mxu2  ;;  %v10900_v52 = vor.u32 %v13526_v40, %v10897_v28  ;;  %v11265_v40 = vld [vmem:[#allocation15 + $0xa58] sm:$0xf0] }
 0x3f0   :  { %v5731_v17 = vadd.f32 %v5730_v43, %v5702_v47  ;;  %v5759_v1 = vpop.f32.mrf.mxu3  ;;  %v5674_v59 = vpop.f32.mrf.mxu0  ;;  %v10916_v47 = vor.u32 %v13530_v55, %v10913_v27  ;;  %6202 = vmatpush.bf16.msra.mxu3 %v11300_v51  ;;  %v11153_v27 = vld [vmem:[#allocation15 + $0x978] sm:$0xf0] }
 0x3f1   :  { %v5703_v21 = vpop.f32.mrf.mxu1  ;;  %6173 = vmatpush.bf16.msra.mxu2 %v11172_v61  ;;  %v16927_v59 = vld [vmem:[#allocation29_spill] sm:$0xff]  ;;  %v11156_v56 = vor.u32 %v13590_v39, %v11153_v27  ;;  %v11281_v55 = vld [vmem:[#allocation15 + $0xa78] sm:$0xf0] }
 0x3f2   :  { %v15658_v34 = vadd.f32 %v5759_v1, %v5731_v17  ;;  %6115 = vmatpush.bf16.msra.mxu0 %v10916_v47  ;;  %v11041_v17 = vld [vmem:[#allocation15 + $0x898] sm:$0xf0] }
 0x3f3   :  { %v11044_v21 = vor.u32 %v13562_v44, %v11041_v17  ;;  %v11025_v44 = vld [vmem:[#allocation15 + $0x878] sm:$0xf0] }
 0x3f4   :  { %v10881_v27 = vld [vmem:[#allocation15 + $0x758] sm:$0xf0] }
 0x3f5   :  { %6144 = vmatpush.bf16.msra.mxu1 %v11044_v21  ;;  %6174 = vmatpush.bf16.msra.mxu2 %v11156_v56  ;;  %v13586_v21 = vld [vmem:[#allocation15 + $0x94c] sm:$0xf] }
 0x3f6   :  { %6116 = vmatpush.bf16.msra.mxu0 %v10900_v52 }
 0x3f7   :  { %v5732_v7 = vpop.f32.mrf.mxu2 }
 0x3f8   :  { %v5761_v6 = vpop.f32.mrf.mxu3  ;;  %v5773_v46 = vpop.f32.mrf.mxu0 }
 0x3f9   :  { %v5774_v43 = vadd.f32 %v5773_v46, %v15629_v10  ;;  %v5802_v54 = vpop.f32.mrf.mxu1  ;;  %v13622_v10 = vld [vmem:[#allocation15 + $0xa6c] sm:$0xf] }
 0x3fa   :  { %v11284_v47 = vor.u32 %v13622_v10, %v11281_v55 }
 0x3fb   :  { %v5803_v1 = vadd.f32 %v5802_v54, %v5774_v43  ;;  %6004 = vmatmul.bf16.vlgmr.msrb.gmra.mxu0 %v16927_v59  ;;  %6033 = vmatmul.bf16.vlgmr.msrb.gmra.mxu1 %v16928_v63  ;;  %v13558_v54 = vld [vmem:[#allocation15 + $0x86c] sm:$0xf]  ;;  %v11137_v63 = vld [vmem:[#allocation15 + $0x958] sm:$0xf0] }
 0x3fc   :  { %6062 = vmatmul.bf16.vlgmr.msrb.gmra.mxu2 %v16929_v41  ;;  %6203 = vmatpush.bf16.msra.mxu3 %v11284_v47  ;;  %v11028_v59 = vor.u32 %v13558_v54, %v11025_v44  ;;  %v13522_v41 = vld [vmem:[#allocation15 + $0x74c] sm:$0xf]  ;;  %v11140_v39 = vor.u32 %v13586_v21, %v11137_v63  ;;  %v11121_v21 = vld [vmem:[#allocation15 + $0x938] sm:$0xf0] }
 0x3fd   :  { %6091 = vmatmul.bf16.vlgmr.msrb.gmra.mxu3 %v16858_v23  ;;  %v10884_v56 = vor.u32 %v13522_v41, %v10881_v27  ;;  %v16931_v44 = vld [vmem:[#allocation46_spill] sm:$0xff]  ;;  %v10865_v41 = vld [vmem:[#allocation15 + $0x738] sm:$0xf0] }
 0x3fe   :  { %6145 = vmatpush.bf16.msra.mxu1 %v11028_v59  ;;  %6175 = vmatpush.bf16.msra.mxu2 %v11140_v39  ;;  %v16932_v59 = vld [vmem:[#allocation47_spill] sm:$0xff]  ;;  %v13518_v63 = vld [vmem:[#allocation15 + $0x72c] sm:$0xf]  ;;  %v11249_v27 = vld [vmem:[#allocation15 + $0xa38] sm:$0xf0] }
 0x3ff   :  { %v5831_v61 = vpop.f32.mrf.mxu2  ;;  %6117 = vmatpush.bf16.msra.mxu0 %v10884_v56  ;;  %v13614_v39 = vld [vmem:[#allocation15 + $0xa2c] sm:$0xf] }
 0x400   :  { %v5832_v51 = vadd.f32 %v5831_v61, %v5803_v1  ;;  %v5860_v7 = vpop.f32.mrf.mxu3  ;;  %v5775_v6 = vpop.f32.mrf.mxu0  ;;  %v13618_v1 = vld [vmem:[#allocation15 + $0xa4c] sm:$0xf]  ;;  %v11252_v56 = vor.u32 %v13614_v39, %v11249_v27  ;;  %v10977_v39 = vld [vmem:[#allocation15 + $0x818] sm:$0xf0] }
 0x401   :  { %v5776_v46 = vadd.f32 %v5775_v6, %v15632_v26  ;;  %v5804_v43 = vpop.f32.mrf.mxu1  ;;  %v11268_v28 = vor.u32 %v13618_v1, %v11265_v40  ;;  %v11009_v6 = vld [vmem:[#allocation15 + $0x858] sm:$0xf0]  ;;  %v10868_v40 = vor.u32 %v13518_v63, %v10865_v41  ;;  %v13546_v41 = vld [vmem:[#allocation15 + $0x80c] sm:$0xf] }
 0x402   :  { %v15666_v23 = vadd.f32 %v5860_v7, %v5832_v51  ;;  %v13554_v7 = vld [vmem:[#allocation15 + $0x84c] sm:$0xf]  ;;  %v11233_v63 = vld [vmem:[#allocation15 + $0xa18] sm:$0xf0] }
 0x403   :  { %v5805_v17 = vadd.f32 %v5804_v43, %v5776_v46  ;;  %6204 = vmatpush.bf16.msra.mxu3 %v11268_v28  ;;  %v16930_v43 = vld [vmem:[#allocation33_spill] sm:$0xff]  ;;  %v11012_v54 = vor.u32 %v13554_v7, %v11009_v6  ;;  %6118 = vmatpush.bf16.msra.mxu0 %v10868_v40  ;;  %v13578_v7 = vld [vmem:[#allocation15 + $0x90c] sm:$0xf] }
 0x405   :  { %6146 = vmatpush.bf16.msra.mxu1 %v11012_v54  ;;  %v11105_v54 = vld [vmem:[#allocation15 + $0x918] sm:$0xf0] }
 0x407   :  { %v5833_v26 = vpop.f32.mrf.mxu2  ;;  %6205 = vmatpush.bf16.msra.mxu3 %v11252_v56  ;;  %v10980_v56 = vor.u32 %v13546_v41, %v10977_v39 }
 0x408   :  { %v5834_v10 = vadd.f32 %v5833_v26, %v5805_v17  ;;  %v5862_v55 = vpop.f32.mrf.mxu3  ;;  %v5778_v61 = vpop.f32.mrf.mxu0  ;;  %v13582_v17 = vld [vmem:[#allocation15 + $0x92c] sm:$0xf] }
 0x409   :  { %v5779_v52 = vadd.f32 %v5778_v61, %v15639_v14  ;;  %v5807_v47 = vpop.f32.mrf.mxu1  ;;  %v11124_v14 = vor.u32 %v13582_v17, %v11121_v21  ;;  %v11108_v17 = vor.u32 %v13578_v7, %v11105_v54  ;;  %v13610_v21 = vld [vmem:[#allocation15 + $0xa0c] sm:$0xf] }
 0x40a   :  { %v15669_v51 = vadd.f32 %v5862_v55, %v5834_v10  ;;  %v13734_v7 = vld [vmem:[#allocation15 + $0xdec] sm:$0xf] }
 0x40b   :  { %v5808_v46 = vadd.f32 %v5807_v47, %v5779_v52  ;;  %6009 = vmatmul.bf16.gmra.mxu0 %v16930_v43  ;;  %6038 = vmatmul.bf16.gmra.mxu1 %v16931_v44  ;;  %v13550_v52 = vld [vmem:[#allocation15 + $0x82c] sm:$0xf]  ;;  %v10993_v47 = vld [vmem:[#allocation15 + $0x838] sm:$0xf0] }
 0x40c   :  { %6067 = vmatmul.bf16.gmra.mxu2 %v16932_v59  ;;  %v10996_v43 = vor.u32 %v13550_v52, %v10993_v47  ;;  %v13514_v44 = vld [vmem:[#allocation15 + $0x70c] sm:$0xf]  ;;  %v10849_v59 = vld [vmem:[#allocation15 + $0x718] sm:$0xf0]  ;;  %v16935_v47 = vld [vmem:[#allocation51_spill] sm:$0xff] }
 0x40d   :  { %6096 = vmatmul.bf16.gmra.mxu3 %v16865_v50  ;;  %6176 = vmatpush.bf16.msra.mxu2 %v11124_v14  ;;  %v11236_v14 = vor.u32 %v13610_v21, %v11233_v63  ;;  %v16934_v52 = vld [vmem:[#allocation50_spill] sm:$0xff] }
 0x40e   :  { %6147 = vmatpush.bf16.msra.mxu1 %v10996_v43  ;;  %v13766_v63 = vld [vmem:[#allocation15 + $0xeec] sm:$0xf] }
 0x40f   :  { %v5836_v1 = vpop.f32.mrf.mxu2  ;;  %6206 = vmatpush.bf16.msra.mxu3 %v11236_v14  ;;  %v11857_v14 = vld [vmem:[#allocation15 + $0xef8] sm:$0xf0] }
 0x410   :  { %v5837_v28 = vadd.f32 %v5836_v1, %v5808_v46  ;;  %v5865_v26 = vpop.f32.mrf.mxu3  ;;  %v5780_v10 = vpop.f32.mrf.mxu0  ;;  %v10852_v46 = vor.u32 %v13514_v44, %v10849_v59  ;;  %v13670_v44 = vld [vmem:[#allocation15 + $0xbec] sm:$0xf]  ;;  %v11473_v59 = vld [vmem:[#allocation15 + $0xbf8] sm:$0xf0]  ;;  %v11860_v39 = vor.u32 %v13766_v63, %v11857_v14 }
 0x411   :  { %v5781_v55 = vadd.f32 %v5780_v10, %v15642_v9  ;;  %v5809_v61 = vpop.f32.mrf.mxu1  ;;  %6177 = vmatpush.bf16.msra.mxu2 %v11108_v17  ;;  %v11476_v21 = vor.u32 %v13670_v44, %v11473_v59  ;;  %v11585_v63 = vld [vmem:[#allocation15 + $0xcd8] sm:$0xf0] }
 0x412   :  { %v15676_v50 = vadd.f32 %v5865_v26, %v5837_v28  ;;  %6119 = vmatpush.bf16.msra.mxu0 %v10852_v46  ;;  %6148 = vmatpush.bf16.msra.mxu1 %v10980_v56 }
 0x413   :  { %v5810_v6 = vadd.f32 %v5809_v61, %v5781_v55  ;;  %v16933_v61 = vld [vmem:[#allocation37_spill] sm:$0xff]  ;;  %6315 = vmatpush.bf16.msrb.mxu3 %v11860_v39  ;;  %v16937_v39 = vld [vmem:[#allocation54_spill] sm:$0xff] }
 0x416   :  { %6228 = vmatpush.bf16.msrb.mxu0 %v11476_v21  ;;  %v13698_v21 = vld [vmem:[#allocation15 + $0xccc] sm:$0xf] }
 0x417   :  { %v5838_v9 = vpop.f32.mrf.mxu2 }
 0x418   :  { %v5839_v27 = vadd.f32 %v5838_v9, %v5810_v6  ;;  %v5867_v1 = vpop.f32.mrf.mxu3  ;;  %v5783_v40 = vpop.f32.mrf.mxu0  ;;  %v11729_v6 = vld [vmem:[#allocation15 + $0xdf8] sm:$0xf0] }
 0x419   :  { %v5784_v28 = vadd.f32 %v5783_v40, %v15649_v12  ;;  %v5812_v26 = vpop.f32.mrf.mxu1  ;;  %v11732_v54 = vor.u32 %v13734_v7, %v11729_v6  ;;  %v11841_v7 = vld [vmem:[#allocation15 + $0xed8] sm:$0xf0] }
 0x41a   :  { %v15679_v10 = vadd.f32 %v5867_v1, %v5839_v27  ;;  %v11601_v1 = vld [vmem:[#allocation15 + $0xcf8] sm:$0xf0] }
 0x41b   :  { %v5813_v55 = vadd.f32 %v5812_v26, %v5784_v28  ;;  %6014 = vmatmul.bf16.gmra.mxu0 %v16933_v61  ;;  %6043 = vmatmul.bf16.gmra.mxu1 %v16934_v52  ;;  %v13730_v28 = vld [vmem:[#allocation15 + $0xdcc] sm:$0xf]  ;;  %v11713_v26 = vld [vmem:[#allocation15 + $0xdd8] sm:$0xf0] }
 0x41c   :  { %6072 = vmatmul.bf16.gmra.mxu2 %v16935_v47  ;;  %v11716_v61 = vor.u32 %v13730_v28, %v11713_v26  ;;  %v11457_v52 = vld [vmem:[#allocation15 + $0xbd8] sm:$0xf0]  ;;  %v13762_v47 = vld [vmem:[#allocation15 + $0xecc] sm:$0xf] }
 0x41d   :  { %6101 = vmatmul.bf16.gmra.mxu3 %v16869_v3  ;;  %6286 = vmatpush.bf16.msrb.mxu2 %v11732_v54  ;;  %v13702_v3 = vld [vmem:[#allocation15 + $0xcec] sm:$0xf] }
 0x41e   :  { %v11604_v56 = vor.u32 %v13702_v3, %v11601_v1  ;;  %v16938_v3 = vld [vmem:[#allocation55_spill] sm:$0xff] }
 0x41f   :  { %v5841_v43 = vpop.f32.mrf.mxu2 }
 0x420   :  { %v5842_v12 = vadd.f32 %v5841_v43, %v5813_v55  ;;  %v5870_v17 = vpop.f32.mrf.mxu3  ;;  %v5785_v46 = vpop.f32.mrf.mxu0  ;;  %6257 = vmatpush.bf16.msrb.mxu1 %v11604_v56  ;;  %v13666_v55 = vld [vmem:[#allocation15 + $0xbcc] sm:$0xf]  ;;  %v11844_v43 = vor.u32 %v13762_v47, %v11841_v7  ;;  %v11441_v7 = vld [vmem:[#allocation15 + $0xbb8] sm:$0xf0] }
 0x421   :  { %v5786_v9 = vadd.f32 %v5785_v46, %v15652_v31  ;;  %v5814_v41 = vpop.f32.mrf.mxu1  ;;  %v11460_v6 = vor.u32 %v13666_v55, %v11457_v52  ;;  %6287 = vmatpush.bf16.msrb.mxu2 %v11716_v61  ;;  %v13726_v55 = vld [vmem:[#allocation15 + $0xdac] sm:$0xf]  ;;  %v11697_v61 = vld [vmem:[#allocation15 + $0xdb8] sm:$0xf0] }
 0x422   :  { %v15686_v27 = vadd.f32 %v5870_v17, %v5842_v12  ;;  %6316 = vmatpush.bf16.msrb.mxu3 %v11844_v43  ;;  %v13662_v52 = vld [vmem:[#allocation15 + $0xbac] sm:$0xf]  ;;  %v11700_v47 = vor.u32 %v13726_v55, %v11697_v61  ;;  %v11553_v61 = vld [vmem:[#allocation15 + $0xc98] sm:$0xf0] }
 0x423   :  { %v5815_v40 = vadd.f32 %v5814_v41, %v5786_v9  ;;  %6229 = vmatpush.bf16.msrb.mxu0 %v11460_v6  ;;  %v16936_v9 = vld [vmem:[#allocation41_spill] sm:$0xff]  ;;  %v11588_v41 = vor.u32 %v13698_v21, %v11585_v63  ;;  %v11825_v6 = vld [vmem:[#allocation15 + $0xeb8] sm:$0xf0]  ;;  %v11444_v43 = vor.u32 %v13662_v52, %v11441_v7  ;;  %v13658_v21 = vld [vmem:[#allocation15 + $0xb8c] sm:$0xf] }
 0x424   :  { %v13690_v55 = vld [vmem:[#allocation15 + $0xc8c] sm:$0xf] }
 0x425   :  { %6258 = vmatpush.bf16.msrb.mxu1 %v11588_v41  ;;  %6288 = vmatpush.bf16.msrb.mxu2 %v11700_v47  ;;  %v11809_v41 = vld [vmem:[#allocation15 + $0xe98] sm:$0xf0]  ;;  %v11556_v52 = vor.u32 %v13690_v55, %v11553_v61  ;;  %v13650_v61 = vld [vmem:[#allocation15 + $0xb4c] sm:$0xf] }
 0x427   :  { %v5843_v31 = vpop.f32.mrf.mxu2  ;;  %6230 = vmatpush.bf16.msrb.mxu0 %v11444_v43 }
 0x428   :  { %v5844_v54 = vadd.f32 %v5843_v31, %v5815_v40  ;;  %v5872_v44 = vpop.f32.mrf.mxu3  ;;  %v5788_v59 = vpop.f32.mrf.mxu0  ;;  %v13758_v31 = vld [vmem:[#allocation15 + $0xeac] sm:$0xf] }
 0x429   :  { %v5789_v12 = vadd.f32 %v5788_v59, %v15658_v34  ;;  %v5817_v17 = vpop.f32.mrf.mxu1  ;;  %v11569_v59 = vld [vmem:[#allocation15 + $0xcb8] sm:$0xf0] }
 0x42a   :  { %v15689_v46 = vadd.f32 %v5872_v44, %v5844_v54  ;;  %v11828_v54 = vor.u32 %v13758_v31, %v11825_v6  ;;  %v13694_v44 = vld [vmem:[#allocation15 + $0xcac] sm:$0xf] }
 0x42b   :  { %v5818_v14 = vadd.f32 %v5817_v17, %v5789_v12  ;;  %6019 = vmatmul.bf16.gmra.mxu0 %v16936_v9  ;;  %6048 = vmatmul.bf16.gmra.mxu1 %v16937_v39  ;;  %v13722_v12 = vld [vmem:[#allocation15 + $0xd8c] sm:$0xf]  ;;  %v11681_v17 = vld [vmem:[#allocation15 + $0xd98] sm:$0xf0] }
 0x42c   :  { %6077 = vmatmul.bf16.gmra.mxu2 %v16938_v3  ;;  %6317 = vmatpush.bf16.msrb.mxu3 %v11828_v54  ;;  %v11684_v63 = vor.u32 %v13722_v12, %v11681_v17  ;;  %v13754_v9 = vld [vmem:[#allocation15 + $0xe8c] sm:$0xf] }
 0x42d   :  { %6106 = vmatmul.bf16.gmra.mxu3 %v16874_v53  ;;  %v11572_v53 = vor.u32 %v13694_v44, %v11569_v59  ;;  %v16939_v44 = vld [vmem:[#allocation102_spill] sm:$0xff] }
 0x42e   :  { %6289 = vmatpush.bf16.msrb.mxu2 %v11684_v63  ;;  %v6941_v59 = vperm.slane %v16939_v44, 2  ;;  %v13654_v17 = vld [vmem:[#allocation15 + $0xb6c] sm:$0xf]  ;;  %v11409_v63 = vld [vmem:[#allocation15 + $0xb78] sm:$0xf0] }
 0x42f   :  { %v5846_v1 = vpop.f32.mrf.mxu2  ;;  %6259 = vmatpush.bf16.msrb.mxu1 %v11572_v53 }
 0x430   :  { %v5847_v34 = vadd.f32 %v5846_v1, %v5818_v14  ;;  %v5875_v40 = vpop.f32.mrf.mxu3  ;;  %v5790_v56 = vpop.f32.mrf.mxu0  ;;  %v11425_v14 = vld [vmem:[#allocation15 + $0xb98] sm:$0xf0]  ;;  %v11812_v1 = vor.u32 %v13754_v9, %v11809_v41  ;;  %v11412_v41 = vor.u32 %v13654_v17, %v11409_v63  ;;  %vm15711_vm5 = vcmp.eq.s32.totalorder %v6941_v59, 1 }
 0x431   :  { %v5819_v28 = vpop.f32.mrf.mxu1  ;;  %v11428_v3 = vor.u32 %v13658_v21, %v11425_v14  ;;  %v13750_v14 = vld [vmem:[#allocation15 + $0xe6c] sm:$0xf]  ;;  %v11793_v9 = vld [vmem:[#allocation15 + $0xe78] sm:$0xf0] }
 0x432   :  { %v15695_v26 = vadd.f32 %v5875_v40, %v5847_v34  ;;  %6318 = vmatpush.bf16.msrb.mxu3 %v11812_v1  ;;  %v11537_v1 = vld [vmem:[#allocation15 + $0xc78] sm:$0xf0] }
 0x433   :  { %6231 = vmatpush.bf16.msrb.mxu0 %v11428_v3  ;;  %6260 = vmatpush.bf16.msrb.mxu1 %v11556_v52  ;;  %v13686_v3 = vld [vmem:[#allocation15 + $0xc6c] sm:$0xf]  ;;  %v11393_v52 = vld [vmem:[#allocation15 + $0xb58] sm:$0xf0] }
 0x437   :  { %v5848_v39 = vpop.f32.mrf.mxu2  ;;  %6232 = vmatpush.bf16.msrb.mxu0 %v11412_v41  ;;  %v11521_v41 = vld [vmem:[#allocation15 + $0xc58] sm:$0xf0] }
 0x438   :  { %v5877_v34 = vpop.f32.mrf.mxu3  ;;  %v5889_v40 = vpop.f32.mrf.mxu0  ;;  %v11796_v39 = vor.u32 %v13750_v14, %v11793_v9 }
 0x439   :  { %v5890_v56 = vadd.f32 %v5889_v40, %v15666_v23  ;;  %v5918_v28 = vpop.f32.mrf.mxu1  ;;  %v11540_v40 = vor.u32 %v13686_v3, %v11537_v1 }
 0x43a   :  { %6319 = vmatpush.bf16.msrb.mxu3 %v11796_v39 }
 0x43b   :  { %vm6525_vm4 = vcmp.ge.f32.partialorder %v5890_v56, 1.25  ;;  %6120 = vmatmul.bf16.vlgmr.msra.gmra.mxu0 %v16861_v19  ;;  %6149 = vmatmul.bf16.vlgmr.msra.gmra.mxu1 %v16862_v29  ;;  %v6558_v43 = vmul.f32 0.75, %v5890_v56  ;;  %v13718_v29 = vld [vmem:[#allocation15 + $0xd6c] sm:$0xf] }
 0x43c   :  { %6178 = vmatmul.bf16.vlgmr.msra.gmra.mxu2 %v16818_v58  ;;  %v6547_v47 = vsel %vm6525_vm4, 0.0, %v5890_v56  ;;  %v11665_v58 = vld [vmem:[#allocation15 + $0xd78] sm:$0xf0]  ;;  %6261 = vmatpush.bf16.msrb.mxu1 %v11540_v40 }
 0x43d   :  { %6207 = vmatmul.bf16.vlgmr.msra.gmra.mxu3 %v16880_v62  ;;  %v6566_v54 = vmul.f32 0.97, %v6547_v47  ;;  %v11668_v21 = vor.u32 %v13718_v29, %v11665_v58  ;;  %v13746_v47 = vld [vmem:[#allocation15 + $0xe4c] sm:$0xf] }
 0x43f   :  { %v5947_v23 = vpop.f32.mrf.mxu2  ;;  %6290 = vmatpush.bf16.msrb.mxu2 %v11668_v21 }
 0x440   :  { %v5948_v7 = vadd.f32 %v5947_v23, %v5918_v28  ;;  %v5976_v31 = vpop.f32.mrf.mxu3  ;;  %v5891_v6 = vpop.f32.mrf.mxu0  ;;  %v13714_v28 = vld [vmem:[#allocation15 + $0xd4c] sm:$0xf]  ;;  %v15709_v23 = vsel %vm6525_vm4, 1.0, %v16810_v42 }
 0x441   :  { %v5892_v19 = vadd.f32 %v5891_v6, %v15669_v51  ;;  %v5920_v53 = vpop.f32.mrf.mxu1  ;;  %v11649_v51 = vld [vmem:[#allocation15 + $0xd58] sm:$0xf0]  ;;  %v11396_v6 = vor.u32 %v13650_v61, %v11393_v52 }
 0x442   :  { %v15705_v12 = vadd.f32 %v5976_v31, %v5948_v7  ;;  %v11652_v55 = vor.u32 %v13714_v28, %v11649_v51  ;;  %v12825_v7 = vld [vmem:[#allocation17 + $0x2d0] sm:$0xf0] }
 0x443   :  { %v6562_v62 = vadd.f32 %v6558_v43, %v5892_v19  ;;  %v11777_v43 = vld [vmem:[#allocation15 + $0xe58] sm:$0xf0]  ;;  %6233 = vmatpush.bf16.msrb.mxu0 %v11396_v6 }
 0x444   :  { %v11780_v21 = vor.u32 %v13746_v47, %v11777_v43  ;;  %6291 = vmatpush.bf16.msrb.mxu2 %v11652_v55 }
 0x445   :  { %v6570_v34 = vadd.f32 %v6566_v54, %v6562_v62  ;;  %v6607_v63 = vmul.f32 0.75, %v6562_v62 }
 0x446   :  { %6320 = vmatpush.bf16.msrb.mxu3 %v11780_v21 }
 0x447   :  { %v5949_v31 = vpop.f32.mrf.mxu2  ;;  %vm6574_vm6 = vcmp.ge.f32.partialorder %v6570_v34, 1.25 }
 0x448   :  { %v5950_v54 = vadd.f32 %v5949_v31, %v5920_v53  ;;  %v5978_v19 = vpop.f32.mrf.mxu3  ;;  %v5894_v29 = vpop.f32.mrf.mxu0  ;;  %v15716_v58 = vsel %vm6574_vm6, 1.0, %v16810_v42  ;;  %v6596_v17 = vsel %vm6574_vm6, 0.0, %v6570_v34  ;;  %v13682_v53 = vld [vmem:[#allocation15 + $0xc4c] sm:$0xf] }
 0x449   :  { %v5895_v56 = vadd.f32 %v5894_v29, %v15676_v50  ;;  %v5923_v14 = vpop.f32.mrf.mxu1  ;;  %v6615_v3 = vmul.f32 0.97, %v6596_v17  ;;  %v11524_v1 = vor.u32 %v13682_v53, %v11521_v41  ;;  %v16942_v50 = vld [vmem:[#allocation103_spill] sm:$0xff]  ;;  %v13646_v29 = vld [vmem:[#allocation15 + $0xb2c] sm:$0xf] }
 0x44a   :  { %v15723_v9 = vadd.f32 %v5978_v19, %v5950_v54  ;;  %v6987_v62 = vperm.slane %v16942_v50, 2  ;;  %v13710_v54 = vld [vmem:[#allocation15 + $0xd2c] sm:$0xf]  ;;  %v11633_v19 = vld [vmem:[#allocation15 + $0xd38] sm:$0xf0] }
 0x44b   :  { %v6611_v39 = vadd.f32 %v6607_v63, %v5895_v56  ;;  %6125 = vmatmul.bf16.gmra.mxu0 %v16867_v49  ;;  %6154 = vmatmul.bf16.gmra.mxu1 %v16868_v33  ;;  %v11636_v21 = vor.u32 %v13710_v54, %v11633_v19  ;;  %v11377_v56 = vld [vmem:[#allocation15 + $0xb38] sm:$0xf0]  ;;  %v13742_v63 = vld [vmem:[#allocation15 + $0xe2c] sm:$0xf] }
 0x44c   :  { %6183 = vmatmul.bf16.gmra.mxu2 %v16822_v60  ;;  %6262 = vmatpush.bf16.msrb.mxu1 %v11524_v1  ;;  %vm15730_vm8 = vcmp.eq.s32.totalorder %v6987_v62, 1  ;;  %v11380_v53 = vor.u32 %v13646_v29, %v11377_v56  ;;  %v13674_v54 = vld [vmem:[#allocation15 + $0xc0c] sm:$0xf]  ;;  %v11489_v19 = vld [vmem:[#allocation15 + $0xc18] sm:$0xf0] }
 0x44d   :  { %v6619_v34 = vadd.f32 %v6615_v3, %v6611_v39  ;;  %6212 = vmatmul.bf16.gmra.mxu3 %v16883_v4  ;;  %v6656_v33 = vmul.f32 0.75, %v6611_v39  ;;  %v13678_v39 = vld [vmem:[#allocation15 + $0xc2c] sm:$0xf]  ;;  %6292 = vmatpush.bf16.msrb.mxu2 %v11636_v21 }
 0x44e   :  { %v13706_v3 = vld [vmem:[#allocation15 + $0xd0c] sm:$0xf]  ;;  %6234 = vmatpush.bf16.msrb.mxu0 %v11380_v53 }
 0x44f   :  { %vm6623_vm7 = vcmp.ge.f32.partialorder %v6619_v34, 1.25  ;;  %v5952_v40 = vpop.f32.mrf.mxu2 }
 0x450   :  { %v15735_v51 = vsel %vm6623_vm7, 1.0, %v16810_v42  ;;  %v6645_v49 = vsel %vm6623_vm7, 0.0, %v6619_v34  ;;  %v5953_v55 = vadd.f32 %v5952_v40, %v5923_v14  ;;  %v5981_v61 = vpop.f32.mrf.mxu3  ;;  %v5896_v52 = vpop.f32.mrf.mxu0  ;;  %v11761_v14 = vld [vmem:[#allocation15 + $0xe38] sm:$0xf0]  ;;  %v13642_v40 = vld [vmem:[#allocation15 + $0xb0c] sm:$0xf] }
 0x451   :  { %v6664_v47 = vmul.f32 0.97, %v6645_v49  ;;  %v6961_v60 = vsel %vm15711_vm5, %v15716_v58, %v15735_v51  ;;  %v5897_v4 = vadd.f32 %v5896_v52, %v15679_v10  ;;  %v5925_v31 = vpop.f32.mrf.mxu1  ;;  %v11764_v41 = vor.u32 %v13742_v63, %v11761_v14  ;;  %v11505_v10 = vld [vmem:[#allocation15 + $0xc38] sm:$0xf0] }
 0x452   :  { %v15745_v6 = vsel %vm15730_vm8, %v15709_v23, %v6961_v60  ;;  %v15747_v43 = vadd.f32 %v5981_v61, %v5953_v55  ;;  %v11508_v62 = vor.u32 %v13678_v39, %v11505_v10  ;;  %v11617_v34 = vld [vmem:[#allocation15 + $0xd18] sm:$0xf0]  ;;  %v13738_v61 = vld [vmem:[#allocation15 + $0xe0c] sm:$0xf]  ;;  %v11492_v14 = vor.u32 %v13674_v54, %v11489_v19 }
 0x453   :  { %16945 = vst [vmem:[#allocation59_spill] sm:$0xff] %v15745_v6  ;;  %v6660_v17 = vadd.f32 %v6656_v33, %v5897_v4  ;;  %6321 = vmatpush.bf16.msrb.mxu3 %v11764_v41  ;;  %v11620_v49 = vor.u32 %v13706_v3, %v11617_v34  ;;  %v11361_v55 = vld [vmem:[#allocation15 + $0xb18] sm:$0xf0]  ;;  %v13983_v6 = vld [vmem:[#allocation17 + $0x22c] sm:$0xf0] }
 0x454   :  { %v11745_v52 = vld [vmem:[#allocation15 + $0xe18] sm:$0xf0]  ;;  %6263 = vmatpush.bf16.msrb.mxu1 %v11508_v62  ;;  %v11364_v60 = vor.u32 %v13642_v40, %v11361_v55 }
 0x455   :  { %v6668_v1 = vadd.f32 %v6664_v47, %v6660_v17  ;;  %v11748_v4 = vor.u32 %v13738_v61, %v11745_v52  ;;  %v6705_v41 = vmul.f32 0.75, %v6660_v17  ;;  %6293 = vmatpush.bf16.msrb.mxu2 %v11620_v49  ;;  %v13862_v17 = vld [vmem:[#allocation15 + $0x11ec] sm:$0xf]  ;;  %v12241_v34 = vld [vmem:[#allocation15 + $0x11f8] sm:$0xf0] }
 0x456   :  { %6235 = vmatpush.bf16.msrb.mxu0 %v11364_v60  ;;  %v12244_v40 = vor.u32 %v13862_v17, %v12241_v34  ;;  %v13798_v49 = vld [vmem:[#allocation15 + $0xfec] sm:$0xf]  ;;  %v11985_v55 = vld [vmem:[#allocation15 + $0xff8] sm:$0xf0] }
 0x457   :  { %v5954_v33 = vpop.f32.mrf.mxu2  ;;  %vm6672_vm9 = vcmp.ge.f32.partialorder %v6668_v1, 1.25  ;;  %6322 = vmatpush.bf16.msrb.mxu3 %v11748_v4  ;;  %v13894_v61 = vld [vmem:[#allocation15 + $0x12ec] sm:$0xf]  ;;  %v12369_v60 = vld [vmem:[#allocation15 + $0x12f8] sm:$0xf0] }
 0x458   :  { %v5955_v29 = vadd.f32 %v5954_v33, %v5925_v31  ;;  %v5983_v56 = vpop.f32.mrf.mxu3  ;;  %v5899_v47 = vpop.f32.mrf.mxu0  ;;  %v15750_v21 = vsel %vm6672_vm9, 1.0, %v16810_v42  ;;  %v6694_v63 = vsel %vm6672_vm9, 0.0, %v6668_v1  ;;  %6264 = vmatpush.bf16.msrb.mxu1 %v11492_v14  ;;  %v11988_v33 = vor.u32 %v13798_v49, %v11985_v55  ;;  %v13794_v17 = vld [vmem:[#allocation15 + $0xfcc] sm:$0xf]  ;;  %v12353_v49 = vld [vmem:[#allocation15 + $0x12d8] sm:$0xf0] }
 0x459   :  { %v5900_v53 = vadd.f32 %v5899_v47, %v15686_v27  ;;  %v6965_v39 = vsel %vm15711_vm5, %v15735_v51, %v15750_v21  ;;  %v5928_v10 = vpop.f32.mrf.mxu1  ;;  %v6713_v62 = vmul.f32 0.97, %v6694_v63  ;;  %6402 = vmatpush.bf16.msra.mxu2 %v12244_v40  ;;  %v12372_v19 = vor.u32 %v13894_v61, %v12369_v60  ;;  %v13890_v40 = vld [vmem:[#allocation15 + $0x12cc] sm:$0xf] }
 0x45a   :  { %v15757_v3 = vadd.f32 %v5983_v56, %v5955_v29  ;;  %v15762_v31 = vsel %vm15730_vm8, %v15716_v58, %v6965_v39  ;;  %6344 = vmatpush.bf16.msra.mxu0 %v11988_v33  ;;  %v12113_v39 = vld [vmem:[#allocation15 + $0x10f8] sm:$0xf0] }
 0x45b   :  { %16946 = vst [vmem:[#allocation63_spill] sm:$0xff] %v15762_v31  ;;  %v6709_v1 = vadd.f32 %v6705_v41, %v5900_v53  ;;  %6130 = vmatmul.bf16.gmra.mxu0 %v16870_v57  ;;  %6159 = vmatmul.bf16.gmra.mxu1 %v16871_v37  ;;  %v13830_v41 = vld [vmem:[#allocation15 + $0x10ec] sm:$0xf]  ;;  %v14019_v31 = vld [vmem:[#allocation17 + $0x34c] sm:$0xf0] }
 0x45c   :  { %6188 = vmatmul.bf16.gmra.mxu2 %v16826_v8  ;;  %6431 = vmatpush.bf16.msra.mxu3 %v12372_v19 }
 0x45d   :  { %v6717_v27 = vadd.f32 %v6713_v62, %v6709_v1  ;;  %6217 = vmatmul.bf16.gmra.mxu3 %v16887_v32  ;;  %v6754_v32 = vmul.f32 0.75, %v6709_v1  ;;  %v12116_v1 = vor.u32 %v13830_v41, %v12113_v39  ;;  %v13858_v62 = vld [vmem:[#allocation15 + $0x11cc] sm:$0xf]  ;;  %v12097_v41 = vld [vmem:[#allocation15 + $0x10d8] sm:$0xf0] }
 0x45f   :  { %vm6721_vm10 = vcmp.ge.f32.partialorder %v6717_v27, 1.25  ;;  %v5957_v52 = vpop.f32.mrf.mxu2  ;;  %6373 = vmatpush.bf16.msra.mxu1 %v12116_v1 }
 0x460   :  { %v15769_v57 = vsel %vm6721_vm10, 1.0, %v16810_v42  ;;  %v6743_v4 = vsel %vm6721_vm10, 0.0, %v6717_v27  ;;  %v5958_v37 = vadd.f32 %v5957_v52, %v5928_v10  ;;  %v5986_v54 = vpop.f32.mrf.mxu3  ;;  %v5901_v8 = vpop.f32.mrf.mxu0  ;;  %v12225_v27 = vld [vmem:[#allocation15 + $0x11d8] sm:$0xf0]  ;;  %v12356_v52 = vor.u32 %v13890_v40, %v12353_v49 }
 0x461   :  { %v6969_v29 = vsel %vm15711_vm5, %v15750_v21, %v15769_v57  ;;  %v5902_v56 = vadd.f32 %v5901_v8, %v15689_v46  ;;  %v5930_v47 = vpop.f32.mrf.mxu1  ;;  %v6762_v63 = vmul.f32 0.97, %v6743_v4  ;;  %v12228_v34 = vor.u32 %v13858_v62, %v12225_v27  ;;  %v11969_v46 = vld [vmem:[#allocation15 + $0xfd8] sm:$0xf0]  ;;  %v13854_v62 = vld [vmem:[#allocation15 + $0x11ac] sm:$0xf] }
 0x462   :  { %v15779_v14 = vsel %vm15730_vm8, %v15735_v51, %v6969_v29  ;;  %v15781_v53 = vadd.f32 %v5986_v54, %v5958_v37  ;;  %v11972_v61 = vor.u32 %v13794_v17, %v11969_v46  ;;  %6432 = vmatpush.bf16.msra.mxu3 %v12356_v52  ;;  %v12209_v27 = vld [vmem:[#allocation15 + $0x11b8] sm:$0xf0]  ;;  %v13790_v17 = vld [vmem:[#allocation15 + $0xfac] sm:$0xf] }
 0x463   :  { %16947 = vst [vmem:[#allocation67_spill] sm:$0xff] %v15779_v14  ;;  %v6758_v10 = vadd.f32 %v6754_v32, %v5902_v56  ;;  %6403 = vmatpush.bf16.msra.mxu2 %v12228_v34  ;;  %v11953_v34 = vld [vmem:[#allocation15 + $0xfb8] sm:$0xf0]  ;;  %v13886_v46 = vld [vmem:[#allocation15 + $0x12ac] sm:$0xf] }
 0x464   :  { %6345 = vmatpush.bf16.msra.mxu0 %v11972_v61  ;;  %v12337_v40 = vld [vmem:[#allocation15 + $0x12b8] sm:$0xf0] }
 0x465   :  { %v6766_v55 = vadd.f32 %v6762_v63, %v6758_v10  ;;  %v6803_v19 = vmul.f32 0.75, %v6758_v10 }
 0x467   :  { %v5959_v51 = vpop.f32.mrf.mxu2  ;;  %vm6770_vm11 = vcmp.ge.f32.partialorder %v6766_v55, 1.25 }
 0x468   :  { %v5960_v33 = vadd.f32 %v5959_v51, %v5930_v47  ;;  %v5988_v60 = vpop.f32.mrf.mxu3  ;;  %v5904_v4 = vpop.f32.mrf.mxu0  ;;  %v12395_v37 = vsel %vm6770_vm11, 1.0, %v16810_v42  ;;  %v6792_v54 = vsel %vm6770_vm11, 0.0, %v6766_v55  ;;  %v13826_v47 = vld [vmem:[#allocation15 + $0x10cc] sm:$0xf]  ;;  %v11956_v55 = vor.u32 %v13790_v17, %v11953_v34  ;;  %v12065_v34 = vld [vmem:[#allocation15 + $0x1098] sm:$0xf0] }
 0x469   :  { %v5905_v8 = vadd.f32 %v5904_v4, %v15695_v26  ;;  %v6973_v32 = vsel %vm15711_vm5, %v15769_v57, %v12395_v37  ;;  %v5933_v29 = vpop.f32.mrf.mxu1  ;;  %v6811_v1 = vmul.f32 0.97, %v6792_v54  ;;  %v12100_v26 = vor.u32 %v13826_v47, %v12097_v41  ;;  %v13822_v4 = vld [vmem:[#allocation15 + $0x10ac] sm:$0xf]  ;;  %v12081_v54 = vld [vmem:[#allocation15 + $0x10b8] sm:$0xf0] }
 0x46a   :  { %v15788_v56 = vadd.f32 %v5988_v60, %v5960_v33  ;;  %v15793_v63 = vsel %vm15730_vm8, %v15750_v21, %v6973_v32  ;;  %v12212_v21 = vor.u32 %v13854_v62, %v12209_v27  ;;  %6346 = vmatpush.bf16.msra.mxu0 %v11956_v55  ;;  %v12193_v32 = vld [vmem:[#allocation15 + $0x1198] sm:$0xf0] }
 0x46b   :  { %16948 = vst [vmem:[#allocation75_spill] sm:$0xff] %v15793_v63  ;;  %v6807_v39 = vadd.f32 %v6803_v19, %v5905_v8  ;;  %6135 = vmatmul.bf16.gmra.mxu0 %v16875_v18  ;;  %6164 = vmatmul.bf16.gmra.mxu1 %v16876_v38  ;;  %v12340_v18 = vor.u32 %v13886_v46, %v12337_v40  ;;  %v13850_v19 = vld [vmem:[#allocation15 + $0x118c] sm:$0xf]  ;;  %v11937_v41 = vld [vmem:[#allocation15 + $0xf98] sm:$0xf0] }
 0x46c   :  { %6193 = vmatmul.bf16.gmra.mxu2 %v16878_v24  ;;  %6374 = vmatpush.bf16.msra.mxu1 %v12100_v26  ;;  %v12084_v8 = vor.u32 %v13822_v4, %v12081_v54  ;;  %v12196_v47 = vor.u32 %v13850_v19, %v12193_v32  ;;  %v12177_v55 = vld [vmem:[#allocation15 + $0x1178] sm:$0xf0] }
 0x46d   :  { %v6815_v10 = vadd.f32 %v6811_v1, %v6807_v39  ;;  %6222 = vmatmul.bf16.gmra.mxu3 %v16891_v35  ;;  %6404 = vmatpush.bf16.msra.mxu2 %v12212_v21  ;;  %v13882_v39 = vld [vmem:[#allocation15 + $0x128c] sm:$0xf]  ;;  %v12049_v19 = vld [vmem:[#allocation15 + $0x1078] sm:$0xf0] }
 0x46e   :  { %6433 = vmatpush.bf16.msra.mxu3 %v12340_v18  ;;  %v13818_v21 = vld [vmem:[#allocation15 + $0x108c] sm:$0xf] }
 0x46f   :  { %vm6819_vm12 = vcmp.ge.f32.partialorder %v6815_v10, 1.25  ;;  %v5962_v49 = vpop.f32.mrf.mxu2  ;;  %v12068_v40 = vor.u32 %v13818_v21, %v12065_v34  ;;  %v13782_v18 = vld [vmem:[#allocation15 + $0xf6c] sm:$0xf] }
 0x470   :  { %v12399_v61 = vsel %vm6819_vm12, 1.0, %v16810_v42  ;;  %v5963_v38 = vadd.f32 %v5962_v49, %v5933_v29  ;;  %v5991_v52 = vpop.f32.mrf.mxu3  ;;  %v5906_v24 = vpop.f32.mrf.mxu0  ;;  %v13786_v29 = vld [vmem:[#allocation15 + $0xf8c] sm:$0xf]  ;;  %6375 = vmatpush.bf16.msra.mxu1 %v12084_v8 }
 0x471   :  { %v6977_v35 = vsel %vm15711_vm5, %v12395_v37, %v12399_v61  ;;  %v5935_v51 = vpop.f32.mrf.mxu1  ;;  %v12321_v37 = vld [vmem:[#allocation15 + $0x1298] sm:$0xf0]  ;;  %v11940_v1 = vor.u32 %v13786_v29, %v11937_v41  ;;  %6405 = vmatpush.bf16.msra.mxu2 %v12196_v47  ;;  %v13846_v49 = vld [vmem:[#allocation15 + $0x116c] sm:$0xf] }
 0x472   :  { %v15805_v33 = vsel %vm15730_vm8, %v15769_v57, %v6977_v35  ;;  %v15807_v60 = vadd.f32 %v5991_v52, %v5963_v38  ;;  %v12324_v26 = vor.u32 %v13882_v39, %v12321_v37  ;;  %v12180_v61 = vor.u32 %v13846_v49, %v12177_v55  ;;  %v11921_v38 = vld [vmem:[#allocation15 + $0xf78] sm:$0xf0]  ;;  %v13814_v8 = vld [vmem:[#allocation15 + $0x106c] sm:$0xf] }
 0x473   :  { %16949 = vst [vmem:[#allocation44_spill] sm:$0xff] %v15805_v33  ;;  %6347 = vmatpush.bf16.msra.mxu0 %v11940_v1  ;;  %v12305_v52 = vld [vmem:[#allocation15 + $0x1278] sm:$0xf0]  ;;  %v11924_v35 = vor.u32 %v13782_v18, %v11921_v38  ;;  %v12052_v29 = vor.u32 %v13814_v8, %v12049_v19  ;;  %v13842_v47 = vld [vmem:[#allocation15 + $0x114c] sm:$0xf] }
 0x474   :  { %6434 = vmatpush.bf16.msra.mxu3 %v12324_v26  ;;  %6376 = vmatpush.bf16.msra.mxu1 %v12068_v40  ;;  %v12161_v41 = vld [vmem:[#allocation15 + $0x1158] sm:$0xf0]  ;;  %v13778_v39 = vld [vmem:[#allocation15 + $0xf4c] sm:$0xf]  ;;  %v14023_v33 = vld [vmem:[#allocation17 + $0x36c] sm:$0xf0] }
 0x475   :  { %6406 = vmatpush.bf16.msra.mxu2 %v12180_v61  ;;  %v12164_v37 = vor.u32 %v13842_v47, %v12161_v41  ;;  %v11905_v1 = vld [vmem:[#allocation15 + $0xf58] sm:$0xf0]  ;;  %v13874_v26 = vld [vmem:[#allocation15 + $0x124c] sm:$0xf] }
 0x476   :  { %v13810_v49 = vld [vmem:[#allocation15 + $0x104c] sm:$0xf]  ;;  %v12033_v55 = vld [vmem:[#allocation15 + $0x1058] sm:$0xf0] }
 0x477   :  { %v5964_v10 = vpop.f32.mrf.mxu2  ;;  %6348 = vmatpush.bf16.msra.mxu0 %v11924_v35  ;;  %v12036_v61 = vor.u32 %v13810_v49, %v12033_v55  ;;  %v13838_v38 = vld [vmem:[#allocation15 + $0x112c] sm:$0xf]  ;;  %v12017_v19 = vld [vmem:[#allocation15 + $0x1038] sm:$0xf0] }
 0x478   :  { %v5993_v57 = vpop.f32.mrf.mxu3  ;;  %v6005_v62 = vpop.f32.mrf.mxu0  ;;  %v12289_v10 = vld [vmem:[#allocation15 + $0x1258] sm:$0xf0]  ;;  %6377 = vmatpush.bf16.msra.mxu1 %v12052_v29  ;;  %v13870_v35 = vld [vmem:[#allocation15 + $0x122c] sm:$0xf] }
 0x479   :  { %v6006_v27 = vadd.f32 %v6005_v62, %v15705_v12  ;;  %v6034_v17 = vpop.f32.mrf.mxu1  ;;  %v13878_v12 = vld [vmem:[#allocation15 + $0x126c] sm:$0xf]  ;;  %v11908_v57 = vor.u32 %v13778_v39, %v11905_v1  ;;  %v12292_v62 = vor.u32 %v13874_v26, %v12289_v10  ;;  %6407 = vmatpush.bf16.msra.mxu2 %v12164_v37  ;;  %v12129_v41 = vld [vmem:[#allocation15 + $0x1118] sm:$0xf0] }
 0x47a   :  { %v12308_v51 = vor.u32 %v13878_v12, %v12305_v52  ;;  %v12145_v12 = vld [vmem:[#allocation15 + $0x1138] sm:$0xf0]  ;;  %v13774_v52 = vld [vmem:[#allocation15 + $0xf2c] sm:$0xf] }
 0x47b   :  { %v6035_v46 = vadd.f32 %v6034_v17, %v6006_v27  ;;  %6236 = vmatmul.bf16.vlgmr.msrb.gmra.mxu0 %v16881_v15  ;;  %6265 = vmatmul.bf16.vlgmr.msrb.gmra.mxu1 %v16882_v22  ;;  %v13806_v8 = vld [vmem:[#allocation15 + $0x102c] sm:$0xf]  ;;  %v11873_v37 = vld [vmem:[#allocation15 + $0xf18] sm:$0xf0] }
 0x47c   :  { %6294 = vmatmul.bf16.vlgmr.msrb.gmra.mxu2 %v16834_v48  ;;  %6435 = vmatpush.bf16.msra.mxu3 %v12308_v51  ;;  %v12273_v51 = vld [vmem:[#allocation15 + $0x1238] sm:$0xf0]  ;;  %v12020_v47 = vor.u32 %v13806_v8, %v12017_v19  ;;  %v13770_v39 = vld [vmem:[#allocation15 + $0xf0c] sm:$0xf] }
 0x47d   :  { %6323 = vmatmul.bf16.vlgmr.msrb.gmra.mxu3 %v16895_v11  ;;  %6349 = vmatpush.bf16.msra.mxu0 %v11908_v57  ;;  %v11876_v26 = vor.u32 %v13770_v39, %v11873_v37  ;;  %v13866_v10 = vld [vmem:[#allocation15 + $0x120c] sm:$0xf]  ;;  %v12257_v57 = vld [vmem:[#allocation15 + $0x1218] sm:$0xf0]  ;;  %v16952_v37 = vld [vmem:[#allocation77_spill] sm:$0xff] }
 0x47e   :  { %6378 = vmatpush.bf16.msra.mxu1 %v12036_v61 }
 0x47f   :  { %v6063_v24 = vpop.f32.mrf.mxu2 }
 0x480   :  { %v6064_v4 = vadd.f32 %v6063_v24, %v6035_v46  ;;  %v6092_v15 = vpop.f32.mrf.mxu3  ;;  %v6007_v54 = vpop.f32.mrf.mxu0  ;;  %6436 = vmatpush.bf16.msra.mxu3 %v12292_v62  ;;  %v11889_v24 = vld [vmem:[#allocation15 + $0xf38] sm:$0xf0]  ;;  %v12260_v62 = vor.u32 %v13866_v10, %v12257_v57  ;;  %v16953_v10 = vld [vmem:[#allocation90_spill] sm:$0xff]  ;;  %v16954_v57 = vld [vmem:[#allocation91_spill] sm:$0xff] }
 0x481   :  { %v6008_v22 = vadd.f32 %v6007_v54, %v15723_v9  ;;  %v6036_v48 = vpop.f32.mrf.mxu1  ;;  %v12276_v54 = vor.u32 %v13870_v35, %v12273_v51 }
 0x482   :  { %v15815_v11 = vadd.f32 %v6092_v15, %v6064_v4  ;;  %v11892_v15 = vor.u32 %v13774_v52, %v11889_v24  ;;  %6379 = vmatpush.bf16.msra.mxu1 %v12020_v47 }
 0x483   :  { %v6037_v32 = vadd.f32 %v6036_v48, %v6008_v22 }
 0x484   :  { %6350 = vmatpush.bf16.msra.mxu0 %v11892_v15  ;;  %6437 = vmatpush.bf16.msra.mxu3 %v12276_v54 }
 0x487   :  { %v6065_v9 = vpop.f32.mrf.mxu2 }
 0x488   :  { %v6066_v27 = vadd.f32 %v6065_v9, %v6037_v32  ;;  %v6094_v17 = vpop.f32.mrf.mxu3  ;;  %v6010_v21 = vpop.f32.mrf.mxu0  ;;  %v13834_v32 = vld [vmem:[#allocation15 + $0x110c] sm:$0xf]  ;;  %6351 = vmatpush.bf16.msra.mxu0 %v11876_v26  ;;  %6438 = vmatpush.bf16.msra.mxu3 %v12260_v62  ;;  %v12711_v26 = vld [vmem:[#allocation17 + $0x1e0] sm:$0xf] }
 0x489   :  { %v6011_v34 = vadd.f32 %v6010_v21, %v15747_v43  ;;  %v6039_v46 = vpop.f32.mrf.mxu1  ;;  %v12148_v43 = vor.u32 %v13838_v38, %v12145_v12  ;;  %v12132_v1 = vor.u32 %v13834_v32, %v12129_v41  ;;  %v13802_v9 = vld [vmem:[#allocation15 + $0x100c] sm:$0xf] }
 0x48a   :  { %v15818_v40 = vadd.f32 %v6094_v17, %v6066_v27  ;;  %v12001_v27 = vld [vmem:[#allocation15 + $0x1018] sm:$0xf0] }
 0x48b   :  { %v6040_v18 = vadd.f32 %v6039_v46, %v6011_v34  ;;  %6241 = vmatmul.bf16.gmra.mxu0 %v16884_v5  ;;  %6270 = vmatmul.bf16.gmra.mxu1 %v16885_v36  ;;  %v12004_v46 = vor.u32 %v13802_v9, %v12001_v27  ;;  %v16955_v9 = vld [vmem:[#allocation92_spill] sm:$0xff] }
 0x48c   :  { %6299 = vmatmul.bf16.gmra.mxu2 %v16886_v2 }
 0x48d   :  { %6328 = vmatmul.bf16.gmra.mxu3 %v16899_v13  ;;  %6408 = vmatpush.bf16.msra.mxu2 %v12148_v43 }
 0x48e   :  { %6380 = vmatpush.bf16.msra.mxu1 %v12004_v46 }
 0x48f   :  { %v6068_v4 = vpop.f32.mrf.mxu2 }
 0x490   :  { %v6069_v22 = vadd.f32 %v6068_v4, %v6040_v18  ;;  %v6097_v5 = vpop.f32.mrf.mxu3  ;;  %v6012_v48 = vpop.f32.mrf.mxu0 }
 0x491   :  { %v6013_v36 = vadd.f32 %v6012_v48, %v15757_v3  ;;  %v6041_v2 = vpop.f32.mrf.mxu1  ;;  %6409 = vmatpush.bf16.msra.mxu2 %v12132_v1  ;;  %v13943_v1 = vld [vmem:[#allocation17 + $0xec] sm:$0xf0] }
 0x492   :  { %v15825_v13 = vadd.f32 %v6097_v5, %v6069_v22  ;;  %v16950_v5 = vld [vmem:[#allocation87_spill] sm:$0xff] }
 0x493   :  { %v6042_v29 = vadd.f32 %v6041_v2, %v6013_v36 }
 0x497   :  { %v6070_v3 = vpop.f32.mrf.mxu2 }
 0x498   :  { %v6071_v17 = vadd.f32 %v6070_v3, %v6042_v29  ;;  %v6099_v21 = vpop.f32.mrf.mxu3  ;;  %v6015_v34 = vpop.f32.mrf.mxu0  ;;  %v13975_v3 = vld [vmem:[#allocation17 + $0x1ec] sm:$0xf0] }
 0x499   :  { %v6016_v49 = vadd.f32 %v6015_v34, %v15781_v53  ;;  %v6044_v55 = vpop.f32.mrf.mxu1  ;;  %v12712_v27 = vor.u32 %v13975_v3, %v12711_v26  ;;  %v12695_v34 = vld [vmem:[#allocation17 + $0x1c0] sm:$0xf]  ;;  %v13959_v26 = vld [vmem:[#allocation17 + $0x16c] sm:$0xf0] }
 0x49a   :  { %v15828_v18 = vadd.f32 %v6099_v21, %v6071_v17  ;;  %v13939_v21 = vld [vmem:[#allocation17 + $0xcc] sm:$0xf0] }
 0x49b   :  { %v6045_v61 = vadd.f32 %v6044_v55, %v6016_v49  ;;  %6246 = vmatmul.bf16.gmra.mxu0 %v16888_v16  ;;  %6275 = vmatmul.bf16.gmra.mxu1 %v16889_v30  ;;  %v13923_v3 = vld [vmem:[#allocation17 + $0x4c] sm:$0xf0] }
 0x49c   :  { %6304 = vmatmul.bf16.gmra.mxu2 %v16890_v20  ;;  %7974 = vmatpush.bf16.msrb.mxu1 %v12712_v27 }
 0x49d   :  { %6333 = vmatmul.bf16.gmra.mxu3 %v16903_v45 }
 0x49f   :  { %v6073_v38 = vpop.f32.mrf.mxu2 }
 0x4a0   :  { %v6074_v12 = vadd.f32 %v6073_v38, %v6045_v61  ;;  %v6102_v52 = vpop.f32.mrf.mxu3  ;;  %v6017_v43 = vpop.f32.mrf.mxu0  ;;  %v13971_v38 = vld [vmem:[#allocation17 + $0x1cc] sm:$0xf0] }
 0x4a1   :  { %v6018_v24 = vadd.f32 %v6017_v43, %v15788_v56  ;;  %v6046_v53 = vpop.f32.mrf.mxu1  ;;  %v16951_v56 = vld [vmem:[#allocation88_spill] sm:$0xff]  ;;  %v12696_v43 = vor.u32 %v13971_v38, %v12695_v34  ;;  %v13955_v34 = vld [vmem:[#allocation17 + $0x14c] sm:$0xf0]  ;;  %v12487_v38 = vld [vmem:[#allocation17 + $0x20] sm:$0xf] }
 0x4a2   :  { %v15835_v35 = vadd.f32 %v6102_v52, %v6074_v12 }
 0x4a3   :  { %v6047_v51 = vadd.f32 %v6046_v53, %v6018_v24  ;;  %7975 = vmatpush.bf16.msrb.mxu1 %v12696_v43 }
 0x4a7   :  { %v6075_v4 = vpop.f32.mrf.mxu2 }
 0x4a8   :  { %v6076_v15 = vadd.f32 %v6075_v4, %v6047_v51  ;;  %v6104_v54 = vpop.f32.mrf.mxu3  ;;  %v6020_v16 = vpop.f32.mrf.mxu0  ;;  %v12551_v51 = vld [vmem:[#allocation17 + $0xa0] sm:$0xf]  ;;  %v13935_v4 = vld [vmem:[#allocation17 + $0xac] sm:$0xf0] }
 0x4a9   :  { %v6021_v30 = vadd.f32 %v6020_v16, %v15807_v60  ;;  %v6049_v22 = vpop.f32.mrf.mxu1  ;;  %v13967_v16 = vld [vmem:[#allocation17 + $0x1ac] sm:$0xf0] }
 0x4aa   :  { %v15838_v20 = vadd.f32 %v6104_v54, %v6076_v15  ;;  %v12679_v15 = vld [vmem:[#allocation17 + $0x1a0] sm:$0xf]  ;;  %v12552_v54 = vor.u32 %v13935_v4, %v12551_v51  ;;  %v13951_v4 = vld [vmem:[#allocation17 + $0x12c] sm:$0xf0] }
 0x4ab   :  { %v6050_v45 = vadd.f32 %v6049_v22, %v6021_v30  ;;  %6251 = vmatmul.bf16.gmra.mxu0 %v16892_v0  ;;  %6280 = vmatmul.bf16.gmra.mxu1 %v16893_v25  ;;  %v12583_v25 = vld [vmem:[#allocation17 + $0xe0] sm:$0xf]  ;;  %v12680_v30 = vor.u32 %v13967_v16, %v12679_v15 }
 0x4ac   :  { %6309 = vmatmul.bf16.gmra.mxu2 %v16950_v5  ;;  %v12584_v62 = vor.u32 %v13943_v1, %v12583_v25  ;;  %v12663_v5 = vld [vmem:[#allocation17 + $0x180] sm:$0xf]  ;;  %v16958_v25 = vld [vmem:[#allocation94_spill] sm:$0xff] }
 0x4ad   :  { %6338 = vmatmul.bf16.gmra.mxu3 %v16951_v56  ;;  %7976 = vmatpush.bf16.msrb.mxu1 %v12680_v30  ;;  %v12471_v16 = vld [vmem:[#allocation17] sm:$0xf] }
 0x4ae   :  { %7945 = vmatpush.bf16.msrb.mxu0 %v12584_v62  ;;  %v12503_v62 = vld [vmem:[#allocation17 + $0x40] sm:$0xf] }
 0x4af   :  { %v6078_v48 = vpop.f32.mrf.mxu2  ;;  %v12599_v30 = vld [vmem:[#allocation17 + $0x100] sm:$0xf] }
 0x4b0   :  { %v6079_v36 = vadd.f32 %v6078_v48, %v6050_v45  ;;  %v6107_v2 = vpop.f32.mrf.mxu3  ;;  %v6022_v8 = vpop.f32.mrf.mxu0  ;;  %v12535_v45 = vld [vmem:[#allocation17 + $0x80] sm:$0xf] }
 0x4b1   :  { %v6051_v19 = vpop.f32.mrf.mxu1 }
 0x4b2   :  { %v15844_v32 = vadd.f32 %v6107_v2, %v6079_v36  ;;  %v13963_v2 = vld [vmem:[#allocation17 + $0x18c] sm:$0xf0] }
 0x4b7   :  { %v6080_v60 = vpop.f32.mrf.mxu2 }
 0x4b8   :  { %v6109_v29 = vpop.f32.mrf.mxu3  ;;  %v6121_v47 = vpop.f32.mrf.mxu0  ;;  %v12664_v60 = vor.u32 %v13963_v2, %v12663_v5 }
 0x4b9   :  { %v6122_v41 = vadd.f32 %v6121_v47, %v15815_v11  ;;  %v6150_v39 = vpop.f32.mrf.mxu1  ;;  %v12567_v11 = vld [vmem:[#allocation17 + $0xc0] sm:$0xf] }
 0x4ba   :  { %v12568_v61 = vor.u32 %v13939_v21, %v12567_v11  ;;  %v16956_v47 = vld [vmem:[#allocation81_spill] sm:$0xff]  ;;  %7977 = vmatpush.bf16.msrb.mxu1 %v12664_v60  ;;  %v12504_v21 = vor.u32 %v13923_v3, %v12503_v62 }
 0x4bb   :  { %v6151_v0 = vadd.f32 %v6150_v39, %v6122_v41  ;;  %6352 = vmatmul.bf16.vlgmr.msra.gmra.mxu0 %v16952_v37  ;;  %6381 = vmatmul.bf16.vlgmr.msra.gmra.mxu1 %v16953_v10  ;;  %v12519_v41 = vld [vmem:[#allocation17 + $0x60] sm:$0xf]  ;;  %v13927_v39 = vld [vmem:[#allocation17 + $0x6c] sm:$0xf0] }
 0x4bc   :  { %6410 = vmatmul.bf16.vlgmr.msra.gmra.mxu2 %v16954_v57  ;;  %7946 = vmatpush.bf16.msrb.mxu0 %v12568_v61  ;;  %v16957_v37 = vld [vmem:[#allocation93_spill] sm:$0xff]  ;;  %v12520_v1 = vor.u32 %v13927_v39, %v12519_v41  ;;  %v16959_v10 = vld [vmem:[#allocation95_spill] sm:$0xff]  ;;  %v16963_v41 = vld [vmem:[#allocation98_spill] sm:$0xff] }
 0x4bd   :  { %6439 = vmatmul.bf16.vlgmr.msra.gmra.mxu3 %v16955_v9  ;;  %v12631_v9 = vld [vmem:[#allocation17 + $0x140] sm:$0xf] }
 0x4be   :  { %v16960_v60 = vld [vmem:[#allocation85_spill] sm:$0xff] }
 0x4bf   :  { %v6179_v17 = vpop.f32.mrf.mxu2 }
 0x4c0   :  { %v6180_v46 = vadd.f32 %v6179_v17, %v6151_v0  ;;  %v6208_v49 = vpop.f32.mrf.mxu3  ;;  %v6123_v55 = vpop.f32.mrf.mxu0  ;;  %7947 = vmatpush.bf16.msrb.mxu0 %v12552_v54  ;;  %v12647_v0 = vld [vmem:[#allocation17 + $0x160] sm:$0xf] }
 0x4c1   :  { %v6124_v12 = vadd.f32 %v6123_v55, %v15818_v40  ;;  %v6152_v52 = vpop.f32.mrf.mxu1  ;;  %v13931_v40 = vld [vmem:[#allocation17 + $0x8c] sm:$0xf0]  ;;  %v12648_v57 = vor.u32 %v13959_v26, %v12647_v0  ;;  %v12632_v55 = vor.u32 %v13955_v34, %v12631_v9 }
 0x4c2   :  { %v15852_v24 = vadd.f32 %v6208_v49, %v6180_v46  ;;  %v12536_v36 = vor.u32 %v13931_v40, %v12535_v45 }
 0x4c3   :  { %v15854_v53 = vadd.f32 %v6152_v52, %v6124_v12  ;;  %7978 = vmatpush.bf16.msrb.mxu1 %v12648_v57  ;;  %v13919_v12 = vld [vmem:[#allocation17 + $0x2c] sm:$0xf0]  ;;  %v12615_v52 = vld [vmem:[#allocation17 + $0x120] sm:$0xf] }
 0x4c4   :  { %7948 = vmatpush.bf16.msrb.mxu0 %v12536_v36  ;;  %v12488_v51 = vor.u32 %v13919_v12, %v12487_v38  ;;  %v12616_v15 = vor.u32 %v13951_v4, %v12615_v52  ;;  %v12407_v52 = vld [vmem:[#allocation4] sm:$0xf]  ;;  %v13897_v4 = vld [vmem:[#allocation4 + $0x4] sm:$0xf] }
 0x4c7   :  { %v15856_v22 = vpop.f32.mrf.mxu2  ;;  %7979 = vmatpush.bf16.msrb.mxu1 %v12632_v55 }
 0x4c8   :  { %v15858_v56 = vpop.f32.mrf.mxu3  ;;  %v6126_v48 = vpop.f32.mrf.mxu0  ;;  %7949 = vmatpush.bf16.msrb.mxu0 %v12520_v1 }
 0x4c9   :  { %v6127_v8 = vadd.f32 %v6126_v48, %v15825_v13  ;;  %v6155_v19 = vpop.f32.mrf.mxu1  ;;  %v13947_v48 = vld [vmem:[#allocation17 + $0x10c] sm:$0xf0] }
 0x4cb   :  { %v6156_v29 = vadd.f32 %v6155_v19, %v6127_v8  ;;  %6357 = vmatmul.bf16.gmra.mxu0 %v16956_v47  ;;  %6386 = vmatmul.bf16.gmra.mxu1 %v16957_v37  ;;  %v12600_v8 = vor.u32 %v13947_v48, %v12599_v30  ;;  %v16962_v47 = vld [vmem:[#allocation97_spill] sm:$0xff] }
 0x4cc   :  { %6415 = vmatmul.bf16.gmra.mxu2 %v16958_v25  ;;  %7950 = vmatpush.bf16.msrb.mxu0 %v12504_v21  ;;  %v16966_v21 = vld [vmem:[#allocation100_spill] sm:$0xff]  ;;  %v12839_v48 = vld [vmem:[#allocation17 + $0x2e0] sm:$0xf] }
 0x4cd   :  { %6444 = vmatmul.bf16.gmra.mxu3 %v16959_v10  ;;  %7980 = vmatpush.bf16.msrb.mxu1 %v12616_v15  ;;  %v12409_v15 = vld [vmem:[#allocation4 + $0x10] sm:$0xf0] }
 0x4cf   :  { %v6184_v13 = vpop.f32.mrf.mxu2 }
 0x4d0   :  { %v6185_v27 = vadd.f32 %v6184_v13, %v6156_v29  ;;  %v6213_v17 = vpop.f32.mrf.mxu3  ;;  %v6128_v11 = vpop.f32.mrf.mxu0  ;;  %7951 = vmatpush.bf16.msrb.mxu0 %v12488_v51  ;;  %v16961_v29 = vld [vmem:[#allocation96_spill] sm:$0xff]  ;;  %v13899_v51 = vld [vmem:[#allocation4 + $0xc] sm:$0xf0] }
 0x4d1   :  { %v6129_v46 = vadd.f32 %v6128_v11, %v15828_v18  ;;  %v6157_v49 = vpop.f32.mrf.mxu1  ;;  %v13915_v18 = vld [vmem:[#allocation17 + $0xc] sm:$0xf0]  ;;  %7981 = vmatpush.bf16.msrb.mxu1 %v12600_v8  ;;  %v12967_v8 = vld [vmem:[#allocation17 + $0x3e0] sm:$0xf] }
 0x4d2   :  { %v15866_v61 = vadd.f32 %v6213_v17, %v6185_v27  ;;  %v12472_v5 = vor.u32 %v13915_v18, %v12471_v16  ;;  %v16964_v17 = vld [vmem:[#allocation89_spill] sm:$0xff]  ;;  %v16965_v11 = vld [vmem:[#allocation99_spill] sm:$0xff] }
 0x4d3   :  { %v15868_v43 = vadd.f32 %v6157_v49, %v6129_v46 }
 0x4d4   :  { %7952 = vmatpush.bf16.msrb.mxu0 %v12472_v5  ;;  %v15901_v5 = vor.u32 %v13897_v4, %v12409_v15  ;;  %v12681_v4 = vld [vmem:[#allocation17 + $0x1b0] sm:$0xf0] }
 0x4d7   :  { %v15870_v54 = vpop.f32.mrf.mxu2 }
 0x4d8   :  { %v15872_v45 = vpop.f32.mrf.mxu3  ;;  %v6131_v40 = vpop.f32.mrf.mxu0 }
 0x4d9   :  { %v6132_v36 = vadd.f32 %v6131_v40, %v15835_v35  ;;  %v6160_v2 = vpop.f32.mrf.mxu1  ;;  %v15899_v40 = vor.u32 %v13899_v51, %v12407_v52  ;;  %v12553_v51 = vld [vmem:[#allocation17 + $0xb0] sm:$0xf0] }
 0x4db   :  { %v6161_v19 = vadd.f32 %v6160_v2, %v6132_v36  ;;  %6362 = vmatmul.bf16.gmra.mxu0 %v16960_v60  ;;  %6391 = vmatmul.bf16.gmra.mxu1 %v16961_v29  ;;  %v14007_v36 = vld [vmem:[#allocation17 + $0x2ec] sm:$0xf0]  ;;  %v13941_v29 = vld [vmem:[#allocation17 + $0xe4] sm:$0xf] }
 0x4dc   :  { %6420 = vmatmul.bf16.gmra.mxu2 %v16962_v47  ;;  %v12840_v2 = vor.u32 %v14007_v36, %v12839_v48  ;;  %v12585_v47 = vld [vmem:[#allocation17 + $0xf0] sm:$0xf0]  ;;  %v13903_v48 = vld [vmem:[#allocation4 + $0x2c] sm:$0xf0] }
 0x4dd   :  { %6449 = vmatmul.bf16.gmra.mxu3 %v16963_v41  ;;  %v13973_v41 = vld [vmem:[#allocation17 + $0x1e4] sm:$0xf] }
 0x4de   :  { %8003 = vmatpush.bf16.msrb.mxu2 %v12840_v2  ;;  %v12425_v2 = vld [vmem:[#allocation4 + $0x30] sm:$0xf0] }
 0x4df   :  { %v6189_v39 = vpop.f32.mrf.mxu2 }
 0x4e0   :  { %v6190_v0 = vadd.f32 %v6189_v39, %v6161_v19  ;;  %v6218_v37 = vpop.f32.mrf.mxu3  ;;  %v6133_v25 = vpop.f32.mrf.mxu0  ;;  %v14039_v19 = vld [vmem:[#allocation17 + $0x3ec] sm:$0xf0]  ;;  %v12588_v39 = vor.u32 %v13941_v29, %v12585_v47  ;;  %v13901_v29 = vld [vmem:[#allocation4 + $0x24] sm:$0xf] }
 0x4e1   :  { %v6134_v1 = vadd.f32 %v6133_v25, %v15838_v20  ;;  %v6162_v35 = vpop.f32.mrf.mxu1  ;;  %v16967_v20 = vld [vmem:[#allocation101_spill] sm:$0xff]  ;;  %v12968_v60 = vor.u32 %v14039_v19, %v12967_v8 }
 0x4e2   :  { %v15880_v26 = vadd.f32 %v6218_v37, %v6190_v0  ;;  %v12713_v0 = vld [vmem:[#allocation17 + $0x1f0] sm:$0xf0]  ;;  %8061 = vmatpush.bf16.msra.mxu0 %v12588_v39  ;;  %v13929_v39 = vld [vmem:[#allocation17 + $0x84] sm:$0xf] }
 0x4e3   :  { %v15882_v10 = vadd.f32 %v6162_v35, %v6134_v1  ;;  %8032 = vmatpush.bf16.msrb.mxu3 %v12968_v60  ;;  %v12716_v37 = vor.u32 %v13973_v41, %v12713_v0  ;;  %v12423_v60 = vld [vmem:[#allocation4 + $0x20] sm:$0xf]  ;;  %v12537_v0 = vld [vmem:[#allocation17 + $0x90] sm:$0xf0] }
 0x4e4   :  { %v15921_v41 = vor.u32 %v13903_v48, %v12423_v60  ;;  %v13921_v60 = vld [vmem:[#allocation17 + $0x44] sm:$0xf] }
 0x4e5   :  { %8090 = vmatpush.bf16.msra.mxu1 %v12716_v37  ;;  %v13961_v37 = vld [vmem:[#allocation17 + $0x184] sm:$0xf] }
 0x4e7   :  { %v15884_v57 = vpop.f32.mrf.mxu2 }
 0x4e8   :  { %v15886_v13 = vpop.f32.mrf.mxu3  ;;  %v6136_v62 = vpop.f32.mrf.mxu0 }
 0x4e9   :  { %v6137_v3 = vadd.f32 %v6136_v62, %v15844_v32  ;;  %v6165_v9 = vpop.f32.mrf.mxu1 }
 0x4eb   :  { %v6166_v27 = vadd.f32 %v6165_v9, %v6137_v3  ;;  %6367 = vmatmul.bf16.gmra.mxu0 %v16964_v17  ;;  %6396 = vmatmul.bf16.gmra.mxu1 %v16965_v11  ;;  %v13937_v3 = vld [vmem:[#allocation17 + $0xc4] sm:$0xf]  ;;  %v12569_v9 = vld [vmem:[#allocation17 + $0xd0] sm:$0xf0]  ;;  %v12823_v17 = vld [vmem:[#allocation17 + $0x2c0] sm:$0xf] }
 0x4ec   :  { %6425 = vmatmul.bf16.gmra.mxu2 %v16966_v21  ;;  %v14003_v11 = vld [vmem:[#allocation17 + $0x2cc] sm:$0xf0]  ;;  %v12572_v21 = vor.u32 %v13937_v3, %v12569_v9  ;;  %v15923_v3 = vor.u32 %v13901_v29, %v12425_v2  ;;  %v12807_v9 = vld [vmem:[#allocation17 + $0x2a0] sm:$0xf]  ;;  %v12505_v29 = vld [vmem:[#allocation17 + $0x50] sm:$0xf0] }
 0x4ed   :  { %6454 = vmatmul.bf16.gmra.mxu3 %v16967_v20  ;;  %v12697_v20 = vld [vmem:[#allocation17 + $0x1d0] sm:$0xf0] }
 0x4ee   :  { %8062 = vmatpush.bf16.msra.mxu0 %v12572_v21 }
 0x4ef   :  { %v6194_v34 = vpop.f32.mrf.mxu2 }
 0x4f0   :  { %v6195_v46 = vadd.f32 %v6194_v34, %v6166_v27  ;;  %v6223_v49 = vpop.f32.mrf.mxu3  ;;  %v6138_v55 = vpop.f32.mrf.mxu0  ;;  %v13969_v27 = vld [vmem:[#allocation17 + $0x1c4] sm:$0xf]  ;;  %v12824_v34 = vor.u32 %v14003_v11, %v12823_v17  ;;  %v12540_v17 = vor.u32 %v13929_v39, %v12537_v0  ;;  %v12665_v11 = vld [vmem:[#allocation17 + $0x190] sm:$0xf0]  ;;  %v12791_v0 = vld [vmem:[#allocation17 + $0x280] sm:$0xf] }
 0x4f1   :  { %v6167_v38 = vpop.f32.mrf.mxu1  ;;  %v14035_v55 = vld [vmem:[#allocation17 + $0x3cc] sm:$0xf0]  ;;  %v13953_v39 = vld [vmem:[#allocation17 + $0x144] sm:$0xf] }
 0x4f2   :  { %v15893_v12 = vadd.f32 %v6223_v49, %v6195_v46  ;;  %v12700_v46 = vor.u32 %v13969_v27, %v12697_v20  ;;  %v12951_v49 = vld [vmem:[#allocation17 + $0x3c0] sm:$0xf]  ;;  %v13933_v38 = vld [vmem:[#allocation17 + $0xa4] sm:$0xf]  ;;  %8004 = vmatpush.bf16.msrb.mxu2 %v12824_v34  ;;  %v13999_v27 = vld [vmem:[#allocation17 + $0x2ac] sm:$0xf0]  ;;  %v12668_v20 = vor.u32 %v13961_v37, %v12665_v11 }
 0x4f3   :  { %v12952_v52 = vor.u32 %v14035_v55, %v12951_v49  ;;  %v12556_v15 = vor.u32 %v13933_v38, %v12553_v51  ;;  %v12808_v21 = vor.u32 %v13999_v27, %v12807_v9  ;;  %v12935_v34 = vld [vmem:[#allocation17 + $0x3a0] sm:$0xf]  ;;  %v13925_v55 = vld [vmem:[#allocation17 + $0x64] sm:$0xf]  ;;  %v12521_v38 = vld [vmem:[#allocation17 + $0x70] sm:$0xf0]  ;;  %v12508_v9 = vor.u32 %v13921_v60, %v12505_v29 }
 0x4f4   :  { %8091 = vmatpush.bf16.msra.mxu1 %v12700_v46  ;;  %v14031_v46 = vld [vmem:[#allocation17 + $0x3ac] sm:$0xf0]  ;;  %v12524_v51 = vor.u32 %v13925_v55, %v12521_v38  ;;  %v12633_v27 = vld [vmem:[#allocation17 + $0x150] sm:$0xf0]  ;;  %v13949_v55 = vld [vmem:[#allocation17 + $0x124] sm:$0xf] }
 0x4f5   :  { %8033 = vmatpush.bf16.msrb.mxu3 %v12952_v52  ;;  %8063 = vmatpush.bf16.msra.mxu0 %v12556_v15  ;;  %v12936_v49 = vor.u32 %v14031_v46, %v12935_v34  ;;  %v13957_v52 = vld [vmem:[#allocation17 + $0x164] sm:$0xf]  ;;  %v13995_v37 = vld [vmem:[#allocation17 + $0x28c] sm:$0xf0]  ;;  %v12636_v11 = vor.u32 %v13953_v39, %v12633_v27  ;;  %v12617_v38 = vld [vmem:[#allocation17 + $0x130] sm:$0xf0] }
 0x4f6   :  { %8005 = vmatpush.bf16.msrb.mxu2 %v12808_v21  ;;  %v12919_v21 = vld [vmem:[#allocation17 + $0x380] sm:$0xf]  ;;  %v13917_v34 = vld [vmem:[#allocation17 + $0x24] sm:$0xf]  ;;  %v12441_v29 = vld [vmem:[#allocation4 + $0x50] sm:$0xf0] }
 0x4f7   :  { %v6196_v32 = vpop.f32.mrf.mxu2  ;;  %v12439_v60 = vld [vmem:[#allocation4 + $0x40] sm:$0xf]  ;;  %v13991_v27 = vld [vmem:[#allocation17 + $0x26c] sm:$0xf0] }
 0x4f8   :  { %v6225_v16 = vpop.f32.mrf.mxu3  ;;  %v15895_v18 = vpop.f32.mrf.mxu0  ;;  %v13965_v32 = vld [vmem:[#allocation17 + $0x1a4] sm:$0xf] }
 0x4f9   :  { %v15897_v30 = vpop.f32.mrf.mxu1  ;;  %v12684_v16 = vor.u32 %v13965_v32, %v12681_v4  ;;  %8064 = vmatpush.bf16.msra.mxu0 %v12540_v17  ;;  %v12649_v32 = vld [vmem:[#allocation17 + $0x170] sm:$0xf0]  ;;  %8034 = vmatpush.bf16.msrb.mxu3 %v12936_v49  ;;  %v12792_v17 = vor.u32 %v13995_v37, %v12791_v0  ;;  %v13905_v37 = vld [vmem:[#allocation4 + $0x44] sm:$0xf] }
 0x4fa   :  { %v12652_v4 = vor.u32 %v13957_v52, %v12649_v32  ;;  %v12489_v49 = vld [vmem:[#allocation17 + $0x30] sm:$0xf0]  ;;  %v13907_v32 = vld [vmem:[#allocation4 + $0x4c] sm:$0xf0] }
 0x4fb   :  { %7953 = vmatmul.bf16.vlgmr.msrb.gmra.mxu0 %v15899_v40  ;;  %7982 = vmatmul.bf16.vlgmr.msrb.gmra.mxu1 %v15901_v5  ;;  %v12492_v52 = vor.u32 %v13917_v34, %v12489_v49  ;;  %v12473_v34 = vld [vmem:[#allocation17 + $0x10] sm:$0xf0]  ;;  %v15945_v49 = vor.u32 %v13905_v37, %v12441_v29 }
 0x4fc   :  { %8092 = vmatpush.bf16.msra.mxu1 %v12684_v16  ;;  %8006 = vmatpush.bf16.msrb.mxu2 %v12792_v17  ;;  %v15943_v17 = vor.u32 %v13907_v32, %v12439_v60 }
 0x4fd   :  { %8065 = vmatpush.bf16.msra.mxu0 %v12524_v51  ;;  %v12620_v51 = vor.u32 %v13949_v55, %v12617_v38  ;;  %16969 = vst [vmem:[#allocation58_spill] sm:$0xff] %v15945_v49  ;;  %v12601_v38 = vld [vmem:[#allocation17 + $0x110] sm:$0xf0] }
 0x4fe   :  { %16968 = vst [vmem:[#allocation45_spill] sm:$0xff] %v15943_v17 }
 0x4ff   :  { %v15905_v25 = vpop.f32.mrf.mxu2 }
 0x500   :  { %v15907_v1 = vpop.f32.mrf.mxu3  ;;  %v15909_v35 = vpop.f32.mrf.mxu0  ;;  %8093 = vmatpush.bf16.msra.mxu1 %v12668_v20  ;;  %v14027_v20 = vld [vmem:[#allocation17 + $0x38c] sm:$0xf0] }
 0x501   :  { %v15911_v62 = vpop.f32.mrf.mxu1  ;;  %8066 = vmatpush.bf16.msra.mxu0 %v12508_v9  ;;  %v12920_v46 = vor.u32 %v14027_v20, %v12919_v21  ;;  %v12775_v9 = vld [vmem:[#allocation17 + $0x260] sm:$0xf]  ;;  %v13913_v20 = vld [vmem:[#allocation17 + $0x4] sm:$0xf] }
 0x502   :  { %v12476_v55 = vor.u32 %v13913_v20, %v12473_v34 }
 0x503   :  { %8035 = vmatpush.bf16.msrb.mxu3 %v12920_v46  ;;  %v13945_v46 = vld [vmem:[#allocation17 + $0x104] sm:$0xf] }
 0x504   :  { %8094 = vmatpush.bf16.msra.mxu1 %v12652_v4  ;;  %v12604_v59 = vor.u32 %v13945_v46, %v12601_v38  ;;  %v12455_v46 = vld [vmem:[#allocation4 + $0x60] sm:$0xf] }
 0x505   :  { %8067 = vmatpush.bf16.msra.mxu0 %v12492_v52  ;;  %v12903_v52 = vld [vmem:[#allocation17 + $0x360] sm:$0xf] }
 0x506   :  { %v12904_v32 = vor.u32 %v14023_v33, %v12903_v52  ;;  %v13909_v33 = vld [vmem:[#allocation4 + $0x64] sm:$0xf]  ;;  %v12759_v38 = vld [vmem:[#allocation17 + $0x240] sm:$0xf]  ;;  %v13987_v52 = vld [vmem:[#allocation17 + $0x24c] sm:$0xf0] }
 0x507   :  { %v15913_v36 = vpop.f32.mrf.mxu2  ;;  %v12760_v14 = vor.u32 %v13987_v52, %v12759_v38 }
 0x508   :  { %v15915_v8 = vpop.f32.mrf.mxu3  ;;  %v15917_v19 = vpop.f32.mrf.mxu0  ;;  %8095 = vmatpush.bf16.msra.mxu1 %v12636_v11  ;;  %v12776_v11 = vor.u32 %v13991_v27, %v12775_v9  ;;  %8036 = vmatpush.bf16.msrb.mxu3 %v12904_v32  ;;  %v13911_v9 = vld [vmem:[#allocation4 + $0x6c] sm:$0xf0]  ;;  %v12887_v32 = vld [vmem:[#allocation17 + $0x340] sm:$0xf] }
 0x509   :  { %v15919_v47 = vpop.f32.mrf.mxu1  ;;  %8068 = vmatpush.bf16.msra.mxu0 %v12476_v55  ;;  %v15965_v55 = vor.u32 %v13911_v9, %v12455_v46  ;;  %v6238_v9 = vadd.f32 %v15895_v18, %v15852_v24 }
 0x50a   :  { %8007 = vmatpush.bf16.msrb.mxu2 %v12776_v11  ;;  %v12457_v11 = vld [vmem:[#allocation4 + $0x70] sm:$0xf0] }
 0x50b   :  { %7958 = vmatmul.bf16.gmra.mxu0 %v15921_v41  ;;  %7987 = vmatmul.bf16.gmra.mxu1 %v15923_v3  ;;  %16972 = vst [vmem:[#allocation62_spill] sm:$0xff] %v15965_v55  ;;  %v15967_v63 = vor.u32 %v13909_v33, %v12457_v11  ;;  %v6182_v11 = vadd.f32 %v15856_v22, %v15854_v53 }
 0x50c   :  { %8096 = vmatpush.bf16.msra.mxu1 %v12620_v51 }
 0x50d   :  { %16973 = vst [vmem:[#allocation52_spill] sm:$0xff] %v15967_v63  ;;  %v6211_v18 = vadd.f32 %v15858_v56, %v6182_v11  ;;  %v12591_v56 = vld [vmem:[#allocation17 + $0xe8] sm:$0xf]  ;;  %v12841_v11 = vld [vmem:[#allocation17 + $0x2f0] sm:$0xf0] }
 0x50e   :  { %8008 = vmatpush.bf16.msrb.mxu2 %v12760_v14 }
 0x50f   :  { %v15927_v15 = vpop.f32.mrf.mxu2  ;;  %v6240_v22 = vadd.f32 %v15909_v35, %v6211_v18  ;;  %v12719_v35 = vld [vmem:[#allocation17 + $0x1e8] sm:$0xf] }
 0x510   :  { %v15929_v16 = vpop.f32.mrf.mxu3  ;;  %v15931_v48 = vpop.f32.mrf.mxu0  ;;  %8097 = vmatpush.bf16.msra.mxu1 %v12604_v59 }
 0x511   :  { %v15933_v2 = vpop.f32.mrf.mxu1 }
 0x517   :  { %v15935_v4 = vpop.f32.mrf.mxu2 }
 0x518   :  { %v15937_v0 = vpop.f32.mrf.mxu3  ;;  %v15939_v39 = vpop.f32.mrf.mxu0 }
 0x519   :  { %v15941_v21 = vpop.f32.mrf.mxu1 }
 0x51b   :  { %7963 = vmatmul.bf16.gmra.mxu0 %v15943_v17  ;;  %7992 = vmatmul.bf16.gmra.mxu1 %v15945_v49  ;;  %v12888_v49 = vor.u32 %v14019_v31, %v12887_v32  ;;  %v12871_v17 = vld [vmem:[#allocation17 + $0x320] sm:$0xf]  ;;  %v13979_v32 = vld [vmem:[#allocation17 + $0x20c] sm:$0xf0] }
 0x51d   :  { %8037 = vmatpush.bf16.msrb.mxu3 %v12888_v49  ;;  %v12727_v49 = vld [vmem:[#allocation17 + $0x200] sm:$0xf] }
 0x51e   :  { %v12728_v24 = vor.u32 %v13979_v32, %v12727_v49  ;;  %v14037_v49 = vld [vmem:[#allocation17 + $0x3e4] sm:$0xf] }
 0x51f   :  { %v15949_v51 = vpop.f32.mrf.mxu2 }
 0x520   :  { %v15951_v60 = vpop.f32.mrf.mxu3  ;;  %v15953_v29 = vpop.f32.mrf.mxu0 }
 0x521   :  { %v15955_v37 = vpop.f32.mrf.mxu1 }
 0x527   :  { %v15957_v27 = vpop.f32.mrf.mxu2 }
 0x528   :  { %v15959_v20 = vpop.f32.mrf.mxu3  ;;  %v15961_v34 = vpop.f32.mrf.mxu0 }
 0x529   :  { %16970 = vst [vmem:[#allocation48_spill] sm:$0xff] %v15959_v20  ;;  %v15963_v59 = vpop.f32.mrf.mxu1  ;;  %v12743_v20 = vld [vmem:[#allocation17 + $0x220] sm:$0xf] }
 0x52a   :  { %16971 = vst [vmem:[#allocation49_spill] sm:$0xff] %v15963_v59  ;;  %v12744_v46 = vor.u32 %v13983_v6, %v12743_v20  ;;  %v14015_v59 = vld [vmem:[#allocation17 + $0x32c] sm:$0xf0] }
 0x52b   :  { %7968 = vmatmul.bf16.gmra.mxu0 %v15965_v55  ;;  %7997 = vmatmul.bf16.gmra.mxu1 %v15967_v63  ;;  %v12872_v38 = vor.u32 %v14015_v59, %v12871_v17  ;;  %v12855_v63 = vld [vmem:[#allocation17 + $0x300] sm:$0xf]  ;;  %v6267_v55 = vadd.f32 %v15897_v30, %v6238_v9  ;;  %v14011_v6 = vld [vmem:[#allocation17 + $0x30c] sm:$0xf0] }
 0x52c   :  { %8009 = vmatpush.bf16.msrb.mxu2 %v12744_v46  ;;  %v12856_v20 = vor.u32 %v14011_v6, %v12855_v63  ;;  %v6243_v63 = vadd.f32 %v15917_v19, %v15866_v61  ;;  %v6942_v6 = vperm.slane %v16939_v44, 3 }
 0x52d   :  { %8038 = vmatpush.bf16.msrb.mxu3 %v12872_v38  ;;  %v6296_v53 = vadd.f32 %v15905_v25, %v6267_v55  ;;  %v13944_v25 = vld [vmem:[#allocation17 + $0xf4] sm:$0xf0] }
 0x52e   :  { %v12592_v32 = vor.u32 %v13944_v25, %v12591_v56  ;;  %vm15998_vm13 = vcmp.eq.s32.totalorder %v6942_v6, 1  ;;  %v13974_v25 = vld [vmem:[#allocation17 + $0x1ec] sm:$0xf] }
 0x52f   :  { %v15975_v33 = vpop.f32.mrf.mxu2  ;;  %v6325_v59 = vadd.f32 %v15907_v1, %v6296_v53  ;;  %v14005_v1 = vld [vmem:[#allocation17 + $0x2e4] sm:$0xf]  ;;  %v13976_v53 = vld [vmem:[#allocation17 + $0x1f4] sm:$0xf0] }
 0x530   :  { %v15977_v52 = vpop.f32.mrf.mxu3  ;;  %v6254_v31 = vpop.f32.mrf.mxu0  ;;  %8010 = vmatpush.bf16.msrb.mxu2 %v12728_v24  ;;  %v12844_v18 = vor.u32 %v14005_v1, %v12841_v11  ;;  %8177 = vmatpush.bf16.msrb.mxu0 %v12592_v32  ;;  %v13936_v1 = vld [vmem:[#allocation17 + $0xb4] sm:$0xf0] }
 0x531   :  { %v6283_v14 = vpop.f32.mrf.mxu1  ;;  %8039 = vmatpush.bf16.msrb.mxu3 %v12856_v20  ;;  %v6269_v31 = vadd.f32 %v15911_v62, %v6240_v22  ;;  %v6187_v62 = vadd.f32 %v15870_v54, %v15868_v43  ;;  %v12969_v20 = vld [vmem:[#allocation17 + $0x3f0] sm:$0xf0]  ;;  %v6988_v22 = vperm.slane %v16942_v50, 3  ;;  %v12575_v43 = vld [vmem:[#allocation17 + $0xc8] sm:$0xf] }
 0x532   :  { %v13940_v54 = vld [vmem:[#allocation17 + $0xd4] sm:$0xf0] }
 0x533   :  { %v6298_v9 = vadd.f32 %v15913_v36, %v6269_v31  ;;  %v6216_v56 = vadd.f32 %v15872_v45, %v6187_v62  ;;  %vm16005_vm15 = vcmp.eq.s32.totalorder %v6988_v22, 1  ;;  %v12687_v62 = vld [vmem:[#allocation17 + $0x1a8] sm:$0xf] }
 0x534   :  { %8119 = vmatpush.bf16.msra.mxu2 %v12844_v18  ;;  %v13968_v18 = vld [vmem:[#allocation17 + $0x1b4] sm:$0xf0] }
 0x535   :  { %v6327_v36 = vadd.f32 %v15915_v8, %v6298_v9  ;;  %v12703_v8 = vld [vmem:[#allocation17 + $0x1c8] sm:$0xf]  ;;  %v13972_v9 = vld [vmem:[#allocation17 + $0x1d4] sm:$0xf0] }
 0x537   :  { %v6312_v17 = vpop.f32.mrf.mxu2 }
 0x538   :  { %v6341_v46 = vpop.f32.mrf.mxu3  ;;  %v6353_v38 = vpop.f32.mrf.mxu0 }
 0x539   :  { %v6382_v14 = vpop.f32.mrf.mxu1  ;;  %v6354_v30 = vadd.f32 %v6353_v38, %v6325_v59  ;;  %v12972_v59 = vor.u32 %v14037_v49, %v12969_v20  ;;  %v12720_v46 = vor.u32 %v13976_v53, %v12719_v35  ;;  %v6272_v38 = vadd.f32 %v15919_v47, %v6243_v63 }
 0x53a   :  { %v12704_v47 = vor.u32 %v13972_v9, %v12703_v8  ;;  %v6953_v63 = vsel %vm15711_vm5, 0.0, %v15709_v23  ;;  %v6192_v9 = vadd.f32 %v15884_v57, %v15882_v10  ;;  %v12415_v10 = vld [vmem:[#allocation4 + $0x8] sm:$0xf] }
 0x53b   :  { %8069 = vmatmul.bf16.vlgmr.msra.gmra.mxu0 %v15899_v40  ;;  %8098 = vmatmul.bf16.vlgmr.msra.gmra.mxu1 %v15901_v5  ;;  %v6383_v55 = vadd.f32 %v6382_v14, %v6354_v30  ;;  %v12576_v30 = vor.u32 %v13940_v54, %v12575_v43  ;;  %v6301_v50 = vadd.f32 %v15927_v15, %v6272_v38  ;;  %v12559_v15 = vld [vmem:[#allocation17 + $0xa8] sm:$0xf] }
 0x53c   :  { %8148 = vmatpush.bf16.msra.mxu3 %v12972_v59  ;;  %8206 = vmatpush.bf16.msrb.mxu1 %v12720_v46  ;;  %v12560_v32 = vor.u32 %v13936_v1, %v12559_v15  ;;  %v12543_v38 = vld [vmem:[#allocation17 + $0x88] sm:$0xf]  ;;  %v13898_v15 = vld [vmem:[#allocation4 + $0xc] sm:$0xf]  ;;  %v14001_v1 = vld [vmem:[#allocation17 + $0x2c4] sm:$0xf] }
 0x53d   :  { %8178 = vmatpush.bf16.msrb.mxu0 %v12576_v30  ;;  %v12671_v43 = vld [vmem:[#allocation17 + $0x188] sm:$0xf]  ;;  %v13964_v30 = vld [vmem:[#allocation17 + $0x194] sm:$0xf0] }
 0x53e   :  { %v12527_v57 = vld [vmem:[#allocation17 + $0x68] sm:$0xf] }
 0x53f   :  { %v6411_v24 = vpop.f32.mrf.mxu2 }
 0x540   :  { %v6412_v61 = vadd.f32 %v6411_v24, %v6383_v55  ;;  %v6440_v19 = vpop.f32.mrf.mxu3  ;;  %v6355_v17 = vpop.f32.mrf.mxu0  ;;  %v6245_v55 = vadd.f32 %v15931_v48, %v6216_v56  ;;  %8207 = vmatpush.bf16.msrb.mxu1 %v12704_v47  ;;  %v6330_v24 = vadd.f32 %v15929_v16, %v6301_v50  ;;  %v6248_v50 = vadd.f32 %v15939_v39, %v15880_v26  ;;  %v13928_v26 = vld [vmem:[#allocation17 + $0x74] sm:$0xf0] }
 0x541   :  { %v6384_v31 = vpop.f32.mrf.mxu1  ;;  %v6356_v44 = vadd.f32 %v6355_v17, %v6327_v36  ;;  %v6999_v36 = vsel %vm15730_vm8, 0.0, %v6953_v63  ;;  %8179 = vmatpush.bf16.msrb.mxu0 %v12560_v32  ;;  %v12688_v17 = vor.u32 %v13968_v18, %v12687_v62  ;;  %v12828_v32 = vor.u32 %v14001_v1, %v12825_v7  ;;  %v14033_v62 = vld [vmem:[#allocation17 + $0x3c4] sm:$0xf] }
 0x542   :  { %v6441_v14 = vadd.f32 %v6440_v19, %v6412_v61  ;;  %v6274_v59 = vadd.f32 %v15933_v2, %v6245_v55  ;;  %v12672_v2 = vor.u32 %v13964_v30, %v12671_v43  ;;  %v6277_v28 = vadd.f32 %v15941_v21, %v6248_v50 }
 0x543   :  { %v6385_v49 = vadd.f32 %v6384_v31, %v6356_v44  ;;  %v13932_v31 = vld [vmem:[#allocation17 + $0x94] sm:$0xf0]  ;;  %8120 = vmatpush.bf16.msra.mxu2 %v12828_v32 }
 0x544   :  { %vm6526_vm14 = vcmp.ge.f32.partialorder %v6441_v14, 1.25  ;;  %v6559_v16 = vmul.f32 0.75, %v6441_v14  ;;  %8208 = vmatpush.bf16.msrb.mxu1 %v12688_v17  ;;  %v12544_v44 = vor.u32 %v13932_v31, %v12543_v38  ;;  %v6303_v56 = vadd.f32 %v15935_v4, %v6274_v59 }
 0x545   :  { %v16012_v45 = vsel %vm6526_vm14, 1.0, %v16810_v42  ;;  %v6548_v20 = vsel %vm6526_vm14, 0.0, %v6441_v14  ;;  %v16978_v14 = vsel %vm15711_vm5, %v15709_v23, %v15716_v58  ;;  %v6221_v23 = vadd.f32 %v15886_v13, %v6192_v9 }
 0x546   :  { %v6954_v11 = vsel %vm15998_vm13, 0.0, %v16012_v45  ;;  %v16037_v47 = vsel %vm15730_vm8, 0.0, %v16978_v14  ;;  %v6567_v63 = vmul.f32 0.97, %v6548_v20  ;;  %8180 = vmatpush.bf16.msrb.mxu0 %v12544_v44  ;;  %v6332_v58 = vadd.f32 %v15937_v0, %v6303_v56  ;;  %v13960_v44 = vld [vmem:[#allocation17 + $0x174] sm:$0xf0] }
 0x547   :  { %v7000_v48 = vsel %vm16005_vm15, 0.0, %v6954_v11  ;;  %v6413_v6 = vpop.f32.mrf.mxu2  ;;  %v12528_v11 = vor.u32 %v13928_v26, %v12527_v57  ;;  %v6306_v30 = vadd.f32 %v15949_v51, %v6277_v28  ;;  %v13924_v14 = vld [vmem:[#allocation17 + $0x54] sm:$0xf0]  ;;  %v12639_v26 = vld [vmem:[#allocation17 + $0x148] sm:$0xf] }
 0x548   :  { %v7028_v53 = vpack.c.bf16 %v7000_v48, %v6999_v36  ;;  %v6414_v61 = vadd.f32 %v6413_v6, %v6385_v49  ;;  %v6442_v19 = vpop.f32.mrf.mxu3  ;;  %v6358_v22 = vpop.f32.mrf.mxu0  ;;  %8209 = vmatpush.bf16.msrb.mxu1 %v12672_v2  ;;  %v12953_v36 = vld [vmem:[#allocation17 + $0x3d0] sm:$0xf0]  ;;  %v12655_v48 = vld [vmem:[#allocation17 + $0x168] sm:$0xf] }
 0x549   :  { %v6387_v46 = vpop.f32.mrf.mxu1  ;;  %v6359_v8 = vadd.f32 %v6358_v22, %v6330_v24  ;;  %v13997_v24 = vld [vmem:[#allocation17 + $0x2a4] sm:$0xf]  ;;  %v12511_v2 = vld [vmem:[#allocation17 + $0x48] sm:$0xf] }
 0x54a   :  { %7044 = vst [vmem:[#allocation4 + $0x18] sm:$0xff] %v7028_v53  ;;  %v6443_v54 = vadd.f32 %v6442_v19, %v6414_v61  ;;  %v12956_v61 = vor.u32 %v14033_v62, %v12953_v36  ;;  %v12809_v19 = vld [vmem:[#allocation17 + $0x2b0] sm:$0xf0]  ;;  %v14029_v22 = vld [vmem:[#allocation17 + $0x3a4] sm:$0xf]  ;;  %8181 = vmatpush.bf16.msrb.mxu0 %v12528_v11  ;;  %v12512_v57 = vor.u32 %v13924_v14, %v12511_v2 }
 0x54b   :  { %8074 = vmatmul.bf16.gmra.mxu0 %v15921_v41  ;;  %8103 = vmatmul.bf16.gmra.mxu1 %v15923_v3  ;;  %v6388_v39 = vadd.f32 %v6387_v46, %v6359_v8  ;;  %v12812_v38 = vor.u32 %v13997_v24, %v12809_v19  ;;  %v12937_v8 = vld [vmem:[#allocation17 + $0x3b0] sm:$0xf0]  ;;  %v12495_v51 = vld [vmem:[#allocation17 + $0x28] sm:$0xf]  ;;  %v16983_v2 = vld [vmem:[#allocation49_spill] sm:$0xff] }
 0x54c   :  { %v6563_v55 = vadd.f32 %v6559_v16, %v6443_v54  ;;  %8149 = vmatpush.bf16.msra.mxu3 %v12956_v61  ;;  %v12940_v50 = vor.u32 %v14029_v22, %v12937_v8  ;;  %v12623_v28 = vld [vmem:[#allocation17 + $0x128] sm:$0xf] }
 0x54d   :  { %8121 = vmatpush.bf16.msra.mxu2 %v12812_v38  ;;  %v16981_v8 = vld [vmem:[#allocation58_spill] sm:$0xff] }
 0x54e   :  { %v6571_v4 = vadd.f32 %v6567_v63, %v6563_v55  ;;  %v6608_v20 = vmul.f32 0.75, %v6563_v55  ;;  %8182 = vmatpush.bf16.msrb.mxu0 %v12512_v57  ;;  %v12921_v57 = vld [vmem:[#allocation17 + $0x390] sm:$0xf0] }
 0x54f   :  { %v6416_v49 = vpop.f32.mrf.mxu2 }
 0x550   :  { %v6417_v6 = vadd.f32 %v6416_v49, %v6388_v39  ;;  %v6445_v18 = vpop.f32.mrf.mxu3  ;;  %vm6575_vm0 = vcmp.ge.f32.partialorder %v6571_v4, 1.25  ;;  %v6360_v53 = vpop.f32.mrf.mxu0  ;;  %v6250_v39 = vadd.f32 %v15953_v29, %v6221_v23  ;;  %8150 = vmatpush.bf16.msra.mxu3 %v12940_v50  ;;  %v13952_v49 = vld [vmem:[#allocation17 + $0x134] sm:$0xf0] }
 0x551   :  { %v16044_v13 = vsel %vm6575_vm0, 1.0, %v16810_v42  ;;  %v6597_v0 = vsel %vm6575_vm0, 0.0, %v6571_v4  ;;  %v6361_v21 = vadd.f32 %v6360_v53, %v6332_v58  ;;  %v6389_v17 = vpop.f32.mrf.mxu1  ;;  %v13900_v59 = vld [vmem:[#allocation4 + $0x14] sm:$0xf0]  ;;  %v12417_v46 = vld [vmem:[#allocation4 + $0x18] sm:$0xf0]  ;;  %v12624_v22 = vor.u32 %v13952_v49, %v12623_v28 }
 0x552   :  { %v6446_v31 = vadd.f32 %v6445_v18, %v6417_v6  ;;  %v6616_v43 = vmul.f32 0.97, %v6597_v0  ;;  %v6958_v16 = vsel %vm15998_vm13, %v16012_v45, %v16044_v13  ;;  %v16050_v54 = vor.u32 %v13900_v59, %v12415_v10  ;;  %v13956_v4 = vld [vmem:[#allocation17 + $0x154] sm:$0xf0]  ;;  %v12607_v59 = vld [vmem:[#allocation17 + $0x108] sm:$0xf] }
 0x553   :  { %v7004_v9 = vsel %vm16005_vm15, 0.0, %v6958_v16  ;;  %v16055_v56 = vor.u32 %v13898_v15, %v12417_v46  ;;  %v12656_v10 = vor.u32 %v13960_v44, %v12655_v48  ;;  %v13920_v15 = vld [vmem:[#allocation17 + $0x34] sm:$0xf0]  ;;  %v6390_v7 = vadd.f32 %v6389_v17, %v6361_v21  ;;  %v16979_v17 = vld [vmem:[#allocation45_spill] sm:$0xff] }
 0x554   :  { %v6612_v63 = vadd.f32 %v6608_v20, %v6446_v31  ;;  %v7030_v55 = vpack.c.bf16 %v7004_v9, %v16037_v47  ;;  %8011 = vmatmul.bf16.vlgmr.msrb.gmra.mxu2 %v16050_v54  ;;  %v12640_v11 = vor.u32 %v13956_v4, %v12639_v26  ;;  %v6335_v47 = vadd.f32 %v15951_v60, %v6306_v30  ;;  %v12479_v20 = vld [vmem:[#allocation17 + $0x8] sm:$0xf]  ;;  %v13916_v53 = vld [vmem:[#allocation17 + $0x14] sm:$0xf0]  ;;  %v16980_v31 = vld [vmem:[#allocation59_spill] sm:$0xff] }
 0x555   :  { %8040 = vmatmul.bf16.vlgmr.msrb.gmra.mxu3 %v16055_v56  ;;  %8210 = vmatpush.bf16.msrb.mxu1 %v12656_v10  ;;  %v12496_v36 = vor.u32 %v13920_v15, %v12495_v51  ;;  %v6279_v24 = vadd.f32 %v15955_v37, %v6250_v39  ;;  %v6253_v37 = vadd.f32 %v15961_v34, %v15893_v12  ;;  %v13948_v46 = vld [vmem:[#allocation17 + $0x114] sm:$0xf0]  ;;  %v13993_v12 = vld [vmem:[#allocation17 + $0x284] sm:$0xf]  ;;  %v12793_v34 = vld [vmem:[#allocation17 + $0x290] sm:$0xf0] }
 0x556   :  { %v6620_v1 = vadd.f32 %v6616_v43, %v6612_v63  ;;  %7046 = vst [vmem:[#allocation4 + $0x28] sm:$0xff] %v7030_v55  ;;  %v6657_v32 = vmul.f32 0.75, %v6612_v63  ;;  %v12480_v44 = vor.u32 %v13916_v53, %v12479_v20  ;;  %v12608_v9 = vor.u32 %v13948_v46, %v12607_v59  ;;  %v14025_v10 = vld [vmem:[#allocation17 + $0x384] sm:$0xf]  ;;  %v12889_v53 = vld [vmem:[#allocation17 + $0x350] sm:$0xf0] }
 0x557   :  { %v6418_v58 = vpop.f32.mrf.mxu2  ;;  %v6308_v0 = vadd.f32 %v15957_v27, %v6279_v24  ;;  %8183 = vmatpush.bf16.msrb.mxu0 %v12496_v36  ;;  %v6282_v14 = vadd.f32 %v16983_v2, %v6253_v37  ;;  %v12796_v55 = vor.u32 %v13993_v12, %v12793_v34  ;;  %v13989_v26 = vld [vmem:[#allocation17 + $0x264] sm:$0xf] }
 0x558   :  { %vm6624_vm1 = vcmp.ge.f32.partialorder %v6620_v1, 1.25  ;;  %v6419_v29 = vadd.f32 %v6418_v58, %v6390_v7  ;;  %v6447_v23 = vpop.f32.mrf.mxu3  ;;  %v6363_v62 = vpop.f32.mrf.mxu0  ;;  %v12777_v7 = vld [vmem:[#allocation17 + $0x270] sm:$0xf0]  ;;  %v13985_v24 = vld [vmem:[#allocation17 + $0x244] sm:$0xf] }
 0x559   :  { %v16064_v48 = vsel %vm6624_vm1, 1.0, %v16810_v42  ;;  %v6646_v6 = vsel %vm6624_vm1, 0.0, %v6620_v1  ;;  %v6392_v18 = vpop.f32.mrf.mxu1  ;;  %v6364_v19 = vadd.f32 %v6363_v62, %v6335_v47  ;;  %8211 = vmatpush.bf16.msrb.mxu1 %v12640_v11  ;;  %v12924_v1 = vor.u32 %v14025_v10, %v12921_v57  ;;  %v14021_v11 = vld [vmem:[#allocation17 + $0x364] sm:$0xf]  ;;  %8122 = vmatpush.bf16.msra.mxu2 %v12796_v55 }
 0x55a   :  { %v6962_v60 = vsel %vm15998_vm13, %v16044_v13, %v16064_v48  ;;  %v6448_v61 = vadd.f32 %v6447_v23, %v6419_v29  ;;  %v6665_v38 = vmul.f32 0.97, %v6646_v6  ;;  %v12905_v29 = vld [vmem:[#allocation17 + $0x370] sm:$0xf0] }
 0x55b   :  { %v7008_v21 = vsel %vm16005_vm15, %v16012_v45, %v6962_v60  ;;  %8079 = vmatmul.bf16.gmra.mxu0 %v16979_v17  ;;  %8108 = vmatmul.bf16.gmra.mxu1 %v16981_v8  ;;  %v6393_v30 = vadd.f32 %v6392_v18, %v6364_v19  ;;  %v16982_v45 = vld [vmem:[#allocation48_spill] sm:$0xff]  ;;  %v12908_v36 = vor.u32 %v14021_v11, %v12905_v29  ;;  %v12761_v6 = vld [vmem:[#allocation17 + $0x250] sm:$0xf0]  ;;  %v14017_v18 = vld [vmem:[#allocation17 + $0x344] sm:$0xf] }
 0x55c   :  { %v7032_v43 = vpack.c.bf16 %v7008_v21, %v16980_v31  ;;  %v6661_v16 = vadd.f32 %v6657_v32, %v6448_v61  ;;  %v6337_v50 = vadd.f32 %v16982_v45, %v6308_v0  ;;  %8184 = vmatpush.bf16.msrb.mxu0 %v12480_v44  ;;  %v12780_v32 = vor.u32 %v13989_v26, %v12777_v7  ;;  %v12745_v45 = vld [vmem:[#allocation17 + $0x230] sm:$0xf0]  ;;  %v14013_v26 = vld [vmem:[#allocation17 + $0x324] sm:$0xf] }
 0x55d   :  { %8212 = vmatpush.bf16.msrb.mxu1 %v12624_v22  ;;  %8151 = vmatpush.bf16.msra.mxu3 %v12924_v1  ;;  %v6311_v60 = vadd.f32 %v15975_v33, %v6282_v14  ;;  %v16984_v22 = vld [vmem:[#allocation63_spill] sm:$0xff]  ;;  %v12431_v37 = vld [vmem:[#allocation4 + $0x28] sm:$0xf]  ;;  %v13902_v46 = vld [vmem:[#allocation4 + $0x2c] sm:$0xf]  ;;  %v12764_v31 = vor.u32 %v13985_v24, %v12761_v6 }
 0x55e   :  { %7048 = vst [vmem:[#allocation4 + $0x38] sm:$0xff] %v7032_v43  ;;  %v6669_v27 = vadd.f32 %v6665_v38, %v6661_v16  ;;  %v6706_v51 = vmul.f32 0.75, %v6661_v16  ;;  %8123 = vmatpush.bf16.msra.mxu2 %v12780_v32  ;;  %v12892_v43 = vor.u32 %v14017_v18, %v12889_v53  ;;  %v16986_v7 = vld [vmem:[#allocation67_spill] sm:$0xff] }
 0x55f   :  { %v6421_v63 = vpop.f32.mrf.mxu2  ;;  %v12729_v32 = vld [vmem:[#allocation17 + $0x210] sm:$0xf0] }
 0x560   :  { %v6422_v4 = vadd.f32 %v6421_v63, %v6393_v30  ;;  %v6450_v39 = vpop.f32.mrf.mxu3  ;;  %vm6673_vm2 = vcmp.ge.f32.partialorder %v6669_v27, 1.25  ;;  %v6365_v15 = vpop.f32.mrf.mxu0 }
 0x561   :  { %v16082_v47 = vsel %vm6673_vm2, 1.0, %v16810_v42  ;;  %v6695_v58 = vsel %vm6673_vm2, 0.0, %v6669_v27  ;;  %v6366_v28 = vadd.f32 %v6365_v15, %v6337_v50  ;;  %v6394_v49 = vpop.f32.mrf.mxu1  ;;  %8213 = vmatpush.bf16.msrb.mxu1 %v12608_v9  ;;  %8152 = vmatpush.bf16.msra.mxu3 %v12908_v36  ;;  %v6340_v27 = vadd.f32 %v15977_v52, %v6311_v60  ;;  %v13981_v9 = vld [vmem:[#allocation17 + $0x224] sm:$0xf] }
 0x562   :  { %v6451_v23 = vadd.f32 %v6450_v39, %v6422_v4  ;;  %v6966_v62 = vsel %vm15998_vm13, %v16064_v48, %v16082_v47  ;;  %v6714_v19 = vmul.f32 0.97, %v6695_v58  ;;  %8124 = vmatpush.bf16.msra.mxu2 %v12764_v31  ;;  %v12748_v63 = vor.u32 %v13981_v9, %v12745_v45  ;;  %v12873_v4 = vld [vmem:[#allocation17 + $0x330] sm:$0xf0] }
 0x563   :  { %v7012_v20 = vsel %vm16005_vm15, %v16044_v13, %v6966_v62  ;;  %v6395_v21 = vadd.f32 %v6394_v49, %v6366_v28  ;;  %v12876_v15 = vor.u32 %v14013_v26, %v12873_v4  ;;  %v16987_v28 = vld [vmem:[#allocation52_spill] sm:$0xff]  ;;  %v13977_v49 = vld [vmem:[#allocation17 + $0x204] sm:$0xf]  ;;  %v12975_v26 = vld [vmem:[#allocation17 + $0x3e8] sm:$0xf] }
 0x564   :  { %v6710_v61 = vadd.f32 %v6706_v51, %v6451_v23  ;;  %v7034_v0 = vpack.c.bf16 %v7012_v20, %v16984_v22  ;;  %v16985_v51 = vld [vmem:[#allocation62_spill] sm:$0xff]  ;;  %v12732_v29 = vor.u32 %v13977_v49, %v12729_v32  ;;  %v14009_v22 = vld [vmem:[#allocation17 + $0x304] sm:$0xf]  ;;  %v14040_v4 = vld [vmem:[#allocation17 + $0x3f4] sm:$0xf0] }
 0x565   :  { %v13904_v59 = vld [vmem:[#allocation4 + $0x34] sm:$0xf0]  ;;  %v12433_v38 = vld [vmem:[#allocation4 + $0x38] sm:$0xf0]  ;;  %8153 = vmatpush.bf16.msra.mxu3 %v12892_v43 }
 0x566   :  { %v6718_v16 = vadd.f32 %v6714_v19, %v6710_v61  ;;  %7050 = vst [vmem:[#allocation4 + $0x48] sm:$0xff] %v7034_v0  ;;  %v16093_v44 = vor.u32 %v13904_v59, %v12431_v37  ;;  %v16095_v13 = vor.u32 %v13902_v46, %v12433_v38  ;;  %v6755_v55 = vmul.f32 0.75, %v6710_v61  ;;  %8125 = vmatpush.bf16.msra.mxu2 %v12748_v63  ;;  %v12857_v0 = vld [vmem:[#allocation17 + $0x310] sm:$0xf0]  ;;  %v12721_v32 = vld [vmem:[#allocation17 + $0x1f8] sm:$0xf0] }
 0x567   :  { %v6423_v33 = vpop.f32.mrf.mxu2  ;;  %v16988_v38 = vld [vmem:[#allocation75_spill] sm:$0xff] }
 0x568   :  { %vm6722_vm3 = vcmp.ge.f32.partialorder %v6718_v16, 1.25  ;;  %v6424_v30 = vadd.f32 %v6423_v33, %v6395_v21  ;;  %v6452_v12 = vpop.f32.mrf.mxu3  ;;  %8016 = vmatmul.bf16.gmra.mxu2 %v16093_v44  ;;  %8045 = vmatmul.bf16.gmra.mxu3 %v16095_v13  ;;  %v6368_v34 = vpop.f32.mrf.mxu0  ;;  %v12860_v21 = vor.u32 %v14009_v22, %v12857_v0  ;;  %v13934_v0 = vld [vmem:[#allocation17 + $0xac] sm:$0xf] }
 0x569   :  { %v16101_v50 = vsel %vm6722_vm3, 1.0, %v16810_v42  ;;  %v6744_v2 = vsel %vm6722_vm3, 0.0, %v6718_v16  ;;  %v6397_v14 = vpop.f32.mrf.mxu1  ;;  %v6369_v57 = vadd.f32 %v6368_v34, %v6340_v27  ;;  %8154 = vmatpush.bf16.msra.mxu3 %v12876_v15  ;;  %v12976_v15 = vor.u32 %v14040_v4, %v12975_v26  ;;  %v12673_v4 = vld [vmem:[#allocation17 + $0x198] sm:$0xf0] }
 0x56a   :  { %v6970_v52 = vsel %vm15998_vm13, %v16082_v47, %v16101_v50  ;;  %v6453_v10 = vadd.f32 %v6452_v12, %v6424_v30  ;;  %v6763_v1 = vmul.f32 0.97, %v6744_v2  ;;  %8126 = vmatpush.bf16.msra.mxu2 %v12732_v29  ;;  %v12847_v2 = vld [vmem:[#allocation17 + $0x2e8] sm:$0xf]  ;;  %v12724_v29 = vor.u32 %v13974_v25, %v12721_v32  ;;  %v13958_v25 = vld [vmem:[#allocation17 + $0x16c] sm:$0xf] }
 0x56b   :  { %v7016_v39 = vsel %vm16005_vm15, %v16064_v48, %v6970_v52  ;;  %8084 = vmatmul.bf16.gmra.mxu0 %v16985_v51  ;;  %8113 = vmatmul.bf16.gmra.mxu1 %v16987_v28  ;;  %v6398_v62 = vadd.f32 %v6397_v14, %v6369_v57  ;;  %v14008_v14 = vld [vmem:[#allocation17 + $0x2f4] sm:$0xf0]  ;;  %v12657_v32 = vld [vmem:[#allocation17 + $0x178] sm:$0xf0] }
 0x56c   :  { %v7036_v11 = vpack.c.bf16 %v7016_v39, %v16986_v7  ;;  %v6759_v58 = vadd.f32 %v6755_v55, %v6453_v10  ;;  %v12848_v52 = vor.u32 %v14008_v14, %v12847_v2  ;;  %8322 = vmatpush.bf16.msra.mxu1 %v12724_v29  ;;  %v12799_v29 = vld [vmem:[#allocation17 + $0x288] sm:$0xf] }
 0x56d   :  { %v12447_v43 = vld [vmem:[#allocation4 + $0x48] sm:$0xf]  ;;  %v13906_v33 = vld [vmem:[#allocation4 + $0x4c] sm:$0xf]  ;;  %8155 = vmatpush.bf16.msra.mxu3 %v12860_v21 }
 0x56e   :  { %7052 = vst [vmem:[#allocation4 + $0x58] sm:$0xff] %v7036_v11  ;;  %v6767_v23 = vadd.f32 %v6763_v1, %v6759_v58  ;;  %v6804_v61 = vmul.f32 0.75, %v6759_v58  ;;  %8235 = vmatpush.bf16.msrb.mxu2 %v12848_v52  ;;  %v16989_v1 = vld [vmem:[#allocation44_spill] sm:$0xff]  ;;  %v13942_v11 = vld [vmem:[#allocation17 + $0xec] sm:$0xf] }
 0x56f   :  { %v6426_v36 = vpop.f32.mrf.mxu2  ;;  %v12593_v58 = vld [vmem:[#allocation17 + $0xf8] sm:$0xf0]  ;;  %v13966_v21 = vld [vmem:[#allocation17 + $0x1ac] sm:$0xf] }
 0x570   :  { %v6427_v24 = vadd.f32 %v6426_v36, %v6398_v62  ;;  %v6455_v48 = vpop.f32.mrf.mxu3  ;;  %vm6771_vm4 = vcmp.ge.f32.partialorder %v6767_v23, 1.25  ;;  %v6370_v6 = vpop.f32.mrf.mxu0  ;;  %v12596_v49 = vor.u32 %v13942_v11, %v12593_v58  ;;  %v14004_v62 = vld [vmem:[#allocation17 + $0x2d4] sm:$0xf0]  ;;  %v13962_v52 = vld [vmem:[#allocation17 + $0x18c] sm:$0xf] }
 0x571   :  { %v12396_v18 = vsel %vm6771_vm4, 1.0, %v16810_v42  ;;  %v6793_v20 = vsel %vm6771_vm4, 0.0, %v6767_v23  ;;  %v6399_v53 = vpop.f32.mrf.mxu1  ;;  %8264 = vmatpush.bf16.msrb.mxu3 %v12976_v15  ;;  %v12831_v23 = vld [vmem:[#allocation17 + $0x2c8] sm:$0xf]  ;;  %v13970_v6 = vld [vmem:[#allocation17 + $0x1cc] sm:$0xf] }
 0x572   :  { %v6456_v60 = vadd.f32 %v6455_v48, %v6427_v24  ;;  %v6974_v19 = vsel %vm15998_vm13, %v16101_v50, %v12396_v18  ;;  %v6812_v46 = vmul.f32 0.97, %v6793_v20  ;;  %8293 = vmatpush.bf16.msra.mxu0 %v12596_v49  ;;  %v12832_v35 = vor.u32 %v14004_v62, %v12831_v23  ;;  %v13938_v24 = vld [vmem:[#allocation17 + $0xcc] sm:$0xf]  ;;  %v12577_v48 = vld [vmem:[#allocation17 + $0xd8] sm:$0xf0] }
 0x573   :  { %v7020_v37 = vsel %vm16005_vm15, %v16082_v47, %v6974_v19  ;;  %v12580_v20 = vor.u32 %v13938_v24, %v12577_v48  ;;  %v12705_v53 = vld [vmem:[#allocation17 + $0x1d8] sm:$0xf0]  ;;  %v14032_v15 = vld [vmem:[#allocation17 + $0x3b4] sm:$0xf0]  ;;  %v13926_v11 = vld [vmem:[#allocation17 + $0x6c] sm:$0xf]  ;;  %v12660_v62 = vor.u32 %v13958_v25, %v12657_v32 }
 0x574   :  { %v6808_v59 = vadd.f32 %v6804_v61, %v6456_v60  ;;  %v7038_v31 = vpack.c.bf16 %v7020_v37, %v16988_v38  ;;  %8236 = vmatpush.bf16.msrb.mxu2 %v12832_v35  ;;  %v12959_v60 = vld [vmem:[#allocation17 + $0x3c8] sm:$0xf]  ;;  %v14036_v61 = vld [vmem:[#allocation17 + $0x3d4] sm:$0xf0]  ;;  %v12708_v19 = vor.u32 %v13970_v6, %v12705_v53  ;;  %v12561_v37 = vld [vmem:[#allocation17 + $0xb8] sm:$0xf0] }
 0x575   :  { %v13908_v16 = vld [vmem:[#allocation4 + $0x54] sm:$0xf0]  ;;  %v12449_v27 = vld [vmem:[#allocation4 + $0x58] sm:$0xf0]  ;;  %v12960_v22 = vor.u32 %v14036_v61, %v12959_v60  ;;  %v13922_v24 = vld [vmem:[#allocation17 + $0x4c] sm:$0xf] }
 0x576   :  { %v6816_v30 = vadd.f32 %v6812_v46, %v6808_v59  ;;  %7054 = vst [vmem:[#allocation4 + $0x68] sm:$0xff] %v7038_v31  ;;  %v16121_v12 = vor.u32 %v13908_v16, %v12447_v43  ;;  %v16123_v34 = vor.u32 %v13906_v33, %v12449_v27  ;;  %8294 = vmatpush.bf16.msra.mxu0 %v12580_v20  ;;  %v12689_v46 = vld [vmem:[#allocation17 + $0x1b8] sm:$0xf0]  ;;  %v13996_v23 = vld [vmem:[#allocation17 + $0x294] sm:$0xf0] }
 0x577   :  { %v6428_v9 = vpop.f32.mrf.mxu2  ;;  %8323 = vmatpush.bf16.msra.mxu1 %v12708_v19  ;;  %8265 = vmatpush.bf16.msrb.mxu3 %v12960_v22  ;;  %v12564_v16 = vor.u32 %v13934_v0, %v12561_v37  ;;  %v12692_v33 = vor.u32 %v13966_v21, %v12689_v46  ;;  %v12529_v58 = vld [vmem:[#allocation17 + $0x78] sm:$0xf0]  ;;  %v12800_v35 = vor.u32 %v13996_v23, %v12799_v29  ;;  %v13954_v6 = vld [vmem:[#allocation17 + $0x14c] sm:$0xf]  ;;  %v12927_v61 = vld [vmem:[#allocation17 + $0x388] sm:$0xf] }
 0x578   :  { %vm6820_vm5 = vcmp.ge.f32.partialorder %v6816_v30, 1.25  ;;  %v6457_v45 = vpop.f32.mrf.mxu3  ;;  %8021 = vmatmul.bf16.gmra.mxu2 %v16121_v12  ;;  %8050 = vmatmul.bf16.gmra.mxu3 %v16123_v34  ;;  %v7954_v47 = vpop.f32.mrf.mxu0  ;;  %v12532_v49 = vor.u32 %v13926_v11, %v12529_v58  ;;  %v12513_v48 = vld [vmem:[#allocation17 + $0x58] sm:$0xf0]  ;;  %v14028_v19 = vld [vmem:[#allocation17 + $0x394] sm:$0xf0] }
 0x579   :  { %v12400_v63 = vsel %vm6820_vm5, 1.0, %v16810_v42  ;;  %v7983_v55 = vpop.f32.mrf.mxu1  ;;  %v12815_v45 = vld [vmem:[#allocation17 + $0x2a8] sm:$0xf]  ;;  %v12516_v53 = vor.u32 %v13922_v24, %v12513_v48  ;;  %v12641_v60 = vld [vmem:[#allocation17 + $0x158] sm:$0xf0]  ;;  %v12928_v0 = vor.u32 %v14028_v19, %v12927_v61 }
 0x57a   :  { %v6978_v10 = vsel %vm15998_vm13, %v12396_v18, %v12400_v63  ;;  %v16130_v57 = vadd.f32 %v7983_v55, %v7954_v47  ;;  %v14000_v47 = vld [vmem:[#allocation17 + $0x2b4] sm:$0xf0]  ;;  %8295 = vmatpush.bf16.msra.mxu0 %v12564_v16  ;;  %v13930_v63 = vld [vmem:[#allocation17 + $0x8c] sm:$0xf]  ;;  %v12545_v55 = vld [vmem:[#allocation17 + $0x98] sm:$0xf0]  ;;  %v12644_v22 = vor.u32 %v13954_v6, %v12641_v60 }
 0x57b   :  { %v7024_v39 = vsel %vm16005_vm15, %v16101_v50, %v6978_v10  ;;  %8185 = vmatmul.bf16.vlgmr.msrb.gmra.mxu0 %v15899_v40  ;;  %8214 = vmatmul.bf16.vlgmr.msrb.gmra.mxu1 %v15901_v5  ;;  %v12816_v14 = vor.u32 %v14000_v47, %v12815_v45  ;;  %v12548_v26 = vor.u32 %v13930_v63, %v12545_v55  ;;  %v13918_v37 = vld [vmem:[#allocation17 + $0x2c] sm:$0xf]  ;;  %v12497_v21 = vld [vmem:[#allocation17 + $0x38] sm:$0xf0]  ;;  %v12783_v16 = vld [vmem:[#allocation17 + $0x268] sm:$0xf] }
 0x57c   :  { %v7040_v7 = vpack.c.bf16 %v7024_v39, %v16989_v1  ;;  %8324 = vmatpush.bf16.msra.mxu1 %v12692_v33  ;;  %v12943_v39 = vld [vmem:[#allocation17 + $0x3a8] sm:$0xf]  ;;  %v12676_v1 = vor.u32 %v13962_v52, %v12673_v4  ;;  %v12625_v46 = vld [vmem:[#allocation17 + $0x138] sm:$0xf0]  ;;  %v13992_v33 = vld [vmem:[#allocation17 + $0x274] sm:$0xf0] }
 0x57d   :  { %v12463_v59 = vld [vmem:[#allocation4 + $0x68] sm:$0xf]  ;;  %v13910_v31 = vld [vmem:[#allocation4 + $0x6c] sm:$0xf]  ;;  %8237 = vmatpush.bf16.msrb.mxu2 %v12816_v14  ;;  %v12784_v45 = vor.u32 %v13992_v33, %v12783_v16  ;;  %v12609_v52 = vld [vmem:[#allocation17 + $0x118] sm:$0xf0] }
 0x57e   :  { %7056 = vst [vmem:[#allocation4 + $0x78] sm:$0xff] %v7040_v7  ;;  %v12944_v7 = vor.u32 %v14032_v15, %v12943_v39  ;;  %8296 = vmatpush.bf16.msra.mxu0 %v12548_v26  ;;  %v13914_v47 = vld [vmem:[#allocation17 + $0xc] sm:$0xf]  ;;  %v12911_v26 = vld [vmem:[#allocation17 + $0x368] sm:$0xf] }
 0x57f   :  { %v13946_v14 = vld [vmem:[#allocation17 + $0x10c] sm:$0xf]  ;;  %v14024_v4 = vld [vmem:[#allocation17 + $0x374] sm:$0xf0]  ;;  %v12895_v32 = vld [vmem:[#allocation17 + $0x348] sm:$0xf] }
 0x580   :  { %v7956_v50 = vpop.f32.mrf.mxu0  ;;  %8325 = vmatpush.bf16.msra.mxu1 %v12676_v1  ;;  %8266 = vmatpush.bf16.msrb.mxu3 %v12944_v7  ;;  %v12612_v39 = vor.u32 %v13946_v14, %v12609_v52  ;;  %v12912_v15 = vor.u32 %v14024_v4, %v12911_v26  ;;  %v12767_v1 = vld [vmem:[#allocation17 + $0x248] sm:$0xf]  ;;  %v13988_v7 = vld [vmem:[#allocation17 + $0x254] sm:$0xf0]  ;;  %v14006_v16 = vld [vmem:[#allocation17 + $0x2ec] sm:$0xf] }
 0x581   :  { %v7985_v36 = vpop.f32.mrf.mxu1  ;;  %8238 = vmatpush.bf16.msrb.mxu2 %v12800_v35  ;;  %v12768_v11 = vor.u32 %v13988_v7, %v12767_v1  ;;  %v14020_v29 = vld [vmem:[#allocation17 + $0x354] sm:$0xf0]  ;;  %v12751_v35 = vld [vmem:[#allocation17 + $0x228] sm:$0xf]  ;;  %v12849_v33 = vld [vmem:[#allocation17 + $0x2f8] sm:$0xf0] }
 0x582   :  { %v16138_v18 = vadd.f32 %v7985_v36, %v7956_v50  ;;  %8297 = vmatpush.bf16.msra.mxu0 %v12532_v49  ;;  %v12896_v23 = vor.u32 %v14020_v29, %v12895_v32  ;;  %v12879_v6 = vld [vmem:[#allocation17 + $0x328] sm:$0xf]  ;;  %v13980_v19 = vld [vmem:[#allocation17 + $0x214] sm:$0xf0]  ;;  %v14002_v52 = vld [vmem:[#allocation17 + $0x2cc] sm:$0xf] }
 0x583   :  { %v12735_v61 = vld [vmem:[#allocation17 + $0x208] sm:$0xf]  ;;  %v12833_v26 = vld [vmem:[#allocation17 + $0x2d8] sm:$0xf0]  ;;  %v14034_v4 = vld [vmem:[#allocation17 + $0x3cc] sm:$0xf] }
 0x584   :  { %8326 = vmatpush.bf16.msra.mxu1 %v12660_v62  ;;  %8267 = vmatpush.bf16.msrb.mxu3 %v12928_v0  ;;  %v13998_v1 = vld [vmem:[#allocation17 + $0x2ac] sm:$0xf]  ;;  %v12817_v7 = vld [vmem:[#allocation17 + $0x2b8] sm:$0xf0] }
 0x585   :  { %v13912_v38 = vld [vmem:[#allocation4 + $0x74] sm:$0xf0]  ;;  %v12465_v43 = vld [vmem:[#allocation4 + $0x78] sm:$0xf0]  ;;  %8239 = vmatpush.bf16.msrb.mxu2 %v12784_v45  ;;  %v12852_v45 = vor.u32 %v14006_v16, %v12849_v33  ;;  %v14030_v32 = vld [vmem:[#allocation17 + $0x3ac] sm:$0xf] }
 0x586   :  { %v16140_v27 = vor.u32 %v13912_v38, %v12463_v59  ;;  %v16142_v30 = vor.u32 %v13910_v31, %v12465_v43  ;;  %v13950_v59 = vld [vmem:[#allocation17 + $0x12c] sm:$0xf]  ;;  %8298 = vmatpush.bf16.msra.mxu0 %v12516_v53  ;;  %v12500_v38 = vor.u32 %v13918_v37, %v12497_v21  ;;  %v14016_v53 = vld [vmem:[#allocation17 + $0x334] sm:$0xf0]  ;;  %v12863_v21 = vld [vmem:[#allocation17 + $0x308] sm:$0xf] }
 0x587   :  { %v12628_v31 = vor.u32 %v13950_v59, %v12625_v46  ;;  %v12880_v60 = vor.u32 %v14016_v53, %v12879_v6  ;;  %v14012_v59 = vld [vmem:[#allocation17 + $0x314] sm:$0xf0]  ;;  %v12945_v29 = vld [vmem:[#allocation17 + $0x3b8] sm:$0xf0]  ;;  %v14026_v6 = vld [vmem:[#allocation17 + $0x38c] sm:$0xf] }
 0x588   :  { %8026 = vmatmul.bf16.gmra.mxu2 %v16140_v27  ;;  %8055 = vmatmul.bf16.gmra.mxu3 %v16142_v30  ;;  %v7959_v9 = vpop.f32.mrf.mxu0  ;;  %v12864_v46 = vor.u32 %v14012_v59, %v12863_v21  ;;  %v13990_v21 = vld [vmem:[#allocation17 + $0x26c] sm:$0xf]  ;;  %v12785_v59 = vld [vmem:[#allocation17 + $0x278] sm:$0xf0] }
 0x589   :  { %v7988_v2 = vpop.f32.mrf.mxu1  ;;  %8327 = vmatpush.bf16.msra.mxu1 %v12644_v22  ;;  %8268 = vmatpush.bf16.msrb.mxu3 %v12912_v15  ;;  %v12736_v22 = vor.u32 %v13980_v19, %v12735_v61  ;;  %v12961_v15 = vld [vmem:[#allocation17 + $0x3d8] sm:$0xf0] }
 0x58a   :  { %v16146_v10 = vadd.f32 %v7988_v2, %v7959_v9  ;;  %8299 = vmatpush.bf16.msra.mxu0 %v12500_v38  ;;  %v12481_v2 = vld [vmem:[#allocation17 + $0x18] sm:$0xf0]  ;;  %8240 = vmatpush.bf16.msrb.mxu2 %v12768_v11 }
 0x58b   :  { %8190 = vmatmul.bf16.gmra.mxu0 %v15921_v41  ;;  %8219 = vmatmul.bf16.gmra.mxu1 %v15923_v3  ;;  %v12484_v55 = vor.u32 %v13914_v47, %v12481_v2  ;;  %v14038_v47 = vld [vmem:[#allocation17 + $0x3ec] sm:$0xf]  ;;  %v12977_v2 = vld [vmem:[#allocation17 + $0x3f8] sm:$0xf0] }
 0x58d   :  { %8328 = vmatpush.bf16.msra.mxu1 %v12628_v31  ;;  %8269 = vmatpush.bf16.msrb.mxu3 %v12896_v23  ;;  %v12948_v23 = vor.u32 %v14030_v32, %v12945_v29  ;;  %v12897_v32 = vld [vmem:[#allocation17 + $0x358] sm:$0xf0] }
 0x58e   :  { %8300 = vmatpush.bf16.msra.mxu0 %v12484_v55  ;;  %v12980_v55 = vor.u32 %v14038_v47, %v12977_v2 }
 0x590   :  { %v7961_v50 = vpop.f32.mrf.mxu0 }
 0x591   :  { %v7990_v36 = vpop.f32.mrf.mxu1  ;;  %8329 = vmatpush.bf16.msra.mxu1 %v12612_v39  ;;  %8270 = vmatpush.bf16.msrb.mxu3 %v12880_v60  ;;  %v12836_v39 = vor.u32 %v14002_v52, %v12833_v26  ;;  %v16990_v26 = vmov 0  }
 0x592   :  { %v16150_v20 = vadd.f32 %v7990_v36, %v7961_v50  ;;  %v13984_v50 = vld [vmem:[#allocation17 + $0x234] sm:$0xf0] }
 0x593   :  { %v12752_v24 = vor.u32 %v13984_v50, %v12751_v35 }
 0x595   :  { %8241 = vmatpush.bf16.msrb.mxu2 %v12752_v24  ;;  %8271 = vmatpush.bf16.msrb.mxu3 %v12864_v46  ;;  %v12801_v24 = vld [vmem:[#allocation17 + $0x298] sm:$0xf0]  ;;  %v14022_v46 = vld [vmem:[#allocation17 + $0x36c] sm:$0xf] }
 0x598   :  { %8127 = vmatmul.bf16.vlgmr.msra.gmra.mxu2 %v16050_v54  ;;  %8156 = vmatmul.bf16.vlgmr.msra.gmra.mxu3 %v16055_v56  ;;  %v7964_v43 = vpop.f32.mrf.mxu0 }
 0x599   :  { %v7993_v9 = vpop.f32.mrf.mxu1  ;;  %8242 = vmatpush.bf16.msrb.mxu2 %v12736_v22  ;;  %8380 = vmatpush.bf16.msra.mxu3 %v12980_v55 }
 0x59a   :  { %v16154_v63 = vadd.f32 %v7993_v9, %v7964_v43 }
 0x59b   :  { %8195 = vmatmul.bf16.gmra.mxu0 %v16979_v17  ;;  %8224 = vmatmul.bf16.gmra.mxu1 %v16981_v8 }
 0x59d   :  { %8351 = vmatpush.bf16.msra.mxu2 %v12852_v45 }
 0x5a0   :  { %v7966_v58 = vpop.f32.mrf.mxu0 }
 0x5a1   :  { %v7995_v25 = vpop.f32.mrf.mxu1  ;;  %8352 = vmatpush.bf16.msra.mxu2 %v12836_v39 }
 0x5a2   :  { %v16158_v49 = vadd.f32 %v7995_v25, %v7966_v58  ;;  %v12820_v58 = vor.u32 %v13998_v1, %v12817_v7  ;;  %v13986_v1 = vld [vmem:[#allocation17 + $0x24c] sm:$0xf]  ;;  %v12769_v7 = vld [vmem:[#allocation17 + $0x258] sm:$0xf0] }
 0x5a5   :  { %8353 = vmatpush.bf16.msra.mxu2 %v12820_v58  ;;  %v12772_v58 = vor.u32 %v13986_v1, %v12769_v7  ;;  %v12737_v1 = vld [vmem:[#allocation17 + $0x218] sm:$0xf0] }
 0x5a8   :  { %8132 = vmatmul.bf16.gmra.mxu2 %v16093_v44  ;;  %8161 = vmatmul.bf16.gmra.mxu3 %v16095_v13  ;;  %v7969_v62 = vpop.f32.mrf.mxu0 }
 0x5a9   :  { %v7998_v36 = vpop.f32.mrf.mxu1 }
 0x5aa   :  { %v16162_v48 = vadd.f32 %v7998_v36, %v7969_v62  ;;  %v13994_v36 = vld [vmem:[#allocation17 + $0x28c] sm:$0xf] }
 0x5ab   :  { %8200 = vmatmul.bf16.gmra.mxu0 %v16985_v51  ;;  %8229 = vmatmul.bf16.gmra.mxu1 %v16987_v28  ;;  %v12804_v61 = vor.u32 %v13994_v36, %v12801_v24 }
 0x5ad   :  { %8354 = vmatpush.bf16.msra.mxu2 %v12804_v61 }
 0x5b0   :  { %v7971_v0 = vpop.f32.mrf.mxu0 }
 0x5b1   :  { %v8000_v37 = vpop.f32.mrf.mxu1 }
 0x5b8   :  { %8137 = vmatmul.bf16.gmra.mxu2 %v16121_v12  ;;  %8166 = vmatmul.bf16.gmra.mxu3 %v16123_v34  ;;  %v8070_v38 = vpop.f32.mrf.mxu0 }
 0x5b9   :  { %v8099_v31 = vpop.f32.mrf.mxu1 }
 0x5ba   :  { %v16168_v43 = vadd.f32 %v8099_v31, %v8070_v38  ;;  %v12913_v38 = vld [vmem:[#allocation17 + $0x378] sm:$0xf0]  ;;  %v8793_v31 = vld [vmem:[#allocation22] sm:$0xf] }
 0x5bb   :  { %8301 = vmatmul.bf16.vlgmr.msra.gmra.mxu0 %v15899_v40  ;;  %8330 = vmatmul.bf16.vlgmr.msra.gmra.mxu1 %v15901_v5  ;;  %v12964_v5 = vor.u32 %v14034_v4, %v12961_v15  ;;  %v12916_v16 = vor.u32 %v14022_v46, %v12913_v38  ;;  %vm8830_vm7 = vcmp.eq.s32.totalorder %v8793_v31, 2  ;;  %vm8876_vm10 = vcmp.eq.s32.totalorder %v8793_v31, 3 }
 0x5bc   :  { %v16200_v4 = vsel %vm8830_vm7, 1, %v16990_v26  ;;  %v16228_v46 = vsel %vm8876_vm10, 1, %v16990_v26 }
 0x5bd   :  { %8381 = vmatpush.bf16.msra.mxu3 %v12964_v5 }
 0x5c0   :  { %v16172_v9 = vpop.f32.mrf.mxu0 }
 0x5c1   :  { %v16174_v14 = vpop.f32.mrf.mxu1  ;;  %8382 = vmatpush.bf16.msra.mxu3 %v12948_v23 }
 0x5c8   :  { %8142 = vmatmul.bf16.gmra.mxu2 %v16140_v27  ;;  %8171 = vmatmul.bf16.gmra.mxu3 %v16142_v30  ;;  %v8075_v40 = vpop.f32.mrf.mxu0 }
 0x5c9   :  { %v8104_v11 = vpop.f32.mrf.mxu1 }
 0x5ca   :  { %v16178_v25 = vadd.f32 %v8104_v11, %v8075_v40  ;;  %v8832_v40 = vperm.slane %v16200_v4, 0 }
 0x5cb   :  { %8306 = vmatmul.bf16.gmra.mxu0 %v15921_v41  ;;  %8335 = vmatmul.bf16.gmra.mxu1 %v15923_v3  ;;  %v12929_v3 = vld [vmem:[#allocation17 + $0x398] sm:$0xf0] }
 0x5cc   :  { %v12932_v22 = vor.u32 %v14026_v6, %v12929_v3  ;;  %vm16209_vm9 = vcmp.eq.s32.totalorder %v8832_v40, 1 }
 0x5ce   :  { %8383 = vmatpush.bf16.msra.mxu3 %v12932_v22  ;;  %v14014_v22 = vld [vmem:[#allocation17 + $0x32c] sm:$0xf] }
 0x5d0   :  { %v16182_v62 = vpop.f32.mrf.mxu0 }
 0x5d1   :  { %v16184_v35 = vpop.f32.mrf.mxu1 }
 0x5d2   :  { %8384 = vmatpush.bf16.msra.mxu3 %v12916_v16  ;;  %v8107_v23 = vadd.f32 %v16184_v35, %v16182_v62 }
 0x5d7   :  { %v8012_v50 = vpop.f32.mrf.mxu2 }
 0x5d8   :  { %v8013_v53 = vadd.f32 %v8012_v50, %v16130_v57  ;;  %v8041_v60 = vpop.f32.mrf.mxu3  ;;  %8243 = vmatmul.bf16.vlgmr.msrb.gmra.mxu2 %v16050_v54  ;;  %8272 = vmatmul.bf16.vlgmr.msrb.gmra.mxu3 %v16055_v56  ;;  %v8080_v41 = vpop.f32.mrf.mxu0  ;;  %v12788_v57 = vor.u32 %v13990_v21, %v12785_v59 }
 0x5d9   :  { %v8109_v19 = vpop.f32.mrf.mxu1 }
 0x5da   :  { %v8042_v0 = vadd.f32 %v8041_v60, %v8013_v53  ;;  %v16189_v37 = vadd.f32 %v8109_v19, %v8080_v41  ;;  %8355 = vmatpush.bf16.msra.mxu2 %v12788_v57  ;;  %v13982_v60 = vld [vmem:[#allocation17 + $0x22c] sm:$0xf]  ;;  %v12753_v41 = vld [vmem:[#allocation17 + $0x238] sm:$0xf0] }
 0x5db   :  { %8311 = vmatmul.bf16.gmra.mxu0 %v16979_v17  ;;  %8340 = vmatmul.bf16.gmra.mxu1 %v16981_v8  ;;  %v12756_v19 = vor.u32 %v13982_v60, %v12753_v41  ;;  %v14063_v60 = vld [vmem:[#allocation19 + $0x30] sm:$0xff] }
 0x5dc   :  { %vm8469_vm6 = vcmp.ge.f32.partialorder %v8042_v0, 1.25  ;;  %v8495_v52 = vmul.f32 0.75, %v8042_v0  ;;  %v14071_v41 = vld [vmem:[#allocation19 + $0x70] sm:$0xff] }
 0x5dd   :  { %v8487_v2 = vsel %vm8469_vm6, 0.0, %v8042_v0  ;;  %v16207_v29 = vsel %vm8469_vm6, 1.0, %v16810_v42  ;;  %v12881_v0 = vld [vmem:[#allocation17 + $0x338] sm:$0xf0] }
 0x5de   :  { %v8503_v39 = vmul.f32 0.97, %v8487_v2  ;;  %8356 = vmatpush.bf16.msra.mxu2 %v12772_v58  ;;  %v12884_v59 = vor.u32 %v14014_v22, %v12881_v0 }
 0x5df   :  { %v8014_v33 = vpop.f32.mrf.mxu2 }
 0x5e0   :  { %v8015_v45 = vadd.f32 %v8014_v33, %v16138_v18  ;;  %v16194_v47 = vpop.f32.mrf.mxu0  ;;  %v8043_v55 = vpop.f32.mrf.mxu3  ;;  %v14018_v18 = vld [vmem:[#allocation17 + $0x34c] sm:$0xf] }
 0x5e1   :  { %v16197_v17 = vpop.f32.mrf.mxu1  ;;  %v12900_v24 = vor.u32 %v14018_v18, %v12897_v32  ;;  %v14010_v32 = vld [vmem:[#allocation17 + $0x30c] sm:$0xf] }
 0x5e2   :  { %v8044_v8 = vadd.f32 %v8043_v55, %v8015_v45  ;;  %8357 = vmatpush.bf16.msra.mxu2 %v12756_v19 }
 0x5e3   :  { %8385 = vmatpush.bf16.msra.mxu3 %v12900_v24 }
 0x5e4   :  { %v8499_v15 = vadd.f32 %v8495_v52, %v8044_v8  ;;  %v14064_v52 = vld [vmem:[#allocation19 + $0x38] sm:$0xff] }
 0x5e5   :  { %9326 = vmatpush.bf16.msrb.mxu0 %v14064_v52  ;;  %v14061_v52 = vld [vmem:[#allocation19 + $0x20] sm:$0xff] }
 0x5e6   :  { %v8507_v5 = vadd.f32 %v8503_v39, %v8499_v15  ;;  %v8537_v16 = vmul.f32 0.75, %v8499_v15 }
 0x5e7   :  { %8386 = vmatpush.bf16.msra.mxu3 %v12884_v59  ;;  %v14062_v59 = vld [vmem:[#allocation19 + $0x28] sm:$0xff] }
 0x5e8   :  { %8248 = vmatmul.bf16.gmra.mxu2 %v16093_v44  ;;  %8277 = vmatmul.bf16.gmra.mxu3 %v16095_v13  ;;  %v8085_v11 = vpop.f32.mrf.mxu0  ;;  %vm8511_vm8 = vcmp.ge.f32.partialorder %v8507_v5, 1.25 }
 0x5e9   :  { %v8114_v50 = vpop.f32.mrf.mxu1  ;;  %v16215_v36 = vsel %vm8511_vm8, 1.0, %v16810_v42  ;;  %v8529_v57 = vsel %vm8511_vm8, 0.0, %v8507_v5  ;;  %v13978_v5 = vld [vmem:[#allocation17 + $0x20c] sm:$0xf]  ;;  %9327 = vmatpush.bf16.msrb.mxu0 %v14063_v60 }
 0x5ea   :  { %v16217_v6 = vadd.f32 %v8114_v50, %v8085_v11  ;;  %v8848_v53 = vsel %vm16209_vm9, %v16207_v29, %v16215_v36  ;;  %v8545_v45 = vmul.f32 0.97, %v8529_v57  ;;  %v12740_v58 = vor.u32 %v13978_v5, %v12737_v1  ;;  %v12865_v50 = vld [vmem:[#allocation17 + $0x318] sm:$0xf0]  ;;  %v14070_v57 = vld [vmem:[#allocation19 + $0x68] sm:$0xff] }
 0x5eb   :  { %v8017_v61 = vpop.f32.mrf.mxu2  ;;  %v8046_v3 = vpop.f32.mrf.mxu3  ;;  %8316 = vmatmul.bf16.gmra.mxu0 %v16985_v51  ;;  %8345 = vmatmul.bf16.gmra.mxu1 %v16987_v28  ;;  %v8878_v51 = vperm.slane %v16228_v46, 0  ;;  %v14072_v28 = vld [vmem:[#allocation19 + $0x78] sm:$0xff]  ;;  %v12868_v24 = vor.u32 %v14010_v32, %v12865_v50 }
 0x5ec   :  { %v8018_v21 = vadd.f32 %v8017_v61, %v16146_v10  ;;  %9355 = vmatpush.bf16.msrb.mxu1 %v14072_v28  ;;  %8358 = vmatpush.bf16.msra.mxu2 %v12740_v58  ;;  %v14069_v28 = vld [vmem:[#allocation19 + $0x60] sm:$0xff] }
 0x5ed   :  { %vm16232_vm11 = vcmp.eq.s32.totalorder %v8878_v51, 1  ;;  %8387 = vmatpush.bf16.msra.mxu3 %v12868_v24  ;;  %9328 = vmatpush.bf16.msrb.mxu0 %v14062_v59 }
 0x5ee   :  { %v8047_v38 = vadd.f32 %v8046_v3, %v8018_v21 }
 0x5f0   :  { %v8541_v33 = vadd.f32 %v8537_v16, %v8047_v38  ;;  %v8087_v2 = vpop.f32.mrf.mxu0  ;;  %9356 = vmatpush.bf16.msrb.mxu1 %v14071_v41 }
 0x5f1   :  { %v8116_v55 = vpop.f32.mrf.mxu1  ;;  %9329 = vmatpush.bf16.msrb.mxu0 %v14061_v52 }
 0x5f2   :  { %v8549_v10 = vadd.f32 %v8545_v45, %v8541_v33  ;;  %v8579_v7 = vmul.f32 0.75, %v8541_v33 }
 0x5f3   :  { %v8019_v8 = vpop.f32.mrf.mxu2  ;;  %v8048_v39 = vpop.f32.mrf.mxu3 }
 0x5f4   :  { %vm8553_vm12 = vcmp.ge.f32.partialorder %v8549_v10, 1.25  ;;  %v8020_v26 = vadd.f32 %v8019_v8, %v16150_v20  ;;  %9357 = vmatpush.bf16.msrb.mxu1 %v14070_v57 }
 0x5f5   :  { %v16238_v15 = vsel %vm8553_vm12, 1.0, %v16810_v42  ;;  %v8571_v40 = vsel %vm8553_vm12, 0.0, %v8549_v10 }
 0x5f6   :  { %v8852_v18 = vsel %vm16209_vm9, %v16215_v36, %v16238_v15  ;;  %v8049_v11 = vadd.f32 %v8048_v39, %v8020_v26  ;;  %v8587_v61 = vmul.f32 0.97, %v8571_v40 }
 0x5f7   :  { %v16247_v20 = vsel %vm16232_vm11, %v16207_v29, %v8852_v18  ;;  %v14068_v18 = vld [vmem:[#allocation19 + $0x58] sm:$0xff] }
 0x5f8   :  { %v8583_v3 = vadd.f32 %v8579_v7, %v8049_v11  ;;  %8253 = vmatmul.bf16.gmra.mxu2 %v16121_v12  ;;  %8282 = vmatmul.bf16.gmra.mxu3 %v16123_v34  ;;  %v8186_v19 = vpop.f32.mrf.mxu0  ;;  %v14060_v7 = vld [vmem:[#allocation19 + $0x18] sm:$0xff] }
 0x5f9   :  { %v8215_v22 = vpop.f32.mrf.mxu1  ;;  %9358 = vmatpush.bf16.msrb.mxu1 %v14069_v28  ;;  %9330 = vmatpush.bf16.msrb.mxu0 %v14060_v7 }
 0x5fa   :  { %v8591_v0 = vadd.f32 %v8587_v61, %v8583_v3  ;;  %v16251_v21 = vadd.f32 %v8215_v22, %v8186_v19  ;;  %v8621_v55 = vmul.f32 0.75, %v8583_v3  ;;  %v14059_v3 = vld [vmem:[#allocation19 + $0x10] sm:$0xff] }
 0x5fb   :  { %v8022_v38 = vpop.f32.mrf.mxu2  ;;  %v8051_v16 = vpop.f32.mrf.mxu3  ;;  %v14067_v19 = vld [vmem:[#allocation19 + $0x50] sm:$0xff] }
 0x5fc   :  { %v8023_v51 = vadd.f32 %v8022_v38, %v16154_v63  ;;  %vm8595_vm13 = vcmp.ge.f32.partialorder %v8591_v0, 1.25 }
 0x5fd   :  { %v12993_v33 = vsel %vm8595_vm13, 1.0, %v16810_v42  ;;  %v8613_v45 = vsel %vm8595_vm13, 0.0, %v8591_v0  ;;  %9359 = vmatpush.bf16.msrb.mxu1 %v14068_v18  ;;  %9331 = vmatpush.bf16.msrb.mxu0 %v14059_v3 }
 0x5fe   :  { %v8052_v2 = vadd.f32 %v8051_v16, %v8023_v51  ;;  %v8856_v10 = vsel %vm16209_vm9, %v16238_v15, %v12993_v33  ;;  %v8629_v39 = vmul.f32 0.97, %v8613_v45  ;;  %v14058_v51 = vld [vmem:[#allocation19 + $0x8] sm:$0xff] }
 0x5ff   :  { %v16261_v8 = vsel %vm16232_vm11, %v16215_v36, %v8856_v10  ;;  %v14066_v45 = vld [vmem:[#allocation19 + $0x48] sm:$0xff] }
 0x600   :  { %v8625_v63 = vadd.f32 %v8621_v55, %v8052_v2  ;;  %v8188_v26 = vpop.f32.mrf.mxu0 }
 0x601   :  { %v8217_v40 = vpop.f32.mrf.mxu1  ;;  %9360 = vmatpush.bf16.msrb.mxu1 %v14067_v19  ;;  %9332 = vmatpush.bf16.msrb.mxu0 %v14058_v51  ;;  %v8879_v51 = vperm.slane %v16228_v46, 1 }
 0x602   :  { %v8633_v5 = vadd.f32 %v8629_v39, %v8625_v63  ;;  %v16263_v1 = vadd.f32 %v8217_v40, %v8188_v26  ;;  %v8663_v60 = vmul.f32 0.75, %v8625_v63  ;;  %v14057_v26 = vld [vmem:[#allocation19] sm:$0xff] }
 0x603   :  { %v8024_v11 = vpop.f32.mrf.mxu2  ;;  %v8053_v58 = vpop.f32.mrf.mxu3  ;;  %v14065_v40 = vld [vmem:[#allocation19 + $0x40] sm:$0xff]  ;;  %vm16309_vm3 = vcmp.eq.s32.totalorder %v8879_v51, 1 }
 0x604   :  { %vm8637_vm14 = vcmp.ge.f32.partialorder %v8633_v5, 1.25  ;;  %v8025_v32 = vadd.f32 %v8024_v11, %v16158_v49 }
 0x605   :  { %v12997_v50 = vsel %vm8637_vm14, 1.0, %v16810_v42  ;;  %v8655_v24 = vsel %vm8637_vm14, 0.0, %v8633_v5  ;;  %9361 = vmatpush.bf16.msrb.mxu1 %v14066_v45  ;;  %9333 = vmatpush.bf16.msrb.mxu0 %v14057_v26 }
 0x606   :  { %v8860_v41 = vsel %vm16209_vm9, %v12993_v33, %v12997_v50  ;;  %v8054_v61 = vadd.f32 %v8053_v58, %v8025_v32  ;;  %v8671_v0 = vmul.f32 0.97, %v8655_v24 }
 0x607   :  { %v16272_v22 = vsel %vm16232_vm11, %v16238_v15, %v8860_v41 }
 0x608   :  { %v8667_v59 = vadd.f32 %v8663_v60, %v8054_v61  ;;  %8258 = vmatmul.bf16.gmra.mxu2 %v16140_v27  ;;  %8287 = vmatmul.bf16.gmra.mxu3 %v16142_v30  ;;  %v8191_v49 = vpop.f32.mrf.mxu0 }
 0x609   :  { %v8220_v57 = vpop.f32.mrf.mxu1  ;;  %9362 = vmatpush.bf16.msrb.mxu1 %v14065_v40 }
 0x60a   :  { %v8675_v38 = vadd.f32 %v8671_v0, %v8667_v59  ;;  %v16276_v16 = vadd.f32 %v8220_v57, %v8191_v49  ;;  %v8705_v63 = vmul.f32 0.75, %v8667_v59  ;;  %v8833_v57 = vperm.slane %v16200_v4, 1 }
 0x60b   :  { %v8027_v2 = vpop.f32.mrf.mxu2  ;;  %v8056_v55 = vpop.f32.mrf.mxu3 }
 0x60c   :  { %v8028_v15 = vadd.f32 %v8027_v2, %v16162_v48  ;;  %vm8679_vm15 = vcmp.ge.f32.partialorder %v8675_v38, 1.25  ;;  %vm16302_vm1 = vcmp.eq.s32.totalorder %v8833_v57, 1 }
 0x60d   :  { %v13001_v10 = vsel %vm8679_vm15, 1.0, %v16810_v42  ;;  %v8697_v52 = vsel %vm8679_vm15, 0.0, %v8675_v38 }
 0x60e   :  { %v8057_v28 = vadd.f32 %v8056_v55, %v8028_v15  ;;  %v8864_v39 = vsel %vm16209_vm9, %v12997_v50, %v13001_v10  ;;  %v8713_v18 = vmul.f32 0.97, %v8697_v52  ;;  %v8102_v15 = vadd.f32 %v16174_v14, %v16172_v9 }
 0x60f   :  { %v16284_v5 = vsel %vm16232_vm11, %v12993_v33, %v8864_v39 }
 0x610   :  { %v8709_v7 = vadd.f32 %v8705_v63, %v8057_v28  ;;  %v8193_v48 = vpop.f32.mrf.mxu0 }
 0x611   :  { %v8222_v11 = vpop.f32.mrf.mxu1 }
 0x612   :  { %v8717_v58 = vadd.f32 %v8713_v18, %v8709_v7  ;;  %v16286_v32 = vadd.f32 %v8222_v11, %v8193_v48 }
 0x613   :  { %v8029_v24 = vpop.f32.mrf.mxu2  ;;  %v8058_v60 = vpop.f32.mrf.mxu3 }
 0x614   :  { %vm8721_vm0 = vcmp.ge.f32.partialorder %v8717_v58, 1.25 }
 0x615   :  { %v13005_v41 = vsel %vm8721_vm0, 1.0, %v16810_v42 }
 0x616   :  { %v8868_v61 = vsel %vm16209_vm9, %v13001_v10, %v13005_v41 }
 0x617   :  { %v16293_v33 = vsel %vm16232_vm11, %v12997_v50, %v8868_v61 }
 0x618   :  { %8359 = vmatmul.bf16.vlgmr.msra.gmra.mxu2 %v16050_v54  ;;  %8388 = vmatmul.bf16.vlgmr.msra.gmra.mxu3 %v16055_v56  ;;  %v8196_v3 = vpop.f32.mrf.mxu0  ;;  %v8844_v54 = vsel %vm16209_vm9, 0.0, %v16207_v29 }
 0x619   :  { %v8225_v19 = vpop.f32.mrf.mxu1  ;;  %v8890_v28 = vsel %vm16232_vm11, 0.0, %v8844_v54 }
 0x61a   :  { %v16297_v0 = vadd.f32 %v8225_v19, %v8196_v3  ;;  %v13015_v19 = vld [vmem:[#allocation5] sm:$0xf] }
 0x61b   :  { %v8128_v59 = vpop.f32.mrf.mxu2  ;;  %v8157_v49 = vpop.f32.mrf.mxu3 }
 0x61c   :  { %v8129_v38 = vadd.f32 %v8128_v59, %v16168_v43 }
 0x61e   :  { %v8158_v45 = vadd.f32 %v8157_v49, %v8129_v38  ;;  %v14041_v49 = vld [vmem:[#allocation5 + $0x4] sm:$0xf] }
 0x620   :  { %vm8470_vm2 = vcmp.ge.f32.partialorder %v8158_v45, 1.25  ;;  %v8198_v2 = vpop.f32.mrf.mxu0  ;;  %v8496_v48 = vmul.f32 0.75, %v8158_v45 }
 0x621   :  { %v12982_v55 = vsel %vm8470_vm2, 1.0, %v16810_v42  ;;  %v8227_v43 = vpop.f32.mrf.mxu1  ;;  %v8488_v18 = vsel %vm8470_vm2, 0.0, %v8158_v45 }
 0x622   :  { %v8845_v10 = vsel %vm16302_vm1, 0.0, %v12982_v55  ;;  %v16318_v52 = vadd.f32 %v8227_v43, %v8198_v2  ;;  %v8504_v9 = vmul.f32 0.97, %v8488_v18 }
 0x623   :  { %v8891_v63 = vsel %vm16309_vm3, 0.0, %v8845_v10  ;;  %v8130_v39 = vpop.f32.mrf.mxu2  ;;  %v8159_v26 = vpop.f32.mrf.mxu3 }
 0x624   :  { %v8920_v40 = vpack.c.bf16 %v8891_v63, %v8890_v28  ;;  %v8131_v7 = vadd.f32 %v8130_v39, %v8102_v15 }
 0x626   :  { %8936 = vst [vmem:[#allocation5 + $0x10] sm:$0xff] %v8920_v40  ;;  %v8160_v11 = vadd.f32 %v8159_v26, %v8131_v7 }
 0x628   :  { %v8500_v14 = vadd.f32 %v8496_v48, %v8160_v11  ;;  %8364 = vmatmul.bf16.gmra.mxu2 %v16093_v44  ;;  %8393 = vmatmul.bf16.gmra.mxu3 %v16095_v13  ;;  %v8201_v58 = vpop.f32.mrf.mxu0 }
 0x629   :  { %v8230_v24 = vpop.f32.mrf.mxu1 }
 0x62a   :  { %v8508_v60 = vadd.f32 %v8504_v9, %v8500_v14  ;;  %v16326_v41 = vadd.f32 %v8230_v24, %v8201_v58  ;;  %v8538_v54 = vmul.f32 0.75, %v8500_v14 }
 0x62b   :  { %v8133_v61 = vpop.f32.mrf.mxu2  ;;  %v8162_v3 = vpop.f32.mrf.mxu3 }
 0x62c   :  { %v8134_v59 = vadd.f32 %v8133_v61, %v16178_v25  ;;  %vm8512_vm4 = vcmp.ge.f32.partialorder %v8508_v60, 1.25  ;;  %v8894_v25 = vsel %vm16232_vm11, 0.0, %v8848_v53 }
 0x62d   :  { %v12986_v57 = vsel %vm8512_vm4, 1.0, %v16810_v42  ;;  %v8530_v38 = vsel %vm8512_vm4, 0.0, %v8508_v60  ;;  %v14043_v51 = vld [vmem:[#allocation5 + $0xc] sm:$0xf0]  ;;  %v13017_v45 = vld [vmem:[#allocation5 + $0x10] sm:$0xf0] }
 0x62e   :  { %v8163_v44 = vadd.f32 %v8162_v3, %v8134_v59  ;;  %v8849_v13 = vsel %vm16302_vm1, %v12982_v55, %v12986_v57  ;;  %v13016_v2 = vor.u32 %v14043_v51, %v13015_v19  ;;  %v13020_v15 = vor.u32 %v14041_v49, %v13017_v45 }
 0x62f   :  { %v8895_v43 = vsel %vm16309_vm3, 0.0, %v8849_v13  ;;  %v8546_v28 = vmul.f32 0.97, %v8530_v38 }
 0x630   :  { %v8542_v10 = vadd.f32 %v8538_v54, %v8163_v44  ;;  %v8922_v63 = vpack.c.bf16 %v8895_v43, %v8894_v25  ;;  %9334 = vmatmul.bf16.vlgmr.msrb.gmra.mxu0 %v13016_v2  ;;  %v8203_v39 = vpop.f32.mrf.mxu0  ;;  %9363 = vmatmul.bf16.vlgmr.msrb.gmra.mxu1 %v13020_v15  ;;  %v8112_v43 = vadd.f32 %v16197_v17, %v16194_v47 }
 0x631   :  { %v8232_v26 = vpop.f32.mrf.mxu1 }
 0x632   :  { %v8550_v40 = vadd.f32 %v8546_v28, %v8542_v10  ;;  %8938 = vst [vmem:[#allocation5 + $0x20] sm:$0xff] %v8922_v63  ;;  %v8580_v18 = vmul.f32 0.75, %v8542_v10 }
 0x633   :  { %v8135_v29 = vpop.f32.mrf.mxu2  ;;  %v8164_v36 = vpop.f32.mrf.mxu3 }
 0x634   :  { %vm8554_vm5 = vcmp.ge.f32.partialorder %v8550_v40, 1.25  ;;  %v8136_v53 = vadd.f32 %v8135_v29, %v8107_v23 }
 0x635   :  { %v12990_v31 = vsel %vm8554_vm5, 1.0, %v16810_v42  ;;  %v8572_v7 = vsel %vm8554_vm5, 0.0, %v8550_v40 }
 0x636   :  { %v8853_v48 = vsel %vm16302_vm1, %v12986_v57, %v12990_v31  ;;  %v8165_v11 = vadd.f32 %v8164_v36, %v8136_v53  ;;  %v8588_v14 = vmul.f32 0.97, %v8572_v7 }
 0x637   :  { %v8899_v9 = vsel %vm16309_vm3, %v12982_v55, %v8853_v48 }
 0x638   :  { %v8924_v62 = vpack.c.bf16 %v8899_v9, %v16247_v20  ;;  %v8584_v35 = vadd.f32 %v8580_v18, %v8165_v11  ;;  %8369 = vmatmul.bf16.gmra.mxu2 %v16121_v12  ;;  %8398 = vmatmul.bf16.gmra.mxu3 %v16123_v34  ;;  %v8302_v58 = vpop.f32.mrf.mxu0 }
 0x639   :  { %v8331_v24 = vpop.f32.mrf.mxu1  ;;  %v13031_v2 = vld [vmem:[#allocation5 + $0x20] sm:$0xf]  ;;  %v14045_v63 = vld [vmem:[#allocation5 + $0x24] sm:$0xf] }
 0x63a   :  { %8940 = vst [vmem:[#allocation5 + $0x30] sm:$0xff] %v8924_v62  ;;  %v8592_v60 = vadd.f32 %v8588_v14, %v8584_v35  ;;  %v16351_v61 = vadd.f32 %v8331_v24, %v8302_v58  ;;  %v8622_v38 = vmul.f32 0.75, %v8584_v35 }
 0x63b   :  { %v8138_v3 = vpop.f32.mrf.mxu2  ;;  %v8167_v19 = vpop.f32.mrf.mxu3 }
 0x63c   :  { %v8139_v59 = vadd.f32 %v8138_v3, %v16189_v37  ;;  %vm8596_vm6 = vcmp.ge.f32.partialorder %v8592_v60, 1.25 }
 0x63d   :  { %v12994_v55 = vsel %vm8596_vm6, 1.0, %v16810_v42  ;;  %v8614_v49 = vsel %vm8596_vm6, 0.0, %v8592_v60 }
 0x63e   :  { %v8168_v20 = vadd.f32 %v8167_v19, %v8139_v59  ;;  %v8857_v12 = vsel %vm16302_vm1, %v12990_v31, %v12994_v55  ;;  %v8630_v45 = vmul.f32 0.97, %v8614_v49 }
 0x63f   :  { %v8903_v34 = vsel %vm16309_vm3, %v12986_v57, %v8857_v12 }
 0x640   :  { %v8626_v51 = vadd.f32 %v8622_v38, %v8168_v20  ;;  %v8926_v44 = vpack.c.bf16 %v8903_v34, %v16261_v8  ;;  %v8304_v54 = vpop.f32.mrf.mxu0 }
 0x641   :  { %v8333_v13 = vpop.f32.mrf.mxu1  ;;  %v14047_v37 = vld [vmem:[#allocation5 + $0x2c] sm:$0xf0]  ;;  %v13033_v25 = vld [vmem:[#allocation5 + $0x30] sm:$0xf0] }
 0x642   :  { %v8634_v15 = vadd.f32 %v8630_v45, %v8626_v51  ;;  %8942 = vst [vmem:[#allocation5 + $0x40] sm:$0xff] %v8926_v44  ;;  %v16362_v10 = vadd.f32 %v8333_v13, %v8304_v54  ;;  %v13032_v28 = vor.u32 %v14047_v37, %v13031_v2  ;;  %v13036_v26 = vor.u32 %v14045_v63, %v13033_v25 }
 0x643   :  { %v8140_v39 = vpop.f32.mrf.mxu2  ;;  %v8169_v57 = vpop.f32.mrf.mxu3  ;;  %v8664_v29 = vmul.f32 0.75, %v8626_v51 }
 0x644   :  { %vm8638_vm7 = vcmp.ge.f32.partialorder %v8634_v15, 1.25  ;;  %v8141_v23 = vadd.f32 %v8140_v39, %v8112_v43  ;;  %9339 = vmatmul.bf16.gmra.mxu0 %v13032_v28  ;;  %9368 = vmatmul.bf16.gmra.mxu1 %v13036_v26 }
 0x645   :  { %v12998_v8 = vsel %vm8638_vm7, 1.0, %v16810_v42  ;;  %v8656_v40 = vsel %vm8638_vm7, 0.0, %v8634_v15 }
 0x646   :  { %v8861_v47 = vsel %vm16302_vm1, %v12994_v55, %v12998_v8  ;;  %v8170_v17 = vadd.f32 %v8169_v57, %v8141_v23  ;;  %v8672_v53 = vmul.f32 0.97, %v8656_v40  ;;  %v14080_v23 = vld [vmem:[#allocation19 + $0xb8] sm:$0xff] }
 0x647   :  { %v8907_v36 = vsel %vm16309_vm3, %v12990_v31, %v8861_v47  ;;  %v14088_v40 = vld [vmem:[#allocation19 + $0xf8] sm:$0xff]  ;;  %9384 = vmatpush.bf16.msrb.mxu2 %v14080_v23 }
 0x648   :  { %v8928_v7 = vpack.c.bf16 %v8907_v36, %v16272_v22  ;;  %v8668_v18 = vadd.f32 %v8664_v29, %v8170_v17  ;;  %8374 = vmatmul.bf16.gmra.mxu2 %v16140_v27  ;;  %8403 = vmatmul.bf16.gmra.mxu3 %v16142_v30  ;;  %v8307_v48 = vpop.f32.mrf.mxu0 }
 0x649   :  { %v8336_v11 = vpop.f32.mrf.mxu1  ;;  %v13047_v20 = vld [vmem:[#allocation5 + $0x40] sm:$0xf]  ;;  %v14049_v12 = vld [vmem:[#allocation5 + $0x44] sm:$0xf]  ;;  %9413 = vmatpush.bf16.msrb.mxu3 %v14088_v40 }
 0x64a   :  { %8944 = vst [vmem:[#allocation5 + $0x50] sm:$0xff] %v8928_v7  ;;  %v8676_v9 = vadd.f32 %v8672_v53, %v8668_v18  ;;  %v16372_v14 = vadd.f32 %v8336_v11, %v8307_v48  ;;  %v8706_v60 = vmul.f32 0.75, %v8668_v18 }
 0x64b   :  { %v8143_v62 = vpop.f32.mrf.mxu2  ;;  %v8172_v35 = vpop.f32.mrf.mxu3 }
 0x64c   :  { %v8144_v58 = vadd.f32 %v8143_v62, %v16217_v6  ;;  %vm8680_vm8 = vcmp.ge.f32.partialorder %v8676_v9, 1.25  ;;  %v14079_v62 = vld [vmem:[#allocation19 + $0xb0] sm:$0xff] }
 0x64d   :  { %v13002_v31 = vsel %vm8680_vm8, 1.0, %v16810_v42  ;;  %v8698_v24 = vsel %vm8680_vm8, 0.0, %v8676_v9  ;;  %9385 = vmatpush.bf16.msrb.mxu2 %v14079_v62 }
 0x64e   :  { %v8173_v22 = vadd.f32 %v8172_v35, %v8144_v58  ;;  %v8865_v27 = vsel %vm16302_vm1, %v12998_v8, %v13002_v31  ;;  %v8714_v19 = vmul.f32 0.97, %v8698_v24  ;;  %v14087_v35 = vld [vmem:[#allocation19 + $0xf0] sm:$0xff] }
 0x64f   :  { %v8911_v30 = vsel %vm16309_vm3, %v12994_v55, %v8865_v27  ;;  %9414 = vmatpush.bf16.msrb.mxu3 %v14087_v35 }
 0x650   :  { %v8710_v3 = vadd.f32 %v8706_v60, %v8173_v22  ;;  %v8930_v59 = vpack.c.bf16 %v8911_v30, %v16284_v5  ;;  %v8309_v49 = vpop.f32.mrf.mxu0  ;;  %v8834_v22 = vperm.slane %v16200_v4, 2 }
 0x651   :  { %v8338_v38 = vpop.f32.mrf.mxu1  ;;  %v14051_v6 = vld [vmem:[#allocation5 + $0x4c] sm:$0xf0]  ;;  %v13049_v34 = vld [vmem:[#allocation5 + $0x50] sm:$0xf0] }
 0x652   :  { %v8718_v51 = vadd.f32 %v8714_v19, %v8710_v3  ;;  %8946 = vst [vmem:[#allocation5 + $0x60] sm:$0xff] %v8930_v59  ;;  %v16381_v45 = vadd.f32 %v8338_v38, %v8309_v49  ;;  %v13048_v44 = vor.u32 %v14051_v6, %v13047_v20  ;;  %v13052_v54 = vor.u32 %v14049_v12, %v13049_v34 }
 0x653   :  { %v8145_v13 = vpop.f32.mrf.mxu2  ;;  %v8174_v2 = vpop.f32.mrf.mxu3  ;;  %vm16404_vm12 = vcmp.eq.s32.totalorder %v8834_v22, 1 }
 0x654   :  { %vm8722_vm9 = vcmp.ge.f32.partialorder %v8718_v51, 1.25  ;;  %9344 = vmatmul.bf16.gmra.mxu0 %v13048_v44  ;;  %9373 = vmatmul.bf16.gmra.mxu1 %v13052_v54  ;;  %v14086_v51 = vld [vmem:[#allocation19 + $0xe8] sm:$0xff] }
 0x655   :  { %v13006_v55 = vsel %vm8722_vm9, 1.0, %v16810_v42  ;;  %9415 = vmatpush.bf16.msrb.mxu3 %v14086_v51 }
 0x656   :  { %v8869_v5 = vsel %vm16302_vm1, %v13002_v31, %v13006_v55  ;;  %v8880_v55 = vperm.slane %v16228_v46, 2 }
 0x657   :  { %v8915_v37 = vsel %vm16309_vm3, %v12998_v8, %v8869_v5 }
 0x658   :  { %v8932_v25 = vpack.c.bf16 %v8915_v37, %v16293_v33  ;;  %v8312_v43 = vpop.f32.mrf.mxu0  ;;  %vm16418_vm14 = vcmp.eq.s32.totalorder %v8880_v55, 1 }
 0x659   :  { %v8341_v15 = vpop.f32.mrf.mxu1  ;;  %v13063_v47 = vld [vmem:[#allocation5 + $0x60] sm:$0xf]  ;;  %v14053_v36 = vld [vmem:[#allocation5 + $0x64] sm:$0xf] }
 0x65a   :  { %8948 = vst [vmem:[#allocation5 + $0x70] sm:$0xff] %v8932_v25  ;;  %v16389_v28 = vadd.f32 %v8341_v15, %v8312_v43 }
 0x65b   :  { %v8244_v63 = vpop.f32.mrf.mxu2  ;;  %v8273_v39 = vpop.f32.mrf.mxu3 }
 0x65c   :  { %v8245_v57 = vadd.f32 %v8244_v63, %v16251_v21 }
 0x65e   :  { %v8274_v26 = vadd.f32 %v8273_v39, %v8245_v57 }
 0x660   :  { %v8314_v29 = vpop.f32.mrf.mxu0  ;;  %vm8471_vm10 = vcmp.ge.f32.partialorder %v8274_v26, 1.25  ;;  %v8497_v9 = vmul.f32 0.75, %v8274_v26 }
 0x661   :  { %v8343_v50 = vpop.f32.mrf.mxu1  ;;  %v14055_v17 = vld [vmem:[#allocation5 + $0x6c] sm:$0xf0]  ;;  %v13065_v56 = vld [vmem:[#allocation5 + $0x70] sm:$0xf0]  ;;  %v8489_v48 = vsel %vm8471_vm10, 0.0, %v8274_v26  ;;  %v16402_v59 = vsel %vm8471_vm10, 1.0, %v16810_v42 }
 0x662   :  { %v16392_v33 = vadd.f32 %v8343_v50, %v8314_v29  ;;  %v13064_v8 = vor.u32 %v14055_v17, %v13063_v47  ;;  %v13068_v18 = vor.u32 %v14053_v36, %v13065_v56  ;;  %v8505_v58 = vmul.f32 0.97, %v8489_v48  ;;  %v14077_v29 = vld [vmem:[#allocation19 + $0xa0] sm:$0xff]  ;;  %v14076_v17 = vld [vmem:[#allocation19 + $0x98] sm:$0xff] }
 0x663   :  { %v8246_v53 = vpop.f32.mrf.mxu2  ;;  %v8275_v7 = vpop.f32.mrf.mxu3  ;;  %v14084_v56 = vld [vmem:[#allocation19 + $0xd8] sm:$0xff] }
 0x664   :  { %v8247_v21 = vadd.f32 %v8246_v53, %v16263_v1  ;;  %9349 = vmatmul.bf16.gmra.mxu0 %v13064_v8  ;;  %9378 = vmatmul.bf16.gmra.mxu1 %v13068_v18 }
 0x666   :  { %v8276_v11 = vadd.f32 %v8275_v7, %v8247_v21 }
 0x668   :  { %v8501_v31 = vadd.f32 %v8497_v9, %v8276_v11  ;;  %v8317_v24 = vpop.f32.mrf.mxu0 }
 0x669   :  { %v8346_v60 = vpop.f32.mrf.mxu1 }
 0x66a   :  { %v8509_v27 = vadd.f32 %v8505_v58, %v8501_v31  ;;  %v16397_v30 = vadd.f32 %v8346_v60, %v8317_v24  ;;  %v8539_v34 = vmul.f32 0.75, %v8501_v31 }
 0x66b   :  { %v8249_v1 = vpop.f32.mrf.mxu2  ;;  %v8278_v3 = vpop.f32.mrf.mxu3 }
 0x66c   :  { %vm8513_vm11 = vcmp.ge.f32.partialorder %v8509_v27, 1.25  ;;  %v8250_v19 = vadd.f32 %v8249_v1, %v16276_v16  ;;  %v14078_v16 = vld [vmem:[#allocation19 + $0xa8] sm:$0xff] }
 0x66d   :  { %v16409_v20 = vsel %vm8513_vm11, 1.0, %v16810_v42  ;;  %v8531_v38 = vsel %vm8513_vm11, 0.0, %v8509_v27  ;;  %9386 = vmatpush.bf16.msrb.mxu2 %v14078_v16 }
 0x66e   :  { %v8850_v6 = vsel %vm16404_vm12, %v16402_v59, %v16409_v20  ;;  %v8279_v12 = vadd.f32 %v8278_v3, %v8250_v19  ;;  %v8547_v54 = vmul.f32 0.97, %v8531_v38  ;;  %v14075_v38 = vld [vmem:[#allocation19 + $0x90] sm:$0xff] }
 0x670   :  { %v8543_v44 = vadd.f32 %v8539_v34, %v8279_v12  ;;  %v8319_v13 = vpop.f32.mrf.mxu0  ;;  %v14083_v12 = vld [vmem:[#allocation19 + $0xd0] sm:$0xff] }
 0x671   :  { %v8348_v2 = vpop.f32.mrf.mxu1  ;;  %9387 = vmatpush.bf16.msrb.mxu2 %v14077_v29 }
 0x672   :  { %v8551_v5 = vadd.f32 %v8547_v54, %v8543_v44  ;;  %v8581_v23 = vmul.f32 0.75, %v8543_v44  ;;  %v14082_v54 = vld [vmem:[#allocation19 + $0xc8] sm:$0xff] }
 0x673   :  { %v8251_v37 = vpop.f32.mrf.mxu2  ;;  %v8280_v25 = vpop.f32.mrf.mxu3 }
 0x674   :  { %vm8555_vm13 = vcmp.ge.f32.partialorder %v8551_v5, 1.25  ;;  %v8252_v43 = vadd.f32 %v8251_v37, %v16286_v32  ;;  %v14085_v32 = vld [vmem:[#allocation19 + $0xe0] sm:$0xff] }
 0x675   :  { %v12991_v15 = vsel %vm8555_vm13, 1.0, %v16810_v42  ;;  %v8573_v63 = vsel %vm8555_vm13, 0.0, %v8551_v5  ;;  %9416 = vmatpush.bf16.msrb.mxu3 %v14085_v32  ;;  %9388 = vmatpush.bf16.msrb.mxu2 %v14076_v17 }
 0x676   :  { %v8854_v57 = vsel %vm16404_vm12, %v16409_v20, %v12991_v15  ;;  %v8281_v26 = vadd.f32 %v8280_v25, %v8252_v43  ;;  %v8589_v47 = vmul.f32 0.97, %v8573_v63  ;;  %v14073_v63 = vld [vmem:[#allocation19 + $0x80] sm:$0xff] }
 0x677   :  { %v16428_v40 = vsel %vm16418_vm14, %v16402_v59, %v8854_v57  ;;  %v14081_v57 = vld [vmem:[#allocation19 + $0xc0] sm:$0xff] }
 0x678   :  { %v8585_v50 = vadd.f32 %v8581_v23, %v8281_v26 }
 0x679   :  { %9417 = vmatpush.bf16.msrb.mxu3 %v14084_v56  ;;  %9389 = vmatpush.bf16.msrb.mxu2 %v14075_v38 }
 0x67a   :  { %v8593_v8 = vadd.f32 %v8589_v47, %v8585_v50  ;;  %v8623_v9 = vmul.f32 0.75, %v8585_v50 }
 0x67b   :  { %v8254_v36 = vpop.f32.mrf.mxu2  ;;  %v8283_v53 = vpop.f32.mrf.mxu3 }
 0x67c   :  { %vm8597_vm15 = vcmp.ge.f32.partialorder %v8593_v8, 1.25  ;;  %v8255_v7 = vadd.f32 %v8254_v36, %v16297_v0 }
 0x67d   :  { %v12995_v18 = vsel %vm8597_vm15, 1.0, %v16810_v42  ;;  %v8615_v21 = vsel %vm8597_vm15, 0.0, %v8593_v8  ;;  %9418 = vmatpush.bf16.msrb.mxu3 %v14083_v12 }
 0x67e   :  { %v8858_v48 = vsel %vm16404_vm12, %v12991_v15, %v12995_v18  ;;  %v8284_v11 = vadd.f32 %v8283_v53, %v8255_v7  ;;  %v8631_v58 = vmul.f32 0.97, %v8615_v21  ;;  %v8835_v53 = vperm.slane %v16200_v4, 3 }
 0x67f   :  { %v16437_v62 = vsel %vm16418_vm14, %v16409_v20, %v8858_v48 }
 0x680   :  { %v8627_v35 = vadd.f32 %v8623_v9, %v8284_v11  ;;  %vm16465_vm3 = vcmp.eq.s32.totalorder %v8835_v53, 1  ;;  %v8846_v11 = vsel %vm16404_vm12, 0.0, %v16402_v59 }
 0x681   :  { %9419 = vmatpush.bf16.msrb.mxu3 %v14082_v54 }
 0x682   :  { %v8635_v31 = vadd.f32 %v8631_v58, %v8627_v35  ;;  %v8665_v19 = vmul.f32 0.75, %v8627_v35 }
 0x683   :  { %v8256_v24 = vpop.f32.mrf.mxu2  ;;  %v8285_v0 = vpop.f32.mrf.mxu3 }
 0x684   :  { %vm8639_vm0 = vcmp.ge.f32.partialorder %v8635_v31, 1.25  ;;  %v8257_v22 = vadd.f32 %v8256_v24, %v16318_v52  ;;  %v14074_v52 = vld [vmem:[#allocation19 + $0x88] sm:$0xff] }
 0x685   :  { %v12999_v60 = vsel %vm8639_vm0, 1.0, %v16810_v42  ;;  %v8657_v27 = vsel %vm8639_vm0, 0.0, %v8635_v31  ;;  %9390 = vmatpush.bf16.msrb.mxu2 %v14074_v52  ;;  %9420 = vmatpush.bf16.msrb.mxu3 %v14081_v57 }
 0x686   :  { %v8862_v1 = vsel %vm16404_vm12, %v12995_v18, %v12999_v60  ;;  %v8286_v3 = vadd.f32 %v8285_v0, %v8257_v22  ;;  %v8673_v51 = vmul.f32 0.97, %v8657_v27 }
 0x687   :  { %v16445_v34 = vsel %vm16418_vm14, %v12991_v15, %v8862_v1 }
 0x688   :  { %v8669_v16 = vadd.f32 %v8665_v19, %v8286_v3 }
 0x689   :  { %9391 = vmatpush.bf16.msrb.mxu2 %v14073_v63 }
 0x68a   :  { %v8677_v44 = vadd.f32 %v8673_v51, %v8669_v16  ;;  %v8707_v15 = vmul.f32 0.75, %v8669_v16  ;;  %v13023_v16 = vld [vmem:[#allocation5 + $0x8] sm:$0xf] }
 0x68b   :  { %v8259_v13 = vpop.f32.mrf.mxu2  ;;  %v8288_v2 = vpop.f32.mrf.mxu3 }
 0x68c   :  { %vm8681_vm1 = vcmp.ge.f32.partialorder %v8677_v44, 1.25  ;;  %v8260_v55 = vadd.f32 %v8259_v13, %v16326_v41 }
 0x68d   :  { %v13003_v5 = vsel %vm8681_vm1, 1.0, %v16810_v42  ;;  %v8699_v37 = vsel %vm8681_vm1, 0.0, %v8677_v44  ;;  %v14042_v44 = vld [vmem:[#allocation5 + $0xc] sm:$0xf] }
 0x68e   :  { %v8866_v25 = vsel %vm16404_vm12, %v12999_v60, %v13003_v5  ;;  %v8289_v43 = vadd.f32 %v8288_v2, %v8260_v55  ;;  %v8715_v29 = vmul.f32 0.97, %v8699_v37 }
 0x68f   :  { %v16453_v26 = vsel %vm16418_vm14, %v12995_v18, %v8866_v25  ;;  %v8881_v18 = vperm.slane %v16228_v46, 3  ;;  %v8892_v46 = vsel %vm16418_vm14, 0.0, %v8846_v11 }
 0x690   :  { %v8711_v23 = vadd.f32 %v8707_v15, %v8289_v43 }
 0x691   :  { %vm16472_vm5 = vcmp.eq.s32.totalorder %v8881_v18, 1 }
 0x692   :  { %v8719_v41 = vadd.f32 %v8715_v29, %v8711_v23 }
 0x693   :  { %v8261_v32 = vpop.f32.mrf.mxu2  ;;  %v8290_v50 = vpop.f32.mrf.mxu3 }
 0x694   :  { %vm8723_vm2 = vcmp.ge.f32.partialorder %v8719_v41, 1.25 }
 0x695   :  { %v13007_v47 = vsel %vm8723_vm2, 1.0, %v16810_v42 }
 0x696   :  { %v8870_v17 = vsel %vm16404_vm12, %v13003_v5, %v13007_v47 }
 0x697   :  { %v16460_v56 = vsel %vm16418_vm14, %v12999_v60, %v8870_v17 }
 0x69b   :  { %v8360_v8 = vpop.f32.mrf.mxu2  ;;  %v8389_v36 = vpop.f32.mrf.mxu3 }
 0x69c   :  { %v8361_v7 = vadd.f32 %v8360_v8, %v16351_v61 }
 0x69e   :  { %v8390_v21 = vadd.f32 %v8389_v36, %v8361_v7 }
 0x6a0   :  { %vm8472_vm4 = vcmp.ge.f32.partialorder %v8390_v21, 1.25  ;;  %v8498_v27 = vmul.f32 0.75, %v8390_v21 }
 0x6a1   :  { %v12984_v4 = vsel %vm8472_vm4, 1.0, %v16810_v42  ;;  %v8490_v22 = vsel %vm8472_vm4, 0.0, %v8390_v21 }
 0x6a2   :  { %v8847_v61 = vsel %vm16465_vm3, 0.0, %v12984_v4  ;;  %v8506_v1 = vmul.f32 0.97, %v8490_v22 }
 0x6a3   :  { %v8893_v35 = vsel %vm16472_vm5, 0.0, %v8847_v61  ;;  %v8362_v58 = vpop.f32.mrf.mxu2  ;;  %v8391_v31 = vpop.f32.mrf.mxu3 }
 0x6a4   :  { %v8921_v24 = vpack.c.bf16 %v8893_v35, %v8892_v46  ;;  %v8363_v0 = vadd.f32 %v8362_v58, %v16362_v10 }
 0x6a6   :  { %8937 = vst [vmem:[#allocation5 + $0x18] sm:$0xff] %v8921_v24  ;;  %v8392_v60 = vadd.f32 %v8391_v31, %v8363_v0 }
 0x6a8   :  { %v8502_v3 = vadd.f32 %v8498_v27, %v8392_v60 }
 0x6aa   :  { %v8510_v19 = vadd.f32 %v8506_v1, %v8502_v3  ;;  %v8540_v37 = vmul.f32 0.75, %v8502_v3 }
 0x6ab   :  { %v8365_v38 = vpop.f32.mrf.mxu2  ;;  %v8394_v12 = vpop.f32.mrf.mxu3 }
 0x6ac   :  { %vm8514_vm6 = vcmp.ge.f32.partialorder %v8510_v19, 1.25  ;;  %v8366_v51 = vadd.f32 %v8365_v38, %v16372_v14  ;;  %v8896_v14 = vsel %vm16418_vm14, 0.0, %v8850_v6 }
 0x6ad   :  { %v12988_v52 = vsel %vm8514_vm6, 1.0, %v16810_v42  ;;  %v8532_v54 = vsel %vm8514_vm6, 0.0, %v8510_v19  ;;  %v9335_v13 = vpop.f32.mrf.mxu0  ;;  %v14044_v2 = vld [vmem:[#allocation5 + $0x14] sm:$0xf0]  ;;  %v13025_v10 = vld [vmem:[#allocation5 + $0x18] sm:$0xf0]  ;;  %v9364_v25 = vpop.f32.mrf.mxu1 }
 0x6ae   :  { %v8851_v55 = vsel %vm16465_vm3, %v12984_v4, %v12988_v52  ;;  %v8395_v5 = vadd.f32 %v8394_v12, %v8366_v51  ;;  %v13024_v43 = vor.u32 %v14044_v2, %v13023_v16  ;;  %v16497_v63 = vadd.f32 %v9364_v25, %v9335_v13 }
 0x6af   :  { %v8897_v15 = vsel %vm16472_vm5, 0.0, %v8851_v55  ;;  %v13028_v57 = vor.u32 %v14042_v44, %v13025_v10  ;;  %v8548_v41 = vmul.f32 0.97, %v8532_v54 }
 0x6b0   :  { %v8923_v23 = vpack.c.bf16 %v8897_v15, %v8896_v14  ;;  %v8544_v29 = vadd.f32 %v8540_v37, %v8395_v5  ;;  %9392 = vmatmul.bf16.vlgmr.msrb.gmra.mxu2 %v13024_v43 }
 0x6b1   :  { %9421 = vmatmul.bf16.vlgmr.msrb.gmra.mxu3 %v13028_v57 }
 0x6b2   :  { %8939 = vst [vmem:[#allocation5 + $0x28] sm:$0xff] %v8923_v23  ;;  %v8552_v32 = vadd.f32 %v8548_v41, %v8544_v29  ;;  %v8582_v8 = vmul.f32 0.75, %v8544_v29 }
 0x6b3   :  { %v8367_v49 = vpop.f32.mrf.mxu2  ;;  %v8396_v50 = vpop.f32.mrf.mxu3 }
 0x6b4   :  { %vm8556_vm7 = vcmp.ge.f32.partialorder %v8552_v32, 1.25  ;;  %v8368_v59 = vadd.f32 %v8367_v49, %v16381_v45 }
 0x6b5   :  { %v12992_v20 = vsel %vm8556_vm7, 1.0, %v16810_v42  ;;  %v8574_v6 = vsel %vm8556_vm7, 0.0, %v8552_v32  ;;  %v9337_v39 = vpop.f32.mrf.mxu0  ;;  %v9366_v36 = vpop.f32.mrf.mxu1 }
 0x6b6   :  { %v8855_v47 = vsel %vm16465_vm3, %v12988_v52, %v12992_v20  ;;  %v8397_v17 = vadd.f32 %v8396_v50, %v8368_v59  ;;  %v16505_v7 = vadd.f32 %v9366_v36, %v9337_v39  ;;  %v8590_v11 = vmul.f32 0.97, %v8574_v6 }
 0x6b7   :  { %v8901_v53 = vsel %vm16472_vm5, %v12984_v4, %v8855_v47 }
 0x6b8   :  { %v8925_v18 = vpack.c.bf16 %v8901_v53, %v16428_v40  ;;  %v8586_v21 = vadd.f32 %v8582_v8, %v8397_v17 }
 0x6b9   :  { %v13039_v1 = vld [vmem:[#allocation5 + $0x28] sm:$0xf]  ;;  %v14046_v38 = vld [vmem:[#allocation5 + $0x2c] sm:$0xf] }
 0x6ba   :  { %8941 = vst [vmem:[#allocation5 + $0x38] sm:$0xff] %v8925_v18  ;;  %v8594_v45 = vadd.f32 %v8590_v11, %v8586_v21  ;;  %v8624_v0 = vmul.f32 0.75, %v8586_v21 }
 0x6bb   :  { %v8370_v61 = vpop.f32.mrf.mxu2  ;;  %v8399_v46 = vpop.f32.mrf.mxu3 }
 0x6bc   :  { %vm8598_vm8 = vcmp.ge.f32.partialorder %v8594_v45, 1.25  ;;  %v8371_v35 = vadd.f32 %v8370_v61, %v16389_v28 }
 0x6bd   :  { %v12996_v58 = vsel %vm8598_vm8, 1.0, %v16810_v42  ;;  %v8616_v31 = vsel %vm8598_vm8, 0.0, %v8594_v45 }
 0x6be   :  { %v8859_v24 = vsel %vm16465_vm3, %v12992_v20, %v12996_v58  ;;  %v8400_v4 = vadd.f32 %v8399_v46, %v8371_v35  ;;  %v8632_v27 = vmul.f32 0.97, %v8616_v31 }
 0x6bf   :  { %v8905_v40 = vsel %vm16472_vm5, %v12988_v52, %v8859_v24 }
 0x6c0   :  { %v8927_v22 = vpack.c.bf16 %v8905_v40, %v16437_v62  ;;  %v8628_v60 = vadd.f32 %v8624_v0, %v8400_v4 }
 0x6c1   :  { %v9340_v3 = vpop.f32.mrf.mxu0  ;;  %v14048_v19 = vld [vmem:[#allocation5 + $0x34] sm:$0xf0]  ;;  %v13041_v28 = vld [vmem:[#allocation5 + $0x38] sm:$0xf0]  ;;  %v9369_v16 = vpop.f32.mrf.mxu1 }
 0x6c2   :  { %8943 = vst [vmem:[#allocation5 + $0x48] sm:$0xff] %v8927_v22  ;;  %v8636_v12 = vadd.f32 %v8632_v27, %v8628_v60  ;;  %v13040_v51 = vor.u32 %v14048_v19, %v13039_v1  ;;  %v13044_v44 = vor.u32 %v14046_v38, %v13041_v28  ;;  %v16515_v54 = vadd.f32 %v9369_v16, %v9340_v3 }
 0x6c3   :  { %v8372_v13 = vpop.f32.mrf.mxu2  ;;  %v8401_v2 = vpop.f32.mrf.mxu3  ;;  %v8666_v37 = vmul.f32 0.75, %v8628_v60 }
 0x6c4   :  { %vm8640_vm9 = vcmp.ge.f32.partialorder %v8636_v12, 1.25  ;;  %v8373_v52 = vadd.f32 %v8372_v13, %v16392_v33  ;;  %9397 = vmatmul.bf16.gmra.mxu2 %v13040_v51  ;;  %9426 = vmatmul.bf16.gmra.mxu3 %v13044_v44 }
 0x6c5   :  { %v13000_v62 = vsel %vm8640_vm9, 1.0, %v16810_v42  ;;  %v8658_v10 = vsel %vm8640_vm9, 0.0, %v8636_v12 }
 0x6c6   :  { %v8863_v55 = vsel %vm16465_vm3, %v12996_v58, %v13000_v62  ;;  %v8402_v5 = vadd.f32 %v8401_v2, %v8373_v52  ;;  %v8674_v15 = vmul.f32 0.97, %v8658_v10 }
 0x6c7   :  { %v8909_v25 = vsel %vm16472_vm5, %v12992_v20, %v8863_v55 }
 0x6c8   :  { %v8929_v43 = vpack.c.bf16 %v8909_v25, %v16445_v34  ;;  %v8670_v14 = vadd.f32 %v8666_v37, %v8402_v5 }
 0x6c9   :  { %v9342_v57 = vpop.f32.mrf.mxu0  ;;  %v9371_v23 = vpop.f32.mrf.mxu1  ;;  %v13055_v36 = vld [vmem:[#allocation5 + $0x48] sm:$0xf]  ;;  %v14050_v21 = vld [vmem:[#allocation5 + $0x4c] sm:$0xf] }
 0x6ca   :  { %8945 = vst [vmem:[#allocation5 + $0x58] sm:$0xff] %v8929_v43  ;;  %v8678_v33 = vadd.f32 %v8674_v15, %v8670_v14  ;;  %v16524_v29 = vadd.f32 %v9371_v23, %v9342_v57  ;;  %v8708_v6 = vmul.f32 0.75, %v8670_v14 }
 0x6cb   :  { %v8375_v41 = vpop.f32.mrf.mxu2  ;;  %v8404_v32 = vpop.f32.mrf.mxu3 }
 0x6cc   :  { %vm8682_vm10 = vcmp.ge.f32.partialorder %v8678_v33, 1.25  ;;  %v8376_v49 = vadd.f32 %v8375_v41, %v16397_v30 }
 0x6cd   :  { %v13004_v50 = vsel %vm8682_vm10, 1.0, %v16810_v42  ;;  %v8700_v59 = vsel %vm8682_vm10, 0.0, %v8678_v33 }
 0x6ce   :  { %v8867_v20 = vsel %vm16465_vm3, %v13000_v62, %v13004_v50  ;;  %v8405_v34 = vadd.f32 %v8404_v32, %v8376_v49  ;;  %v8716_v8 = vmul.f32 0.97, %v8700_v59 }
 0x6cf   :  { %v8913_v39 = vsel %vm16472_vm5, %v12996_v58, %v8867_v20 }
 0x6d0   :  { %v8931_v47 = vpack.c.bf16 %v8913_v39, %v16453_v26  ;;  %v8712_v17 = vadd.f32 %v8708_v6, %v8405_v34 }
 0x6d1   :  { %v9345_v53 = vpop.f32.mrf.mxu0  ;;  %v14052_v18 = vld [vmem:[#allocation5 + $0x54] sm:$0xf0]  ;;  %v13057_v30 = vld [vmem:[#allocation5 + $0x58] sm:$0xf0]  ;;  %v9374_v45 = vpop.f32.mrf.mxu1 }
 0x6d2   :  { %8947 = vst [vmem:[#allocation5 + $0x68] sm:$0xff] %v8931_v47  ;;  %v8720_v11 = vadd.f32 %v8716_v8, %v8712_v17  ;;  %v13056_v61 = vor.u32 %v14052_v18, %v13055_v36  ;;  %v13060_v46 = vor.u32 %v14050_v21, %v13057_v30  ;;  %v16533_v35 = vadd.f32 %v9374_v45, %v9345_v53 }
 0x6d3   :  { %v8377_v31 = vpop.f32.mrf.mxu2  ;;  %v8406_v24 = vpop.f32.mrf.mxu3 }
 0x6d4   :  { %vm8724_vm11 = vcmp.ge.f32.partialorder %v8720_v11, 1.25  ;;  %9402 = vmatmul.bf16.gmra.mxu2 %v13056_v61  ;;  %9431 = vmatmul.bf16.gmra.mxu3 %v13060_v46 }
 0x6d5   :  { %v13008_v26 = vsel %vm8724_vm11, 1.0, %v16810_v42 }
 0x6d6   :  { %v8871_v58 = vsel %vm16465_vm3, %v13004_v50, %v13008_v26 }
 0x6d7   :  { %v8917_v4 = vsel %vm16472_vm5, %v13000_v62, %v8871_v58 }
 0x6d8   :  { %v8933_v0 = vpack.c.bf16 %v8917_v4, %v16460_v56 }
 0x6d9   :  { %v9347_v40 = vpop.f32.mrf.mxu0  ;;  %v9376_v22 = vpop.f32.mrf.mxu1  ;;  %v13071_v27 = vld [vmem:[#allocation5 + $0x68] sm:$0xf]  ;;  %v14054_v19 = vld [vmem:[#allocation5 + $0x6c] sm:$0xf] }
 0x6da   :  { %8949 = vst [vmem:[#allocation5 + $0x78] sm:$0xff] %v8933_v0  ;;  %v16541_v60 = vadd.f32 %v9376_v22, %v9347_v40 }
 0x6e1   :  { %v9350_v1 = vpop.f32.mrf.mxu0  ;;  %v14056_v3 = vld [vmem:[#allocation5 + $0x74] sm:$0xf0]  ;;  %v13073_v38 = vld [vmem:[#allocation5 + $0x78] sm:$0xf0]  ;;  %v9379_v28 = vpop.f32.mrf.mxu1 }
 0x6e2   :  { %v13072_v12 = vor.u32 %v14056_v3, %v13071_v27  ;;  %v13076_v16 = vor.u32 %v14054_v19, %v13073_v38  ;;  %v16543_v48 = vadd.f32 %v9379_v28, %v9350_v1 }
 0x6e4   :  { %9407 = vmatmul.bf16.gmra.mxu2 %v13072_v12  ;;  %9436 = vmatmul.bf16.gmra.mxu3 %v13076_v16 }
 0x6e9   :  { %v9352_v9 = vpop.f32.mrf.mxu0  ;;  %v9381_v51 = vpop.f32.mrf.mxu1 }
 0x733   :  { %v9393_v56 = vpop.f32.mrf.mxu2 }
 0x734   :  { %v9394_v44 = vadd.f32 %v9393_v56, %v16497_v63  ;;  %v9422_v13 = vpop.f32.mrf.mxu3 }
 0x736   :  { %v9423_v2 = vadd.f32 %v9422_v13, %v9394_v44 }
 0x738   :  { %vm9457_vm12 = vcmp.ge.f32.partialorder %v9423_v2, 1.25  ;;  %v9466_v43 = vmul.f32 0.75, %v9423_v2 }
 0x739   :  { %v13205_v52 = vsel %vm9457_vm12, 1.0, %v16810_v42  ;;  %v9463_v5 = vsel %vm9457_vm12, 0.0, %v9423_v2 }
 0x73a   :  { %v14092_v62 = vpack.c.bf16 %v13205_v52, %v16810_v42  ;;  %v9468_v14 = vmul.f32 0.97, %v9463_v5 }
 0x73b   :  { %v9395_v10 = vpop.f32.mrf.mxu2 }
 0x73c   :  { %14093 = vst [vmem:[%s16578_s6] sm:$0xff] %v14092_v62   ;;  %v9396_v55 = vadd.f32 %v9395_v10, %v16505_v7  ;;  %v9424_v37 = vpop.f32.mrf.mxu3 }
 0x73e   :  { %v9425_v25 = vadd.f32 %v9424_v37, %v9396_v55 }
 0x740   :  { %v9467_v63 = vadd.f32 %v9466_v43, %v9425_v25 }
 0x742   :  { %v9469_v15 = vadd.f32 %v9468_v14, %v9467_v63  ;;  %v9479_v49 = vmul.f32 0.75, %v9467_v63 }
 0x744   :  { %vm9470_vm13 = vcmp.ge.f32.partialorder %v9469_v15, 1.25 }
 0x745   :  { %v9476_v41 = vsel %vm9470_vm13, 0.0, %v9469_v15  ;;  %v13206_v39 = vsel %vm9470_vm13, 1.0, %v16810_v42 }
 0x746   :  { %v9481_v59 = vmul.f32 0.97, %v9476_v41 }
 0x747   :  { %v9398_v57 = vpop.f32.mrf.mxu2  ;;  %v9427_v33 = vpop.f32.mrf.mxu3 }
 0x748   :  { %v9399_v23 = vadd.f32 %v9398_v57, %v16515_v54 }
 0x74a   :  { %v9428_v32 = vadd.f32 %v9427_v33, %v9399_v23 }
 0x74c   :  { %v9480_v50 = vadd.f32 %v9479_v49, %v9428_v32 }
 0x74e   :  { %v9482_v20 = vadd.f32 %v9481_v59, %v9480_v50  ;;  %v9492_v53 = vmul.f32 0.75, %v9480_v50 }
 0x74f   :  { %v9400_v34 = vpop.f32.mrf.mxu2  ;;  %v9429_v7 = vpop.f32.mrf.mxu3 }
 0x750   :  { %vm9483_vm14 = vcmp.ge.f32.partialorder %v9482_v20, 1.25  ;;  %v9401_v6 = vadd.f32 %v9400_v34, %v16524_v29 }
 0x751   :  { %v13207_v47 = vsel %vm9483_vm14, 1.0, %v16810_v42  ;;  %v9489_v17 = vsel %vm9483_vm14, 0.0, %v9482_v20 }
 0x752   :  { %v14097_v8 = vpack.c.bf16 %v13207_v47, %v13206_v39  ;;  %v9430_v36 = vadd.f32 %v9429_v7, %v9401_v6  ;;  %v9494_v18 = vmul.f32 0.97, %v9489_v17 }
 0x754   :  { %14109 = vst [vmem:[%s16578_s6 + $0x8] sm:$0xff] %v14097_v8   ;;  %v9493_v54 = vadd.f32 %v9492_v53, %v9430_v36 }
 0x756   :  { %v9495_v21 = vadd.f32 %v9494_v18, %v9493_v54  ;;  %v9505_v46 = vmul.f32 0.75, %v9493_v54 }
 0x757   :  { %v9403_v30 = vpop.f32.mrf.mxu2  ;;  %v9432_v11 = vpop.f32.mrf.mxu3 }
 0x758   :  { %vm9496_vm15 = vcmp.ge.f32.partialorder %v9495_v21, 1.25  ;;  %v9404_v29 = vadd.f32 %v9403_v30, %v16533_v35 }
 0x759   :  { %v9502_v45 = vsel %vm9496_vm15, 0.0, %v9495_v21  ;;  %v13208_v40 = vsel %vm9496_vm15, 1.0, %v16810_v42 }
 0x75a   :  { %v9433_v61 = vadd.f32 %v9432_v11, %v9404_v29  ;;  %v9507_v24 = vmul.f32 0.97, %v9502_v45 }
 0x75c   :  { %v9506_v31 = vadd.f32 %v9505_v46, %v9433_v61 }
 0x75e   :  { %v9508_v26 = vadd.f32 %v9507_v24, %v9506_v31  ;;  %v9518_v19 = vmul.f32 0.75, %v9506_v31 }
 0x75f   :  { %v9405_v58 = vpop.f32.mrf.mxu2  ;;  %v9434_v4 = vpop.f32.mrf.mxu3 }
 0x760   :  { %vm9509_vm0 = vcmp.ge.f32.partialorder %v9508_v26, 1.25  ;;  %v9406_v0 = vadd.f32 %v9405_v58, %v16541_v60 }
 0x761   :  { %v13209_v22 = vsel %vm9509_vm0, 1.0, %v16810_v42  ;;  %v9515_v27 = vsel %vm9509_vm0, 0.0, %v9508_v26 }
 0x762   :  { %v14102_v1 = vpack.c.bf16 %v13209_v22, %v13208_v40  ;;  %v9435_v3 = vadd.f32 %v9434_v4, %v9406_v0  ;;  %v9520_v38 = vmul.f32 0.97, %v9515_v27 }
 0x764   :  { %14110 = vst [vmem:[%s16578_s6 + $0x10] sm:$0xff] %v14102_v1   ;;  %v9519_v35 = vadd.f32 %v9518_v19, %v9435_v3 }
 0x766   :  { %v9521_v28 = vadd.f32 %v9520_v38, %v9519_v35  ;;  %v9531_v56 = vmul.f32 0.75, %v9519_v35 }
 0x767   :  { %v9408_v12 = vpop.f32.mrf.mxu2  ;;  %v9437_v16 = vpop.f32.mrf.mxu3 }
 0x768   :  { %vm9522_vm1 = vcmp.ge.f32.partialorder %v9521_v28, 1.25  ;;  %v9409_v60 = vadd.f32 %v9408_v12, %v16543_v48 }
 0x769   :  { %v9528_v9 = vsel %vm9522_vm1, 0.0, %v9521_v28  ;;  %v13210_v10 = vsel %vm9522_vm1, 1.0, %v16810_v42 }
 0x76a   :  { %v9438_v51 = vadd.f32 %v9437_v16, %v9409_v60  ;;  %v9533_v13 = vmul.f32 0.97, %v9528_v9 }
 0x76c   :  { %v9532_v44 = vadd.f32 %v9531_v56, %v9438_v51 }
 0x76e   :  { %v9534_v2 = vadd.f32 %v9533_v13, %v9532_v44 }
 0x76f   :  { %v9410_v52 = vpop.f32.mrf.mxu2  ;;  %v9439_v62 = vpop.f32.mrf.mxu3 }
 0x770   :  { %vm9535_vm2 = vcmp.ge.f32.partialorder %v9534_v2, 1.25 }
 0x771   :  { %v13211_v55 = vsel %vm9535_vm2, 1.0, %v16810_v42 }
 0x772   :  { %v14107_v5 = vpack.c.bf16 %v13211_v55, %v13210_v10 }
 0x774   :  { %14111 = vst [vmem:[%s16578_s6 + $0x18] sm:$0xff] %v14107_v5  }
 0x775   :  { %9587 = vsyncpa [#allocation16], 1 }
 0x776   :  { %9588 = vsyncpa [#allocation18], 1 }
 0x777   :  { %9589 = vsyncpa [#allocation21], 1 }

</bundles_post_ra>
